<compile_context>
chip_gen: v7x
topology: tpu7x:2x2x1
jax: 0.10.0
libtpu: 0.0.40
codegen_flags: <defaults>
</compile_context>

<pallas_src>
import jax
import jax.numpy as jnp
from jax.experimental import pallas as pl
from jax.experimental.pallas import tpu as pltpu


def _layer_norm(x, w, b, eps=1e-5):
    mu = jnp.mean(x, axis=-1, keepdims=True)
    var = jnp.mean((x - mu) ** 2, axis=-1, keepdims=True)
    return (x - mu) * jax.lax.rsqrt(var + eps) * w + b


def _make_kernel(num_layers, nhead, seq_len, d_model):
    Dh = d_model // nhead
    scale = 1.0 / float(Dh) ** 0.5
    S, D = seq_len, d_model

    def kernel(*refs):
        out_ref = refs[-1]
        x_ref, emb_w_ref, emb_b_ref = refs[0], refs[1], refs[2]
        idx = 3
        layers = []
        for _ in range(num_layers):
            layers.append(refs[idx:idx + 16])
            idx += 16
        fc_w_ref, fc_b_ref = refs[idx], refs[idx + 1]

        # embed: Linear(1, D) applied to x.unsqueeze(-1); x block is (1, S, 1)
        x_col = x_ref[...].reshape(S, 1)                       # (S, 1) f32
        h = x_col * emb_w_ref[...] + emb_b_ref[...]            # (S, D) f32

        for (wq_ref, wk_ref, wv_ref, bq_ref, bk_ref, bv_ref, wo_ref, bo_ref,
             ln1_w_ref, ln1_b_ref, ff1_w_ref, ff1_b_ref,
             ff2_w_ref, ff2_b_ref, ln2_w_ref, ln2_b_ref) in layers:

            # ---- multi-head self-attention (q = k = v = h), per-head weights ----
            h_bf = h.astype(jnp.bfloat16)
            attn = jnp.zeros((S, D), jnp.float32)
            for hd in range(nhead):                            # static unroll
                q = jnp.einsum('sd,ed->se', h_bf, wq_ref[hd],
                               preferred_element_type=jnp.float32) + bq_ref[hd]
                k = jnp.einsum('sd,ed->se', h_bf, wk_ref[hd],
                               preferred_element_type=jnp.float32) + bk_ref[hd]
                v = jnp.einsum('sd,ed->se', h_bf, wv_ref[hd],
                               preferred_element_type=jnp.float32) + bv_ref[hd]
                s = jnp.einsum('qe,ke->qk', q, k,
                               preferred_element_type=jnp.float32) * scale
                s = s - jnp.max(s, axis=-1, keepdims=True)
                p = jnp.exp(s)
                p = p * pl.reciprocal(jnp.sum(p, axis=-1, keepdims=True),
                                      approx=True)
                ctx = jnp.einsum('qk,ke->qe', p, v,
                                 preferred_element_type=jnp.float32)   # (S, Dh)
                # out_proj decomposed per head: attn += ctx_h @ W_o[:, h*Dh:(h+1)*Dh].T
                attn = attn + jnp.einsum('se,ed->sd', ctx.astype(jnp.bfloat16),
                                         wo_ref[hd],
                                         preferred_element_type=jnp.float32)
            attn = attn + bo_ref[...]

            # post-norm residual 1
            h = _layer_norm(h + attn, ln1_w_ref[...], ln1_b_ref[...])

            # ---- feed-forward: linear2(relu(linear1(h))) ----
            h_bf = h.astype(jnp.bfloat16)
            hid = jnp.einsum('sd,fd->sf', h_bf, ff1_w_ref[...],
                             preferred_element_type=jnp.float32) + ff1_b_ref[...]
            hid = jnp.maximum(hid, 0.0).astype(jnp.bfloat16)
            ff = jnp.einsum('sf,df->sd', hid, ff2_w_ref[...],
                            preferred_element_type=jnp.float32) + ff2_b_ref[...]

            # post-norm residual 2
            h = _layer_norm(h + ff, ln2_w_ref[...], ln2_b_ref[...])

        pooled = jnp.mean(h, axis=0, keepdims=True)            # (1, D)
        logits = jnp.einsum('bd,cd->bc', pooled.astype(jnp.bfloat16), fc_w_ref[...],
                            preferred_element_type=jnp.float32) + fc_b_ref[...]
        out_ref[...] = logits.reshape(1, 1, -1)                # lane-dense (1,1,Cpad)

    return kernel


def _const_index_map(ndim):
    return lambda b: (0,) * ndim


def prepare_params(p, nhead, lane=128):
    """Host-side re-layout: per-head split, bf16 cast of matmul weights, fc padding."""
    D = p['embed_w'].shape[0]
    Dh = D // nhead
    bf = jnp.bfloat16
    flat = [p['embed_w'].reshape(1, D),                    # embed is elementwise: keep f32
            p['embed_b'].reshape(1, D)]
    for lp in p['layers']:
        W_in, b_in = lp['in_proj_w'], lp['in_proj_b']
        wq, wk, wv = W_in[:D], W_in[D:2 * D], W_in[2 * D:]
        bq, bk, bv = b_in[:D], b_in[D:2 * D], b_in[2 * D:]
        flat += [
            wq.reshape(nhead, Dh, D).astype(bf),
            wk.reshape(nhead, Dh, D).astype(bf),
            wv.reshape(nhead, Dh, D).astype(bf),
            bq.reshape(nhead, 1, Dh),
            bk.reshape(nhead, 1, Dh),
            bv.reshape(nhead, 1, Dh),
            lp['out_proj_w'].T.reshape(nhead, Dh, D).astype(bf),
            lp['out_proj_b'].reshape(1, D),
            lp['ln1_w'].reshape(1, D), lp['ln1_b'].reshape(1, D),
            lp['ff1_w'].astype(bf), lp['ff1_b'].reshape(1, -1),
            lp['ff2_w'].astype(bf), lp['ff2_b'].reshape(1, D),
            lp['ln2_w'].reshape(1, D), lp['ln2_b'].reshape(1, D),
        ]
    C = p['fc_w'].shape[0]
    C_pad = ((C + lane - 1) // lane) * lane
    fc_w = jnp.zeros((C_pad, D), jnp.float32).at[:C].set(p['fc_w']).astype(bf)
    fc_b = jnp.zeros((1, C_pad), jnp.float32).at[0, :C].set(p['fc_b'])
    flat += [fc_w, fc_b]
    return tuple(flat), C_pad


def ecg_classifier_forward(x, torch_params, *, nhead):
    B, S = x.shape
    num_layers = len(torch_params['layers'])
    D = torch_params['embed_w'].shape[0]
    dim_ff = torch_params['layers'][0]['ff1_w'].shape[0]
    num_classes = torch_params['fc_w'].shape[0]

    flat, C_pad = prepare_params(torch_params, nhead)
    x3 = x[:, :, None]                                     # the torch unsqueeze(-1)
    inputs = (x3,) + flat

    in_specs = [pl.BlockSpec((1, S, 1), lambda b: (b, 0, 0))]
    in_specs += [pl.BlockSpec(a.shape, _const_index_map(a.ndim)) for a in flat]
    out_spec = pl.BlockSpec((1, 1, C_pad), lambda b: (b, 0, 0))

    flops = (2 * B * S * num_layers * (4 * D * D + 2 * D * dim_ff + 2 * S * D)
             + 2 * B * S * D + 2 * B * D * C_pad)
    bytes_accessed = sum(int(a.size) * a.dtype.itemsize for a in inputs) + B * C_pad * 4
    transcendentals = B * num_layers * nhead * S * S

    out = pl.pallas_call(
        _make_kernel(num_layers, nhead, S, D),
        out_shape=jax.ShapeDtypeStruct((B, 1, C_pad), jnp.float32),
        grid=(B,),
        in_specs=in_specs,
        out_specs=out_spec,
        compiler_params=pltpu.CompilerParams(
            dimension_semantics=("parallel",),
            vmem_limit_bytes=16 << 20),
        cost_estimate=pl.CostEstimate(
            flops=flops,
            transcendentals=transcendentals,
            bytes_accessed=bytes_accessed),
    )(*inputs)
    return out.reshape(B, C_pad)[:, :num_classes]


def init_torch_params(key, d_model, num_classes, dim_ff, num_layers):
    """Deterministic synthetic params in the PyTorch module's native shapes."""
    std = 0.02
    keys = jax.random.split(key, 2 + 4 * num_layers)
    ki = iter(keys)
    p = {
        'embed_w': std * jax.random.normal(next(ki), (d_model, 1), jnp.float32),
        'embed_b': jnp.zeros((d_model,), jnp.float32),
        'layers': [],
    }
    for _ in range(num_layers):
        p['layers'].append({
            'in_proj_w': std * jax.random.normal(next(ki), (3 * d_model, d_model), jnp.float32),
            'in_proj_b': jnp.zeros((3 * d_model,), jnp.float32),
            'out_proj_w': std * jax.random.normal(next(ki), (d_model, d_model), jnp.float32),
            'out_proj_b': jnp.zeros((d_model,), jnp.float32),
            'ln1_w': jnp.ones((d_model,), jnp.float32),
            'ln1_b': jnp.zeros((d_model,), jnp.float32),
            'ln2_w': jnp.ones((d_model,), jnp.float32),
            'ln2_b': jnp.zeros((d_model,), jnp.float32),
            'ff1_w': std * jax.random.normal(next(ki), (dim_ff, d_model), jnp.float32),
            'ff1_b': jnp.zeros((dim_ff,), jnp.float32),
            'ff2_w': std * jax.random.normal(next(ki), (d_model, dim_ff), jnp.float32),
            'ff2_b': jnp.zeros((d_model,), jnp.float32),
        })
    p['fc_w'] = std * jax.random.normal(next(ki), (num_classes, d_model), jnp.float32)
    p['fc_b'] = jnp.zeros((num_classes,), jnp.float32)
    return p


if __name__ == "__main__":
    B, S = 2, 16
    d_model, nhead, num_layers, num_classes = 128, 4, 2, 21
    dim_ff = 2048  # PyTorch TransformerEncoderLayer default dim_feedforward

    key = jax.random.PRNGKey(0)
    kx, kp = jax.random.split(key)
    x = jax.random.normal(kx, (B, S), dtype=jnp.float32)   # raw ECG signal (B, S)
    params = init_torch_params(kp, d_model, num_classes, dim_ff, num_layers)

    logits = ecg_classifier_forward(x, params, nhead=nhead)
    jax.block_until_ready(logits)

    assert logits.shape == (B, num_classes)
    assert bool(jnp.all(jnp.isfinite(logits)))
    print("KERNEL_OK")
</pallas_src>

<mosaic_0001>
module attributes {stable_mosaic.version = 11 : i64} {
  func.func @kernel(%arg0: i32, %arg1: memref<1x16x1xf32, #tpu.memory_space<vmem>>, %arg2: memref<1x128xf32, #tpu.memory_space<vmem>>, %arg3: memref<1x128xf32, #tpu.memory_space<vmem>>, %arg4: memref<4x32x128xbf16, #tpu.memory_space<vmem>>, %arg5: memref<4x32x128xbf16, #tpu.memory_space<vmem>>, %arg6: memref<4x32x128xbf16, #tpu.memory_space<vmem>>, %arg7: memref<4x1x32xf32, #tpu.memory_space<vmem>>, %arg8: memref<4x1x32xf32, #tpu.memory_space<vmem>>, %arg9: memref<4x1x32xf32, #tpu.memory_space<vmem>>, %arg10: memref<4x32x128xbf16, #tpu.memory_space<vmem>>, %arg11: memref<1x128xf32, #tpu.memory_space<vmem>>, %arg12: memref<1x128xf32, #tpu.memory_space<vmem>>, %arg13: memref<1x128xf32, #tpu.memory_space<vmem>>, %arg14: memref<2048x128xbf16, #tpu.memory_space<vmem>>, %arg15: memref<1x2048xf32, #tpu.memory_space<vmem>>, %arg16: memref<128x2048xbf16, #tpu.memory_space<vmem>>, %arg17: memref<1x128xf32, #tpu.memory_space<vmem>>, %arg18: memref<1x128xf32, #tpu.memory_space<vmem>>, %arg19: memref<1x128xf32, #tpu.memory_space<vmem>>, %arg20: memref<4x32x128xbf16, #tpu.memory_space<vmem>>, %arg21: memref<4x32x128xbf16, #tpu.memory_space<vmem>>, %arg22: memref<4x32x128xbf16, #tpu.memory_space<vmem>>, %arg23: memref<4x1x32xf32, #tpu.memory_space<vmem>>, %arg24: memref<4x1x32xf32, #tpu.memory_space<vmem>>, %arg25: memref<4x1x32xf32, #tpu.memory_space<vmem>>, %arg26: memref<4x32x128xbf16, #tpu.memory_space<vmem>>, %arg27: memref<1x128xf32, #tpu.memory_space<vmem>>, %arg28: memref<1x128xf32, #tpu.memory_space<vmem>>, %arg29: memref<1x128xf32, #tpu.memory_space<vmem>>, %arg30: memref<2048x128xbf16, #tpu.memory_space<vmem>>, %arg31: memref<1x2048xf32, #tpu.memory_space<vmem>>, %arg32: memref<128x2048xbf16, #tpu.memory_space<vmem>>, %arg33: memref<1x128xf32, #tpu.memory_space<vmem>>, %arg34: memref<1x128xf32, #tpu.memory_space<vmem>>, %arg35: memref<1x128xf32, #tpu.memory_space<vmem>>, %arg36: memref<128x128xbf16, #tpu.memory_space<vmem>>, %arg37: memref<1x128xf32, #tpu.memory_space<vmem>>, %arg38: memref<1x1x128xf32, #tpu.memory_space<vmem>>) attributes {dimension_semantics = [#tpu.dimension_semantics<parallel>], iteration_bounds = array<i64: 2>, scalar_prefetch = 0 : i64, scratch_operands = 0 : i64, tpu.core_type = #tpu.core_type<tc>, window_params = [{transform_indices = @transform_0, window_bounds = array<i64: 1, 16, 1>}, {pipeline_mode = #tpu.pipeline_mode<synchronous>, transform_indices = @transform_1, window_bounds = array<i64: 1, 128>}, {pipeline_mode = #tpu.pipeline_mode<synchronous>, transform_indices = @transform_2, window_bounds = array<i64: 1, 128>}, {pipeline_mode = #tpu.pipeline_mode<synchronous>, transform_indices = @transform_3, window_bounds = array<i64: 4, 32, 128>}, {pipeline_mode = #tpu.pipeline_mode<synchronous>, transform_indices = @transform_4, window_bounds = array<i64: 4, 32, 128>}, {pipeline_mode = #tpu.pipeline_mode<synchronous>, transform_indices = @transform_5, window_bounds = array<i64: 4, 32, 128>}, {pipeline_mode = #tpu.pipeline_mode<synchronous>, transform_indices = @transform_6, window_bounds = array<i64: 4, 1, 32>}, {pipeline_mode = #tpu.pipeline_mode<synchronous>, transform_indices = @transform_7, window_bounds = array<i64: 4, 1, 32>}, {pipeline_mode = #tpu.pipeline_mode<synchronous>, transform_indices = @transform_8, window_bounds = array<i64: 4, 1, 32>}, {pipeline_mode = #tpu.pipeline_mode<synchronous>, transform_indices = @transform_9, window_bounds = array<i64: 4, 32, 128>}, {pipeline_mode = #tpu.pipeline_mode<synchronous>, transform_indices = @transform_10, window_bounds = array<i64: 1, 128>}, {pipeline_mode = #tpu.pipeline_mode<synchronous>, transform_indices = @transform_11, window_bounds = array<i64: 1, 128>}, {pipeline_mode = #tpu.pipeline_mode<synchronous>, transform_indices = @transform_12, window_bounds = array<i64: 1, 128>}, {pipeline_mode = #tpu.pipeline_mode<synchronous>, transform_indices = @transform_13, window_bounds = array<i64: 2048, 128>}, {pipeline_mode = #tpu.pipeline_mode<synchronous>, transform_indices = @transform_14, window_bounds = array<i64: 1, 2048>}, {pipeline_mode = #tpu.pipeline_mode<synchronous>, transform_indices = @transform_15, window_bounds = array<i64: 128, 2048>}, {pipeline_mode = #tpu.pipeline_mode<synchronous>, transform_indices = @transform_16, window_bounds = array<i64: 1, 128>}, {pipeline_mode = #tpu.pipeline_mode<synchronous>, transform_indices = @transform_17, window_bounds = array<i64: 1, 128>}, {pipeline_mode = #tpu.pipeline_mode<synchronous>, transform_indices = @transform_18, window_bounds = array<i64: 1, 128>}, {pipeline_mode = #tpu.pipeline_mode<synchronous>, transform_indices = @transform_19, window_bounds = array<i64: 4, 32, 128>}, {pipeline_mode = #tpu.pipeline_mode<synchronous>, transform_indices = @transform_20, window_bounds = array<i64: 4, 32, 128>}, {pipeline_mode = #tpu.pipeline_mode<synchronous>, transform_indices = @transform_21, window_bounds = array<i64: 4, 32, 128>}, {pipeline_mode = #tpu.pipeline_mode<synchronous>, transform_indices = @transform_22, window_bounds = array<i64: 4, 1, 32>}, {pipeline_mode = #tpu.pipeline_mode<synchronous>, transform_indices = @transform_23, window_bounds = array<i64: 4, 1, 32>}, {pipeline_mode = #tpu.pipeline_mode<synchronous>, transform_indices = @transform_24, window_bounds = array<i64: 4, 1, 32>}, {pipeline_mode = #tpu.pipeline_mode<synchronous>, transform_indices = @transform_25, window_bounds = array<i64: 4, 32, 128>}, {pipeline_mode = #tpu.pipeline_mode<synchronous>, transform_indices = @transform_26, window_bounds = array<i64: 1, 128>}, {pipeline_mode = #tpu.pipeline_mode<synchronous>, transform_indices = @transform_27, window_bounds = array<i64: 1, 128>}, {pipeline_mode = #tpu.pipeline_mode<synchronous>, transform_indices = @transform_28, window_bounds = array<i64: 1, 128>}, {pipeline_mode = #tpu.pipeline_mode<synchronous>, transform_indices = @transform_29, window_bounds = array<i64: 2048, 128>}, {pipeline_mode = #tpu.pipeline_mode<synchronous>, transform_indices = @transform_30, window_bounds = array<i64: 1, 2048>}, {pipeline_mode = #tpu.pipeline_mode<synchronous>, transform_indices = @transform_31, window_bounds = array<i64: 128, 2048>}, {pipeline_mode = #tpu.pipeline_mode<synchronous>, transform_indices = @transform_32, window_bounds = array<i64: 1, 128>}, {pipeline_mode = #tpu.pipeline_mode<synchronous>, transform_indices = @transform_33, window_bounds = array<i64: 1, 128>}, {pipeline_mode = #tpu.pipeline_mode<synchronous>, transform_indices = @transform_34, window_bounds = array<i64: 1, 128>}, {pipeline_mode = #tpu.pipeline_mode<synchronous>, transform_indices = @transform_35, window_bounds = array<i64: 128, 128>}, {pipeline_mode = #tpu.pipeline_mode<synchronous>, transform_indices = @transform_36, window_bounds = array<i64: 1, 128>}, {transform_indices = @transform_37, window_bounds = array<i64: 1, 1, 128>}]} {
    %c0 = arith.constant 0 : index
    %c0_0 = arith.constant 0 : index
    %c0_1 = arith.constant 0 : index
    %0 = vector.load %arg1[%c0, %c0_0, %c0_1] : memref<1x16x1xf32, #tpu.memory_space<vmem>>, vector<1x16x1xf32>
    %1 = vector.shape_cast %0 : vector<1x16x1xf32> to vector<16x1xf32>
    %c0_2 = arith.constant 0 : index
    %c0_3 = arith.constant 0 : index
    %2 = vector.load %arg2[%c0_2, %c0_3] : memref<1x128xf32, #tpu.memory_space<vmem>>, vector<1x128xf32>
    %3 = vector.broadcast %1 : vector<16x1xf32> to vector<16x128xf32>
    %4 = vector.broadcast %2 : vector<1x128xf32> to vector<16x128xf32>
    %5 = arith.mulf %3, %4 : vector<16x128xf32>
    %c0_4 = arith.constant 0 : index
    %c0_5 = arith.constant 0 : index
    %6 = vector.load %arg3[%c0_4, %c0_5] : memref<1x128xf32, #tpu.memory_space<vmem>>, vector<1x128xf32>
    %7 = vector.broadcast %6 : vector<1x128xf32> to vector<16x128xf32>
    %8 = arith.addf %5, %7 : vector<16x128xf32>
    %9 = arith.truncf %8 : vector<16x128xf32> to vector<16x128xbf16>
    %cst = arith.constant 0.000000e+00 : f32
    %10 = vector.broadcast %cst : f32 to vector<16x128xf32>
    %c0_6 = arith.constant 0 : index
    %c0_7 = arith.constant 0 : index
    %c0_8 = arith.constant 0 : index
    %11 = vector.load %arg4[%c0_6, %c0_7, %c0_8] : memref<4x32x128xbf16, #tpu.memory_space<vmem>>, vector<1x32x128xbf16>
    %12 = vector.shape_cast %11 : vector<1x32x128xbf16> to vector<32x128xbf16>
    "tpu.trace_start"() <{level = 10 : i32, message = "sd,ed->se"}> : () -> ()
    %cst_9 = arith.constant dense<0.000000e+00> : vector<16x32xf32>
    %13 = tpu.matmul %9, %12, %cst_9 {dimension_numbers = #tpu.dot_dimension_numbers<[1], [1], [0], [0], [0, 0, 1, 0], [], []>} : vector<16x128xbf16>, vector<32x128xbf16>, vector<16x32xf32> -> vector<16x32xf32>
    "tpu.trace_stop"() : () -> ()
    %c0_10 = arith.constant 0 : index
    %c0_11 = arith.constant 0 : index
    %c0_12 = arith.constant 0 : index
    %14 = vector.load %arg7[%c0_10, %c0_11, %c0_12] : memref<4x1x32xf32, #tpu.memory_space<vmem>>, vector<1x1x32xf32>
    %15 = vector.shape_cast %14 : vector<1x1x32xf32> to vector<1x32xf32>
    %16 = vector.broadcast %15 : vector<1x32xf32> to vector<16x32xf32>
    %17 = arith.addf %13, %16 : vector<16x32xf32>
    %c0_13 = arith.constant 0 : index
    %c0_14 = arith.constant 0 : index
    %c0_15 = arith.constant 0 : index
    %18 = vector.load %arg5[%c0_13, %c0_14, %c0_15] : memref<4x32x128xbf16, #tpu.memory_space<vmem>>, vector<1x32x128xbf16>
    %19 = vector.shape_cast %18 : vector<1x32x128xbf16> to vector<32x128xbf16>
    "tpu.trace_start"() <{level = 10 : i32, message = "sd,ed->se"}> : () -> ()
    %cst_16 = arith.constant dense<0.000000e+00> : vector<16x32xf32>
    %20 = tpu.matmul %9, %19, %cst_16 {dimension_numbers = #tpu.dot_dimension_numbers<[1], [1], [0], [0], [0, 0, 1, 0], [], []>} : vector<16x128xbf16>, vector<32x128xbf16>, vector<16x32xf32> -> vector<16x32xf32>
    "tpu.trace_stop"() : () -> ()
    %c0_17 = arith.constant 0 : index
    %c0_18 = arith.constant 0 : index
    %c0_19 = arith.constant 0 : index
    %21 = vector.load %arg8[%c0_17, %c0_18, %c0_19] : memref<4x1x32xf32, #tpu.memory_space<vmem>>, vector<1x1x32xf32>
    %22 = vector.shape_cast %21 : vector<1x1x32xf32> to vector<1x32xf32>
    %23 = vector.broadcast %22 : vector<1x32xf32> to vector<16x32xf32>
    %24 = arith.addf %20, %23 : vector<16x32xf32>
    %c0_20 = arith.constant 0 : index
    %c0_21 = arith.constant 0 : index
    %c0_22 = arith.constant 0 : index
    %25 = vector.load %arg6[%c0_20, %c0_21, %c0_22] : memref<4x32x128xbf16, #tpu.memory_space<vmem>>, vector<1x32x128xbf16>
    %26 = vector.shape_cast %25 : vector<1x32x128xbf16> to vector<32x128xbf16>
    "tpu.trace_start"() <{level = 10 : i32, message = "sd,ed->se"}> : () -> ()
    %cst_23 = arith.constant dense<0.000000e+00> : vector<16x32xf32>
    %27 = tpu.matmul %9, %26, %cst_23 {dimension_numbers = #tpu.dot_dimension_numbers<[1], [1], [0], [0], [0, 0, 1, 0], [], []>} : vector<16x128xbf16>, vector<32x128xbf16>, vector<16x32xf32> -> vector<16x32xf32>
    "tpu.trace_stop"() : () -> ()
    %c0_24 = arith.constant 0 : index
    %c0_25 = arith.constant 0 : index
    %c0_26 = arith.constant 0 : index
    %28 = vector.load %arg9[%c0_24, %c0_25, %c0_26] : memref<4x1x32xf32, #tpu.memory_space<vmem>>, vector<1x1x32xf32>
    %29 = vector.shape_cast %28 : vector<1x1x32xf32> to vector<1x32xf32>
    %30 = vector.broadcast %29 : vector<1x32xf32> to vector<16x32xf32>
    %31 = arith.addf %27, %30 : vector<16x32xf32>
    "tpu.trace_start"() <{level = 10 : i32, message = "qe,ke->qk"}> : () -> ()
    %cst_27 = arith.constant dense<0.000000e+00> : vector<16x16xf32>
    %32 = tpu.matmul %17, %24, %cst_27 {dimension_numbers = #tpu.dot_dimension_numbers<[1], [1], [0], [0], [0, 0, 1, 0], [], []>} : vector<16x32xf32>, vector<16x32xf32>, vector<16x16xf32> -> vector<16x16xf32>
    "tpu.trace_stop"() : () -> ()
    %cst_28 = arith.constant 0.176776692 : f32
    %33 = vector.broadcast %cst_28 : f32 to vector<16x16xf32>
    %34 = arith.mulf %32, %33 : vector<16x16xf32>
    %cst_29 = arith.constant dense<0xFF800000> : vector<16xf32>
    %35 = vector.multi_reduction <maximumf>, %34, %cst_29 [1] : vector<16x16xf32> to vector<16xf32>
    %36 = vector.shape_cast %35 : vector<16xf32> to vector<16x1xf32>
    %37 = vector.broadcast %36 : vector<16x1xf32> to vector<16x16xf32>
    %38 = arith.subf %34, %37 : vector<16x16xf32>
    %39 = math.exp %38 : vector<16x16xf32>
    %cst_30 = arith.constant dense<0.000000e+00> : vector<16xf32>
    %40 = vector.multi_reduction <add>, %39, %cst_30 [1] : vector<16x16xf32> to vector<16xf32>
    %41 = vector.shape_cast %40 : vector<16xf32> to vector<16x1xf32>
    %42 = tpu.reciprocal %41 {approx = true} : vector<16x1xf32> -> vector<16x1xf32>
    %43 = vector.broadcast %42 : vector<16x1xf32> to vector<16x16xf32>
    %44 = arith.mulf %39, %43 : vector<16x16xf32>
    "tpu.trace_start"() <{level = 10 : i32, message = "qk,ke->qe"}> : () -> ()
    %cst_31 = arith.constant dense<0.000000e+00> : vector<16x32xf32>
    %45 = tpu.matmul %44, %31, %cst_31 {dimension_numbers = #tpu.dot_dimension_numbers<[1], [0], [0], [1], [0, 0, 1, 1], [], []>} : vector<16x16xf32>, vector<16x32xf32>, vector<16x32xf32> -> vector<16x32xf32>
    "tpu.trace_stop"() : () -> ()
    %46 = arith.truncf %45 : vector<16x32xf32> to vector<16x32xbf16>
    %c0_32 = arith.constant 0 : index
    %c0_33 = arith.constant 0 : index
    %c0_34 = arith.constant 0 : index
    %47 = vector.load %arg10[%c0_32, %c0_33, %c0_34] : memref<4x32x128xbf16, #tpu.memory_space<vmem>>, vector<1x32x128xbf16>
    %48 = vector.shape_cast %47 : vector<1x32x128xbf16> to vector<32x128xbf16>
    "tpu.trace_start"() <{level = 10 : i32, message = "se,ed->sd"}> : () -> ()
    %cst_35 = arith.constant dense<0.000000e+00> : vector<16x128xf32>
    %49 = tpu.matmul %46, %48, %cst_35 {dimension_numbers = #tpu.dot_dimension_numbers<[1], [0], [0], [1], [0, 0, 1, 1], [], []>} : vector<16x32xbf16>, vector<32x128xbf16>, vector<16x128xf32> -> vector<16x128xf32>
    "tpu.trace_stop"() : () -> ()
    %50 = arith.addf %10, %49 : vector<16x128xf32>
    %c1 = arith.constant 1 : index
    %c0_36 = arith.constant 0 : index
    %c0_37 = arith.constant 0 : index
    %51 = vector.load %arg4[%c1, %c0_36, %c0_37] : memref<4x32x128xbf16, #tpu.memory_space<vmem>>, vector<1x32x128xbf16>
    %52 = vector.shape_cast %51 : vector<1x32x128xbf16> to vector<32x128xbf16>
    "tpu.trace_start"() <{level = 10 : i32, message = "sd,ed->se"}> : () -> ()
    %cst_38 = arith.constant dense<0.000000e+00> : vector<16x32xf32>
    %53 = tpu.matmul %9, %52, %cst_38 {dimension_numbers = #tpu.dot_dimension_numbers<[1], [1], [0], [0], [0, 0, 1, 0], [], []>} : vector<16x128xbf16>, vector<32x128xbf16>, vector<16x32xf32> -> vector<16x32xf32>
    "tpu.trace_stop"() : () -> ()
    %c1_39 = arith.constant 1 : index
    %c0_40 = arith.constant 0 : index
    %c0_41 = arith.constant 0 : index
    %54 = vector.load %arg7[%c1_39, %c0_40, %c0_41] : memref<4x1x32xf32, #tpu.memory_space<vmem>>, vector<1x1x32xf32>
    %55 = vector.shape_cast %54 : vector<1x1x32xf32> to vector<1x32xf32>
    %56 = vector.broadcast %55 : vector<1x32xf32> to vector<16x32xf32>
    %57 = arith.addf %53, %56 : vector<16x32xf32>
    %c1_42 = arith.constant 1 : index
    %c0_43 = arith.constant 0 : index
    %c0_44 = arith.constant 0 : index
    %58 = vector.load %arg5[%c1_42, %c0_43, %c0_44] : memref<4x32x128xbf16, #tpu.memory_space<vmem>>, vector<1x32x128xbf16>
    %59 = vector.shape_cast %58 : vector<1x32x128xbf16> to vector<32x128xbf16>
    "tpu.trace_start"() <{level = 10 : i32, message = "sd,ed->se"}> : () -> ()
    %cst_45 = arith.constant dense<0.000000e+00> : vector<16x32xf32>
    %60 = tpu.matmul %9, %59, %cst_45 {dimension_numbers = #tpu.dot_dimension_numbers<[1], [1], [0], [0], [0, 0, 1, 0], [], []>} : vector<16x128xbf16>, vector<32x128xbf16>, vector<16x32xf32> -> vector<16x32xf32>
    "tpu.trace_stop"() : () -> ()
    %c1_46 = arith.constant 1 : index
    %c0_47 = arith.constant 0 : index
    %c0_48 = arith.constant 0 : index
    %61 = vector.load %arg8[%c1_46, %c0_47, %c0_48] : memref<4x1x32xf32, #tpu.memory_space<vmem>>, vector<1x1x32xf32>
    %62 = vector.shape_cast %61 : vector<1x1x32xf32> to vector<1x32xf32>
    %63 = vector.broadcast %62 : vector<1x32xf32> to vector<16x32xf32>
    %64 = arith.addf %60, %63 : vector<16x32xf32>
    %c1_49 = arith.constant 1 : index
    %c0_50 = arith.constant 0 : index
    %c0_51 = arith.constant 0 : index
    %65 = vector.load %arg6[%c1_49, %c0_50, %c0_51] : memref<4x32x128xbf16, #tpu.memory_space<vmem>>, vector<1x32x128xbf16>
    %66 = vector.shape_cast %65 : vector<1x32x128xbf16> to vector<32x128xbf16>
    "tpu.trace_start"() <{level = 10 : i32, message = "sd,ed->se"}> : () -> ()
    %cst_52 = arith.constant dense<0.000000e+00> : vector<16x32xf32>
    %67 = tpu.matmul %9, %66, %cst_52 {dimension_numbers = #tpu.dot_dimension_numbers<[1], [1], [0], [0], [0, 0, 1, 0], [], []>} : vector<16x128xbf16>, vector<32x128xbf16>, vector<16x32xf32> -> vector<16x32xf32>
    "tpu.trace_stop"() : () -> ()
    %c1_53 = arith.constant 1 : index
    %c0_54 = arith.constant 0 : index
    %c0_55 = arith.constant 0 : index
    %68 = vector.load %arg9[%c1_53, %c0_54, %c0_55] : memref<4x1x32xf32, #tpu.memory_space<vmem>>, vector<1x1x32xf32>
    %69 = vector.shape_cast %68 : vector<1x1x32xf32> to vector<1x32xf32>
    %70 = vector.broadcast %69 : vector<1x32xf32> to vector<16x32xf32>
    %71 = arith.addf %67, %70 : vector<16x32xf32>
    "tpu.trace_start"() <{level = 10 : i32, message = "qe,ke->qk"}> : () -> ()
    %cst_56 = arith.constant dense<0.000000e+00> : vector<16x16xf32>
    %72 = tpu.matmul %57, %64, %cst_56 {dimension_numbers = #tpu.dot_dimension_numbers<[1], [1], [0], [0], [0, 0, 1, 0], [], []>} : vector<16x32xf32>, vector<16x32xf32>, vector<16x16xf32> -> vector<16x16xf32>
    "tpu.trace_stop"() : () -> ()
    %cst_57 = arith.constant 0.176776692 : f32
    %73 = vector.broadcast %cst_57 : f32 to vector<16x16xf32>
    %74 = arith.mulf %72, %73 : vector<16x16xf32>
    %cst_58 = arith.constant dense<0xFF800000> : vector<16xf32>
    %75 = vector.multi_reduction <maximumf>, %74, %cst_58 [1] : vector<16x16xf32> to vector<16xf32>
    %76 = vector.shape_cast %75 : vector<16xf32> to vector<16x1xf32>
    %77 = vector.broadcast %76 : vector<16x1xf32> to vector<16x16xf32>
    %78 = arith.subf %74, %77 : vector<16x16xf32>
    %79 = math.exp %78 : vector<16x16xf32>
    %cst_59 = arith.constant dense<0.000000e+00> : vector<16xf32>
    %80 = vector.multi_reduction <add>, %79, %cst_59 [1] : vector<16x16xf32> to vector<16xf32>
    %81 = vector.shape_cast %80 : vector<16xf32> to vector<16x1xf32>
    %82 = tpu.reciprocal %81 {approx = true} : vector<16x1xf32> -> vector<16x1xf32>
    %83 = vector.broadcast %82 : vector<16x1xf32> to vector<16x16xf32>
    %84 = arith.mulf %79, %83 : vector<16x16xf32>
    "tpu.trace_start"() <{level = 10 : i32, message = "qk,ke->qe"}> : () -> ()
    %cst_60 = arith.constant dense<0.000000e+00> : vector<16x32xf32>
    %85 = tpu.matmul %84, %71, %cst_60 {dimension_numbers = #tpu.dot_dimension_numbers<[1], [0], [0], [1], [0, 0, 1, 1], [], []>} : vector<16x16xf32>, vector<16x32xf32>, vector<16x32xf32> -> vector<16x32xf32>
    "tpu.trace_stop"() : () -> ()
    %86 = arith.truncf %85 : vector<16x32xf32> to vector<16x32xbf16>
    %c1_61 = arith.constant 1 : index
    %c0_62 = arith.constant 0 : index
    %c0_63 = arith.constant 0 : index
    %87 = vector.load %arg10[%c1_61, %c0_62, %c0_63] : memref<4x32x128xbf16, #tpu.memory_space<vmem>>, vector<1x32x128xbf16>
    %88 = vector.shape_cast %87 : vector<1x32x128xbf16> to vector<32x128xbf16>
    "tpu.trace_start"() <{level = 10 : i32, message = "se,ed->sd"}> : () -> ()
    %cst_64 = arith.constant dense<0.000000e+00> : vector<16x128xf32>
    %89 = tpu.matmul %86, %88, %cst_64 {dimension_numbers = #tpu.dot_dimension_numbers<[1], [0], [0], [1], [0, 0, 1, 1], [], []>} : vector<16x32xbf16>, vector<32x128xbf16>, vector<16x128xf32> -> vector<16x128xf32>
    "tpu.trace_stop"() : () -> ()
    %90 = arith.addf %50, %89 : vector<16x128xf32>
    %c2 = arith.constant 2 : index
    %c0_65 = arith.constant 0 : index
    %c0_66 = arith.constant 0 : index
    %91 = vector.load %arg4[%c2, %c0_65, %c0_66] : memref<4x32x128xbf16, #tpu.memory_space<vmem>>, vector<1x32x128xbf16>
    %92 = vector.shape_cast %91 : vector<1x32x128xbf16> to vector<32x128xbf16>
    "tpu.trace_start"() <{level = 10 : i32, message = "sd,ed->se"}> : () -> ()
    %cst_67 = arith.constant dense<0.000000e+00> : vector<16x32xf32>
    %93 = tpu.matmul %9, %92, %cst_67 {dimension_numbers = #tpu.dot_dimension_numbers<[1], [1], [0], [0], [0, 0, 1, 0], [], []>} : vector<16x128xbf16>, vector<32x128xbf16>, vector<16x32xf32> -> vector<16x32xf32>
    "tpu.trace_stop"() : () -> ()
    %c2_68 = arith.constant 2 : index
    %c0_69 = arith.constant 0 : index
    %c0_70 = arith.constant 0 : index
    %94 = vector.load %arg7[%c2_68, %c0_69, %c0_70] : memref<4x1x32xf32, #tpu.memory_space<vmem>>, vector<1x1x32xf32>
    %95 = vector.shape_cast %94 : vector<1x1x32xf32> to vector<1x32xf32>
    %96 = vector.broadcast %95 : vector<1x32xf32> to vector<16x32xf32>
    %97 = arith.addf %93, %96 : vector<16x32xf32>
    %c2_71 = arith.constant 2 : index
    %c0_72 = arith.constant 0 : index
    %c0_73 = arith.constant 0 : index
    %98 = vector.load %arg5[%c2_71, %c0_72, %c0_73] : memref<4x32x128xbf16, #tpu.memory_space<vmem>>, vector<1x32x128xbf16>
    %99 = vector.shape_cast %98 : vector<1x32x128xbf16> to vector<32x128xbf16>
    "tpu.trace_start"() <{level = 10 : i32, message = "sd,ed->se"}> : () -> ()
    %cst_74 = arith.constant dense<0.000000e+00> : vector<16x32xf32>
    %100 = tpu.matmul %9, %99, %cst_74 {dimension_numbers = #tpu.dot_dimension_numbers<[1], [1], [0], [0], [0, 0, 1, 0], [], []>} : vector<16x128xbf16>, vector<32x128xbf16>, vector<16x32xf32> -> vector<16x32xf32>
    "tpu.trace_stop"() : () -> ()
    %c2_75 = arith.constant 2 : index
    %c0_76 = arith.constant 0 : index
    %c0_77 = arith.constant 0 : index
    %101 = vector.load %arg8[%c2_75, %c0_76, %c0_77] : memref<4x1x32xf32, #tpu.memory_space<vmem>>, vector<1x1x32xf32>
    %102 = vector.shape_cast %101 : vector<1x1x32xf32> to vector<1x32xf32>
    %103 = vector.broadcast %102 : vector<1x32xf32> to vector<16x32xf32>
    %104 = arith.addf %100, %103 : vector<16x32xf32>
    %c2_78 = arith.constant 2 : index
    %c0_79 = arith.constant 0 : index
    %c0_80 = arith.constant 0 : index
    %105 = vector.load %arg6[%c2_78, %c0_79, %c0_80] : memref<4x32x128xbf16, #tpu.memory_space<vmem>>, vector<1x32x128xbf16>
    %106 = vector.shape_cast %105 : vector<1x32x128xbf16> to vector<32x128xbf16>
    "tpu.trace_start"() <{level = 10 : i32, message = "sd,ed->se"}> : () -> ()
    %cst_81 = arith.constant dense<0.000000e+00> : vector<16x32xf32>
    %107 = tpu.matmul %9, %106, %cst_81 {dimension_numbers = #tpu.dot_dimension_numbers<[1], [1], [0], [0], [0, 0, 1, 0], [], []>} : vector<16x128xbf16>, vector<32x128xbf16>, vector<16x32xf32> -> vector<16x32xf32>
    "tpu.trace_stop"() : () -> ()
    %c2_82 = arith.constant 2 : index
    %c0_83 = arith.constant 0 : index
    %c0_84 = arith.constant 0 : index
    %108 = vector.load %arg9[%c2_82, %c0_83, %c0_84] : memref<4x1x32xf32, #tpu.memory_space<vmem>>, vector<1x1x32xf32>
    %109 = vector.shape_cast %108 : vector<1x1x32xf32> to vector<1x32xf32>
    %110 = vector.broadcast %109 : vector<1x32xf32> to vector<16x32xf32>
    %111 = arith.addf %107, %110 : vector<16x32xf32>
    "tpu.trace_start"() <{level = 10 : i32, message = "qe,ke->qk"}> : () -> ()
    %cst_85 = arith.constant dense<0.000000e+00> : vector<16x16xf32>
    %112 = tpu.matmul %97, %104, %cst_85 {dimension_numbers = #tpu.dot_dimension_numbers<[1], [1], [0], [0], [0, 0, 1, 0], [], []>} : vector<16x32xf32>, vector<16x32xf32>, vector<16x16xf32> -> vector<16x16xf32>
    "tpu.trace_stop"() : () -> ()
    %cst_86 = arith.constant 0.176776692 : f32
    %113 = vector.broadcast %cst_86 : f32 to vector<16x16xf32>
    %114 = arith.mulf %112, %113 : vector<16x16xf32>
    %cst_87 = arith.constant dense<0xFF800000> : vector<16xf32>
    %115 = vector.multi_reduction <maximumf>, %114, %cst_87 [1] : vector<16x16xf32> to vector<16xf32>
    %116 = vector.shape_cast %115 : vector<16xf32> to vector<16x1xf32>
    %117 = vector.broadcast %116 : vector<16x1xf32> to vector<16x16xf32>
    %118 = arith.subf %114, %117 : vector<16x16xf32>
    %119 = math.exp %118 : vector<16x16xf32>
    %cst_88 = arith.constant dense<0.000000e+00> : vector<16xf32>
    %120 = vector.multi_reduction <add>, %119, %cst_88 [1] : vector<16x16xf32> to vector<16xf32>
    %121 = vector.shape_cast %120 : vector<16xf32> to vector<16x1xf32>
    %122 = tpu.reciprocal %121 {approx = true} : vector<16x1xf32> -> vector<16x1xf32>
    %123 = vector.broadcast %122 : vector<16x1xf32> to vector<16x16xf32>
    %124 = arith.mulf %119, %123 : vector<16x16xf32>
    "tpu.trace_start"() <{level = 10 : i32, message = "qk,ke->qe"}> : () -> ()
    %cst_89 = arith.constant dense<0.000000e+00> : vector<16x32xf32>
    %125 = tpu.matmul %124, %111, %cst_89 {dimension_numbers = #tpu.dot_dimension_numbers<[1], [0], [0], [1], [0, 0, 1, 1], [], []>} : vector<16x16xf32>, vector<16x32xf32>, vector<16x32xf32> -> vector<16x32xf32>
    "tpu.trace_stop"() : () -> ()
    %126 = arith.truncf %125 : vector<16x32xf32> to vector<16x32xbf16>
    %c2_90 = arith.constant 2 : index
    %c0_91 = arith.constant 0 : index
    %c0_92 = arith.constant 0 : index
    %127 = vector.load %arg10[%c2_90, %c0_91, %c0_92] : memref<4x32x128xbf16, #tpu.memory_space<vmem>>, vector<1x32x128xbf16>
    %128 = vector.shape_cast %127 : vector<1x32x128xbf16> to vector<32x128xbf16>
    "tpu.trace_start"() <{level = 10 : i32, message = "se,ed->sd"}> : () -> ()
    %cst_93 = arith.constant dense<0.000000e+00> : vector<16x128xf32>
    %129 = tpu.matmul %126, %128, %cst_93 {dimension_numbers = #tpu.dot_dimension_numbers<[1], [0], [0], [1], [0, 0, 1, 1], [], []>} : vector<16x32xbf16>, vector<32x128xbf16>, vector<16x128xf32> -> vector<16x128xf32>
    "tpu.trace_stop"() : () -> ()
    %130 = arith.addf %90, %129 : vector<16x128xf32>
    %c3 = arith.constant 3 : index
    %c0_94 = arith.constant 0 : index
    %c0_95 = arith.constant 0 : index
    %131 = vector.load %arg4[%c3, %c0_94, %c0_95] : memref<4x32x128xbf16, #tpu.memory_space<vmem>>, vector<1x32x128xbf16>
    %132 = vector.shape_cast %131 : vector<1x32x128xbf16> to vector<32x128xbf16>
    "tpu.trace_start"() <{level = 10 : i32, message = "sd,ed->se"}> : () -> ()
    %cst_96 = arith.constant dense<0.000000e+00> : vector<16x32xf32>
    %133 = tpu.matmul %9, %132, %cst_96 {dimension_numbers = #tpu.dot_dimension_numbers<[1], [1], [0], [0], [0, 0, 1, 0], [], []>} : vector<16x128xbf16>, vector<32x128xbf16>, vector<16x32xf32> -> vector<16x32xf32>
    "tpu.trace_stop"() : () -> ()
    %c3_97 = arith.constant 3 : index
    %c0_98 = arith.constant 0 : index
    %c0_99 = arith.constant 0 : index
    %134 = vector.load %arg7[%c3_97, %c0_98, %c0_99] : memref<4x1x32xf32, #tpu.memory_space<vmem>>, vector<1x1x32xf32>
    %135 = vector.shape_cast %134 : vector<1x1x32xf32> to vector<1x32xf32>
    %136 = vector.broadcast %135 : vector<1x32xf32> to vector<16x32xf32>
    %137 = arith.addf %133, %136 : vector<16x32xf32>
    %c3_100 = arith.constant 3 : index
    %c0_101 = arith.constant 0 : index
    %c0_102 = arith.constant 0 : index
    %138 = vector.load %arg5[%c3_100, %c0_101, %c0_102] : memref<4x32x128xbf16, #tpu.memory_space<vmem>>, vector<1x32x128xbf16>
    %139 = vector.shape_cast %138 : vector<1x32x128xbf16> to vector<32x128xbf16>
    "tpu.trace_start"() <{level = 10 : i32, message = "sd,ed->se"}> : () -> ()
    %cst_103 = arith.constant dense<0.000000e+00> : vector<16x32xf32>
    %140 = tpu.matmul %9, %139, %cst_103 {dimension_numbers = #tpu.dot_dimension_numbers<[1], [1], [0], [0], [0, 0, 1, 0], [], []>} : vector<16x128xbf16>, vector<32x128xbf16>, vector<16x32xf32> -> vector<16x32xf32>
    "tpu.trace_stop"() : () -> ()
    %c3_104 = arith.constant 3 : index
    %c0_105 = arith.constant 0 : index
    %c0_106 = arith.constant 0 : index
    %141 = vector.load %arg8[%c3_104, %c0_105, %c0_106] : memref<4x1x32xf32, #tpu.memory_space<vmem>>, vector<1x1x32xf32>
    %142 = vector.shape_cast %141 : vector<1x1x32xf32> to vector<1x32xf32>
    %143 = vector.broadcast %142 : vector<1x32xf32> to vector<16x32xf32>
    %144 = arith.addf %140, %143 : vector<16x32xf32>
    %c3_107 = arith.constant 3 : index
    %c0_108 = arith.constant 0 : index
    %c0_109 = arith.constant 0 : index
    %145 = vector.load %arg6[%c3_107, %c0_108, %c0_109] : memref<4x32x128xbf16, #tpu.memory_space<vmem>>, vector<1x32x128xbf16>
    %146 = vector.shape_cast %145 : vector<1x32x128xbf16> to vector<32x128xbf16>
    "tpu.trace_start"() <{level = 10 : i32, message = "sd,ed->se"}> : () -> ()
    %cst_110 = arith.constant dense<0.000000e+00> : vector<16x32xf32>
    %147 = tpu.matmul %9, %146, %cst_110 {dimension_numbers = #tpu.dot_dimension_numbers<[1], [1], [0], [0], [0, 0, 1, 0], [], []>} : vector<16x128xbf16>, vector<32x128xbf16>, vector<16x32xf32> -> vector<16x32xf32>
    "tpu.trace_stop"() : () -> ()
    %c3_111 = arith.constant 3 : index
    %c0_112 = arith.constant 0 : index
    %c0_113 = arith.constant 0 : index
    %148 = vector.load %arg9[%c3_111, %c0_112, %c0_113] : memref<4x1x32xf32, #tpu.memory_space<vmem>>, vector<1x1x32xf32>
    %149 = vector.shape_cast %148 : vector<1x1x32xf32> to vector<1x32xf32>
    %150 = vector.broadcast %149 : vector<1x32xf32> to vector<16x32xf32>
    %151 = arith.addf %147, %150 : vector<16x32xf32>
    "tpu.trace_start"() <{level = 10 : i32, message = "qe,ke->qk"}> : () -> ()
    %cst_114 = arith.constant dense<0.000000e+00> : vector<16x16xf32>
    %152 = tpu.matmul %137, %144, %cst_114 {dimension_numbers = #tpu.dot_dimension_numbers<[1], [1], [0], [0], [0, 0, 1, 0], [], []>} : vector<16x32xf32>, vector<16x32xf32>, vector<16x16xf32> -> vector<16x16xf32>
    "tpu.trace_stop"() : () -> ()
    %cst_115 = arith.constant 0.176776692 : f32
    %153 = vector.broadcast %cst_115 : f32 to vector<16x16xf32>
    %154 = arith.mulf %152, %153 : vector<16x16xf32>
    %cst_116 = arith.constant dense<0xFF800000> : vector<16xf32>
    %155 = vector.multi_reduction <maximumf>, %154, %cst_116 [1] : vector<16x16xf32> to vector<16xf32>
    %156 = vector.shape_cast %155 : vector<16xf32> to vector<16x1xf32>
    %157 = vector.broadcast %156 : vector<16x1xf32> to vector<16x16xf32>
    %158 = arith.subf %154, %157 : vector<16x16xf32>
    %159 = math.exp %158 : vector<16x16xf32>
    %cst_117 = arith.constant dense<0.000000e+00> : vector<16xf32>
    %160 = vector.multi_reduction <add>, %159, %cst_117 [1] : vector<16x16xf32> to vector<16xf32>
    %161 = vector.shape_cast %160 : vector<16xf32> to vector<16x1xf32>
    %162 = tpu.reciprocal %161 {approx = true} : vector<16x1xf32> -> vector<16x1xf32>
    %163 = vector.broadcast %162 : vector<16x1xf32> to vector<16x16xf32>
    %164 = arith.mulf %159, %163 : vector<16x16xf32>
    "tpu.trace_start"() <{level = 10 : i32, message = "qk,ke->qe"}> : () -> ()
    %cst_118 = arith.constant dense<0.000000e+00> : vector<16x32xf32>
    %165 = tpu.matmul %164, %151, %cst_118 {dimension_numbers = #tpu.dot_dimension_numbers<[1], [0], [0], [1], [0, 0, 1, 1], [], []>} : vector<16x16xf32>, vector<16x32xf32>, vector<16x32xf32> -> vector<16x32xf32>
    "tpu.trace_stop"() : () -> ()
    %166 = arith.truncf %165 : vector<16x32xf32> to vector<16x32xbf16>
    %c3_119 = arith.constant 3 : index
    %c0_120 = arith.constant 0 : index
    %c0_121 = arith.constant 0 : index
    %167 = vector.load %arg10[%c3_119, %c0_120, %c0_121] : memref<4x32x128xbf16, #tpu.memory_space<vmem>>, vector<1x32x128xbf16>
    %168 = vector.shape_cast %167 : vector<1x32x128xbf16> to vector<32x128xbf16>
    "tpu.trace_start"() <{level = 10 : i32, message = "se,ed->sd"}> : () -> ()
    %cst_122 = arith.constant dense<0.000000e+00> : vector<16x128xf32>
    %169 = tpu.matmul %166, %168, %cst_122 {dimension_numbers = #tpu.dot_dimension_numbers<[1], [0], [0], [1], [0, 0, 1, 1], [], []>} : vector<16x32xbf16>, vector<32x128xbf16>, vector<16x128xf32> -> vector<16x128xf32>
    "tpu.trace_stop"() : () -> ()
    %170 = arith.addf %130, %169 : vector<16x128xf32>
    %c0_123 = arith.constant 0 : index
    %c0_124 = arith.constant 0 : index
    %171 = vector.load %arg11[%c0_123, %c0_124] : memref<1x128xf32, #tpu.memory_space<vmem>>, vector<1x128xf32>
    %172 = vector.broadcast %171 : vector<1x128xf32> to vector<16x128xf32>
    %173 = arith.addf %170, %172 : vector<16x128xf32>
    %174 = arith.addf %8, %173 : vector<16x128xf32>
    %c0_125 = arith.constant 0 : index
    %c0_126 = arith.constant 0 : index
    %175 = vector.load %arg12[%c0_125, %c0_126] : memref<1x128xf32, #tpu.memory_space<vmem>>, vector<1x128xf32>
    %c0_127 = arith.constant 0 : index
    %c0_128 = arith.constant 0 : index
    %176 = vector.load %arg13[%c0_127, %c0_128] : memref<1x128xf32, #tpu.memory_space<vmem>>, vector<1x128xf32>
    %cst_129 = arith.constant dense<0.000000e+00> : vector<16xf32>
    %177 = vector.multi_reduction <add>, %174, %cst_129 [1] : vector<16x128xf32> to vector<16xf32>
    %178 = vector.shape_cast %177 : vector<16xf32> to vector<16x1xf32>
    %cst_130 = arith.constant 1.280000e+02 : f32
    %179 = vector.broadcast %cst_130 : f32 to vector<16x1xf32>
    %180 = arith.divf %178, %179 : vector<16x1xf32>
    %181 = vector.broadcast %180 : vector<16x1xf32> to vector<16x128xf32>
    %182 = arith.subf %174, %181 : vector<16x128xf32>
    %183 = arith.mulf %182, %182 : vector<16x128xf32>
    %cst_131 = arith.constant dense<0.000000e+00> : vector<16xf32>
    %184 = vector.multi_reduction <add>, %183, %cst_131 [1] : vector<16x128xf32> to vector<16xf32>
    %185 = vector.shape_cast %184 : vector<16xf32> to vector<16x1xf32>
    %cst_132 = arith.constant 1.280000e+02 : f32
    %186 = vector.broadcast %cst_132 : f32 to vector<16x1xf32>
    %187 = arith.divf %185, %186 : vector<16x1xf32>
    %188 = vector.broadcast %180 : vector<16x1xf32> to vector<16x128xf32>
    %189 = arith.subf %174, %188 : vector<16x128xf32>
    %cst_133 = arith.constant 9.99999974E-6 : f32
    %190 = vector.broadcast %cst_133 : f32 to vector<16x1xf32>
    %191 = arith.addf %187, %190 : vector<16x1xf32>
    %192 = math.rsqrt %191 : vector<16x1xf32>
    %193 = vector.broadcast %192 : vector<16x1xf32> to vector<16x128xf32>
    %194 = arith.mulf %189, %193 : vector<16x128xf32>
    %195 = vector.broadcast %175 : vector<1x128xf32> to vector<16x128xf32>
    %196 = arith.mulf %194, %195 : vector<16x128xf32>
    %197 = vector.broadcast %176 : vector<1x128xf32> to vector<16x128xf32>
    %198 = arith.addf %196, %197 : vector<16x128xf32>
    %199 = arith.truncf %198 : vector<16x128xf32> to vector<16x128xbf16>
    %c0_134 = arith.constant 0 : index
    %c0_135 = arith.constant 0 : index
    %200 = vector.load %arg14[%c0_134, %c0_135] : memref<2048x128xbf16, #tpu.memory_space<vmem>>, vector<2048x128xbf16>
    "tpu.trace_start"() <{level = 10 : i32, message = "sd,fd->sf"}> : () -> ()
    %cst_136 = arith.constant dense<0.000000e+00> : vector<16x2048xf32>
    %201 = tpu.matmul %199, %200, %cst_136 {dimension_numbers = #tpu.dot_dimension_numbers<[1], [1], [0], [0], [0, 0, 1, 0], [], []>} : vector<16x128xbf16>, vector<2048x128xbf16>, vector<16x2048xf32> -> vector<16x2048xf32>
    "tpu.trace_stop"() : () -> ()
    %c0_137 = arith.constant 0 : index
    %c0_138 = arith.constant 0 : index
    %202 = vector.load %arg15[%c0_137, %c0_138] : memref<1x2048xf32, #tpu.memory_space<vmem>>, vector<1x2048xf32>
    %203 = vector.broadcast %202 : vector<1x2048xf32> to vector<16x2048xf32>
    %204 = arith.addf %201, %203 : vector<16x2048xf32>
    %cst_139 = arith.constant 0.000000e+00 : f32
    %205 = vector.broadcast %cst_139 : f32 to vector<16x2048xf32>
    %206 = arith.maximumf %204, %205 : vector<16x2048xf32>
    %207 = arith.truncf %206 : vector<16x2048xf32> to vector<16x2048xbf16>
    %c0_140 = arith.constant 0 : index
    %c0_141 = arith.constant 0 : index
    %208 = vector.load %arg16[%c0_140, %c0_141] : memref<128x2048xbf16, #tpu.memory_space<vmem>>, vector<128x2048xbf16>
    "tpu.trace_start"() <{level = 10 : i32, message = "sf,df->sd"}> : () -> ()
    %cst_142 = arith.constant dense<0.000000e+00> : vector<16x128xf32>
    %209 = tpu.matmul %207, %208, %cst_142 {dimension_numbers = #tpu.dot_dimension_numbers<[1], [1], [0], [0], [0, 0, 1, 0], [], []>} : vector<16x2048xbf16>, vector<128x2048xbf16>, vector<16x128xf32> -> vector<16x128xf32>
    "tpu.trace_stop"() : () -> ()
    %c0_143 = arith.constant 0 : index
    %c0_144 = arith.constant 0 : index
    %210 = vector.load %arg17[%c0_143, %c0_144] : memref<1x128xf32, #tpu.memory_space<vmem>>, vector<1x128xf32>
    %211 = vector.broadcast %210 : vector<1x128xf32> to vector<16x128xf32>
    %212 = arith.addf %209, %211 : vector<16x128xf32>
    %213 = arith.addf %198, %212 : vector<16x128xf32>
    %c0_145 = arith.constant 0 : index
    %c0_146 = arith.constant 0 : index
    %214 = vector.load %arg18[%c0_145, %c0_146] : memref<1x128xf32, #tpu.memory_space<vmem>>, vector<1x128xf32>
    %c0_147 = arith.constant 0 : index
    %c0_148 = arith.constant 0 : index
    %215 = vector.load %arg19[%c0_147, %c0_148] : memref<1x128xf32, #tpu.memory_space<vmem>>, vector<1x128xf32>
    %cst_149 = arith.constant dense<0.000000e+00> : vector<16xf32>
    %216 = vector.multi_reduction <add>, %213, %cst_149 [1] : vector<16x128xf32> to vector<16xf32>
    %217 = vector.shape_cast %216 : vector<16xf32> to vector<16x1xf32>
    %cst_150 = arith.constant 1.280000e+02 : f32
    %218 = vector.broadcast %cst_150 : f32 to vector<16x1xf32>
    %219 = arith.divf %217, %218 : vector<16x1xf32>
    %220 = vector.broadcast %219 : vector<16x1xf32> to vector<16x128xf32>
    %221 = arith.subf %213, %220 : vector<16x128xf32>
    %222 = arith.mulf %221, %221 : vector<16x128xf32>
    %cst_151 = arith.constant dense<0.000000e+00> : vector<16xf32>
    %223 = vector.multi_reduction <add>, %222, %cst_151 [1] : vector<16x128xf32> to vector<16xf32>
    %224 = vector.shape_cast %223 : vector<16xf32> to vector<16x1xf32>
    %cst_152 = arith.constant 1.280000e+02 : f32
    %225 = vector.broadcast %cst_152 : f32 to vector<16x1xf32>
    %226 = arith.divf %224, %225 : vector<16x1xf32>
    %227 = vector.broadcast %219 : vector<16x1xf32> to vector<16x128xf32>
    %228 = arith.subf %213, %227 : vector<16x128xf32>
    %cst_153 = arith.constant 9.99999974E-6 : f32
    %229 = vector.broadcast %cst_153 : f32 to vector<16x1xf32>
    %230 = arith.addf %226, %229 : vector<16x1xf32>
    %231 = math.rsqrt %230 : vector<16x1xf32>
    %232 = vector.broadcast %231 : vector<16x1xf32> to vector<16x128xf32>
    %233 = arith.mulf %228, %232 : vector<16x128xf32>
    %234 = vector.broadcast %214 : vector<1x128xf32> to vector<16x128xf32>
    %235 = arith.mulf %233, %234 : vector<16x128xf32>
    %236 = vector.broadcast %215 : vector<1x128xf32> to vector<16x128xf32>
    %237 = arith.addf %235, %236 : vector<16x128xf32>
    %238 = arith.truncf %237 : vector<16x128xf32> to vector<16x128xbf16>
    %cst_154 = arith.constant 0.000000e+00 : f32
    %239 = vector.broadcast %cst_154 : f32 to vector<16x128xf32>
    %c0_155 = arith.constant 0 : index
    %c0_156 = arith.constant 0 : index
    %c0_157 = arith.constant 0 : index
    %240 = vector.load %arg20[%c0_155, %c0_156, %c0_157] : memref<4x32x128xbf16, #tpu.memory_space<vmem>>, vector<1x32x128xbf16>
    %241 = vector.shape_cast %240 : vector<1x32x128xbf16> to vector<32x128xbf16>
    "tpu.trace_start"() <{level = 10 : i32, message = "sd,ed->se"}> : () -> ()
    %cst_158 = arith.constant dense<0.000000e+00> : vector<16x32xf32>
    %242 = tpu.matmul %238, %241, %cst_158 {dimension_numbers = #tpu.dot_dimension_numbers<[1], [1], [0], [0], [0, 0, 1, 0], [], []>} : vector<16x128xbf16>, vector<32x128xbf16>, vector<16x32xf32> -> vector<16x32xf32>
    "tpu.trace_stop"() : () -> ()
    %c0_159 = arith.constant 0 : index
    %c0_160 = arith.constant 0 : index
    %c0_161 = arith.constant 0 : index
    %243 = vector.load %arg23[%c0_159, %c0_160, %c0_161] : memref<4x1x32xf32, #tpu.memory_space<vmem>>, vector<1x1x32xf32>
    %244 = vector.shape_cast %243 : vector<1x1x32xf32> to vector<1x32xf32>
    %245 = vector.broadcast %244 : vector<1x32xf32> to vector<16x32xf32>
    %246 = arith.addf %242, %245 : vector<16x32xf32>
    %c0_162 = arith.constant 0 : index
    %c0_163 = arith.constant 0 : index
    %c0_164 = arith.constant 0 : index
    %247 = vector.load %arg21[%c0_162, %c0_163, %c0_164] : memref<4x32x128xbf16, #tpu.memory_space<vmem>>, vector<1x32x128xbf16>
    %248 = vector.shape_cast %247 : vector<1x32x128xbf16> to vector<32x128xbf16>
    "tpu.trace_start"() <{level = 10 : i32, message = "sd,ed->se"}> : () -> ()
    %cst_165 = arith.constant dense<0.000000e+00> : vector<16x32xf32>
    %249 = tpu.matmul %238, %248, %cst_165 {dimension_numbers = #tpu.dot_dimension_numbers<[1], [1], [0], [0], [0, 0, 1, 0], [], []>} : vector<16x128xbf16>, vector<32x128xbf16>, vector<16x32xf32> -> vector<16x32xf32>
    "tpu.trace_stop"() : () -> ()
    %c0_166 = arith.constant 0 : index
    %c0_167 = arith.constant 0 : index
    %c0_168 = arith.constant 0 : index
    %250 = vector.load %arg24[%c0_166, %c0_167, %c0_168] : memref<4x1x32xf32, #tpu.memory_space<vmem>>, vector<1x1x32xf32>
    %251 = vector.shape_cast %250 : vector<1x1x32xf32> to vector<1x32xf32>
    %252 = vector.broadcast %251 : vector<1x32xf32> to vector<16x32xf32>
    %253 = arith.addf %249, %252 : vector<16x32xf32>
    %c0_169 = arith.constant 0 : index
    %c0_170 = arith.constant 0 : index
    %c0_171 = arith.constant 0 : index
    %254 = vector.load %arg22[%c0_169, %c0_170, %c0_171] : memref<4x32x128xbf16, #tpu.memory_space<vmem>>, vector<1x32x128xbf16>
    %255 = vector.shape_cast %254 : vector<1x32x128xbf16> to vector<32x128xbf16>
    "tpu.trace_start"() <{level = 10 : i32, message = "sd,ed->se"}> : () -> ()
    %cst_172 = arith.constant dense<0.000000e+00> : vector<16x32xf32>
    %256 = tpu.matmul %238, %255, %cst_172 {dimension_numbers = #tpu.dot_dimension_numbers<[1], [1], [0], [0], [0, 0, 1, 0], [], []>} : vector<16x128xbf16>, vector<32x128xbf16>, vector<16x32xf32> -> vector<16x32xf32>
    "tpu.trace_stop"() : () -> ()
    %c0_173 = arith.constant 0 : index
    %c0_174 = arith.constant 0 : index
    %c0_175 = arith.constant 0 : index
    %257 = vector.load %arg25[%c0_173, %c0_174, %c0_175] : memref<4x1x32xf32, #tpu.memory_space<vmem>>, vector<1x1x32xf32>
    %258 = vector.shape_cast %257 : vector<1x1x32xf32> to vector<1x32xf32>
    %259 = vector.broadcast %258 : vector<1x32xf32> to vector<16x32xf32>
    %260 = arith.addf %256, %259 : vector<16x32xf32>
    "tpu.trace_start"() <{level = 10 : i32, message = "qe,ke->qk"}> : () -> ()
    %cst_176 = arith.constant dense<0.000000e+00> : vector<16x16xf32>
    %261 = tpu.matmul %246, %253, %cst_176 {dimension_numbers = #tpu.dot_dimension_numbers<[1], [1], [0], [0], [0, 0, 1, 0], [], []>} : vector<16x32xf32>, vector<16x32xf32>, vector<16x16xf32> -> vector<16x16xf32>
    "tpu.trace_stop"() : () -> ()
    %cst_177 = arith.constant 0.176776692 : f32
    %262 = vector.broadcast %cst_177 : f32 to vector<16x16xf32>
    %263 = arith.mulf %261, %262 : vector<16x16xf32>
    %cst_178 = arith.constant dense<0xFF800000> : vector<16xf32>
    %264 = vector.multi_reduction <maximumf>, %263, %cst_178 [1] : vector<16x16xf32> to vector<16xf32>
    %265 = vector.shape_cast %264 : vector<16xf32> to vector<16x1xf32>
    %266 = vector.broadcast %265 : vector<16x1xf32> to vector<16x16xf32>
    %267 = arith.subf %263, %266 : vector<16x16xf32>
    %268 = math.exp %267 : vector<16x16xf32>
    %cst_179 = arith.constant dense<0.000000e+00> : vector<16xf32>
    %269 = vector.multi_reduction <add>, %268, %cst_179 [1] : vector<16x16xf32> to vector<16xf32>
    %270 = vector.shape_cast %269 : vector<16xf32> to vector<16x1xf32>
    %271 = tpu.reciprocal %270 {approx = true} : vector<16x1xf32> -> vector<16x1xf32>
    %272 = vector.broadcast %271 : vector<16x1xf32> to vector<16x16xf32>
    %273 = arith.mulf %268, %272 : vector<16x16xf32>
    "tpu.trace_start"() <{level = 10 : i32, message = "qk,ke->qe"}> : () -> ()
    %cst_180 = arith.constant dense<0.000000e+00> : vector<16x32xf32>
    %274 = tpu.matmul %273, %260, %cst_180 {dimension_numbers = #tpu.dot_dimension_numbers<[1], [0], [0], [1], [0, 0, 1, 1], [], []>} : vector<16x16xf32>, vector<16x32xf32>, vector<16x32xf32> -> vector<16x32xf32>
    "tpu.trace_stop"() : () -> ()
    %275 = arith.truncf %274 : vector<16x32xf32> to vector<16x32xbf16>
    %c0_181 = arith.constant 0 : index
    %c0_182 = arith.constant 0 : index
    %c0_183 = arith.constant 0 : index
    %276 = vector.load %arg26[%c0_181, %c0_182, %c0_183] : memref<4x32x128xbf16, #tpu.memory_space<vmem>>, vector<1x32x128xbf16>
    %277 = vector.shape_cast %276 : vector<1x32x128xbf16> to vector<32x128xbf16>
    "tpu.trace_start"() <{level = 10 : i32, message = "se,ed->sd"}> : () -> ()
    %cst_184 = arith.constant dense<0.000000e+00> : vector<16x128xf32>
    %278 = tpu.matmul %275, %277, %cst_184 {dimension_numbers = #tpu.dot_dimension_numbers<[1], [0], [0], [1], [0, 0, 1, 1], [], []>} : vector<16x32xbf16>, vector<32x128xbf16>, vector<16x128xf32> -> vector<16x128xf32>
    "tpu.trace_stop"() : () -> ()
    %279 = arith.addf %239, %278 : vector<16x128xf32>
    %c1_185 = arith.constant 1 : index
    %c0_186 = arith.constant 0 : index
    %c0_187 = arith.constant 0 : index
    %280 = vector.load %arg20[%c1_185, %c0_186, %c0_187] : memref<4x32x128xbf16, #tpu.memory_space<vmem>>, vector<1x32x128xbf16>
    %281 = vector.shape_cast %280 : vector<1x32x128xbf16> to vector<32x128xbf16>
    "tpu.trace_start"() <{level = 10 : i32, message = "sd,ed->se"}> : () -> ()
    %cst_188 = arith.constant dense<0.000000e+00> : vector<16x32xf32>
    %282 = tpu.matmul %238, %281, %cst_188 {dimension_numbers = #tpu.dot_dimension_numbers<[1], [1], [0], [0], [0, 0, 1, 0], [], []>} : vector<16x128xbf16>, vector<32x128xbf16>, vector<16x32xf32> -> vector<16x32xf32>
    "tpu.trace_stop"() : () -> ()
    %c1_189 = arith.constant 1 : index
    %c0_190 = arith.constant 0 : index
    %c0_191 = arith.constant 0 : index
    %283 = vector.load %arg23[%c1_189, %c0_190, %c0_191] : memref<4x1x32xf32, #tpu.memory_space<vmem>>, vector<1x1x32xf32>
    %284 = vector.shape_cast %283 : vector<1x1x32xf32> to vector<1x32xf32>
    %285 = vector.broadcast %284 : vector<1x32xf32> to vector<16x32xf32>
    %286 = arith.addf %282, %285 : vector<16x32xf32>
    %c1_192 = arith.constant 1 : index
    %c0_193 = arith.constant 0 : index
    %c0_194 = arith.constant 0 : index
    %287 = vector.load %arg21[%c1_192, %c0_193, %c0_194] : memref<4x32x128xbf16, #tpu.memory_space<vmem>>, vector<1x32x128xbf16>
    %288 = vector.shape_cast %287 : vector<1x32x128xbf16> to vector<32x128xbf16>
    "tpu.trace_start"() <{level = 10 : i32, message = "sd,ed->se"}> : () -> ()
    %cst_195 = arith.constant dense<0.000000e+00> : vector<16x32xf32>
    %289 = tpu.matmul %238, %288, %cst_195 {dimension_numbers = #tpu.dot_dimension_numbers<[1], [1], [0], [0], [0, 0, 1, 0], [], []>} : vector<16x128xbf16>, vector<32x128xbf16>, vector<16x32xf32> -> vector<16x32xf32>
    "tpu.trace_stop"() : () -> ()
    %c1_196 = arith.constant 1 : index
    %c0_197 = arith.constant 0 : index
    %c0_198 = arith.constant 0 : index
    %290 = vector.load %arg24[%c1_196, %c0_197, %c0_198] : memref<4x1x32xf32, #tpu.memory_space<vmem>>, vector<1x1x32xf32>
    %291 = vector.shape_cast %290 : vector<1x1x32xf32> to vector<1x32xf32>
    %292 = vector.broadcast %291 : vector<1x32xf32> to vector<16x32xf32>
    %293 = arith.addf %289, %292 : vector<16x32xf32>
    %c1_199 = arith.constant 1 : index
    %c0_200 = arith.constant 0 : index
    %c0_201 = arith.constant 0 : index
    %294 = vector.load %arg22[%c1_199, %c0_200, %c0_201] : memref<4x32x128xbf16, #tpu.memory_space<vmem>>, vector<1x32x128xbf16>
    %295 = vector.shape_cast %294 : vector<1x32x128xbf16> to vector<32x128xbf16>
    "tpu.trace_start"() <{level = 10 : i32, message = "sd,ed->se"}> : () -> ()
    %cst_202 = arith.constant dense<0.000000e+00> : vector<16x32xf32>
    %296 = tpu.matmul %238, %295, %cst_202 {dimension_numbers = #tpu.dot_dimension_numbers<[1], [1], [0], [0], [0, 0, 1, 0], [], []>} : vector<16x128xbf16>, vector<32x128xbf16>, vector<16x32xf32> -> vector<16x32xf32>
    "tpu.trace_stop"() : () -> ()
    %c1_203 = arith.constant 1 : index
    %c0_204 = arith.constant 0 : index
    %c0_205 = arith.constant 0 : index
    %297 = vector.load %arg25[%c1_203, %c0_204, %c0_205] : memref<4x1x32xf32, #tpu.memory_space<vmem>>, vector<1x1x32xf32>
    %298 = vector.shape_cast %297 : vector<1x1x32xf32> to vector<1x32xf32>
    %299 = vector.broadcast %298 : vector<1x32xf32> to vector<16x32xf32>
    %300 = arith.addf %296, %299 : vector<16x32xf32>
    "tpu.trace_start"() <{level = 10 : i32, message = "qe,ke->qk"}> : () -> ()
    %cst_206 = arith.constant dense<0.000000e+00> : vector<16x16xf32>
    %301 = tpu.matmul %286, %293, %cst_206 {dimension_numbers = #tpu.dot_dimension_numbers<[1], [1], [0], [0], [0, 0, 1, 0], [], []>} : vector<16x32xf32>, vector<16x32xf32>, vector<16x16xf32> -> vector<16x16xf32>
    "tpu.trace_stop"() : () -> ()
    %cst_207 = arith.constant 0.176776692 : f32
    %302 = vector.broadcast %cst_207 : f32 to vector<16x16xf32>
    %303 = arith.mulf %301, %302 : vector<16x16xf32>
    %cst_208 = arith.constant dense<0xFF800000> : vector<16xf32>
    %304 = vector.multi_reduction <maximumf>, %303, %cst_208 [1] : vector<16x16xf32> to vector<16xf32>
    %305 = vector.shape_cast %304 : vector<16xf32> to vector<16x1xf32>
    %306 = vector.broadcast %305 : vector<16x1xf32> to vector<16x16xf32>
    %307 = arith.subf %303, %306 : vector<16x16xf32>
    %308 = math.exp %307 : vector<16x16xf32>
    %cst_209 = arith.constant dense<0.000000e+00> : vector<16xf32>
    %309 = vector.multi_reduction <add>, %308, %cst_209 [1] : vector<16x16xf32> to vector<16xf32>
    %310 = vector.shape_cast %309 : vector<16xf32> to vector<16x1xf32>
    %311 = tpu.reciprocal %310 {approx = true} : vector<16x1xf32> -> vector<16x1xf32>
    %312 = vector.broadcast %311 : vector<16x1xf32> to vector<16x16xf32>
    %313 = arith.mulf %308, %312 : vector<16x16xf32>
    "tpu.trace_start"() <{level = 10 : i32, message = "qk,ke->qe"}> : () -> ()
    %cst_210 = arith.constant dense<0.000000e+00> : vector<16x32xf32>
    %314 = tpu.matmul %313, %300, %cst_210 {dimension_numbers = #tpu.dot_dimension_numbers<[1], [0], [0], [1], [0, 0, 1, 1], [], []>} : vector<16x16xf32>, vector<16x32xf32>, vector<16x32xf32> -> vector<16x32xf32>
    "tpu.trace_stop"() : () -> ()
    %315 = arith.truncf %314 : vector<16x32xf32> to vector<16x32xbf16>
    %c1_211 = arith.constant 1 : index
    %c0_212 = arith.constant 0 : index
    %c0_213 = arith.constant 0 : index
    %316 = vector.load %arg26[%c1_211, %c0_212, %c0_213] : memref<4x32x128xbf16, #tpu.memory_space<vmem>>, vector<1x32x128xbf16>
    %317 = vector.shape_cast %316 : vector<1x32x128xbf16> to vector<32x128xbf16>
    "tpu.trace_start"() <{level = 10 : i32, message = "se,ed->sd"}> : () -> ()
    %cst_214 = arith.constant dense<0.000000e+00> : vector<16x128xf32>
    %318 = tpu.matmul %315, %317, %cst_214 {dimension_numbers = #tpu.dot_dimension_numbers<[1], [0], [0], [1], [0, 0, 1, 1], [], []>} : vector<16x32xbf16>, vector<32x128xbf16>, vector<16x128xf32> -> vector<16x128xf32>
    "tpu.trace_stop"() : () -> ()
    %319 = arith.addf %279, %318 : vector<16x128xf32>
    %c2_215 = arith.constant 2 : index
    %c0_216 = arith.constant 0 : index
    %c0_217 = arith.constant 0 : index
    %320 = vector.load %arg20[%c2_215, %c0_216, %c0_217] : memref<4x32x128xbf16, #tpu.memory_space<vmem>>, vector<1x32x128xbf16>
    %321 = vector.shape_cast %320 : vector<1x32x128xbf16> to vector<32x128xbf16>
    "tpu.trace_start"() <{level = 10 : i32, message = "sd,ed->se"}> : () -> ()
    %cst_218 = arith.constant dense<0.000000e+00> : vector<16x32xf32>
    %322 = tpu.matmul %238, %321, %cst_218 {dimension_numbers = #tpu.dot_dimension_numbers<[1], [1], [0], [0], [0, 0, 1, 0], [], []>} : vector<16x128xbf16>, vector<32x128xbf16>, vector<16x32xf32> -> vector<16x32xf32>
    "tpu.trace_stop"() : () -> ()
    %c2_219 = arith.constant 2 : index
    %c0_220 = arith.constant 0 : index
    %c0_221 = arith.constant 0 : index
    %323 = vector.load %arg23[%c2_219, %c0_220, %c0_221] : memref<4x1x32xf32, #tpu.memory_space<vmem>>, vector<1x1x32xf32>
    %324 = vector.shape_cast %323 : vector<1x1x32xf32> to vector<1x32xf32>
    %325 = vector.broadcast %324 : vector<1x32xf32> to vector<16x32xf32>
    %326 = arith.addf %322, %325 : vector<16x32xf32>
    %c2_222 = arith.constant 2 : index
    %c0_223 = arith.constant 0 : index
    %c0_224 = arith.constant 0 : index
    %327 = vector.load %arg21[%c2_222, %c0_223, %c0_224] : memref<4x32x128xbf16, #tpu.memory_space<vmem>>, vector<1x32x128xbf16>
    %328 = vector.shape_cast %327 : vector<1x32x128xbf16> to vector<32x128xbf16>
    "tpu.trace_start"() <{level = 10 : i32, message = "sd,ed->se"}> : () -> ()
    %cst_225 = arith.constant dense<0.000000e+00> : vector<16x32xf32>
    %329 = tpu.matmul %238, %328, %cst_225 {dimension_numbers = #tpu.dot_dimension_numbers<[1], [1], [0], [0], [0, 0, 1, 0], [], []>} : vector<16x128xbf16>, vector<32x128xbf16>, vector<16x32xf32> -> vector<16x32xf32>
    "tpu.trace_stop"() : () -> ()
    %c2_226 = arith.constant 2 : index
    %c0_227 = arith.constant 0 : index
    %c0_228 = arith.constant 0 : index
    %330 = vector.load %arg24[%c2_226, %c0_227, %c0_228] : memref<4x1x32xf32, #tpu.memory_space<vmem>>, vector<1x1x32xf32>
    %331 = vector.shape_cast %330 : vector<1x1x32xf32> to vector<1x32xf32>
    %332 = vector.broadcast %331 : vector<1x32xf32> to vector<16x32xf32>
    %333 = arith.addf %329, %332 : vector<16x32xf32>
    %c2_229 = arith.constant 2 : index
    %c0_230 = arith.constant 0 : index
    %c0_231 = arith.constant 0 : index
    %334 = vector.load %arg22[%c2_229, %c0_230, %c0_231] : memref<4x32x128xbf16, #tpu.memory_space<vmem>>, vector<1x32x128xbf16>
    %335 = vector.shape_cast %334 : vector<1x32x128xbf16> to vector<32x128xbf16>
    "tpu.trace_start"() <{level = 10 : i32, message = "sd,ed->se"}> : () -> ()
    %cst_232 = arith.constant dense<0.000000e+00> : vector<16x32xf32>
    %336 = tpu.matmul %238, %335, %cst_232 {dimension_numbers = #tpu.dot_dimension_numbers<[1], [1], [0], [0], [0, 0, 1, 0], [], []>} : vector<16x128xbf16>, vector<32x128xbf16>, vector<16x32xf32> -> vector<16x32xf32>
    "tpu.trace_stop"() : () -> ()
    %c2_233 = arith.constant 2 : index
    %c0_234 = arith.constant 0 : index
    %c0_235 = arith.constant 0 : index
    %337 = vector.load %arg25[%c2_233, %c0_234, %c0_235] : memref<4x1x32xf32, #tpu.memory_space<vmem>>, vector<1x1x32xf32>
    %338 = vector.shape_cast %337 : vector<1x1x32xf32> to vector<1x32xf32>
    %339 = vector.broadcast %338 : vector<1x32xf32> to vector<16x32xf32>
    %340 = arith.addf %336, %339 : vector<16x32xf32>
    "tpu.trace_start"() <{level = 10 : i32, message = "qe,ke->qk"}> : () -> ()
    %cst_236 = arith.constant dense<0.000000e+00> : vector<16x16xf32>
    %341 = tpu.matmul %326, %333, %cst_236 {dimension_numbers = #tpu.dot_dimension_numbers<[1], [1], [0], [0], [0, 0, 1, 0], [], []>} : vector<16x32xf32>, vector<16x32xf32>, vector<16x16xf32> -> vector<16x16xf32>
    "tpu.trace_stop"() : () -> ()
    %cst_237 = arith.constant 0.176776692 : f32
    %342 = vector.broadcast %cst_237 : f32 to vector<16x16xf32>
    %343 = arith.mulf %341, %342 : vector<16x16xf32>
    %cst_238 = arith.constant dense<0xFF800000> : vector<16xf32>
    %344 = vector.multi_reduction <maximumf>, %343, %cst_238 [1] : vector<16x16xf32> to vector<16xf32>
    %345 = vector.shape_cast %344 : vector<16xf32> to vector<16x1xf32>
    %346 = vector.broadcast %345 : vector<16x1xf32> to vector<16x16xf32>
    %347 = arith.subf %343, %346 : vector<16x16xf32>
    %348 = math.exp %347 : vector<16x16xf32>
    %cst_239 = arith.constant dense<0.000000e+00> : vector<16xf32>
    %349 = vector.multi_reduction <add>, %348, %cst_239 [1] : vector<16x16xf32> to vector<16xf32>
    %350 = vector.shape_cast %349 : vector<16xf32> to vector<16x1xf32>
    %351 = tpu.reciprocal %350 {approx = true} : vector<16x1xf32> -> vector<16x1xf32>
    %352 = vector.broadcast %351 : vector<16x1xf32> to vector<16x16xf32>
    %353 = arith.mulf %348, %352 : vector<16x16xf32>
    "tpu.trace_start"() <{level = 10 : i32, message = "qk,ke->qe"}> : () -> ()
    %cst_240 = arith.constant dense<0.000000e+00> : vector<16x32xf32>
    %354 = tpu.matmul %353, %340, %cst_240 {dimension_numbers = #tpu.dot_dimension_numbers<[1], [0], [0], [1], [0, 0, 1, 1], [], []>} : vector<16x16xf32>, vector<16x32xf32>, vector<16x32xf32> -> vector<16x32xf32>
    "tpu.trace_stop"() : () -> ()
    %355 = arith.truncf %354 : vector<16x32xf32> to vector<16x32xbf16>
    %c2_241 = arith.constant 2 : index
    %c0_242 = arith.constant 0 : index
    %c0_243 = arith.constant 0 : index
    %356 = vector.load %arg26[%c2_241, %c0_242, %c0_243] : memref<4x32x128xbf16, #tpu.memory_space<vmem>>, vector<1x32x128xbf16>
    %357 = vector.shape_cast %356 : vector<1x32x128xbf16> to vector<32x128xbf16>
    "tpu.trace_start"() <{level = 10 : i32, message = "se,ed->sd"}> : () -> ()
    %cst_244 = arith.constant dense<0.000000e+00> : vector<16x128xf32>
    %358 = tpu.matmul %355, %357, %cst_244 {dimension_numbers = #tpu.dot_dimension_numbers<[1], [0], [0], [1], [0, 0, 1, 1], [], []>} : vector<16x32xbf16>, vector<32x128xbf16>, vector<16x128xf32> -> vector<16x128xf32>
    "tpu.trace_stop"() : () -> ()
    %359 = arith.addf %319, %358 : vector<16x128xf32>
    %c3_245 = arith.constant 3 : index
    %c0_246 = arith.constant 0 : index
    %c0_247 = arith.constant 0 : index
    %360 = vector.load %arg20[%c3_245, %c0_246, %c0_247] : memref<4x32x128xbf16, #tpu.memory_space<vmem>>, vector<1x32x128xbf16>
    %361 = vector.shape_cast %360 : vector<1x32x128xbf16> to vector<32x128xbf16>
    "tpu.trace_start"() <{level = 10 : i32, message = "sd,ed->se"}> : () -> ()
    %cst_248 = arith.constant dense<0.000000e+00> : vector<16x32xf32>
    %362 = tpu.matmul %238, %361, %cst_248 {dimension_numbers = #tpu.dot_dimension_numbers<[1], [1], [0], [0], [0, 0, 1, 0], [], []>} : vector<16x128xbf16>, vector<32x128xbf16>, vector<16x32xf32> -> vector<16x32xf32>
    "tpu.trace_stop"() : () -> ()
    %c3_249 = arith.constant 3 : index
    %c0_250 = arith.constant 0 : index
    %c0_251 = arith.constant 0 : index
    %363 = vector.load %arg23[%c3_249, %c0_250, %c0_251] : memref<4x1x32xf32, #tpu.memory_space<vmem>>, vector<1x1x32xf32>
    %364 = vector.shape_cast %363 : vector<1x1x32xf32> to vector<1x32xf32>
    %365 = vector.broadcast %364 : vector<1x32xf32> to vector<16x32xf32>
    %366 = arith.addf %362, %365 : vector<16x32xf32>
    %c3_252 = arith.constant 3 : index
    %c0_253 = arith.constant 0 : index
    %c0_254 = arith.constant 0 : index
    %367 = vector.load %arg21[%c3_252, %c0_253, %c0_254] : memref<4x32x128xbf16, #tpu.memory_space<vmem>>, vector<1x32x128xbf16>
    %368 = vector.shape_cast %367 : vector<1x32x128xbf16> to vector<32x128xbf16>
    "tpu.trace_start"() <{level = 10 : i32, message = "sd,ed->se"}> : () -> ()
    %cst_255 = arith.constant dense<0.000000e+00> : vector<16x32xf32>
    %369 = tpu.matmul %238, %368, %cst_255 {dimension_numbers = #tpu.dot_dimension_numbers<[1], [1], [0], [0], [0, 0, 1, 0], [], []>} : vector<16x128xbf16>, vector<32x128xbf16>, vector<16x32xf32> -> vector<16x32xf32>
    "tpu.trace_stop"() : () -> ()
    %c3_256 = arith.constant 3 : index
    %c0_257 = arith.constant 0 : index
    %c0_258 = arith.constant 0 : index
    %370 = vector.load %arg24[%c3_256, %c0_257, %c0_258] : memref<4x1x32xf32, #tpu.memory_space<vmem>>, vector<1x1x32xf32>
    %371 = vector.shape_cast %370 : vector<1x1x32xf32> to vector<1x32xf32>
    %372 = vector.broadcast %371 : vector<1x32xf32> to vector<16x32xf32>
    %373 = arith.addf %369, %372 : vector<16x32xf32>
    %c3_259 = arith.constant 3 : index
    %c0_260 = arith.constant 0 : index
    %c0_261 = arith.constant 0 : index
    %374 = vector.load %arg22[%c3_259, %c0_260, %c0_261] : memref<4x32x128xbf16, #tpu.memory_space<vmem>>, vector<1x32x128xbf16>
    %375 = vector.shape_cast %374 : vector<1x32x128xbf16> to vector<32x128xbf16>
    "tpu.trace_start"() <{level = 10 : i32, message = "sd,ed->se"}> : () -> ()
    %cst_262 = arith.constant dense<0.000000e+00> : vector<16x32xf32>
    %376 = tpu.matmul %238, %375, %cst_262 {dimension_numbers = #tpu.dot_dimension_numbers<[1], [1], [0], [0], [0, 0, 1, 0], [], []>} : vector<16x128xbf16>, vector<32x128xbf16>, vector<16x32xf32> -> vector<16x32xf32>
    "tpu.trace_stop"() : () -> ()
    %c3_263 = arith.constant 3 : index
    %c0_264 = arith.constant 0 : index
    %c0_265 = arith.constant 0 : index
    %377 = vector.load %arg25[%c3_263, %c0_264, %c0_265] : memref<4x1x32xf32, #tpu.memory_space<vmem>>, vector<1x1x32xf32>
    %378 = vector.shape_cast %377 : vector<1x1x32xf32> to vector<1x32xf32>
    %379 = vector.broadcast %378 : vector<1x32xf32> to vector<16x32xf32>
    %380 = arith.addf %376, %379 : vector<16x32xf32>
    "tpu.trace_start"() <{level = 10 : i32, message = "qe,ke->qk"}> : () -> ()
    %cst_266 = arith.constant dense<0.000000e+00> : vector<16x16xf32>
    %381 = tpu.matmul %366, %373, %cst_266 {dimension_numbers = #tpu.dot_dimension_numbers<[1], [1], [0], [0], [0, 0, 1, 0], [], []>} : vector<16x32xf32>, vector<16x32xf32>, vector<16x16xf32> -> vector<16x16xf32>
    "tpu.trace_stop"() : () -> ()
    %cst_267 = arith.constant 0.176776692 : f32
    %382 = vector.broadcast %cst_267 : f32 to vector<16x16xf32>
    %383 = arith.mulf %381, %382 : vector<16x16xf32>
    %cst_268 = arith.constant dense<0xFF800000> : vector<16xf32>
    %384 = vector.multi_reduction <maximumf>, %383, %cst_268 [1] : vector<16x16xf32> to vector<16xf32>
    %385 = vector.shape_cast %384 : vector<16xf32> to vector<16x1xf32>
    %386 = vector.broadcast %385 : vector<16x1xf32> to vector<16x16xf32>
    %387 = arith.subf %383, %386 : vector<16x16xf32>
    %388 = math.exp %387 : vector<16x16xf32>
    %cst_269 = arith.constant dense<0.000000e+00> : vector<16xf32>
    %389 = vector.multi_reduction <add>, %388, %cst_269 [1] : vector<16x16xf32> to vector<16xf32>
    %390 = vector.shape_cast %389 : vector<16xf32> to vector<16x1xf32>
    %391 = tpu.reciprocal %390 {approx = true} : vector<16x1xf32> -> vector<16x1xf32>
    %392 = vector.broadcast %391 : vector<16x1xf32> to vector<16x16xf32>
    %393 = arith.mulf %388, %392 : vector<16x16xf32>
    "tpu.trace_start"() <{level = 10 : i32, message = "qk,ke->qe"}> : () -> ()
    %cst_270 = arith.constant dense<0.000000e+00> : vector<16x32xf32>
    %394 = tpu.matmul %393, %380, %cst_270 {dimension_numbers = #tpu.dot_dimension_numbers<[1], [0], [0], [1], [0, 0, 1, 1], [], []>} : vector<16x16xf32>, vector<16x32xf32>, vector<16x32xf32> -> vector<16x32xf32>
    "tpu.trace_stop"() : () -> ()
    %395 = arith.truncf %394 : vector<16x32xf32> to vector<16x32xbf16>
    %c3_271 = arith.constant 3 : index
    %c0_272 = arith.constant 0 : index
    %c0_273 = arith.constant 0 : index
    %396 = vector.load %arg26[%c3_271, %c0_272, %c0_273] : memref<4x32x128xbf16, #tpu.memory_space<vmem>>, vector<1x32x128xbf16>
    %397 = vector.shape_cast %396 : vector<1x32x128xbf16> to vector<32x128xbf16>
    "tpu.trace_start"() <{level = 10 : i32, message = "se,ed->sd"}> : () -> ()
    %cst_274 = arith.constant dense<0.000000e+00> : vector<16x128xf32>
    %398 = tpu.matmul %395, %397, %cst_274 {dimension_numbers = #tpu.dot_dimension_numbers<[1], [0], [0], [1], [0, 0, 1, 1], [], []>} : vector<16x32xbf16>, vector<32x128xbf16>, vector<16x128xf32> -> vector<16x128xf32>
    "tpu.trace_stop"() : () -> ()
    %399 = arith.addf %359, %398 : vector<16x128xf32>
    %c0_275 = arith.constant 0 : index
    %c0_276 = arith.constant 0 : index
    %400 = vector.load %arg27[%c0_275, %c0_276] : memref<1x128xf32, #tpu.memory_space<vmem>>, vector<1x128xf32>
    %401 = vector.broadcast %400 : vector<1x128xf32> to vector<16x128xf32>
    %402 = arith.addf %399, %401 : vector<16x128xf32>
    %403 = arith.addf %237, %402 : vector<16x128xf32>
    %c0_277 = arith.constant 0 : index
    %c0_278 = arith.constant 0 : index
    %404 = vector.load %arg28[%c0_277, %c0_278] : memref<1x128xf32, #tpu.memory_space<vmem>>, vector<1x128xf32>
    %c0_279 = arith.constant 0 : index
    %c0_280 = arith.constant 0 : index
    %405 = vector.load %arg29[%c0_279, %c0_280] : memref<1x128xf32, #tpu.memory_space<vmem>>, vector<1x128xf32>
    %cst_281 = arith.constant dense<0.000000e+00> : vector<16xf32>
    %406 = vector.multi_reduction <add>, %403, %cst_281 [1] : vector<16x128xf32> to vector<16xf32>
    %407 = vector.shape_cast %406 : vector<16xf32> to vector<16x1xf32>
    %cst_282 = arith.constant 1.280000e+02 : f32
    %408 = vector.broadcast %cst_282 : f32 to vector<16x1xf32>
    %409 = arith.divf %407, %408 : vector<16x1xf32>
    %410 = vector.broadcast %409 : vector<16x1xf32> to vector<16x128xf32>
    %411 = arith.subf %403, %410 : vector<16x128xf32>
    %412 = arith.mulf %411, %411 : vector<16x128xf32>
    %cst_283 = arith.constant dense<0.000000e+00> : vector<16xf32>
    %413 = vector.multi_reduction <add>, %412, %cst_283 [1] : vector<16x128xf32> to vector<16xf32>
    %414 = vector.shape_cast %413 : vector<16xf32> to vector<16x1xf32>
    %cst_284 = arith.constant 1.280000e+02 : f32
    %415 = vector.broadcast %cst_284 : f32 to vector<16x1xf32>
    %416 = arith.divf %414, %415 : vector<16x1xf32>
    %417 = vector.broadcast %409 : vector<16x1xf32> to vector<16x128xf32>
    %418 = arith.subf %403, %417 : vector<16x128xf32>
    %cst_285 = arith.constant 9.99999974E-6 : f32
    %419 = vector.broadcast %cst_285 : f32 to vector<16x1xf32>
    %420 = arith.addf %416, %419 : vector<16x1xf32>
    %421 = math.rsqrt %420 : vector<16x1xf32>
    %422 = vector.broadcast %421 : vector<16x1xf32> to vector<16x128xf32>
    %423 = arith.mulf %418, %422 : vector<16x128xf32>
    %424 = vector.broadcast %404 : vector<1x128xf32> to vector<16x128xf32>
    %425 = arith.mulf %423, %424 : vector<16x128xf32>
    %426 = vector.broadcast %405 : vector<1x128xf32> to vector<16x128xf32>
    %427 = arith.addf %425, %426 : vector<16x128xf32>
    %428 = arith.truncf %427 : vector<16x128xf32> to vector<16x128xbf16>
    %c0_286 = arith.constant 0 : index
    %c0_287 = arith.constant 0 : index
    %429 = vector.load %arg30[%c0_286, %c0_287] : memref<2048x128xbf16, #tpu.memory_space<vmem>>, vector<2048x128xbf16>
    "tpu.trace_start"() <{level = 10 : i32, message = "sd,fd->sf"}> : () -> ()
    %cst_288 = arith.constant dense<0.000000e+00> : vector<16x2048xf32>
    %430 = tpu.matmul %428, %429, %cst_288 {dimension_numbers = #tpu.dot_dimension_numbers<[1], [1], [0], [0], [0, 0, 1, 0], [], []>} : vector<16x128xbf16>, vector<2048x128xbf16>, vector<16x2048xf32> -> vector<16x2048xf32>
    "tpu.trace_stop"() : () -> ()
    %c0_289 = arith.constant 0 : index
    %c0_290 = arith.constant 0 : index
    %431 = vector.load %arg31[%c0_289, %c0_290] : memref<1x2048xf32, #tpu.memory_space<vmem>>, vector<1x2048xf32>
    %432 = vector.broadcast %431 : vector<1x2048xf32> to vector<16x2048xf32>
    %433 = arith.addf %430, %432 : vector<16x2048xf32>
    %cst_291 = arith.constant 0.000000e+00 : f32
    %434 = vector.broadcast %cst_291 : f32 to vector<16x2048xf32>
    %435 = arith.maximumf %433, %434 : vector<16x2048xf32>
    %436 = arith.truncf %435 : vector<16x2048xf32> to vector<16x2048xbf16>
    %c0_292 = arith.constant 0 : index
    %c0_293 = arith.constant 0 : index
    %437 = vector.load %arg32[%c0_292, %c0_293] : memref<128x2048xbf16, #tpu.memory_space<vmem>>, vector<128x2048xbf16>
    "tpu.trace_start"() <{level = 10 : i32, message = "sf,df->sd"}> : () -> ()
    %cst_294 = arith.constant dense<0.000000e+00> : vector<16x128xf32>
    %438 = tpu.matmul %436, %437, %cst_294 {dimension_numbers = #tpu.dot_dimension_numbers<[1], [1], [0], [0], [0, 0, 1, 0], [], []>} : vector<16x2048xbf16>, vector<128x2048xbf16>, vector<16x128xf32> -> vector<16x128xf32>
    "tpu.trace_stop"() : () -> ()
    %c0_295 = arith.constant 0 : index
    %c0_296 = arith.constant 0 : index
    %439 = vector.load %arg33[%c0_295, %c0_296] : memref<1x128xf32, #tpu.memory_space<vmem>>, vector<1x128xf32>
    %440 = vector.broadcast %439 : vector<1x128xf32> to vector<16x128xf32>
    %441 = arith.addf %438, %440 : vector<16x128xf32>
    %442 = arith.addf %427, %441 : vector<16x128xf32>
    %c0_297 = arith.constant 0 : index
    %c0_298 = arith.constant 0 : index
    %443 = vector.load %arg34[%c0_297, %c0_298] : memref<1x128xf32, #tpu.memory_space<vmem>>, vector<1x128xf32>
    %c0_299 = arith.constant 0 : index
    %c0_300 = arith.constant 0 : index
    %444 = vector.load %arg35[%c0_299, %c0_300] : memref<1x128xf32, #tpu.memory_space<vmem>>, vector<1x128xf32>
    %cst_301 = arith.constant dense<0.000000e+00> : vector<16xf32>
    %445 = vector.multi_reduction <add>, %442, %cst_301 [1] : vector<16x128xf32> to vector<16xf32>
    %446 = vector.shape_cast %445 : vector<16xf32> to vector<16x1xf32>
    %cst_302 = arith.constant 1.280000e+02 : f32
    %447 = vector.broadcast %cst_302 : f32 to vector<16x1xf32>
    %448 = arith.divf %446, %447 : vector<16x1xf32>
    %449 = vector.broadcast %448 : vector<16x1xf32> to vector<16x128xf32>
    %450 = arith.subf %442, %449 : vector<16x128xf32>
    %451 = arith.mulf %450, %450 : vector<16x128xf32>
    %cst_303 = arith.constant dense<0.000000e+00> : vector<16xf32>
    %452 = vector.multi_reduction <add>, %451, %cst_303 [1] : vector<16x128xf32> to vector<16xf32>
    %453 = vector.shape_cast %452 : vector<16xf32> to vector<16x1xf32>
    %cst_304 = arith.constant 1.280000e+02 : f32
    %454 = vector.broadcast %cst_304 : f32 to vector<16x1xf32>
    %455 = arith.divf %453, %454 : vector<16x1xf32>
    %456 = vector.broadcast %448 : vector<16x1xf32> to vector<16x128xf32>
    %457 = arith.subf %442, %456 : vector<16x128xf32>
    %cst_305 = arith.constant 9.99999974E-6 : f32
    %458 = vector.broadcast %cst_305 : f32 to vector<16x1xf32>
    %459 = arith.addf %455, %458 : vector<16x1xf32>
    %460 = math.rsqrt %459 : vector<16x1xf32>
    %461 = vector.broadcast %460 : vector<16x1xf32> to vector<16x128xf32>
    %462 = arith.mulf %457, %461 : vector<16x128xf32>
    %463 = vector.broadcast %443 : vector<1x128xf32> to vector<16x128xf32>
    %464 = arith.mulf %462, %463 : vector<16x128xf32>
    %465 = vector.broadcast %444 : vector<1x128xf32> to vector<16x128xf32>
    %466 = arith.addf %464, %465 : vector<16x128xf32>
    %cst_306 = arith.constant dense<0.000000e+00> : vector<128xf32>
    %467 = vector.multi_reduction <add>, %466, %cst_306 [0] : vector<16x128xf32> to vector<128xf32>
    %468 = vector.shape_cast %467 : vector<128xf32> to vector<1x128xf32>
    %cst_307 = arith.constant 1.600000e+01 : f32
    %469 = vector.broadcast %cst_307 : f32 to vector<1x128xf32>
    %470 = arith.divf %468, %469 : vector<1x128xf32>
    %471 = arith.truncf %470 : vector<1x128xf32> to vector<1x128xbf16>
    %c0_308 = arith.constant 0 : index
    %c0_309 = arith.constant 0 : index
    %472 = vector.load %arg36[%c0_308, %c0_309] : memref<128x128xbf16, #tpu.memory_space<vmem>>, vector<128x128xbf16>
    "tpu.trace_start"() <{level = 10 : i32, message = "bd,cd->bc"}> : () -> ()
    %cst_310 = arith.constant dense<0.000000e+00> : vector<1x128xf32>
    %473 = tpu.matmul %471, %472, %cst_310 {dimension_numbers = #tpu.dot_dimension_numbers<[1], [1], [0], [0], [0, 0, 1, 0], [], []>} : vector<1x128xbf16>, vector<128x128xbf16>, vector<1x128xf32> -> vector<1x128xf32>
    "tpu.trace_stop"() : () -> ()
    %c0_311 = arith.constant 0 : index
    %c0_312 = arith.constant 0 : index
    %474 = vector.load %arg37[%c0_311, %c0_312] : memref<1x128xf32, #tpu.memory_space<vmem>>, vector<1x128xf32>
    %475 = arith.addf %473, %474 : vector<1x128xf32>
    %476 = vector.shape_cast %475 : vector<1x128xf32> to vector<1x1x128xf32>
    %c0_313 = arith.constant 0 : index
    %c0_314 = arith.constant 0 : index
    %c0_315 = arith.constant 0 : index
    %477 = vector.load %arg38[%c0_313, %c0_314, %c0_315] : memref<1x1x128xf32, #tpu.memory_space<vmem>>, vector<1x1x128xf32>
    tpu.vector_store %arg38[%c0_313, %c0_314, %c0_315], %476 {strides = array<i32>} : memref<1x1x128xf32, #tpu.memory_space<vmem>>, vector<1x1x128xf32>,
    return
  }
  func.func @transform_0(%arg0: i32) -> (i32, i32, i32) {
    %c0_i32 = arith.constant 0 : i32
    %c0_i32_0 = arith.constant 0 : i32
    %c0_i32_1 = arith.constant 0 : i32
    return %arg0, %c0_i32, %c0_i32_0 : i32, i32, i32
  }
  func.func @transform_1(%arg0: i32) -> (i32, i32) {
    %c0_i32 = arith.constant 0 : i32
    %c0_i32_0 = arith.constant 0 : i32
    %c0_i32_1 = arith.constant 0 : i32
    return %c0_i32, %c0_i32_0 : i32, i32
  }
  func.func @transform_2(%arg0: i32) -> (i32, i32) {
    %c0_i32 = arith.constant 0 : i32
    %c0_i32_0 = arith.constant 0 : i32
    %c0_i32_1 = arith.constant 0 : i32
    return %c0_i32, %c0_i32_0 : i32, i32
  }
  func.func @transform_3(%arg0: i32) -> (i32, i32, i32) {
    %c0_i32 = arith.constant 0 : i32
    %c0_i32_0 = arith.constant 0 : i32
    %c0_i32_1 = arith.constant 0 : i32
    %c0_i32_2 = arith.constant 0 : i32
    return %c0_i32, %c0_i32_0, %c0_i32_1 : i32, i32, i32
  }
  func.func @transform_4(%arg0: i32) -> (i32, i32, i32) {
    %c0_i32 = arith.constant 0 : i32
    %c0_i32_0 = arith.constant 0 : i32
    %c0_i32_1 = arith.constant 0 : i32
    %c0_i32_2 = arith.constant 0 : i32
    return %c0_i32, %c0_i32_0, %c0_i32_1 : i32, i32, i32
  }
  func.func @transform_5(%arg0: i32) -> (i32, i32, i32) {
    %c0_i32 = arith.constant 0 : i32
    %c0_i32_0 = arith.constant 0 : i32
    %c0_i32_1 = arith.constant 0 : i32
    %c0_i32_2 = arith.constant 0 : i32
    return %c0_i32, %c0_i32_0, %c0_i32_1 : i32, i32, i32
  }
  func.func @transform_6(%arg0: i32) -> (i32, i32, i32) {
    %c0_i32 = arith.constant 0 : i32
    %c0_i32_0 = arith.constant 0 : i32
    %c0_i32_1 = arith.constant 0 : i32
    %c0_i32_2 = arith.constant 0 : i32
    return %c0_i32, %c0_i32_0, %c0_i32_1 : i32, i32, i32
  }
  func.func @transform_7(%arg0: i32) -> (i32, i32, i32) {
    %c0_i32 = arith.constant 0 : i32
    %c0_i32_0 = arith.constant 0 : i32
    %c0_i32_1 = arith.constant 0 : i32
    %c0_i32_2 = arith.constant 0 : i32
    return %c0_i32, %c0_i32_0, %c0_i32_1 : i32, i32, i32
  }
  func.func @transform_8(%arg0: i32) -> (i32, i32, i32) {
    %c0_i32 = arith.constant 0 : i32
    %c0_i32_0 = arith.constant 0 : i32
    %c0_i32_1 = arith.constant 0 : i32
    %c0_i32_2 = arith.constant 0 : i32
    return %c0_i32, %c0_i32_0, %c0_i32_1 : i32, i32, i32
  }
  func.func @transform_9(%arg0: i32) -> (i32, i32, i32) {
    %c0_i32 = arith.constant 0 : i32
    %c0_i32_0 = arith.constant 0 : i32
    %c0_i32_1 = arith.constant 0 : i32
    %c0_i32_2 = arith.constant 0 : i32
    return %c0_i32, %c0_i32_0, %c0_i32_1 : i32, i32, i32
  }
  func.func @transform_10(%arg0: i32) -> (i32, i32) {
    %c0_i32 = arith.constant 0 : i32
    %c0_i32_0 = arith.constant 0 : i32
    %c0_i32_1 = arith.constant 0 : i32
    return %c0_i32, %c0_i32_0 : i32, i32
  }
  func.func @transform_11(%arg0: i32) -> (i32, i32) {
    %c0_i32 = arith.constant 0 : i32
    %c0_i32_0 = arith.constant 0 : i32
    %c0_i32_1 = arith.constant 0 : i32
    return %c0_i32, %c0_i32_0 : i32, i32
  }
  func.func @transform_12(%arg0: i32) -> (i32, i32) {
    %c0_i32 = arith.constant 0 : i32
    %c0_i32_0 = arith.constant 0 : i32
    %c0_i32_1 = arith.constant 0 : i32
    return %c0_i32, %c0_i32_0 : i32, i32
  }
  func.func @transform_13(%arg0: i32) -> (i32, i32) {
    %c0_i32 = arith.constant 0 : i32
    %c0_i32_0 = arith.constant 0 : i32
    %c0_i32_1 = arith.constant 0 : i32
    return %c0_i32, %c0_i32_0 : i32, i32
  }
  func.func @transform_14(%arg0: i32) -> (i32, i32) {
    %c0_i32 = arith.constant 0 : i32
    %c0_i32_0 = arith.constant 0 : i32
    %c0_i32_1 = arith.constant 0 : i32
    return %c0_i32, %c0_i32_0 : i32, i32
  }
  func.func @transform_15(%arg0: i32) -> (i32, i32) {
    %c0_i32 = arith.constant 0 : i32
    %c0_i32_0 = arith.constant 0 : i32
    %c0_i32_1 = arith.constant 0 : i32
    return %c0_i32, %c0_i32_0 : i32, i32
  }
  func.func @transform_16(%arg0: i32) -> (i32, i32) {
    %c0_i32 = arith.constant 0 : i32
    %c0_i32_0 = arith.constant 0 : i32
    %c0_i32_1 = arith.constant 0 : i32
    return %c0_i32, %c0_i32_0 : i32, i32
  }
  func.func @transform_17(%arg0: i32) -> (i32, i32) {
    %c0_i32 = arith.constant 0 : i32
    %c0_i32_0 = arith.constant 0 : i32
    %c0_i32_1 = arith.constant 0 : i32
    return %c0_i32, %c0_i32_0 : i32, i32
  }
  func.func @transform_18(%arg0: i32) -> (i32, i32) {
    %c0_i32 = arith.constant 0 : i32
    %c0_i32_0 = arith.constant 0 : i32
    %c0_i32_1 = arith.constant 0 : i32
    return %c0_i32, %c0_i32_0 : i32, i32
  }
  func.func @transform_19(%arg0: i32) -> (i32, i32, i32) {
    %c0_i32 = arith.constant 0 : i32
    %c0_i32_0 = arith.constant 0 : i32
    %c0_i32_1 = arith.constant 0 : i32
    %c0_i32_2 = arith.constant 0 : i32
    return %c0_i32, %c0_i32_0, %c0_i32_1 : i32, i32, i32
  }
  func.func @transform_20(%arg0: i32) -> (i32, i32, i32) {
    %c0_i32 = arith.constant 0 : i32
    %c0_i32_0 = arith.constant 0 : i32
    %c0_i32_1 = arith.constant 0 : i32
    %c0_i32_2 = arith.constant 0 : i32
    return %c0_i32, %c0_i32_0, %c0_i32_1 : i32, i32, i32
  }
  func.func @transform_21(%arg0: i32) -> (i32, i32, i32) {
    %c0_i32 = arith.constant 0 : i32
    %c0_i32_0 = arith.constant 0 : i32
    %c0_i32_1 = arith.constant 0 : i32
    %c0_i32_2 = arith.constant 0 : i32
    return %c0_i32, %c0_i32_0, %c0_i32_1 : i32, i32, i32
  }
  func.func @transform_22(%arg0: i32) -> (i32, i32, i32) {
    %c0_i32 = arith.constant 0 : i32
    %c0_i32_0 = arith.constant 0 : i32
    %c0_i32_1 = arith.constant 0 : i32
    %c0_i32_2 = arith.constant 0 : i32
    return %c0_i32, %c0_i32_0, %c0_i32_1 : i32, i32, i32
  }
  func.func @transform_23(%arg0: i32) -> (i32, i32, i32) {
    %c0_i32 = arith.constant 0 : i32
    %c0_i32_0 = arith.constant 0 : i32
    %c0_i32_1 = arith.constant 0 : i32
    %c0_i32_2 = arith.constant 0 : i32
    return %c0_i32, %c0_i32_0, %c0_i32_1 : i32, i32, i32
  }
  func.func @transform_24(%arg0: i32) -> (i32, i32, i32) {
    %c0_i32 = arith.constant 0 : i32
    %c0_i32_0 = arith.constant 0 : i32
    %c0_i32_1 = arith.constant 0 : i32
    %c0_i32_2 = arith.constant 0 : i32
    return %c0_i32, %c0_i32_0, %c0_i32_1 : i32, i32, i32
  }
  func.func @transform_25(%arg0: i32) -> (i32, i32, i32) {
    %c0_i32 = arith.constant 0 : i32
    %c0_i32_0 = arith.constant 0 : i32
    %c0_i32_1 = arith.constant 0 : i32
    %c0_i32_2 = arith.constant 0 : i32
    return %c0_i32, %c0_i32_0, %c0_i32_1 : i32, i32, i32
  }
  func.func @transform_26(%arg0: i32) -> (i32, i32) {
    %c0_i32 = arith.constant 0 : i32
    %c0_i32_0 = arith.constant 0 : i32
    %c0_i32_1 = arith.constant 0 : i32
    return %c0_i32, %c0_i32_0 : i32, i32
  }
  func.func @transform_27(%arg0: i32) -> (i32, i32) {
    %c0_i32 = arith.constant 0 : i32
    %c0_i32_0 = arith.constant 0 : i32
    %c0_i32_1 = arith.constant 0 : i32
    return %c0_i32, %c0_i32_0 : i32, i32
  }
  func.func @transform_28(%arg0: i32) -> (i32, i32) {
    %c0_i32 = arith.constant 0 : i32
    %c0_i32_0 = arith.constant 0 : i32
    %c0_i32_1 = arith.constant 0 : i32
    return %c0_i32, %c0_i32_0 : i32, i32
  }
  func.func @transform_29(%arg0: i32) -> (i32, i32) {
    %c0_i32 = arith.constant 0 : i32
    %c0_i32_0 = arith.constant 0 : i32
    %c0_i32_1 = arith.constant 0 : i32
    return %c0_i32, %c0_i32_0 : i32, i32
  }
  func.func @transform_30(%arg0: i32) -> (i32, i32) {
    %c0_i32 = arith.constant 0 : i32
    %c0_i32_0 = arith.constant 0 : i32
    %c0_i32_1 = arith.constant 0 : i32
    return %c0_i32, %c0_i32_0 : i32, i32
  }
  func.func @transform_31(%arg0: i32) -> (i32, i32) {
    %c0_i32 = arith.constant 0 : i32
    %c0_i32_0 = arith.constant 0 : i32
    %c0_i32_1 = arith.constant 0 : i32
    return %c0_i32, %c0_i32_0 : i32, i32
  }
  func.func @transform_32(%arg0: i32) -> (i32, i32) {
    %c0_i32 = arith.constant 0 : i32
    %c0_i32_0 = arith.constant 0 : i32
    %c0_i32_1 = arith.constant 0 : i32
    return %c0_i32, %c0_i32_0 : i32, i32
  }
  func.func @transform_33(%arg0: i32) -> (i32, i32) {
    %c0_i32 = arith.constant 0 : i32
    %c0_i32_0 = arith.constant 0 : i32
    %c0_i32_1 = arith.constant 0 : i32
    return %c0_i32, %c0_i32_0 : i32, i32
  }
  func.func @transform_34(%arg0: i32) -> (i32, i32) {
    %c0_i32 = arith.constant 0 : i32
    %c0_i32_0 = arith.constant 0 : i32
    %c0_i32_1 = arith.constant 0 : i32
    return %c0_i32, %c0_i32_0 : i32, i32
  }
  func.func @transform_35(%arg0: i32) -> (i32, i32) {
    %c0_i32 = arith.constant 0 : i32
    %c0_i32_0 = arith.constant 0 : i32
    %c0_i32_1 = arith.constant 0 : i32
    return %c0_i32, %c0_i32_0 : i32, i32
  }
  func.func @transform_36(%arg0: i32) -> (i32, i32) {
    %c0_i32 = arith.constant 0 : i32
    %c0_i32_0 = arith.constant 0 : i32
    %c0_i32_1 = arith.constant 0 : i32
    return %c0_i32, %c0_i32_0 : i32, i32
  }
  func.func @transform_37(%arg0: i32) -> (i32, i32, i32) {
    %c0_i32 = arith.constant 0 : i32
    %c0_i32_0 = arith.constant 0 : i32
    %c0_i32_1 = arith.constant 0 : i32
    return %arg0, %c0_i32, %c0_i32_0 : i32, i32, i32
  }
}

</mosaic_0001>

<bundles_post_ra>
// kernel: tpu_custom_call.1
= control target key start
LH: loop header
LB: loop body
LE: loop exit
PB: predicated region body
PF: predicated region fallthrough
CT: control target
= control target key end

     0   :  { %s14286_s6 = smov 1   ;;  %s14287_s10 = smov 2   ;;  %s15671_s0 = inlined_call_operand.smem [shape: u32[38], index: -1, kind: input, shape index: {}] }
   0x1   :  { %s14366_s5 = sld [smem:[%s15671_s0]]   ;;  %s14288_s14 = smov 3  }
   0x2   :  { %s14371_s9 = sld [smem:[%s15671_s0 + %s14286_s6]]   ;;  %s14289_s18 = smov 4  }
   0x3   :  { %s14376_s13 = sld [smem:[%s15671_s0 + %s14287_s10]]   ;;  %s14290_s22 = smov 5  }
   0x4   :  { %s14381_s17 = sld [smem:[%s15671_s0 + %s14288_s14]]   ;;  %s14291_s26 = smov 6  }
   0x5   :  { %s14386_s21 = sld [smem:[%s15671_s0 + %s14289_s18]]   ;;  %s14292_s30 = smov 7  }
   0x6   :  { %s14391_s25 = sld [smem:[%s15671_s0 + %s14290_s22]]   ;;  %s14293_s4 = smov 8  }
   0x7   :  { %15718 = sst [smem:[#allocation59_spill]] %s14366_s5  ;;  %s14294_s10 = smov 9  }
   0x8   :  { %15719 = sst [smem:[#allocation60_spill]] %s14371_s9  ;;  %s14295_s15 = smov 10  }
   0x9   :  { %15720 = sst [smem:[#allocation61_spill]] %s14376_s13  ;;  %s14296_s20 = smov 11  }
   0xa   :  { %15721 = sst [smem:[#allocation62_spill]] %s14381_s17  ;;  %s14298_s1 = smov 13  }
   0xb   :  { %15722 = sst [smem:[#allocation63_spill]] %s14386_s21  ;;  %s14299_s7 = smov 14  }
   0xc   :  { %15723 = sst [smem:[#allocation64_spill]] %s14391_s25  ;;  %s14301_s22 = smov 16  }
   0xd   :  { %s14396_s29 = sld [smem:[%s15671_s0 + %s14291_s26]]   ;;  %s14297_s26 = smov 12  }
   0xe   :  { %s14401_s3 = sld [smem:[%s15671_s0 + %s14292_s30]]   ;;  %s14302_s28 = smov 17  }
   0xf   :  { %s14406_s8 = sld [smem:[%s15671_s0 + %s14293_s4]]  }
  0x10   :  { %s14411_s14 = sld [smem:[%s15671_s0 + %s14294_s10]]  }
  0x11   :  { %s14416_s19 = sld [smem:[%s15671_s0 + %s14295_s15]]   ;;  %s14300_s15 = smov 15  }
  0x12   :  { %s14421_s24 = sld [smem:[%s15671_s0 + %s14296_s20]]  }
  0x13   :  { %s14426_s30 = sld [smem:[%s15671_s0 + %s14297_s26]]  }
  0x14   :  { %15724 = sst [smem:[#allocation65_spill]] %s14401_s3 }
  0x15   :  { %15725 = sst [smem:[#allocation66_spill]] %s14406_s8 }
  0x16   :  { %15726 = sst [smem:[#allocation67_spill]] %s14411_s14 }
  0x17   :  { %15727 = sst [smem:[#allocation68_spill]] %s14416_s19 }
  0x18   :  { %s14431_s6 = sld [smem:[%s15671_s0 + %s14298_s1]]  }
  0x19   :  { %15728 = sst [smem:[#allocation69_spill]] %s14426_s30 }
  0x1a   :  { %s14436_s12 = sld [smem:[%s15671_s0 + %s14299_s7]]   ;;  %s14303_s7 = smov 18  }
  0x1b   :  { %s14441_s20 = sld [smem:[%s15671_s0 + %s14300_s15]]   ;;  %s14304_s15 = smov 19  }
  0x1c   :  { %s14446_s27 = sld [smem:[%s15671_s0 + %s14301_s22]]   ;;  %s14305_s22 = smov 20  }
  0x1d   :  { %s14451_s4 = sld [smem:[%s15671_s0 + %s14302_s28]]   ;;  %s14306_s28 = smov 21  }
  0x1e   :  { %15729 = sst [smem:[#allocation70_spill]] %s14431_s6 }
  0x1f   :  { %s14456_s14 = sld [smem:[%s15671_s0 + %s14303_s7]]   ;;  %s14307_s7 = smov 22  }
  0x20   :  { %15730 = sst [smem:[#allocation71_spill]] %s14436_s12 }
  0x21   :  { %s14461_s5 = sld [smem:[%s15671_s0 + %s14304_s15]]   ;;  %s14308_s15 = smov 23  }
  0x22   :  { %15731 = sst [smem:[#allocation72_spill]] %s14446_s27 }
  0x23   :  { %15732 = sst [smem:[#allocation73_spill]] %s14451_s4 }
  0x24   :  { %s14466_s27 = sld [smem:[%s15671_s0 + %s14305_s22]]   ;;  %s14309_s22 = smov 24  }
  0x25   :  { %15733 = sst [smem:[#allocation74_spill]] %s14456_s14 }
  0x26   :  { %s14471_s12 = sld [smem:[%s15671_s0 + %s14306_s28]]   ;;  %s14310_s28 = smov 25  }
  0x27   :  { %15734 = sst [smem:[#allocation75_spill]] %s14461_s5 }
  0x28   :  { %s14476_s14 = sld [smem:[%s15671_s0 + %s14307_s7]]   ;;  %s14311_s7 = smov 26  }
  0x29   :  { %s14481_s30 = sld [smem:[%s15671_s0 + %s14308_s15]]   ;;  %s14312_s15 = smov 27  }
  0x2a   :  { %15735 = sst [smem:[#allocation76_spill]] %s14466_s27 }
  0x2b   :  { %s14486_s27 = sld [smem:[%s15671_s0 + %s14309_s22]]   ;;  %s14313_s22 = smov 28  }
  0x2c   :  { %15736 = sst [smem:[#allocation77_spill]] %s14471_s12 }
  0x2d   :  { %s14491_s19 = sld [smem:[%s15671_s0 + %s14310_s28]]   ;;  %s14314_s28 = smov 29  }
  0x2e   :  { %15737 = sst [smem:[#allocation78_spill]] %s14476_s14 }
  0x2f   :  { %s14496_s14 = sld [smem:[%s15671_s0 + %s14311_s7]]   ;;  %s14315_s7 = smov 30  }
  0x30   :  { %s14501_s3 = sld [smem:[%s15671_s0 + %s14312_s15]]   ;;  %s14316_s15 = smov 31  }
  0x31   :  { %15738 = sst [smem:[#allocation79_spill]] %s14486_s27 }
  0x32   :  { %s14506_s27 = sld [smem:[%s15671_s0 + %s14313_s22]]   ;;  %s14317_s22 = smov 32  }
  0x33   :  { %15739 = sst [smem:[#allocation80_spill]] %s14491_s19 }
  0x34   :  { %s14511_s19 = sld [smem:[%s15671_s0 + %s14314_s28]]   ;;  %s14318_s28 = smov 33  }
  0x35   :  { %15740 = sst [smem:[#allocation81_spill]] %s14496_s14 }
  0x36   :  { %15741 = sst [smem:[#allocation82_spill]] %s14501_s3 }
  0x37   :  { %s14516_s14 = sld [smem:[%s15671_s0 + %s14315_s7]]   ;;  %s14319_s7 = smov 34  }
  0x38   :  { %15742 = sst [smem:[#allocation83_spill]] %s14506_s27 }
  0x39   :  { %s14521_s3 = sld [smem:[%s15671_s0 + %s14316_s15]]   ;;  %s14320_s15 = smov 35  }
  0x3a   :  { %s14526_s27 = sld [smem:[%s15671_s0 + %s14317_s22]]   ;;  %s14321_s22 = smov 36  }
  0x3b   :  { %s14531_s25 = sld [smem:[%s15671_s0 + %s14318_s28]]   ;;  %s14322_s28 = smov 37  }
  0x3d   :  { %15743 = sst [smem:[#allocation84_spill]] %s14516_s14 }
  0x3e   :  { %s14536_s14 = sld [smem:[%s15671_s0 + %s14319_s7]]  }
  0x3f   :  { %15744 = sst [smem:[#allocation85_spill]] %s14521_s3 }
  0x40   :  { %15745 = sst [smem:[#allocation86_spill]] %s14526_s27 }
  0x41   :  { %15746 = sst [smem:[#allocation87_spill]] %s14531_s25 }
  0x42   :  { %s14541_s3 = sld [smem:[%s15671_s0 + %s14320_s15]]  }
  0x43   :  { %s14546_s27 = sld [smem:[%s15671_s0 + %s14321_s22]]  }
  0x44   :  { %s14551_s25 = sld [smem:[%s15671_s0 + %s14322_s28]]  }
  0x45   :  { %80 = vsyncpa [#allocation3], 0 }
  0x46   :  { %81 = vsyncpa [#allocation6], 0 }
  0x47   :  { %82 = vsyncpa [#allocation9], 0 }
  0x48   :  { %83 = vsyncpa [#allocation12], 0 }
  0x49   :  { %84 = vsyncpa [#allocation15], 0 }
  0x4a   :  { %85 = vsyncpa [#allocation18], 0 }
  0x4b   :  { %86 = vsyncpa [#allocation21], 0 }
  0x4c   :  { %87 = vsyncpa [#allocation24], 0 }
  0x4d   :  { %88 = vsyncpa [#allocation27], 0 }
  0x4e   :  { %89 = vsyncpa [#allocation30], 0 }
  0x4f   :  { %90 = vsyncpa [#allocation33], 0 }
  0x50   :  { %91 = vsyncpa [#allocation36], 0 }
  0x51   :  { %92 = vsyncpa [#allocation39], 0 }
  0x52   :  { %93 = vsyncpa [#allocation42], 0 }
  0x53   :  { %94 = vsyncpa [#allocation4], 0 }
  0x54   :  { %96 = vsyncpa [#allocation4 + $0x1], 0  ;;  %s14553_s7 = smov 0   ;;  %s14555_s0 = smov 0  }
  0x55   :  { %s14557_s10 = smov 0   ;;  %s14559_s11 = smov 0  }
  0x56 LB: > { %s15747_s17 = sld [smem:[#allocation62_spill]]  ;;  %s15748_s12 = sld [smem:[#allocation77_spill]]  ;;  %s14272_s7 = sphi %s14553_s7, %s15832_s7   ;;  %s14284_s11 = sphi %s14559_s11, %s15829_s11   ;;  %s14280_s10 = sphi %s14557_s10, %s15831_s10   ;;  %s14276_s0 = sphi %s14555_s0, %s15833_s0  }
  0x57   : > { %s15749_s9 = sld [smem:[#allocation60_spill]]  ;;  %s15750_s8 = sld [smem:[#allocation66_spill]] }
  0x58   : > { %s15751_s5 = sld [smem:[#allocation75_spill]]  ;;  %s15752_s4 = sld [smem:[#allocation73_spill]] }
  0x59   : > { %s15753_s6 = sld [smem:[#allocation70_spill]]  ;;  %s15754_s21 = sld [smem:[#allocation63_spill]] }
  0x5a   : > { %s15755_s13 = sld [smem:[#allocation61_spill]]  ;;  %15756 = sst [smem:[#allocation88_spill]] %s14272_s7 }
  0x5b   : > { %15757 = sst [smem:[#allocation89_spill]] %s14280_s10  ;;  %s14574_s15 = sadd.s32 4294967295, %s14284_s11  }
  0x5c   : > { %15758 = sst [smem:[#allocation90_spill]] %s14284_s11  ;;  %s10995_s16 = sadd.s32 4294967294, %s14284_s11  }
  0x5d   : > { %s14578_s18 = sadd.s32 1, %s14284_s11   ;;  %s891_s22 = sadd.s32 1, %s14280_s10 }
  0x5e   : > { %15759 = sst [smem:[#allocation91_spill]] %s14578_s18  ;;  %s888_s23 = ssub.s32 %s14284_s11, %s14578_s18 }
  0x5f   : > { %p901_p0 = scmp.ne.s32.totalorder %s14280_s10, %s14276_s0  ;;  %p889_p1 = scmp.eq.s32.totalorder %s888_s23, 0 }
  0x60   : > { %p902_p2 = scmp.eq.s32.totalorder %s14574_s15, 1  ;;  %p907_p3 = scmp.ne.s32.totalorder %s14276_s0, %s14272_s7 }
  0x61   : > { %p908_p4 = scmp.eq.s32.totalorder %s10995_s16, 1  ;;  %p10996_p7 = scmp.ge.s32.totalorder %s14284_s11, 1 }
  0x62   : > { %s14589_s26 = scalar_select %p889_p1, %s14280_s10, %s891_s22  }
  0x63   : > { %p14591_p5 = por %p902_p2, %p901_p0  ;;  %p14595_p6 = por %p908_p4, %p907_p3 }
  0x64   : > { %15760 = sst [smem:[#allocation92_spill]] %s14589_s26  ;;  %p915_p8 = scmp.lt.s32.totalorder %s14284_s11, 3 }
  0x65   : > { %s15761_s28 = scalar_select %p14591_p5, 1, 0 }
  0x66   : > { %s15762_s1 = scalar_select %p14595_p6, 1, 0 }
  0x67   : > { %p15691_p9 = scmp.eq.s32.totalorder %s14574_s15, 0  ;;  %p14602_p10 = pnand %p10996_p7, %p915_p8 }
  0x68   : > { %15763 = sst [smem:[#allocation93_spill]] %s15762_s1  ;;  %s14323_s16 = smov [#allocation5]  }
  0x69   : > { %s15764_s2 = scalar_select %p14602_p10, 1, 0 }
  0x6a   : > { %s939_s22 = sshll.u32 %s14323_s16, 4  ;;  %p12790_p11 = pneg %p14602_p10  ;;  %s940_s22 = int_to_ptr.vmem [resolvable:$true] %s939_s22 }
  0x6b   : > { %s14324_s26 = smov [#allocation8]   ;;  %s14325_s18 = smov [#allocation11]  }
  0x6c   : > { %p14610_p12 = pnand %p15691_p9, %p12790_p11  ;;  %s962_s10 = sshll.u32 %s14324_s26, 4  ;;  %s14614_s10 = int_to_ptr.vmem [resolvable:$true] %s962_s10 }
  0x6d   : > { %s14616_s1 = sshll.u32 %s14325_s18, 4  ;;  %s13438_s7 = scalar_lea.hbm %s15755_s13, 16  ;;  %s989_s1 = int_to_ptr.vmem [resolvable:$true] %s14616_s1 }
  0x6e   : > { %p13439_p13 = scmp.ne.s32.totalorder %s15755_s13, %s13438_s7  ;;  %p14622_p0 = pneg %p14610_p12 }
  0x6f   : > { %p13445_p3 = scmp.lt.u32.totalorder %s13438_s7, %s15755_s13 }
  0x70   : > { %p13441_p1 = pnand %p14622_p0, %p13439_p13 }
  0x72   : > { %p13442_p2 = pneg %p13441_p1 }
  0x74   : > { %p13447_p4 = pnand %p13445_p3, %p13442_p2 }
  0x76   : > { %13450 = shalt.err (!%p13447_p4)
}
  0x77   : > { %s13451_s26 = scalar_lea.vmem %s940_s22, 16  ;;  %s13458_s18 = scalar_lea.vmem %s940_s22, 32 }
  0x78   : > { %p13452_p7 = scmp.ne.s32.totalorder %s940_s22, %s13451_s26  ;;  %p13459_p9 = scmp.lt.s32.totalorder %s940_s22, %s940_s22 }
  0x79   : > { %p13460_p6 = scmp.lt.s32.totalorder %s13458_s18, %s13451_s26 }
  0x7a   : > { %p13454_p8 = pnand %p13452_p7, %p14622_p0 }
  0x7b   : > { %p13461_p5 = por %p13460_p6, %p13459_p9 }
  0x7c   : > { %p13455_p11 = pneg %p13454_p8 }
  0x7e   : > { %p13462_p10 = pnand %p13461_p5, %p13455_p11 }
  0x80   : > { %13465 = shalt.err (!%p13462_p10)
}
  0x81   : > { %12796 = dma.hbm_to_vmem [thread:$0]  (!%p14610_p12), %s15755_s13, 16, %s940_s22, [#allocation6]  }
  0x82   : > { %s13466_s7 = scalar_lea.hbm %s15754_s21, 1024 }
  0x83   : > { %p13467_p13 = scmp.ne.s32.totalorder %s15754_s21, %s13466_s7  ;;  %p13473_p3 = scmp.lt.u32.totalorder %s13466_s7, %s15754_s21 }
  0x85   : > { %p13469_p1 = pnand %p13467_p13, %p14622_p0 }
  0x87   : > { %p13470_p2 = pneg %p13469_p1 }
  0x89   : > { %p13475_p4 = pnand %p13473_p3, %p13470_p2 }
  0x8b   : > { %13478 = shalt.err (!%p13475_p4)
}
  0x8c   : > { %s13479_s26 = scalar_lea.vmem %s14614_s10, 1024  ;;  %p13487_p10 = scmp.lt.s32.totalorder %s14614_s10, %s14614_s10 }
  0x8d   : > { %p13480_p5 = scmp.ne.s32.totalorder %s14614_s10, %s13479_s26  ;;  %p13488_p7 = scmp.lt.s32.totalorder %s13479_s26, %s13479_s26 }
  0x8f   : > { %p13482_p6 = pnand %p13480_p5, %p14622_p0  ;;  %p13489_p8 = por %p13488_p7, %p13487_p10 }
  0x91   : > { %p13483_p9 = pneg %p13482_p6 }
  0x93   : > { %p13490_p11 = pnand %p13489_p8, %p13483_p9 }
  0x95   : > { %13493 = shalt.err (!%p13490_p11)
}
  0x96   : > { %s15694_s22 = smov 64   ;;  %s15696_s18 = smov 4  }
  0x97   : > { %12802 = dma.hbm_to_vmem [thread:$0]  (!%p14610_p12), %s15754_s21, 1024, %s14614_s10, [#allocation9], %s15694_s22, %s15694_s22, %s15696_s18  }
  0x98   : > { %s13494_s7 = scalar_lea.hbm %s14396_s29, 64 }
  0x99   : > { %p13495_p13 = scmp.ne.s32.totalorder %s14396_s29, %s13494_s7  ;;  %p13501_p3 = scmp.lt.u32.totalorder %s13494_s7, %s14396_s29 }
  0x9b   : > { %p13497_p1 = pnand %p13495_p13, %p14622_p0 }
  0x9d   : > { %p13498_p2 = pneg %p13497_p1 }
  0x9f   : > { %p13503_p4 = pnand %p13501_p3, %p13498_p2 }
  0xa1   : > { %13506 = shalt.err (!%p13503_p4)
}
  0xa2   : > { %s13507_s26 = scalar_lea.vmem %s989_s1, 64  ;;  %p13515_p10 = scmp.lt.s32.totalorder %s989_s1, %s989_s1 }
  0xa3   : > { %p13508_p5 = scmp.ne.s32.totalorder %s989_s1, %s13507_s26  ;;  %p13516_p7 = scmp.lt.s32.totalorder %s13507_s26, %s13507_s26 }
  0xa5   : > { %p13510_p6 = pnand %p13508_p5, %p14622_p0  ;;  %p13517_p8 = por %p13516_p7, %p13515_p10 }
  0xa7   : > { %p13511_p9 = pneg %p13510_p6 }
  0xa9   : > { %p13518_p11 = pnand %p13517_p8, %p13511_p9 }
  0xab   : > { %13521 = shalt.err (!%p13518_p11)
}
  0xac   : > { %s15701_s10 = smov 16   ;;  %s15703_s7 = smov 1  }
  0xad   : > { %12808 = dma.hbm_to_vmem [thread:$0]  (!%p14610_p12), %s14396_s29, 64, %s989_s1, [#allocation12], %s15701_s10, %s15701_s10, %s15703_s7  }
  0xae   : > { %s14330_s22 = smov [#allocation14]   ;;  %s14331_s26 = smov [#allocation17]  }
  0xaf   : > { %s1014_s18 = sshll.u32 %s14330_s22, 4  ;;  %s1042_s13 = sshll.u32 %s14331_s26, 4  ;;  %s1015_s18 = int_to_ptr.vmem [resolvable:$true] %s1014_s18  ;;  %s1043_s13 = int_to_ptr.vmem [resolvable:$true] %s1042_s13 }
  0xb0   : > { %s13522_s21 = scalar_lea.hbm %s15750_s8, 64 }
  0xb1   : > { %p13523_p13 = scmp.ne.s32.totalorder %s15750_s8, %s13522_s21  ;;  %p13529_p3 = scmp.lt.u32.totalorder %s13522_s21, %s15750_s8 }
  0xb3   : > { %p13525_p1 = pnand %p13523_p13, %p14622_p0 }
  0xb5   : > { %p13526_p2 = pneg %p13525_p1 }
  0xb7   : > { %p13531_p4 = pnand %p13529_p3, %p13526_p2 }
  0xb9   : > { %13534 = shalt.err (!%p13531_p4)
}
  0xba   : > { %s13535_s11 = scalar_lea.vmem %s1015_s18, 64  ;;  %p13543_p10 = scmp.lt.s32.totalorder %s1015_s18, %s1015_s18 }
  0xbb   : > { %p13536_p5 = scmp.ne.s32.totalorder %s1015_s18, %s13535_s11  ;;  %p13544_p7 = scmp.lt.s32.totalorder %s13535_s11, %s13535_s11 }
  0xbd   : > { %p13538_p6 = pnand %p13536_p5, %p14622_p0  ;;  %p13545_p8 = por %p13544_p7, %p13543_p10 }
  0xbf   : > { %p13539_p9 = pneg %p13538_p6 }
  0xc1   : > { %p13546_p11 = pnand %p13545_p8, %p13539_p9 }
  0xc3   : > { %13549 = shalt.err (!%p13546_p11)
}
  0xc4   : > { %12814 = dma.hbm_to_vmem [thread:$0]  (!%p14610_p12), %s15750_s8, 64, %s1015_s18, [#allocation15], %s15701_s10, %s15701_s10, %s15703_s7  }
  0xc5   : > { %s13550_s21 = scalar_lea.hbm %s14421_s24, 16 }
  0xc6   : > { %p13551_p13 = scmp.ne.s32.totalorder %s14421_s24, %s13550_s21  ;;  %p13557_p3 = scmp.lt.u32.totalorder %s13550_s21, %s14421_s24 }
  0xc8   : > { %p13553_p1 = pnand %p13551_p13, %p14622_p0 }
  0xca   : > { %p13554_p2 = pneg %p13553_p1 }
  0xcc   : > { %p13559_p4 = pnand %p13557_p3, %p13554_p2 }
  0xce   : > { %13562 = shalt.err (!%p13559_p4)
}
  0xcf   : > { %s13563_s11 = scalar_lea.vmem %s1043_s13, 16  ;;  %s13570_s1 = scalar_lea.vmem %s1043_s13, 32 }
  0xd0   : > { %p13564_p5 = scmp.ne.s32.totalorder %s1043_s13, %s13563_s11  ;;  %p13571_p10 = scmp.lt.s32.totalorder %s1043_s13, %s1043_s13 }
  0xd1   : > { %p13572_p7 = scmp.lt.s32.totalorder %s13570_s1, %s13563_s11 }
  0xd2   : > { %p13566_p6 = pnand %p13564_p5, %p14622_p0 }
  0xd3   : > { %p13573_p8 = por %p13572_p7, %p13571_p10 }
  0xd4   : > { %p13567_p9 = pneg %p13566_p6 }
  0xd6   : > { %p13574_p11 = pnand %p13573_p8, %p13567_p9 }
  0xd8   : > { %13577 = shalt.err (!%p13574_p11)
}
  0xd9   : > { %12820 = dma.hbm_to_vmem [thread:$0]  (!%p14610_p12), %s14421_s24, 16, %s1043_s13, [#allocation18]  }
  0xda   : > { %s14332_s22 = smov [#allocation20]   ;;  %s14333_s26 = smov [#allocation23]  }
  0xdb   : > { %s1063_s18 = sshll.u32 %s14332_s22, 4  ;;  %s1087_s21 = sshll.u32 %s14333_s26, 4  ;;  %s1064_s18 = int_to_ptr.vmem [resolvable:$true] %s1063_s18  ;;  %s1088_s21 = int_to_ptr.vmem [resolvable:$true] %s1087_s21 }
  0xdc   : > { %s13578_s10 = scalar_lea.hbm %s15753_s6, 16384 }
  0xdd   : > { %p13579_p13 = scmp.ne.s32.totalorder %s15753_s6, %s13578_s10  ;;  %p13585_p3 = scmp.lt.u32.totalorder %s13578_s10, %s15753_s6 }
  0xdf   : > { %p13581_p1 = pnand %p13579_p13, %p14622_p0 }
  0xe1   : > { %p13582_p2 = pneg %p13581_p1 }
  0xe3   : > { %p13587_p4 = pnand %p13585_p3, %p13582_p2 }
  0xe5   : > { %13590 = shalt.err (!%p13587_p4)
}
  0xe6   : > { %s13591_s11 = scalar_lea.vmem %s1064_s18, 16384  ;;  %p13599_p10 = scmp.lt.s32.totalorder %s1064_s18, %s1064_s18 }
  0xe7   : > { %p13592_p5 = scmp.ne.s32.totalorder %s1064_s18, %s13591_s11  ;;  %p13600_p7 = scmp.lt.s32.totalorder %s13591_s11, %s13591_s11 }
  0xe9   : > { %p13594_p6 = pnand %p13592_p5, %p14622_p0  ;;  %p13601_p8 = por %p13600_p7, %p13599_p10 }
  0xeb   : > { %p13595_p9 = pneg %p13594_p6 }
  0xed   : > { %p13602_p11 = pnand %p13601_p8, %p13595_p9 }
  0xef   : > { %13605 = shalt.err (!%p13602_p11)
}
  0xf0   : > { %s15767_s13 = smov 4   ;;  %s15768_s1 = smov 64  }
  0xf1   : > { %12826 = dma.hbm_to_vmem [thread:$0]  (!%p14610_p12), %s15753_s6, 16384, %s1064_s18, [#allocation21], %s15768_s1, %s15768_s1, %s15767_s13  }
  0xf2   : > { %s13606_s10 = scalar_lea.hbm %s14441_s20, 16384 }
  0xf3   : > { %p13607_p13 = scmp.ne.s32.totalorder %s14441_s20, %s13606_s10  ;;  %p13613_p3 = scmp.lt.u32.totalorder %s13606_s10, %s14441_s20 }
  0xf5   : > { %p13609_p1 = pnand %p13607_p13, %p14622_p0 }
  0xf7   : > { %p13610_p2 = pneg %p13609_p1 }
  0xf9   : > { %p13615_p4 = pnand %p13613_p3, %p13610_p2 }
  0xfb   : > { %13618 = shalt.err (!%p13615_p4)
}
  0xfc   : > { %s13619_s22 = scalar_lea.vmem %s1088_s21, 16384  ;;  %p13627_p10 = scmp.lt.s32.totalorder %s1088_s21, %s1088_s21 }
  0xfd   : > { %p13620_p5 = scmp.ne.s32.totalorder %s1088_s21, %s13619_s22  ;;  %p13628_p7 = scmp.lt.s32.totalorder %s13619_s22, %s13619_s22 }
  0xff   : > { %p13622_p6 = pnand %p13620_p5, %p14622_p0  ;;  %p13629_p8 = por %p13628_p7, %p13627_p10 }
 0x101   : > { %p13623_p9 = pneg %p13622_p6 }
 0x103   : > { %p13630_p11 = pnand %p13629_p8, %p13623_p9 }
 0x105   : > { %13633 = shalt.err (!%p13630_p11)
}
 0x106   : > { %s15706_s18 = smov 1024   ;;  %s14335_s26 = smov [#allocation26]  }
 0x107   : > { %12832 = dma.hbm_to_vmem [thread:$0]  (!%p14610_p12), %s14441_s20, 16384, %s1088_s21, [#allocation24], %s15706_s18, %s15706_s18, %s15768_s1  }
 0x108   : > { %s1112_s11 = sshll.u32 %s14335_s26, 4  ;;  %s14336_s10 = smov [#allocation29]   ;;  %s1113_s11 = int_to_ptr.vmem [resolvable:$true] %s1112_s11 }
 0x109   : > { %s1133_s7 = sshll.u32 %s14336_s10, 4  ;;  %s13634_s22 = scalar_lea.hbm %s15752_s4, 16  ;;  %s14715_s7 = int_to_ptr.vmem [resolvable:$true] %s1133_s7 }
 0x10a   : > { %p13635_p13 = scmp.ne.s32.totalorder %s15752_s4, %s13634_s22  ;;  %p13641_p3 = scmp.lt.u32.totalorder %s13634_s22, %s15752_s4 }
 0x10c   : > { %p13637_p1 = pnand %p13635_p13, %p14622_p0 }
 0x10e   : > { %p13638_p2 = pneg %p13637_p1 }
 0x110   : > { %p13643_p4 = pnand %p13641_p3, %p13638_p2 }
 0x112   : > { %13646 = shalt.err (!%p13643_p4)
}
 0x113   : > { %s13647_s6 = scalar_lea.vmem %s1113_s11, 16  ;;  %s13654_s21 = scalar_lea.vmem %s1113_s11, 32 }
 0x114   : > { %p13648_p5 = scmp.ne.s32.totalorder %s1113_s11, %s13647_s6  ;;  %p13655_p10 = scmp.lt.s32.totalorder %s1113_s11, %s1113_s11 }
 0x115   : > { %p13656_p7 = scmp.lt.s32.totalorder %s13654_s21, %s13647_s6 }
 0x116   : > { %p13650_p6 = pnand %p13648_p5, %p14622_p0 }
 0x117   : > { %p13657_p8 = por %p13656_p7, %p13655_p10 }
 0x118   : > { %p13651_p9 = pneg %p13650_p6 }
 0x11a   : > { %p13658_p11 = pnand %p13657_p8, %p13651_p9 }
 0x11c   : > { %13661 = shalt.err (!%p13658_p11)
}
 0x11d   : > { %12838 = dma.hbm_to_vmem [thread:$0]  (!%p14610_p12), %s15752_s4, 16, %s1113_s11, [#allocation27]  }
 0x11e   : > { %s13662_s26 = scalar_lea.hbm %s15751_s5, 1024 }
 0x11f   : > { %p13663_p13 = scmp.ne.s32.totalorder %s15751_s5, %s13662_s26  ;;  %p13669_p3 = scmp.lt.u32.totalorder %s13662_s26, %s15751_s5 }
 0x121   : > { %p13665_p1 = pnand %p13663_p13, %p14622_p0 }
 0x123   : > { %p13666_p2 = pneg %p13665_p1 }
 0x125   : > { %p13671_p4 = pnand %p13669_p3, %p13666_p2 }
 0x127   : > { %13674 = shalt.err (!%p13671_p4)
}
 0x128   : > { %s13675_s6 = scalar_lea.vmem %s14715_s7, 1024  ;;  %p13683_p10 = scmp.lt.s32.totalorder %s14715_s7, %s14715_s7 }
 0x129   : > { %p13676_p5 = scmp.ne.s32.totalorder %s14715_s7, %s13675_s6  ;;  %p13684_p7 = scmp.lt.s32.totalorder %s13675_s6, %s13675_s6 }
 0x12b   : > { %p13678_p6 = pnand %p13676_p5, %p14622_p0  ;;  %p13685_p8 = por %p13684_p7, %p13683_p10 }
 0x12d   : > { %p13679_p9 = pneg %p13678_p6 }
 0x12f   : > { %p13686_p11 = pnand %p13685_p8, %p13679_p9 }
 0x131   : > { %13689 = shalt.err (!%p13686_p11)
}
 0x132   : > { %12844 = dma.hbm_to_vmem [thread:$0]  (!%p14610_p12), %s15751_s5, 1024, %s14715_s7, [#allocation30], %s15768_s1, %s15768_s1, %s15767_s13  }
 0x133   : > { %s14337_s11 = smov [#allocation32]   ;;  %s14338_s22 = smov [#allocation35]  }
 0x134   : > { %s1159_s10 = sshll.u32 %s14337_s11, 4  ;;  %s1185_s21 = sshll.u32 %s14338_s22, 4  ;;  %s1160_s10 = int_to_ptr.vmem [resolvable:$true] %s1159_s10  ;;  %s14745_s21 = int_to_ptr.vmem [resolvable:$true] %s1185_s21 }
 0x135   : > { %s13690_s26 = scalar_lea.hbm %s15748_s12, 1024 }
 0x136   : > { %p13691_p13 = scmp.ne.s32.totalorder %s15748_s12, %s13690_s26  ;;  %p13697_p3 = scmp.lt.u32.totalorder %s13690_s26, %s15748_s12 }
 0x138   : > { %p13693_p1 = pnand %p13691_p13, %p14622_p0 }
 0x13a   : > { %p13694_p2 = pneg %p13693_p1 }
 0x13c   : > { %p13699_p4 = pnand %p13697_p3, %p13694_p2 }
 0x13e   : > { %13702 = shalt.err (!%p13699_p4)
}
 0x13f   : > { %s13703_s6 = scalar_lea.vmem %s1160_s10, 1024  ;;  %p13711_p10 = scmp.lt.s32.totalorder %s1160_s10, %s1160_s10 }
 0x140   : > { %p13704_p5 = scmp.ne.s32.totalorder %s1160_s10, %s13703_s6  ;;  %p13712_p7 = scmp.lt.s32.totalorder %s13703_s6, %s13703_s6 }
 0x142   : > { %p13706_p6 = pnand %p13704_p5, %p14622_p0  ;;  %p13713_p8 = por %p13712_p7, %p13711_p10 }
 0x144   : > { %p13707_p9 = pneg %p13706_p6 }
 0x146   : > { %p13714_p11 = pnand %p13713_p8, %p13707_p9 }
 0x148   : > { %13717 = shalt.err (!%p13714_p11)
}
 0x149   : > { %12850 = dma.hbm_to_vmem [thread:$0]  (!%p14610_p12), %s15748_s12, 1024, %s1160_s10, [#allocation33], %s15768_s1, %s15768_s1, %s15767_s13  }
 0x14a   : > { %s13718_s7 = scalar_lea.hbm %s14481_s30, 64 }
 0x14b   : > { %p13719_p13 = scmp.ne.s32.totalorder %s14481_s30, %s13718_s7  ;;  %p13725_p3 = scmp.lt.u32.totalorder %s13718_s7, %s14481_s30 }
 0x14d   : > { %p13721_p1 = pnand %p13719_p13, %p14622_p0 }
 0x14f   : > { %p13722_p2 = pneg %p13721_p1 }
 0x151   : > { %p13727_p4 = pnand %p13725_p3, %p13722_p2 }
 0x153   : > { %13730 = shalt.err (!%p13727_p4)
}
 0x154   : > { %s13731_s11 = scalar_lea.vmem %s14745_s21, 64  ;;  %p13739_p10 = scmp.lt.s32.totalorder %s14745_s21, %s14745_s21 }
 0x155   : > { %p13732_p5 = scmp.ne.s32.totalorder %s14745_s21, %s13731_s11  ;;  %p13740_p7 = scmp.lt.s32.totalorder %s13731_s11, %s13731_s11 }
 0x157   : > { %p13734_p6 = pnand %p13732_p5, %p14622_p0  ;;  %p13741_p8 = por %p13740_p7, %p13739_p10 }
 0x159   : > { %p13735_p9 = pneg %p13734_p6 }
 0x15b   : > { %p13742_p11 = pnand %p13741_p8, %p13735_p9 }
 0x15d   : > { %13745 = shalt.err (!%p13742_p11)
}
 0x15e   : > { %s15769_s10 = smov 1   ;;  %s15770_s22 = smov 16  }
 0x15f   : > { %12856 = dma.hbm_to_vmem [thread:$0]  (!%p14610_p12), %s14481_s30, 64, %s14745_s21, [#allocation36], %s15770_s22, %s15770_s22, %s15769_s10  }
 0x160   : > { %s14339_s26 = smov [#allocation38]   ;;  %s14340_s7 = smov [#allocation2]  }
 0x161   : > { %s1223_s6 = sshll.u32 %s14339_s26, 4  ;;  %s928_s18 = sshll.u32 %s14340_s7, 4  ;;  %s1224_s6 = int_to_ptr.vmem [resolvable:$true] %s1223_s6  ;;  %s14778_s18 = int_to_ptr.vmem [resolvable:$true] %s928_s18 }
 0x162   : > { %s13746_s11 = scalar_lea.hbm %s14511_s19, 16384 }
 0x163   : > { %p13747_p13 = scmp.ne.s32.totalorder %s14511_s19, %s13746_s11  ;;  %p13753_p3 = scmp.lt.u32.totalorder %s13746_s11, %s14511_s19 }
 0x165   : > { %p13749_p1 = pnand %p13747_p13, %p14622_p0 }
 0x167   : > { %p13750_p2 = pneg %p13749_p1 }
 0x169   : > { %p13755_p4 = pnand %p13753_p3, %p13750_p2 }
 0x16b   : > { %13758 = shalt.err (!%p13755_p4)
}
 0x16c   : > { %s13759_s4 = scalar_lea.vmem %s1224_s6, 16384  ;;  %p13767_p10 = scmp.lt.s32.totalorder %s1224_s6, %s1224_s6 }
 0x16d   : > { %p13760_p5 = scmp.ne.s32.totalorder %s1224_s6, %s13759_s4  ;;  %p13768_p7 = scmp.lt.s32.totalorder %s13759_s4, %s13759_s4 }
 0x16f   : > { %p13762_p6 = pnand %p13760_p5, %p14622_p0  ;;  %p13769_p8 = por %p13768_p7, %p13767_p10 }
 0x171   : > { %p13763_p9 = pneg %p13762_p6 }
 0x173   : > { %p13770_p11 = pnand %p13769_p8, %p13763_p9 }
 0x175   : > { %13773 = shalt.err (!%p13770_p11)
}
 0x176   : > { %12862 = dma.hbm_to_vmem [thread:$0]  (!%p14610_p12), %s14511_s19, 16384, %s1224_s6, [#allocation39], %s15768_s1, %s15768_s1, %s15767_s13  }
 0x177   : > { %s13774_s21 = scalar_lea.hbm %s15749_s9, 16 }
 0x178   : > { %p13775_p13 = scmp.ne.s32.totalorder %s15749_s9, %s13774_s21  ;;  %p13781_p3 = scmp.lt.u32.totalorder %s13774_s21, %s15749_s9 }
 0x17a   : > { %p13777_p1 = pnand %p13775_p13, %p14622_p0 }
 0x17c   : > { %p13778_p2 = pneg %p13777_p1 }
 0x17e   : > { %p13783_p4 = pnand %p13781_p3, %p13778_p2 }
 0x180   : > { %13786 = shalt.err (!%p13783_p4)
}
 0x181   : > { %s13787_s4 = scalar_lea.vmem %s14778_s18, 16  ;;  %s13794_s26 = scalar_lea.vmem %s14778_s18, 32 }
 0x182   : > { %p13788_p5 = scmp.ne.s32.totalorder %s14778_s18, %s13787_s4  ;;  %p13795_p10 = scmp.lt.s32.totalorder %s14778_s18, %s14778_s18 }
 0x183   : > { %p13796_p7 = scmp.lt.s32.totalorder %s13794_s26, %s13787_s4 }
 0x184   : > { %p13790_p6 = pnand %p13788_p5, %p14622_p0 }
 0x185   : > { %p13797_p8 = por %p13796_p7, %p13795_p10 }
 0x186   : > { %p13791_p9 = pneg %p13790_p6 }
 0x188   : > { %p13798_p11 = pnand %p13797_p8, %p13791_p9 }
 0x18a   : > { %13801 = shalt.err (!%p13798_p11)
}
 0x18b   : > { %12793 = dma.hbm_to_vmem [thread:$0]  (!%p14610_p12), %s15749_s9, 16, %s14778_s18, [#allocation3]  }
 0x18c   : > { %s14341_s6 = smov [#allocation7]   ;;  %s14342_s11 = smov [#allocation10]  }
 0x18d   : > { %s949_s7 = sshll.u32 %s14341_s6, 4  ;;  %s975_s21 = sshll.u32 %s14342_s11, 4  ;;  %s950_s7 = int_to_ptr.vmem [resolvable:$true] %s949_s7  ;;  %s14809_s21 = int_to_ptr.vmem [resolvable:$true] %s975_s21 }
 0x18e   : > { %s13802_s4 = scalar_lea.hbm %s15747_s17, 1024 }
 0x18f   : > { %p13803_p13 = scmp.ne.s32.totalorder %s15747_s17, %s13802_s4  ;;  %p13809_p3 = scmp.lt.u32.totalorder %s13802_s4, %s15747_s17 }
 0x191   : > { %p13805_p1 = pnand %p13803_p13, %p14622_p0 }
 0x193   : > { %p13806_p2 = pneg %p13805_p1 }
 0x195   : > { %p13811_p4 = pnand %p13809_p3, %p13806_p2 }
 0x197   : > { %13814 = shalt.err (!%p13811_p4)
}
 0x198   : > { %s13815_s26 = scalar_lea.vmem %s950_s7, 1024  ;;  %p13823_p10 = scmp.lt.s32.totalorder %s950_s7, %s950_s7 }
 0x199   : > { %p13816_p5 = scmp.ne.s32.totalorder %s950_s7, %s13815_s26  ;;  %p13824_p7 = scmp.lt.s32.totalorder %s13815_s26, %s13815_s26 }
 0x19b   : > { %p13818_p6 = pnand %p13816_p5, %p14622_p0  ;;  %p13825_p8 = por %p13824_p7, %p13823_p10 }
 0x19d   : > { %p13819_p9 = pneg %p13818_p6 }
 0x19f   : > { %p13826_p11 = pnand %p13825_p8, %p13819_p9 }
 0x1a1   : > { %13829 = shalt.err (!%p13826_p11)
}
 0x1a2   : > { %s15771_s18 = sld [smem:[#allocation64_spill]] }
 0x1a3   : > { %12799 = dma.hbm_to_vmem [thread:$0]  (!%p14610_p12), %s15747_s17, 1024, %s950_s7, [#allocation6], %s15768_s1, %s15768_s1, %s15767_s13  }
 0x1a8   : > { %s13830_s6 = scalar_lea.hbm %s15771_s18, 1024 }
 0x1a9   : > { %p13831_p13 = scmp.ne.s32.totalorder %s15771_s18, %s13830_s6  ;;  %p13837_p3 = scmp.lt.u32.totalorder %s13830_s6, %s15771_s18 }
 0x1ab   : > { %p13833_p1 = pnand %p13831_p13, %p14622_p0 }
 0x1ad   : > { %p13834_p2 = pneg %p13833_p1 }
 0x1af   : > { %p13839_p4 = pnand %p13837_p3, %p13834_p2 }
 0x1b1   : > { %13842 = shalt.err (!%p13839_p4)
}
 0x1b2   : > { %s13843_s11 = scalar_lea.vmem %s14809_s21, 1024  ;;  %p13851_p10 = scmp.lt.s32.totalorder %s14809_s21, %s14809_s21 }
 0x1b3   : > { %p13844_p5 = scmp.ne.s32.totalorder %s14809_s21, %s13843_s11  ;;  %p13852_p7 = scmp.lt.s32.totalorder %s13843_s11, %s13843_s11 }
 0x1b5   : > { %p13846_p6 = pnand %p13844_p5, %p14622_p0  ;;  %p13853_p8 = por %p13852_p7, %p13851_p10 }
 0x1b7   : > { %p13847_p9 = pneg %p13846_p6 }
 0x1b9   : > { %p13854_p11 = pnand %p13853_p8, %p13847_p9 }
 0x1bb   : > { %13857 = shalt.err (!%p13854_p11)
}
 0x1bc   : > { %s15772_s7 = sld [smem:[#allocation65_spill]]  ;;  %s14343_s26 = smov [#allocation13]  }
 0x1bd   : > { %12805 = dma.hbm_to_vmem [thread:$0]  (!%p14610_p12), %s15771_s18, 1024, %s14809_s21, [#allocation9], %s15768_s1, %s15768_s1, %s15767_s13  }
 0x1be   : > { %s1001_s6 = sshll.u32 %s14343_s26, 4  ;;  %s14344_s5 = smov [#allocation16]   ;;  %s1002_s6 = int_to_ptr.vmem [resolvable:$true] %s1001_s6 }
 0x1bf   : > { %s1031_s8 = sshll.u32 %s14344_s5, 4  ;;  %s14842_s8 = int_to_ptr.vmem [resolvable:$true] %s1031_s8 }
 0x1c2   : > { %s15773_s4 = smov %s15772_s7  ;;  %s13858_s11 = scalar_lea.hbm %s15772_s7, 64 }
 0x1c3   : > { %p13859_p13 = scmp.ne.s32.totalorder %s15773_s4, %s13858_s11  ;;  %p13865_p3 = scmp.lt.u32.totalorder %s13858_s11, %s15773_s4 }
 0x1c5   : > { %p13861_p1 = pnand %p13859_p13, %p14622_p0 }
 0x1c7   : > { %p13862_p2 = pneg %p13861_p1 }
 0x1c9   : > { %p13867_p4 = pnand %p13865_p3, %p13862_p2 }
 0x1cb   : > { %13870 = shalt.err (!%p13867_p4)
}
 0x1cc   : > { %s13871_s9 = scalar_lea.vmem %s1002_s6, 64  ;;  %p13879_p10 = scmp.lt.s32.totalorder %s1002_s6, %s1002_s6 }
 0x1cd   : > { %p13872_p5 = scmp.ne.s32.totalorder %s1002_s6, %s13871_s9  ;;  %p13880_p7 = scmp.lt.s32.totalorder %s13871_s9, %s13871_s9 }
 0x1cf   : > { %p13874_p6 = pnand %p13872_p5, %p14622_p0  ;;  %p13881_p8 = por %p13880_p7, %p13879_p10 }
 0x1d1   : > { %p13875_p9 = pneg %p13874_p6 }
 0x1d3   : > { %p13882_p11 = pnand %p13881_p8, %p13875_p9 }
 0x1d5   : > { %13885 = shalt.err (!%p13882_p11)
}
 0x1d6   : > { %s15774_s5 = sld [smem:[#allocation68_spill]] }
 0x1d7   : > { %12811 = dma.hbm_to_vmem [thread:$0]  (!%p14610_p12), %s15773_s4, 64, %s1002_s6, [#allocation12], %s15770_s22, %s15770_s22, %s15769_s10  }
 0x1dc   : > { %s13886_s21 = scalar_lea.hbm %s15774_s5, 16 }
 0x1dd   : > { %p13887_p13 = scmp.ne.s32.totalorder %s15774_s5, %s13886_s21  ;;  %p13893_p3 = scmp.lt.u32.totalorder %s13886_s21, %s15774_s5 }
 0x1df   : > { %p13889_p1 = pnand %p13887_p13, %p14622_p0 }
 0x1e1   : > { %p13890_p2 = pneg %p13889_p1 }
 0x1e3   : > { %p13895_p4 = pnand %p13893_p3, %p13890_p2 }
 0x1e5   : > { %13898 = shalt.err (!%p13895_p4)
}
 0x1e6   : > { %s13899_s9 = scalar_lea.vmem %s14842_s8, 16  ;;  %s13906_s7 = scalar_lea.vmem %s14842_s8, 32 }
 0x1e7   : > { %p13900_p5 = scmp.ne.s32.totalorder %s14842_s8, %s13899_s9  ;;  %p13907_p10 = scmp.lt.s32.totalorder %s14842_s8, %s14842_s8 }
 0x1e8   : > { %p13908_p7 = scmp.lt.s32.totalorder %s13906_s7, %s13899_s9 }
 0x1e9   : > { %p13902_p6 = pnand %p13900_p5, %p14622_p0 }
 0x1ea   : > { %p13909_p8 = por %p13908_p7, %p13907_p10 }
 0x1eb   : > { %p13903_p9 = pneg %p13902_p6 }
 0x1ed   : > { %p13910_p11 = pnand %p13909_p8, %p13903_p9 }
 0x1ef   : > { %13913 = shalt.err (!%p13910_p11)
}
 0x1f0   : > { %s15775_s26 = sld [smem:[#allocation69_spill]]  ;;  %s14345_s6 = smov [#allocation19]  }
 0x1f1   : > { %12817 = dma.hbm_to_vmem [thread:$0]  (!%p14610_p12), %s15774_s5, 16, %s14842_s8, [#allocation15]  }
 0x1f2   : > { %s1053_s11 = sshll.u32 %s14345_s6, 4  ;;  %s14346_s21 = smov [#allocation22]   ;;  %s1054_s11 = int_to_ptr.vmem [resolvable:$true] %s1053_s11 }
 0x1f3   : > { %s1077_s4 = sshll.u32 %s14346_s21, 4  ;;  %s14873_s4 = int_to_ptr.vmem [resolvable:$true] %s1077_s4 }
 0x1f6   : > { %s13914_s9 = scalar_lea.hbm %s15775_s26, 16 }
 0x1f7   : > { %p13915_p13 = scmp.ne.s32.totalorder %s15775_s26, %s13914_s9  ;;  %p13921_p3 = scmp.lt.u32.totalorder %s13914_s9, %s15775_s26 }
 0x1f9   : > { %p13917_p1 = pnand %p13915_p13, %p14622_p0 }
 0x1fb   : > { %p13918_p2 = pneg %p13917_p1 }
 0x1fd   : > { %p13923_p4 = pnand %p13921_p3, %p13918_p2 }
 0x1ff   : > { %13926 = shalt.err (!%p13923_p4)
}
 0x200   : > { %s13927_s7 = scalar_lea.vmem %s1054_s11, 16  ;;  %s13934_s8 = scalar_lea.vmem %s1054_s11, 32 }
 0x201   : > { %p13928_p5 = scmp.ne.s32.totalorder %s1054_s11, %s13927_s7  ;;  %p13935_p10 = scmp.lt.s32.totalorder %s1054_s11, %s1054_s11 }
 0x202   : > { %p13936_p7 = scmp.lt.s32.totalorder %s13934_s8, %s13927_s7 }
 0x203   : > { %p13930_p6 = pnand %p13928_p5, %p14622_p0 }
 0x204   : > { %p13937_p8 = por %p13936_p7, %p13935_p10 }
 0x205   : > { %p13931_p9 = pneg %p13930_p6 }
 0x207   : > { %p13938_p11 = pnand %p13937_p8, %p13931_p9 }
 0x209   : > { %13941 = shalt.err (!%p13938_p11)
}
 0x20a   : > { %s15776_s6 = sld [smem:[#allocation71_spill]] }
 0x20b   : > { %12823 = dma.hbm_to_vmem [thread:$0]  (!%p14610_p12), %s15775_s26, 16, %s1054_s11, [#allocation18]  }
 0x210   : > { %s13942_s21 = scalar_lea.hbm %s15776_s6, 256 }
 0x211   : > { %p13943_p13 = scmp.ne.s32.totalorder %s15776_s6, %s13942_s21  ;;  %p13949_p3 = scmp.lt.u32.totalorder %s13942_s21, %s15776_s6 }
 0x213   : > { %p13945_p1 = pnand %p13943_p13, %p14622_p0 }
 0x215   : > { %p13946_p2 = pneg %p13945_p1 }
 0x217   : > { %p13951_p4 = pnand %p13949_p3, %p13946_p2 }
 0x219   : > { %13954 = shalt.err (!%p13951_p4)
}
 0x21a   : > { %s13955_s9 = scalar_lea.vmem %s14873_s4, 256  ;;  %p13963_p10 = scmp.lt.s32.totalorder %s14873_s4, %s14873_s4 }
 0x21b   : > { %p13956_p5 = scmp.ne.s32.totalorder %s14873_s4, %s13955_s9  ;;  %p13964_p7 = scmp.lt.s32.totalorder %s13955_s9, %s13955_s9 }
 0x21d   : > { %p13958_p6 = pnand %p13956_p5, %p14622_p0  ;;  %p13965_p8 = por %p13964_p7, %p13963_p10 }
 0x21f   : > { %p13959_p9 = pneg %p13958_p6 }
 0x221   : > { %p13966_p11 = pnand %p13965_p8, %p13959_p9 }
 0x223   : > { %13969 = shalt.err (!%p13966_p11)
}
 0x224   : > { %s15777_s11 = sld [smem:[#allocation72_spill]]  ;;  %s14347_s7 = smov [#allocation25]  }
 0x225   : > { %12829 = dma.hbm_to_vmem [thread:$0]  (!%p14610_p12), %s15776_s6, 256, %s14873_s4, [#allocation21]  }
 0x226   : > { %s1101_s21 = sshll.u32 %s14347_s7, 4  ;;  %s14348_s5 = smov [#allocation28]   ;;  %s1102_s21 = int_to_ptr.vmem [resolvable:$true] %s1101_s21 }
 0x227   : > { %s1123_s12 = sshll.u32 %s14348_s5, 4  ;;  %s14900_s12 = int_to_ptr.vmem [resolvable:$true] %s1123_s12 }
 0x22a   : > { %s15778_s8 = smov %s15777_s11  ;;  %s13970_s9 = scalar_lea.hbm %s15777_s11, 16 }
 0x22b   : > { %p13971_p13 = scmp.ne.s32.totalorder %s15778_s8, %s13970_s9  ;;  %p13977_p3 = scmp.lt.u32.totalorder %s13970_s9, %s15778_s8 }
 0x22d   : > { %p13973_p1 = pnand %p13971_p13, %p14622_p0 }
 0x22f   : > { %p13974_p2 = pneg %p13973_p1 }
 0x231   : > { %p13979_p4 = pnand %p13977_p3, %p13974_p2 }
 0x233   : > { %13982 = shalt.err (!%p13979_p4)
}
 0x234   : > { %s13983_s17 = scalar_lea.vmem %s1102_s21, 16  ;;  %s13990_s4 = scalar_lea.vmem %s1102_s21, 32 }
 0x235   : > { %p13984_p5 = scmp.ne.s32.totalorder %s1102_s21, %s13983_s17  ;;  %p13991_p10 = scmp.lt.s32.totalorder %s1102_s21, %s1102_s21 }
 0x236   : > { %p13992_p7 = scmp.lt.s32.totalorder %s13990_s4, %s13983_s17 }
 0x237   : > { %p13986_p6 = pnand %p13984_p5, %p14622_p0 }
 0x238   : > { %p13993_p8 = por %p13992_p7, %p13991_p10 }
 0x239   : > { %p13987_p9 = pneg %p13986_p6 }
 0x23b   : > { %p13994_p11 = pnand %p13993_p8, %p13987_p9 }
 0x23d   : > { %13997 = shalt.err (!%p13994_p11)
}
 0x23e   : > { %s15779_s5 = sld [smem:[#allocation74_spill]] }
 0x23f   : > { %12835 = dma.hbm_to_vmem [thread:$0]  (!%p14610_p12), %s15778_s8, 16, %s1102_s21, [#allocation24]  }
 0x244   : > { %s13998_s11 = scalar_lea.hbm %s15779_s5, 16 }
 0x245   : > { %p13999_p13 = scmp.ne.s32.totalorder %s15779_s5, %s13998_s11  ;;  %p14005_p3 = scmp.lt.u32.totalorder %s13998_s11, %s15779_s5 }
 0x247   : > { %p14001_p1 = pnand %p13999_p13, %p14622_p0 }
 0x249   : > { %p14002_p2 = pneg %p14001_p1 }
 0x24b   : > { %p14007_p4 = pnand %p14005_p3, %p14002_p2 }
 0x24d   : > { %14010 = shalt.err (!%p14007_p4)
}
 0x24e   : > { %s14011_s17 = scalar_lea.vmem %s14900_s12, 16  ;;  %s14018_s7 = scalar_lea.vmem %s14900_s12, 32 }
 0x24f   : > { %p14012_p5 = scmp.ne.s32.totalorder %s14900_s12, %s14011_s17  ;;  %p14019_p10 = scmp.lt.s32.totalorder %s14900_s12, %s14900_s12 }
 0x250   : > { %p14020_p7 = scmp.lt.s32.totalorder %s14018_s7, %s14011_s17 }
 0x251   : > { %p14014_p6 = pnand %p14012_p5, %p14622_p0 }
 0x252   : > { %p14021_p8 = por %p14020_p7, %p14019_p10 }
 0x253   : > { %p14015_p9 = pneg %p14014_p6 }
 0x255   : > { %p14022_p11 = pnand %p14021_p8, %p14015_p9 }
 0x257   : > { %14025 = shalt.err (!%p14022_p11)
}
 0x258   : > { %s15780_s21 = sld [smem:[#allocation76_spill]]  ;;  %s14349_s9 = smov [#allocation31]  }
 0x259   : > { %12841 = dma.hbm_to_vmem [thread:$0]  (!%p14610_p12), %s15779_s5, 16, %s14900_s12, [#allocation27]  }
 0x25a   : > { %s1146_s4 = sshll.u32 %s14349_s9, 4  ;;  %s14350_s11 = smov [#allocation34]   ;;  %s1147_s4 = int_to_ptr.vmem [resolvable:$true] %s1146_s4 }
 0x25b   : > { %s1172_s6 = sshll.u32 %s14350_s11, 4  ;;  %s14928_s6 = int_to_ptr.vmem [resolvable:$true] %s1172_s6 }
 0x25e   : > { %s14026_s17 = scalar_lea.hbm %s15780_s21, 1024 }
 0x25f   : > { %p14027_p13 = scmp.ne.s32.totalorder %s15780_s21, %s14026_s17  ;;  %p14033_p3 = scmp.lt.u32.totalorder %s14026_s17, %s15780_s21 }
 0x261   : > { %p14029_p1 = pnand %p14027_p13, %p14622_p0 }
 0x263   : > { %p14030_p2 = pneg %p14029_p1 }
 0x265   : > { %p14035_p4 = pnand %p14033_p3, %p14030_p2 }
 0x267   : > { %14038 = shalt.err (!%p14035_p4)
}
 0x268   : > { %s14039_s7 = scalar_lea.vmem %s1147_s4, 1024  ;;  %p14047_p10 = scmp.lt.s32.totalorder %s1147_s4, %s1147_s4 }
 0x269   : > { %p14040_p5 = scmp.ne.s32.totalorder %s1147_s4, %s14039_s7  ;;  %p14048_p7 = scmp.lt.s32.totalorder %s14039_s7, %s14039_s7 }
 0x26b   : > { %p14042_p6 = pnand %p14040_p5, %p14622_p0  ;;  %p14049_p8 = por %p14048_p7, %p14047_p10 }
 0x26d   : > { %p14043_p9 = pneg %p14042_p6 }
 0x26f   : > { %p14050_p11 = pnand %p14049_p8, %p14043_p9 }
 0x271   : > { %14053 = shalt.err (!%p14050_p11)
}
 0x272   : > { %s15781_s12 = sld [smem:[#allocation78_spill]] }
 0x273   : > { %12847 = dma.hbm_to_vmem [thread:$0]  (!%p14610_p12), %s15780_s21, 1024, %s1147_s4, [#allocation30], %s15768_s1, %s15768_s1, %s15767_s13  }
 0x278   : > { %s14054_s9 = scalar_lea.hbm %s15781_s12, 64 }
 0x279   : > { %p14055_p13 = scmp.ne.s32.totalorder %s15781_s12, %s14054_s9  ;;  %p14061_p3 = scmp.lt.u32.totalorder %s14054_s9, %s15781_s12 }
 0x27b   : > { %p14057_p1 = pnand %p14055_p13, %p14622_p0 }
 0x27d   : > { %p14058_p2 = pneg %p14057_p1 }
 0x27f   : > { %p14063_p4 = pnand %p14061_p3, %p14058_p2 }
 0x281   : > { %14066 = shalt.err (!%p14063_p4)
}
 0x282   : > { %s14067_s11 = scalar_lea.vmem %s14928_s6, 64  ;;  %p14075_p10 = scmp.lt.s32.totalorder %s14928_s6, %s14928_s6 }
 0x283   : > { %p14068_p5 = scmp.ne.s32.totalorder %s14928_s6, %s14067_s11  ;;  %p14076_p7 = scmp.lt.s32.totalorder %s14067_s11, %s14067_s11 }
 0x285   : > { %p14070_p6 = pnand %p14068_p5, %p14622_p0  ;;  %p14077_p8 = por %p14076_p7, %p14075_p10 }
 0x287   : > { %p14071_p9 = pneg %p14070_p6 }
 0x289   : > { %p14078_p11 = pnand %p14077_p8, %p14071_p9 }
 0x28b   : > { %14081 = shalt.err (!%p14078_p11)
}
 0x28c   : > { %s15782_s4 = sld [smem:[#allocation79_spill]]  ;;  %s14351_s17 = smov [#allocation37]  }
 0x28d   : > { %12853 = dma.hbm_to_vmem [thread:$0]  (!%p14610_p12), %s15781_s12, 64, %s14928_s6, [#allocation33], %s15770_s22, %s15770_s22, %s15769_s10  }
 0x28e   : > { %s1198_s7 = sshll.u32 %s14351_s17, 4  ;;  %s14352_s9 = smov [#allocation40]   ;;  %s1199_s7 = int_to_ptr.vmem [resolvable:$true] %s1198_s7 }
 0x28f   : > { %s1239_s5 = sshll.u32 %s14352_s9, 4  ;;  %s14961_s5 = int_to_ptr.vmem [resolvable:$true] %s1239_s5 }
 0x292   : > { %s14082_s11 = scalar_lea.hbm %s15782_s4, 64 }
 0x293   : > { %p14083_p13 = scmp.ne.s32.totalorder %s15782_s4, %s14082_s11  ;;  %p14089_p3 = scmp.lt.u32.totalorder %s14082_s11, %s15782_s4 }
 0x295   : > { %p14085_p1 = pnand %p14083_p13, %p14622_p0 }
 0x297   : > { %p14086_p2 = pneg %p14085_p1 }
 0x299   : > { %p14091_p4 = pnand %p14089_p3, %p14086_p2 }
 0x29b   : > { %14094 = shalt.err (!%p14091_p4)
}
 0x29c   : > { %s14095_s8 = scalar_lea.vmem %s1199_s7, 64  ;;  %p14103_p10 = scmp.lt.s32.totalorder %s1199_s7, %s1199_s7 }
 0x29d   : > { %p14096_p5 = scmp.ne.s32.totalorder %s1199_s7, %s14095_s8  ;;  %p14104_p7 = scmp.lt.s32.totalorder %s14095_s8, %s14095_s8 }
 0x29f   : > { %p14098_p6 = pnand %p14096_p5, %p14622_p0  ;;  %p14105_p8 = por %p14104_p7, %p14103_p10 }
 0x2a1   : > { %p14099_p9 = pneg %p14098_p6 }
 0x2a3   : > { %p14106_p11 = pnand %p14105_p8, %p14099_p9 }
 0x2a5   : > { %14109 = shalt.err (!%p14106_p11)
}
 0x2a6   : > { %s15783_s6 = sld [smem:[#allocation85_spill]] }
 0x2a7   : > { %12859 = dma.hbm_to_vmem [thread:$0]  (!%p14610_p12), %s15782_s4, 64, %s1199_s7, [#allocation36], %s15770_s22, %s15770_s22, %s15769_s10  }
 0x2ac   : > { %s14110_s17 = scalar_lea.hbm %s15783_s6, 16384 }
 0x2ad   : > { %p14111_p13 = scmp.ne.s32.totalorder %s15783_s6, %s14110_s17  ;;  %p14117_p3 = scmp.lt.u32.totalorder %s14110_s17, %s15783_s6 }
 0x2af   : > { %p14113_p1 = pnand %p14111_p13, %p14622_p0 }
 0x2b1   : > { %p14114_p2 = pneg %p14113_p1 }
 0x2b3   : > { %p14119_p4 = pnand %p14117_p3, %p14114_p2 }
 0x2b5   : > { %14122 = shalt.err (!%p14119_p4)
}
 0x2b6   : > { %s14123_s8 = scalar_lea.vmem %s14961_s5, 16384  ;;  %p14131_p10 = scmp.lt.s32.totalorder %s14961_s5, %s14961_s5 }
 0x2b7   : > { %p14124_p5 = scmp.ne.s32.totalorder %s14961_s5, %s14123_s8  ;;  %p14132_p7 = scmp.lt.s32.totalorder %s14123_s8, %s14123_s8 }
 0x2b9   : > { %p14126_p6 = pnand %p14124_p5, %p14622_p0  ;;  %p14133_p8 = por %p14132_p7, %p14131_p10 }
 0x2bb   : > { %p14127_p9 = pneg %p14126_p6 }
 0x2bd   : > { %p14134_p11 = pnand %p14133_p8, %p14127_p9 }
 0x2bf   : > { %14137 = shalt.err (!%p14134_p11)
}
 0x2c0   : > { %s15784_s10 = smov 1024   ;;  %s14353_s22 = smov [#allocation41]  }
 0x2c1   : > { %12865 = dma.hbm_to_vmem [thread:$0]  (!%p14610_p12), %s15783_s6, 16384, %s14961_s5, [#allocation39], %s15784_s10, %s15784_s10, %s15768_s1  }
 0x2c2   : > { %s1261_s7 = sshll.u32 %s14353_s22, 4  ;;  %s14138_s9 = scalar_lea.hbm %s14541_s3, 1024  ;;  %s1262_s7 = int_to_ptr.vmem [resolvable:$true] %s1261_s7 }
 0x2c3   : > { %p14139_p13 = scmp.ne.s32.totalorder %s14541_s3, %s14138_s9  ;;  %p14145_p3 = scmp.lt.u32.totalorder %s14138_s9, %s14541_s3 }
 0x2c5   : > { %p14141_p1 = pnand %p14139_p13, %p14622_p0 }
 0x2c7   : > { %p14142_p2 = pneg %p14141_p1 }
 0x2c9   : > { %p14147_p4 = pnand %p14145_p3, %p14142_p2 }
 0x2cb   : > { %14150 = shalt.err (!%p14147_p4)
}
 0x2cc   : > { %s14151_s11 = scalar_lea.vmem %s1262_s7, 1024  ;;  %p14159_p10 = scmp.lt.s32.totalorder %s1262_s7, %s1262_s7 }
 0x2cd   : > { %p14152_p5 = scmp.ne.s32.totalorder %s1262_s7, %s14151_s11  ;;  %p14160_p7 = scmp.lt.s32.totalorder %s14151_s11, %s14151_s11 }
 0x2cf   : > { %p14154_p6 = pnand %p14152_p5, %p14622_p0  ;;  %p14161_p8 = por %p14160_p7, %p14159_p10 }
 0x2d1   : > { %p14155_p9 = pneg %p14154_p6 }
 0x2d3   : > { %p14162_p11 = pnand %p14161_p8, %p14155_p9 }
 0x2d5   : > { %14165 = shalt.err (!%p14162_p11)
}
 0x2d6   : > { %12868 = dma.hbm_to_vmem [thread:$0]  (!%p14610_p12), %s14541_s3, 1024, %s1262_s7, [#allocation42], %s15768_s1, %s15768_s1, %s15767_s13  }
 0x2d7   : > { %p15785_p13 = scmp.ne.s32.totalorder %s15764_s2, 0 }
 0x2d8   : > { %p15786_p1 = scmp.eq.s32.totalorder (!%p15785_p13), %s14574_s15, 0 }
 0x2d9   : > { %1288 = sbr.rel (%p15785_p13) target bundleno = 11636 (0x2d74), region = 168 }
 0x2e0   : > { %14211 = dma.done.wait (%p15786_p1), [#allocation3], 16   ;;  %p15787_p0 = pmov %p15786_p1 }
 0x2e2   : > { %14213 = vsyncadd (%p15787_p0), [#allocation3], 4294967280  ;;  %p15788_p2 = pmov %p15787_p0 }
 0x2e3   : > { %p15789_p3 = pmov %p15787_p0 }
 0x2e4   : > { %14215 = dma.done.wait (%p15788_p2), [#allocation6], 1040  }
 0x2e5   : > { %14217 = vsyncadd (%p15789_p3), [#allocation6], 4294966256  ;;  %p15790_p4 = pmov %p15787_p0 }
 0x2e6   : > { %p15791_p12 = pmov %p15787_p0 }
 0x2e7   : > { %14219 = dma.done.wait (%p15790_p4), [#allocation9], 2048  }
 0x2e8   : > { %14221 = vsyncadd (%p15791_p12), [#allocation9], 4294965248  ;;  %p15792_p5 = pmov %p15787_p0 }
 0x2e9   : > { %p15793_p6 = pmov %p15787_p0 }
 0x2ea   : > { %14223 = dma.done.wait (%p15792_p5), [#allocation12], 128  }
 0x2eb   : > { %14225 = vsyncadd (%p15793_p6), [#allocation12], 4294967168  ;;  %p15794_p9 = pmov %p15787_p0 }
 0x2ec   : > { %p15795_p10 = pmov %p15787_p0 }
 0x2ed   : > { %14227 = dma.done.wait (%p15794_p9), [#allocation15], 80  }
 0x2ee   : > { %14229 = vsyncadd (%p15795_p10), [#allocation15], 4294967216  ;;  %p15796_p7 = pmov %p15787_p0 }
 0x2ef   : > { %p15797_p8 = pmov %p15787_p0 }
 0x2f0   : > { %14231 = dma.done.wait (%p15796_p7), [#allocation18], 32  }
 0x2f1   : > { %14233 = vsyncadd (%p15797_p8), [#allocation18], 4294967264  ;;  %p15798_p11 = pmov %p15787_p0 }
 0x2f2   : > { %p15799_p13 = pmov %p15787_p0 }
 0x2f3   : > { %14235 = dma.done.wait (%p15798_p11), [#allocation21], 16640  }
 0x2f4   : > { %14237 = vsyncadd (%p15799_p13), [#allocation21], 4294950656  ;;  %p15800_p1 = pmov %p15787_p0 }
 0x2f6   : > { %14239 = dma.done.wait (%p15800_p1), [#allocation24], 16400  }
 0x2f7   : > { %14241 = vsyncadd (%p15787_p0), [#allocation24], 4294950896  ;;  %p15801_p2 = pmov %p15787_p0 }
 0x2f8   : > { %p15802_p3 = pmov %p15787_p0 }
 0x2f9   : > { %14243 = dma.done.wait (%p15801_p2), [#allocation27], 32  }
 0x2fa   : > { %14245 = vsyncadd (%p15802_p3), [#allocation27], 4294967264  ;;  %p15803_p4 = pmov %p15787_p0 }
 0x2fb   : > { %p15804_p12 = pmov %p15787_p0 }
 0x2fc   : > { %14247 = dma.done.wait (%p15803_p4), [#allocation30], 2048  }
 0x2fd   : > { %14249 = vsyncadd (%p15804_p12), [#allocation30], 4294965248  ;;  %p15805_p5 = pmov %p15787_p0 }
 0x2fe   : > { %p15806_p6 = pmov %p15787_p0 }
 0x2ff   : > { %14251 = dma.done.wait (%p15805_p5), [#allocation33], 1088  }
 0x300   : > { %14253 = vsyncadd (%p15806_p6), [#allocation33], 4294966208  ;;  %p15807_p9 = pmov %p15787_p0 }
 0x301   : > { %p15808_p10 = pmov %p15787_p0 }
 0x302   : > { %14255 = dma.done.wait (%p15807_p9), [#allocation36], 128  }
 0x303   : > { %14257 = vsyncadd (%p15808_p10), [#allocation36], 4294967168  ;;  %p15809_p7 = pmov %p15787_p0 }
 0x304   : > { %p15810_p8 = pmov %p15787_p0 }
 0x305   : > { %14259 = dma.done.wait (%p15809_p7), [#allocation39], 32768  }
 0x306   : > { %14261 = vsyncadd (%p15810_p8), [#allocation39], 4294934528  ;;  %p15811_p11 = pmov %p15787_p0 }
 0x307   : > { %p15812_p13 = pmov %p15787_p0 }
 0x308   : > { %14263 = dma.done.wait (%p15811_p11), [#allocation42], 1024  }
 0x309   : > { %14265 = vsyncadd (%p15812_p13), [#allocation42], 4294966272  ;;  %s15813_s2 = sld [smem:[#allocation59_spill]]  ;;  %p1479_p1 = scmp.lt.s32.totalorder %s14574_s15, 1  ;;  %v14354_v0 = vmov 0   ;;  %v14355_v1 = vmov 0.0  }
 0x30a   : > { %13029 = vset.pattern.permute.xlu0 %v14354_v0  ;;  %12216 = vmatprep.subr.bf16.mxu0 %v14355_v1  ;;  %v13030_v3 = vld [vmem:[#allocation7] sm:$0xff]   ;;  %v13031_v5 = vld [vmem:[#allocation7 + $0x10] sm:$0xff]   ;;  %v13032_v6 = vld [vmem:[#allocation7 + $0x8] sm:$0xff]   ;;  %vm14356_vm0 = vmmov 0   ;;  %vm1708_vm1 = vcmask 261120   ;;  %vm1798_vm3 = vcmask 130048  }
 0x30b   : > { %s1480_s23 = scalar_select %p1479_p1, %s14574_s15, 1  ;;  %12254 = vmatprep.subr.bf16.mxu1 %v14355_v1  ;;  %12217 = vmatpush3.bf16.xpose.msra.mxu0 %v13030_v3  ;;  %v13033_v7 = vld [vmem:[#allocation7 + $0x18] sm:$0xff]   ;;  %v13034_v14 = vld [vmem:[#allocation8] sm:$0xff]   ;;  %v13035_v15 = vld [vmem:[#allocation10 + $0x10] sm:$0xff]  }
 0x30c   : > { %12255 = vmatpush3.bf16.xpose.msra.mxu1 %v13031_v5  ;;  %12218 = vmatprep.subr.bf16.mxu0 %v14355_v1  ;;  %v11053_v8 = vld [vmem:[#allocation2] ss:$0 sm:$0xff]  ;;  %v11054_v10 = vld [vmem:[#allocation5] ss:$0 sm:$0xff]  ;;  %v13036_v19 = vld [vmem:[#allocation8 + $0x8] sm:$0xff]   ;;  %s15816_s1 = sld [smem:[#allocation67_spill]] }
 0x30d   : > { %s11758_s16 = sshll.u32 %s1480_s23, 4  ;;  %12256 = vmatprep.subr.bf16.mxu1 %v14355_v1  ;;  %12220 = vmatprep.mubr.msk.bf16.mxu0 %vm14356_vm0, %v14355_v1  ;;  %v13037_v20 = vld [vmem:[#allocation10 + $0x18] sm:$0xff]   ;;  %v13038_v21 = vld [vmem:[#allocation10] sm:$0xff]   ;;  %v13039_v22 = vld [vmem:[#allocation10 + $0x8] sm:$0xff]   ;;  %s15817_s5 = sld [smem:[#allocation80_spill]] }
 0x30e   : > { %12258 = vmatprep.mubr.msk.bf16.mxu1 %vm14356_vm0, %v14355_v1  ;;  %v11055_v23 = vld [vmem:[#allocation11] ss:$0 sm:$0xff]  ;;  %v15106_v29 = vld [vmem:[#allocation11 + $0x1] ss:$0 sm:$0xff]  ;;  %v11058_v35 = vld [vmem:[#allocation13] ss:$0 sm:$0xff] }
 0x30f   : > { %s1483_s13 = scalar_lea.vmem %s15813_s2, %s11758_s16  ;;  %v11076_v37 = vld [vmem:[#allocation14 + $0x1] ss:$0 sm:$0xff]  ;;  %vm15114_vm2 = vmpackc.low %vm1708_vm1, %vm1708_vm1  ;;  %v11061_v53 = vld [vmem:[#allocation14] ss:$0 sm:$0xff]  ;;  %s15818_s17 = sld [smem:[#allocation81_spill]] }
 0x310   : > { %v1485_v2 = vld [vmem:[%s1483_s13] sm:$0xff]  ;;  %v1486_v4 = vld [vmem:[%s1483_s13 + $0x8] sm:$0xff]  ;;  %s15819_s8 = sld [smem:[#allocation82_spill]]  ;;  %s15820_s10 = sld [smem:[#allocation83_spill]] }
 0x311   : > { %1490 = vperm.xlu0 %13029, %v1485_v2   ;;  %s15821_s22 = sld [smem:[#allocation84_spill]]  ;;  %s15822_s7 = sld [smem:[#allocation86_spill]] }
 0x312   : > { %s15823_s9 = sld [smem:[#allocation87_spill]]  ;;  %s1477_s11 = sand.u32 1, %s14276_s0  }
 0x313   : > { %12219 = vmatpush3.bf16.xpose.msra.mxu0 %v13032_v6  ;;  %s11755_s2 = sshll.u32 %s14574_s15, 4  ;;  %s1478_s23 = scalar_lea.vmem [#allocation43], %s1477_s11 }
 0x314   : > { %12257 = vmatpush3.bf16.xpose.msra.mxu1 %v13033_v7  ;;  %12224 = vmatprep.subr.bf16.mxu0 %v14355_v1  ;;  %s10653_s16 = sshll.u32 %s1478_s23, 4  ;;  %s15633_s13 = scalar_lea.hbm %s14551_s25, %s11755_s2  ;;  %s15635_s16 = int_to_ptr.vmem [resolvable:$true] %s10653_s16 }
 0x315   : > { %1495 = vperm.xlu0 %13029, %v1486_v4   ;;  %12270 = vmatprep.subr.bf16.mxu1 %v14355_v1  ;;  %p15824_p2 = scmp.ne.s32.totalorder %s15761_s28, 0  ;;  %s14357_s15 = smov [#allocation43]  }
 0x390   : > { %v1491_v9 = vpop.permute.xlu0 %1490 }
 0x391   : > { %v1504_v11 = vmul.f32 %v11053_v8, %v1491_v9 }
 0x393   : > { %v15078_v16 = vadd.f32 %v11054_v10, %v1504_v11 }
 0x394   : > { %v1496_v12 = vpop.permute.xlu0 %1495 }
 0x395   : > { %v1505_v13 = vmul.f32 %v11053_v8, %v1496_v12 }
 0x397   : > { %v15080_v17 = vadd.f32 %v11054_v10, %v1505_v13 }
 0x399   : > { %v15084_v18 = vpack.c.bf16 %v15080_v17, %v15078_v16 }
 0x39b   : > { %12221 = vmatmul.mubr.bf16.vlgmr.msra.gmra.mrb[0].mxu0 %v15084_v18  ;;  %12259 = vmatmul.mubr.bf16.vlgmr.msra.gmra.mrb[0].mxu1 %v15084_v18 }
 0x39c   : > { %12225 = vmatpush3.bf16.xpose.msra.mxu0 %v13034_v14  ;;  %12271 = vmatpush3.bf16.xpose.msra.mxu1 %v13035_v15  ;;  %v13042_v14 = vld [vmem:[%s15816_s1] sm:$0xff]   ;;  %v13043_v15 = vld [vmem:[%s15816_s1 + $0x8] sm:$0xff]  }
 0x39d   : > { %12226 = vmatprep.subr.bf16.mxu0 %v14355_v1  ;;  %12272 = vmatprep.subr.bf16.mxu1 %v14355_v1 }
 0x39e   : > { %12228 = vmatprep.mubr.msk.bf16.mxu0 %vm14356_vm0, %v14355_v1  ;;  %12274 = vmatprep.mubr.msk.bf16.mxu1 %vm14356_vm0, %v14355_v1 }
 0x3a4   : > { %12227 = vmatpush3.bf16.xpose.msra.mxu0 %v13036_v19  ;;  %12273 = vmatpush3.bf16.xpose.msra.mxu1 %v13037_v20 }
 0x3a5   : > { %12232 = vmatprep.subr.bf16.mxu0 %v14355_v1  ;;  %12300 = vmatprep.subr.bf16.mxu1 %v14355_v1 }
 0x3ab   : > { %12229 = vmatmul.mubr.bf16.vlgmr.msra.gmra.mrb[4].mxu0 %v15084_v18  ;;  %12275 = vmatmul.mubr.bf16.vlgmr.msra.gmra.mrb[4].mxu1 %v15084_v18 }
 0x3ac   : > { %12233 = vmatpush3.bf16.xpose.msra.mxu0 %v13038_v21  ;;  %12236 = vmatprep.mubr.msk.bf16.mxu0 %vm14356_vm0, %v14355_v1 }
 0x3ad   : > { %12234 = vmatprep.subr.bf16.mxu0 %v14355_v1  ;;  %12304 = vmatprep.mubr.msk.bf16.mxu1 %vm14356_vm0, %v14355_v1 }
 0x3ae   : > { %12301 = vmatpush3.bf16.msra.mxu1 %v13042_v14  ;;  %v13047_v14 = vld [vmem:[%s15816_s1 + $0x18] sm:$0xff]  }
 0x3af   : > { %12302 = vmatprep.subr.bf16.mxu1 %v14355_v1 }
 0x3b2   : > { %12303 = vmatpush3.bf16.msra.mxu1 %v13043_v15 }
 0x3b3   : > { %12316 = vmatprep.subr.bf16.mxu1 %v14355_v1 }
 0x3b4   : > { %12235 = vmatpush3.bf16.xpose.msra.mxu0 %v13039_v22 }
 0x3bb   : > { %12237 = vmatmul.mubr.bf16.vlgmr.msra.gmra.mrb[8].mxu0 %v15084_v18 }
 0x46e   : > { %v1573_v24 = vpop.f32.mrb[0].mxu0  ;;  %v15104_v25 = vpop.f32.mrb[0].mxu1 }
 0x46f   : > { %v1574_v26 = vadd.f32 %v11055_v23, %v1573_v24  ;;  %v12222_v27 = vpop.f32.mrb[1].mxu0  ;;  %v12260_v28 = vpop.f32.mrb[1].mxu1  ;;  %v13040_v24 = vld [vmem:[#allocation8 + $0x10] sm:$0xff]  }
 0x470   : > { %v1576_v30 = vpop.f32.mrb[2].mxu0  ;;  %v1969_v31 = vpop.f32.mrb[2].mxu1  ;;  %v13041_v27 = vld [vmem:[#allocation8 + $0x18] sm:$0xff]   ;;  %v1967_v28 = vadd.f32 %v15106_v29, %v15104_v25 }
 0x471   : > { %v15109_v32 = vadd.f32 %v15106_v29, %v1969_v31  ;;  %v12223_v33 = vpop.f32.mrb[3].mxu0  ;;  %12244 = vmatprep.mubr.msk.f32.mxu0 %vm1708_vm1, %v1574_v26  ;;  %v12261_v34 = vpop.f32.mrb[3].mxu1  ;;  %v1577_v52 = vadd.f32 %v11055_v23, %v1576_v30 }
 0x472   : > { %v13044_v33 = vld [vmem:[#allocation8 + $0x20] sm:$0xff]  }
 0x47e   : > { %v1637_v36 = vpop.f32.mrb[4].mxu0  ;;  %v2098_v38 = vpop.f32.mrb[4].mxu1 }
 0x47f   : > { %v12230_v39 = vpop.f32.mrb[5].mxu0  ;;  %v12276_v40 = vpop.f32.mrb[5].mxu1  ;;  %v1638_v43 = vadd.f32 %v11058_v35, %v1637_v36  ;;  %v2099_v44 = vadd.f32 %v11076_v37, %v2098_v38  ;;  %v11073_v36 = vld [vmem:[#allocation13 + $0x1] ss:$0 sm:$0xff] }
 0x480   : > { %v1640_v41 = vpop.f32.mrb[6].mxu0  ;;  %v2101_v42 = vpop.f32.mrb[6].mxu1 }
 0x481   : > { %v1641_v45 = vadd.f32 %v11058_v35, %v1640_v41  ;;  %v2102_v46 = vadd.f32 %v11076_v37, %v2101_v42  ;;  %v12231_v47 = vpop.f32.mrb[7].mxu0  ;;  %v12277_v48 = vpop.f32.mrb[7].mxu1  ;;  %v13045_v35 = vld [vmem:[#allocation8 + $0x28] sm:$0xff]  }
 0x483   : > { %v12604_v50 = vpack.c.bf16 %v1641_v45, %v1638_v43  ;;  %v15118_v51 = vpack.c.bf16 %v2102_v46, %v2099_v44  ;;  %v11098_v46 = vld [vmem:[#allocation13 + $0x2] ss:$0 sm:$0xff] }
 0x485   : > { %12606 = vmatprep.subr.msk.bf16.mxu0 %vm15114_vm2, %v12604_v50 }
 0x486   : > { %12609 = vmatpush3.bf16.xpose.msk.msra.mxu0 %vm15114_vm2, %v12604_v50 }
 0x48d   : > { %12245 = vmatmul.mubr.msk.f32.vlgmr.msra.gmra.mrb[12].mxu0 %vm1708_vm1, %v1577_v52 }
 0x48e   : > { %v1701_v54 = vpop.f32.mrb[8].mxu0 }
 0x48f   : > { %v12238_v55 = vpop.f32.mrb[9].mxu0  ;;  %v1702_v57 = vadd.f32 %v11061_v53, %v1701_v54 }
 0x490   : > { %v1704_v56 = vpop.f32.mrb[10].mxu0 }
 0x491   : > { %v1705_v58 = vadd.f32 %v11061_v53, %v1704_v56  ;;  %v12239_v59 = vpop.f32.mrb[11].mxu0 }
 0x493   : > { %v12610_v60 = vpack.c.bf16 %v1705_v58, %v1702_v57 }
 0x495   : > { %12611 = vmatprep.subr.bf16.mxu0 %v12610_v60 }
 0x496   : > { %12613 = vmatpush3.bf16.msra.mxu0 %v12610_v60 }
 0x497   : > { %12262 = vmatprep.subr.bf16.mxu0 %v14355_v1 }
 0x560   : > { %v12246_v61 = vpop.f32.mrb[12].mxu0 }
 0x561   : > { %v1787_v62 = vpop.f32.mrb[13].mxu0  ;;  %v1797_v0 = vmul.f32 0.17677669, %v12246_v61 }
 0x562   : > { %v1796_v63 = vmul.f32 0.17677669, %v1787_v62 }
 0x563   : > { %v1802_v3 = vsel %vm1798_vm3, %v1797_v0, -inf }
 0x564   : > { %v1799_v2 = vsel %vm1798_vm3, %v1796_v63, -inf }
 0x565   : > { %1800 = vmax.xlane.f32.xlu1 %v1799_v2 }
 0x569   : > { %1803 = vmax.xlane.f32.xlu1 %v1802_v3 }
 0x5f2   : > { %v1801_v4 = vpop.xlane.xlu1 %1800 }
 0x5f3   : > { %v1805_v5 = vsub.f32 %v1796_v63, %v1801_v4 }
 0x5f5   : > { %v1807_v6 = vmul.f32 1.442695, %v1805_v5 }
 0x5f6   : > { %v1804_v7 = vpop.xlane.xlu1 %1803 }
 0x5f7   : > { %13358 = vpow2.f32 %v1807_v6  ;;  %v1806_v8 = vsub.f32 %v1797_v0, %v1804_v7 }
 0x5f9   : > { %v1809_v9 = vmul.f32 1.442695, %v1806_v8 }
 0x5fb   : > { %13360 = vpow2.f32 %v1809_v9 }
 0x601   : > { %v13359_v10 = vpop.eup %13358 }
 0x602   : > { %v1811_v11 = vsel %vm1798_vm3, %v13359_v10, 0.0 }
 0x603   : > { %1812 = vadd.xlane.f32.xlu0 %v1811_v11 }
 0x605   : > { %v13361_v12 = vpop.eup %13360 }
 0x606   : > { %v1814_v13 = vsel %vm1798_vm3, %v13361_v12, 0.0 }
 0x607   : > { %1815 = vadd.xlane.f32.xlu1 %v1814_v13 }
 0x690   : > { %v1813_v19 = vpop.xlane.xlu0 %1812 }
 0x691   : > { %13362 = vrcp.f32 %v1813_v19 }
 0x694   : > { %v1816_v20 = vpop.xlane.xlu1 %1815 }
 0x695   : > { %13364 = vrcp.f32 %v1816_v20  ;;  %v13048_v20 = vld [vmem:[#allocation7 + $0x20] sm:$0xff]  }
 0x69b   : > { %v13363_v21 = vpop.eup %13362 }
 0x69c   : > { %v1819_v22 = vmul.f32 %v13363_v21, %v13359_v10 }
 0x69e   : > { %12251 = vmatprep.mubr.msk.f32.mxu0 %vm1798_vm3, %v1819_v22  ;;  %v13049_v22 = vld [vmem:[#allocation7 + $0x28] sm:$0xff]  }
 0x69f   : > { %v13365_v23 = vpop.eup %13364 }
 0x6a0   : > { %v1820_v26 = vmul.f32 %v13365_v23, %v13361_v12  ;;  %v13046_v12 = vld [vmem:[%s15816_s1 + $0x10] sm:$0xff]  }
 0x6a1   : > { %v13050_v23 = vld [vmem:[#allocation10 + $0x20] sm:$0xff]  }
 0x6a2   : > { %12252 = vmatmul.mubr.msk.f32.vlgmr.msra.gmra.mrb[14].mxu0 %vm1798_vm3, %v1820_v26  ;;  %v13052_v26 = vld [vmem:[#allocation7 + $0x30] sm:$0xff]  }
 0x6a3   : > { %12263 = vmatpush3.bf16.xpose.msra.mxu0 %v13040_v24  ;;  %12266 = vmatprep.mubr.msk.bf16.mxu0 %vm14356_vm0, %v14355_v1  ;;  %v13051_v24 = vld [vmem:[#allocation10 + $0x28] sm:$0xff]  }
 0x6a4   : > { %12264 = vmatprep.subr.bf16.mxu0 %v14355_v1 }
 0x6ab   : > { %12265 = vmatpush3.bf16.xpose.msra.mxu0 %v13041_v27  ;;  %v13053_v27 = vld [vmem:[#allocation7 + $0x38] sm:$0xff]  }
 0x6b2   : > { %12267 = vmatmul.mubr.bf16.vlgmr.msra.gmra.mrb[16].mxu0 %v15084_v18 }
 0x6b3   : > { %12282 = vmatprep.mubr.msk.f32.mxu0 %vm1708_vm1, %v1967_v28  ;;  %v13054_v28 = vld [vmem:[#allocation10 + $0x30] sm:$0xff]  }
 0x775   : > { %v12253_v30 = vpop.f32.mrb[14].mxu0 }
 0x776   : > { %v1893_v31 = vpop.f32.mrb[15].mxu0 }
 0x777   : > { %v1902_v34 = vpack.c.bf16 %v12253_v30, %v1893_v31  ;;  %v13055_v30 = vld [vmem:[#allocation10 + $0x38] sm:$0xff]  }
 0x779   : > { %12305 = vmatmul.mubr.msk.bf16.vlgmr.msra.gmra.mrb[8].mxu1 %vm1708_vm1, %v1902_v34 }
 0x77a   : > { %12317 = vmatpush3.bf16.xpose.msra.mxu1 %v13044_v33  ;;  %12320 = vmatprep.mubr.msk.bf16.mxu1 %vm14356_vm0, %v14355_v1 }
 0x77b   : > { %12318 = vmatprep.subr.bf16.mxu1 %v14355_v1 }
 0x782   : > { %12319 = vmatpush3.bf16.xpose.msra.mxu1 %v13045_v35 }
 0x785   : > { %v2032_v25 = vpop.f32.mrb[16].mxu0 }
 0x786   : > { %v12268_v29 = vpop.f32.mrb[17].mxu0  ;;  %v2033_v38 = vadd.f32 %v11073_v36, %v2032_v25 }
 0x787   : > { %v2035_v37 = vpop.f32.mrb[18].mxu0  ;;  %v11095_v29 = vld [vmem:[#allocation11 + $0x2] ss:$0 sm:$0xff] }
 0x788   : > { %v2036_v39 = vadd.f32 %v11073_v36, %v2035_v37  ;;  %v12269_v40 = vpop.f32.mrb[19].mxu0 }
 0x789   : > { %12321 = vmatmul.mubr.bf16.vlgmr.msra.gmra.mrb[12].mxu1 %v15084_v18 }
 0x78a   : > { %v12614_v41 = vpack.c.bf16 %v2036_v39, %v2033_v38 }
 0x78c   : > { %12616 = vmatprep.subr.msk.bf16.mxu0 %vm15114_vm2, %v12614_v41 }
 0x78d   : > { %12619 = vmatpush3.bf16.xpose.msk.msra.mxu0 %vm15114_vm2, %v12614_v41 }
 0x78e   : > { %12621 = vmatprep.subr.bf16.mxu0 %v15118_v51 }
 0x794   : > { %12283 = vmatmul.mubr.msk.f32.vlgmr.msra.gmra.mrb[20].mxu0 %vm1708_vm1, %v15109_v32 }
 0x795   : > { %12623 = vmatpush3.bf16.msra.mxu0 %v15118_v51 }
 0x796   : > { %12292 = vmatprep.subr.bf16.mxu0 %v14355_v1 }
 0x84c   : > { %v15157_v42 = vpop.f32.mrb[8].mxu1 }
 0x84d   : > { %v12306_v43 = vpop.f32.mrb[9].mxu1 }
 0x84e   : > { %v15159_v44 = vpop.f32.mrb[10].mxu1 }
 0x84f   : > { %v12307_v45 = vpop.f32.mrb[11].mxu1 }
 0x850   : > { %v11101_v45 = vld [vmem:[#allocation14 + $0x2] ss:$0 sm:$0xff] }
 0x85c   : > { %v2540_v47 = vpop.f32.mrb[12].mxu1 }
 0x85d   : > { %v12322_v48 = vpop.f32.mrb[13].mxu1  ;;  %v2541_v52 = vadd.f32 %v11098_v46, %v2540_v47 }
 0x85e   : > { %v2543_v50 = vpop.f32.mrb[14].mxu1 }
 0x85f   : > { %v2544_v53 = vadd.f32 %v11098_v46, %v2543_v50  ;;  %v12323_v54 = vpop.f32.mrb[15].mxu1 }
 0x861   : > { %v12624_v55 = vpack.c.bf16 %v2544_v53, %v2541_v52 }
 0x863   : > { %12626 = vmatprep.subr.msk.bf16.mxu1 %vm15114_vm2, %v12624_v55 }
 0x864   : > { %12629 = vmatpush3.bf16.xpose.msk.msra.mxu1 %vm15114_vm2, %v12624_v55  ;;  %v11117_v55 = vld [vmem:[#allocation11 + $0x3] ss:$0 sm:$0xff] }
 0x867   : > { %v12284_v32 = vpop.f32.mrb[20].mxu0 }
 0x868   : > { %v2183_v51 = vpop.f32.mrb[21].mxu0  ;;  %v2193_v57 = vmul.f32 0.17677669, %v12284_v32 }
 0x869   : > { %v2192_v56 = vmul.f32 0.17677669, %v2183_v51 }
 0x86a   : > { %v2197_v59 = vsel %vm1798_vm3, %v2193_v57, -inf }
 0x86b   : > { %v2194_v58 = vsel %vm1798_vm3, %v2192_v56, -inf }
 0x86c   : > { %2195 = vmax.xlane.f32.xlu1 %v2194_v58 }
 0x870   : > { %2198 = vmax.xlane.f32.xlu1 %v2197_v59 }
 0x8f9   : > { %v2196_v60 = vpop.xlane.xlu1 %2195 }
 0x8fa   : > { %v2200_v61 = vsub.f32 %v2192_v56, %v2196_v60 }
 0x8fc   : > { %v2202_v62 = vmul.f32 1.442695, %v2200_v61 }
 0x8fd   : > { %v2199_v63 = vpop.xlane.xlu1 %2198 }
 0x8fe   : > { %13366 = vpow2.f32 %v2202_v62  ;;  %v2201_v0 = vsub.f32 %v2193_v57, %v2199_v63  ;;  %v11123_v57 = vld [vmem:[#allocation14 + $0x3] ss:$0 sm:$0xff] }
 0x900   : > { %v2204_v2 = vmul.f32 1.442695, %v2201_v0 }
 0x902   : > { %13368 = vpow2.f32 %v2204_v2 }
 0x908   : > { %v13367_v3 = vpop.eup %13366 }
 0x909   : > { %v2206_v4 = vsel %vm1798_vm3, %v13367_v3, 0.0 }
 0x90a   : > { %2207 = vadd.xlane.f32.xlu1 %v2206_v4 }
 0x90c   : > { %v13369_v5 = vpop.eup %13368 }
 0x90d   : > { %v2209_v6 = vsel %vm1798_vm3, %v13369_v5, 0.0 }
 0x90e   : > { %2210 = vadd.xlane.f32.xlu1 %v2209_v6 }
 0x997   : > { %v2208_v7 = vpop.xlane.xlu1 %2207 }
 0x998   : > { %13370 = vrcp.f32 %v2208_v7 }
 0x99b   : > { %v2211_v8 = vpop.xlane.xlu1 %2210 }
 0x99c   : > { %13372 = vrcp.f32 %v2211_v8 }
 0x9a2   : > { %v13371_v9 = vpop.eup %13370 }
 0x9a3   : > { %v2214_v10 = vmul.f32 %v13371_v9, %v13367_v3 }
 0x9a5   : > { %12289 = vmatprep.mubr.msk.f32.mxu0 %vm1798_vm3, %v2214_v10 }
 0x9a6   : > { %v13373_v11 = vpop.eup %13372 }
 0x9a7   : > { %v2215_v13 = vmul.f32 %v13373_v11, %v13369_v5 }
 0x9a9   : > { %12290 = vmatmul.mubr.msk.f32.vlgmr.msra.gmra.mrb[22].mxu0 %vm1798_vm3, %v2215_v13 }
 0x9aa   : > { %12293 = vmatpush3.bf16.msra.mxu0 %v13046_v12  ;;  %12296 = vmatprep.mubr.msk.bf16.mxu0 %vm14356_vm0, %v14355_v1 }
 0x9ab   : > { %12294 = vmatprep.subr.bf16.mxu0 %v14355_v1 }
 0x9ae   : > { %12295 = vmatpush3.bf16.msra.mxu0 %v13047_v14 }
 0x9af   : > { %12308 = vmatprep.subr.bf16.mxu0 %v14355_v1 }
 0xa7c   : > { %v12291_v15 = vpop.f32.mrb[22].mxu0 }
 0xa7d   : > { %v2288_v19 = vpop.f32.mrb[23].mxu0 }
 0xa7e   : > { %v2297_v21 = vpack.c.bf16 %v12291_v15, %v2288_v19 }
 0xa80   : > { %12297 = vmatmul.mubr.msk.bf16.vlgmr.msra.gmra.mrb[24].mxu0 %vm1708_vm1, %v2297_v21 }
 0xa81   : > { %12309 = vmatpush3.bf16.xpose.msra.mxu0 %v13048_v20  ;;  %12312 = vmatprep.mubr.msk.bf16.mxu0 %vm14356_vm0, %v14355_v1 }
 0xa82   : > { %12310 = vmatprep.subr.bf16.mxu0 %v14355_v1 }
 0xa89   : > { %12311 = vmatpush3.bf16.xpose.msra.mxu0 %v13049_v22 }
 0xa8a   : > { %12324 = vmatprep.subr.bf16.mxu0 %v14355_v1 }
 0xa90   : > { %12313 = vmatmul.mubr.bf16.vlgmr.msra.gmra.mrb[28].mxu0 %v15084_v18 }
 0xa91   : > { %12325 = vmatpush3.bf16.xpose.msra.mxu0 %v13050_v23  ;;  %12328 = vmatprep.mubr.msk.bf16.mxu0 %vm14356_vm0, %v14355_v1 }
 0xa92   : > { %12326 = vmatprep.subr.bf16.mxu0 %v14355_v1 }
 0xa99   : > { %12327 = vmatpush3.bf16.xpose.msra.mxu0 %v13051_v24 }
 0xa9a   : > { %12354 = vmatprep.subr.bf16.mxu0 %v14355_v1 }
 0xaa0   : > { %12329 = vmatmul.mubr.bf16.vlgmr.msra.gmra.mrb[32].mxu0 %v15084_v18 }
 0xaa1   : > { %12355 = vmatpush3.bf16.xpose.msra.mxu0 %v13052_v26  ;;  %12358 = vmatprep.mubr.msk.bf16.mxu0 %vm14356_vm0, %v14355_v1 }
 0xaa2   : > { %12356 = vmatprep.subr.bf16.mxu0 %v14355_v1 }
 0xaa9   : > { %12357 = vmatpush3.bf16.xpose.msra.mxu0 %v13053_v27  ;;  %v13056_v27 = vld [vmem:[%s15816_s1 + $0x20] sm:$0xff]  }
 0xaaa   : > { %12370 = vmatprep.subr.bf16.mxu0 %v14355_v1 }
 0xab0   : > { %12359 = vmatmul.mubr.bf16.vlgmr.msra.gmra.mrb[36].mxu0 %v15084_v18 }
 0xab1   : > { %12371 = vmatpush3.bf16.xpose.msra.mxu0 %v13054_v28  ;;  %12374 = vmatprep.mubr.msk.bf16.mxu0 %vm14356_vm0, %v14355_v1 }
 0xab2   : > { %12372 = vmatprep.subr.bf16.mxu0 %v14355_v1 }
 0xab9   : > { %12373 = vmatpush3.bf16.xpose.msra.mxu0 %v13055_v30  ;;  %v13057_v30 = vld [vmem:[%s15816_s1 + $0x28] sm:$0xff]  }
 0xaba   : > { %12392 = vmatprep.subr.bf16.mxu0 %v14355_v1 }
 0xac0   : > { %12375 = vmatmul.mubr.bf16.vlgmr.msra.gmra.mrb[40].mxu0 %v15084_v18 }
 0xac1   : > { %12396 = vmatprep.mubr.msk.bf16.mxu0 %vm14356_vm0, %v14355_v1 }
 0xb53   : > { %v2352_v31 = vpop.f32.mrb[24].mxu0 }
 0xb54   : > { %v15201_v33 = vadd.f32 %v15157_v42, %v2352_v31  ;;  %v12298_v34 = vpop.f32.mrb[25].mxu0 }
 0xb55   : > { %v2355_v35 = vpop.f32.mrb[26].mxu0 }
 0xb56   : > { %v15204_v36 = vadd.f32 %v15159_v44, %v2355_v35  ;;  %v12299_v25 = vpop.f32.mrb[27].mxu0  ;;  %v13058_v35 = vld [vmem:[#allocation8 + $0x30] sm:$0xff]  }
 0xb63   : > { %v2474_v37 = vpop.f32.mrb[28].mxu0 }
 0xb64   : > { %v2475_v38 = vadd.f32 %v11095_v29, %v2474_v37  ;;  %v12314_v39 = vpop.f32.mrb[29].mxu0 }
 0xb65   : > { %v2477_v40 = vpop.f32.mrb[30].mxu0 }
 0xb66   : > { %v2478_v41 = vadd.f32 %v11095_v29, %v2477_v40  ;;  %v12315_v43 = vpop.f32.mrb[31].mxu0  ;;  %12336 = vmatprep.mubr.msk.f32.mxu1 %vm1708_vm1, %v2475_v38  ;;  %v13059_v29 = vld [vmem:[#allocation8 + $0x38] sm:$0xff]  }
 0xb68   : > { %12337 = vmatmul.mubr.msk.f32.vlgmr.msra.gmra.mrb[16].mxu1 %vm1708_vm1, %v2478_v41 }
 0xb73   : > { %v2606_v42 = vpop.f32.mrb[32].mxu0 }
 0xb74   : > { %v12330_v46 = vpop.f32.mrb[33].mxu0  ;;  %v2607_v48 = vadd.f32 %v11101_v45, %v2606_v42  ;;  %v11120_v42 = vld [vmem:[#allocation13 + $0x3] ss:$0 sm:$0xff] }
 0xb75   : > { %v2609_v47 = vpop.f32.mrb[34].mxu0 }
 0xb76   : > { %v2610_v50 = vadd.f32 %v11101_v45, %v2609_v47  ;;  %v12331_v44 = vpop.f32.mrb[35].mxu0 }
 0xb78   : > { %v12630_v52 = vpack.c.bf16 %v2610_v50, %v2607_v48 }
 0xb7a   : > { %12631 = vmatprep.subr.bf16.mxu1 %v12630_v52 }
 0xb7b   : > { %12633 = vmatpush3.bf16.msra.mxu1 %v12630_v52 }
 0xb7c   : > { %12346 = vmatprep.subr.bf16.mxu1 %v14355_v1 }
 0xb83   : > { %v15209_v53 = vpop.f32.mrb[36].mxu0 }
 0xb84   : > { %v12360_v54 = vpop.f32.mrb[37].mxu0  ;;  %v2929_v37 = vadd.f32 %v11117_v55, %v15209_v53 }
 0xb85   : > { %v2931_v32 = vpop.f32.mrb[38].mxu0 }
 0xb86   : > { %v15211_v51 = vadd.f32 %v11117_v55, %v2931_v32  ;;  %v12361_v56 = vpop.f32.mrb[39].mxu0 }
 0xb93   : > { %v3060_v58 = vpop.f32.mrb[40].mxu0 }
 0xb94   : > { %v12376_v59 = vpop.f32.mrb[41].mxu0  ;;  %v3061_v61 = vadd.f32 %v11123_v57, %v3060_v58 }
 0xb95   : > { %v3063_v60 = vpop.f32.mrb[42].mxu0 }
 0xb96   : > { %v3064_v62 = vadd.f32 %v11123_v57, %v3063_v60  ;;  %v12377_v63 = vpop.f32.mrb[43].mxu0 }
 0xb98   : > { %v15213_v0 = vpack.c.bf16 %v3064_v62, %v3061_v61 }
 0xc3b   : > { %v12338_v2 = vpop.f32.mrb[16].mxu1 }
 0xc3c   : > { %v2691_v3 = vpop.f32.mrb[17].mxu1  ;;  %v2701_v5 = vmul.f32 0.17677669, %v12338_v2  ;;  %v13060_v2 = vld [vmem:[%s15816_s1 + $0x30] sm:$0xff]  }
 0xc3d   : > { %v2700_v4 = vmul.f32 0.17677669, %v2691_v3  ;;  %12393 = vmatpush3.bf16.msra.mxu0 %v13060_v2  ;;  %v13094_v2 = vld [vmem:[#allocation20 + $0x140] sm:$0xff]  }
 0xc3e   : > { %v2705_v7 = vsel %vm1798_vm3, %v2701_v5, -inf  ;;  %12394 = vmatprep.subr.bf16.mxu0 %v14355_v1 }
 0xc3f   : > { %v2702_v6 = vsel %vm1798_vm3, %v2700_v4, -inf }
 0xc40   : > { %2703 = vmax.xlane.f32.xlu1 %v2702_v6 }
 0xc44   : > { %2706 = vmax.xlane.f32.xlu1 %v2705_v7 }
 0xccd   : > { %v2704_v8 = vpop.xlane.xlu1 %2703 }
 0xcce   : > { %v2708_v9 = vsub.f32 %v2700_v4, %v2704_v8 }
 0xcd0   : > { %v2710_v10 = vmul.f32 1.442695, %v2708_v9  ;;  %v13061_v9 = vld [vmem:[%s15816_s1 + $0x38] sm:$0xff]  }
 0xcd1   : > { %v2707_v11 = vpop.xlane.xlu1 %2706  ;;  %12395 = vmatpush3.bf16.msra.mxu0 %v13061_v9 }
 0xcd2   : > { %13374 = vpow2.f32 %v2710_v10  ;;  %v2709_v12 = vsub.f32 %v2701_v5, %v2707_v11 }
 0xcd4   : > { %v2712_v13 = vmul.f32 1.442695, %v2709_v12 }
 0xcd6   : > { %13376 = vpow2.f32 %v2712_v13 }
 0xcdc   : > { %v13375_v14 = vpop.eup %13374 }
 0xcdd   : > { %v2714_v15 = vsel %vm1798_vm3, %v13375_v14, 0.0 }
 0xcde   : > { %2715 = vadd.xlane.f32.xlu1 %v2714_v15 }
 0xce0   : > { %v13377_v19 = vpop.eup %13376 }
 0xce1   : > { %v2717_v20 = vsel %vm1798_vm3, %v13377_v19, 0.0 }
 0xce2   : > { %2718 = vadd.xlane.f32.xlu0 %v2717_v20 }
 0xd6b   : > { %v2716_v21 = vpop.xlane.xlu1 %2715 }
 0xd6c   : > { %13378 = vrcp.f32 %v2716_v21 }
 0xd6f   : > { %v2719_v22 = vpop.xlane.xlu0 %2718 }
 0xd70   : > { %13380 = vrcp.f32 %v2719_v22 }
 0xd76   : > { %v13379_v23 = vpop.eup %13378 }
 0xd77   : > { %v2722_v24 = vmul.f32 %v13379_v23, %v13375_v14  ;;  %v11139_v14 = vld [vmem:[#allocation16] ss:$0 sm:$0xff] }
 0xd79   : > { %12343 = vmatprep.mubr.msk.f32.mxu1 %vm1798_vm3, %v2722_v24 }
 0xd7a   : > { %v13381_v26 = vpop.eup %13380 }
 0xd7b   : > { %v2723_v28 = vmul.f32 %v13381_v26, %v13377_v19 }
 0xd7d   : > { %12344 = vmatmul.mubr.msk.f32.vlgmr.msra.gmra.mrb[18].mxu1 %vm1798_vm3, %v2723_v28  ;;  %v13062_v28 = vld [vmem:[#allocation20 + $0x40] sm:$0xff]  }
 0xd7e   : > { %12347 = vmatpush3.bf16.msra.mxu1 %v13056_v27  ;;  %12350 = vmatprep.mubr.msk.bf16.mxu1 %vm14356_vm0, %v14355_v1 }
 0xd7f   : > { %12348 = vmatprep.subr.bf16.mxu1 %v14355_v1 }
 0xd82   : > { %12349 = vmatpush3.bf16.msra.mxu1 %v13057_v30  ;;  %v13063_v30 = vld [vmem:[#allocation20 + $0xc0] sm:$0xff]  }
 0xd83   : > { %12362 = vmatprep.subr.bf16.mxu1 %v14355_v1  ;;  %11857 = vmatprep.subr.bf16.mxu0 %v13063_v30  ;;  %v13100_v30 = vld [vmem:[#allocation20 + $0x108] sm:$0xff]  }
 0xe50   : > { %v12345_v31 = vpop.f32.mrb[18].mxu1 }
 0xe51   : > { %v2796_v34 = vpop.f32.mrb[19].mxu1 }
 0xe52   : > { %v2805_v25 = vpack.c.bf16 %v12345_v31, %v2796_v34  ;;  %v13064_v31 = vld [vmem:[#allocation20] sm:$0xff]  }
 0xe53   : > { %v13065_v34 = vld [vmem:[#allocation20 + $0x80] sm:$0xff]  }
 0xe54   : > { %12351 = vmatmul.mubr.msk.bf16.vlgmr.msra.gmra.mrb[20].mxu1 %vm1708_vm1, %v2805_v25  ;;  %v13067_v25 = vld [vmem:[#allocation20 + $0xc8] sm:$0xff]  }
 0xe55   : > { %12363 = vmatpush3.bf16.xpose.msra.mxu1 %v13058_v35  ;;  %12366 = vmatprep.mubr.msk.bf16.mxu1 %vm14356_vm0, %v14355_v1  ;;  %v13066_v35 = vld [vmem:[#allocation20 + $0x48] sm:$0xff]  }
 0xe56   : > { %12364 = vmatprep.subr.bf16.mxu1 %v14355_v1 }
 0xe5d   : > { %12365 = vmatpush3.bf16.xpose.msra.mxu1 %v13059_v29  ;;  %v13068_v29 = vld [vmem:[#allocation20 + $0x8] sm:$0xff]  }
 0xe64   : > { %12367 = vmatmul.mubr.bf16.vlgmr.msra.gmra.mrb[24].mxu1 %v15084_v18 }
 0xe65   : > { %12382 = vmatprep.mubr.msk.f32.mxu1 %vm1708_vm1, %v2929_v37  ;;  %v13069_v37 = vld [vmem:[#allocation20 + $0x88] sm:$0xff]  }
 0xf27   : > { %v2860_v38 = vpop.f32.mrb[20].mxu1 }
 0xf28   : > { %v2867_v39 = vadd.f32 %v2860_v38, %v15201_v33  ;;  %v12352_v40 = vpop.f32.mrb[21].mxu1  ;;  %v13070_v38 = vld [vmem:[#allocation20 + $0x50] sm:$0xff]  }
 0xf29   : > { %v2863_v41 = vpop.f32.mrb[22].mxu1  ;;  %v13074_v40 = vld [vmem:[#allocation20 + $0x58] sm:$0xff]  }
 0xf2a   : > { %v2868_v43 = vadd.f32 %v2863_v41, %v15204_v36  ;;  %v12353_v45 = vpop.f32.mrb[23].mxu1  ;;  %v13075_v41 = vld [vmem:[#allocation20 + $0xd8] sm:$0xff]  }
 0xf2b   : > { %v13077_v45 = vld [vmem:[#allocation20 + $0x98] sm:$0xff]  }
 0xf37   : > { %v2994_v46 = vpop.f32.mrb[24].mxu1 }
 0xf38   : > { %v12368_v47 = vpop.f32.mrb[25].mxu1  ;;  %v2995_v50 = vadd.f32 %v11120_v42, %v2994_v46  ;;  %v13079_v46 = vld [vmem:[#allocation20 + $0xe0] sm:$0xff]  }
 0xf39   : > { %v2997_v48 = vpop.f32.mrb[26].mxu1  ;;  %v13080_v47 = vld [vmem:[#allocation20 + $0x20] sm:$0xff]  }
 0xf3a   : > { %v2998_v44 = vadd.f32 %v11120_v42, %v2997_v48  ;;  %v12369_v52 = vpop.f32.mrb[27].mxu1  ;;  %v13078_v42 = vld [vmem:[#allocation20 + $0x60] sm:$0xff]  }
 0xf3b   : > { %v13081_v48 = vld [vmem:[#allocation20 + $0xa0] sm:$0xff]  }
 0xf3c   : > { %v12634_v53 = vpack.c.bf16 %v2998_v44, %v2995_v50 }
 0xf3e   : > { %12636 = vmatprep.subr.msk.bf16.mxu1 %vm15114_vm2, %v12634_v53 }
 0xf3f   : > { %12639 = vmatpush3.bf16.xpose.msk.msra.mxu1 %vm15114_vm2, %v12634_v53 }
 0xf40   : > { %12641 = vmatprep.subr.bf16.mxu1 %v15213_v0 }
 0xf46   : > { %12383 = vmatmul.mubr.msk.f32.vlgmr.msra.gmra.mrb[28].mxu1 %vm1708_vm1, %v15211_v51 }
 0xf47   : > { %12643 = vmatpush3.bf16.msra.mxu1 %v15213_v0 }
 0xf48   : > { %11839 = vmatprep.subr.bf16.mxu1 %v13062_v28  ;;  %v13099_v28 = vld [vmem:[#allocation20 + $0x1c8] sm:$0xff]  }
0x1019   : > { %v12384_v18 = vpop.f32.mrb[28].mxu1 }
0x101a   : > { %v3155_v33 = vmul.f32 0.17677669, %v12384_v18  ;;  %v3145_v36 = vpop.f32.mrb[29].mxu1 }
0x101b   : > { %v3154_v54 = vmul.f32 0.17677669, %v3145_v36 }
0x101c   : > { %v3159_v55 = vsel %vm1798_vm3, %v3155_v33, -inf }
0x101d   : > { %3160 = vmax.xlane.f32.xlu0 %v3159_v55  ;;  %v3156_v32 = vsel %vm1798_vm3, %v3154_v54, -inf  ;;  %v13082_v55 = vld [vmem:[#allocation20 + $0x68] sm:$0xff]  }
0x101e   : > { %3157 = vmax.xlane.f32.xlu1 %v3156_v32  ;;  %v13083_v32 = vld [vmem:[#allocation20 + $0xe8] sm:$0xff]  }
0x10aa   : > { %v3161_v56 = vpop.xlane.xlu0 %3160 }
0x10ab   : > { %v3163_v57 = vsub.f32 %v3155_v33, %v3161_v56  ;;  %v3158_v58 = vpop.xlane.xlu1 %3157  ;;  %v13084_v56 = vld [vmem:[#allocation20 + $0x28] sm:$0xff]  }
0x10ac   : > { %v3162_v59 = vsub.f32 %v3154_v54, %v3158_v58  ;;  %v13086_v58 = vld [vmem:[#allocation20 + $0x70] sm:$0xff]  }
0x10ad   : > { %v3166_v60 = vmul.f32 1.442695, %v3163_v57  ;;  %v13085_v57 = vld [vmem:[#allocation20 + $0xa8] sm:$0xff]  }
0x10ae   : > { %v3164_v61 = vmul.f32 1.442695, %v3162_v59  ;;  %v13087_v59 = vld [vmem:[#allocation20 + $0xf0] sm:$0xff]  }
0x10af   : > { %13382 = vpow2.f32 %v3166_v60  ;;  %v13088_v60 = vld [vmem:[#allocation20 + $0x30] sm:$0xff]  }
0x10b0   : > { %13384 = vpow2.f32 %v3164_v61  ;;  %v13089_v61 = vld [vmem:[#allocation20 + $0xb0] sm:$0xff]  }
0x10b9   : > { %v13383_v51 = vpop.eup %13382 }
0x10ba   : > { %v13385_v62 = vpop.eup %13384  ;;  %v3171_v63 = vsel %vm1798_vm3, %v13383_v51, 0.0 }
0x10bb   : > { %3172 = vadd.xlane.f32.xlu0 %v3171_v63  ;;  %v3168_v0 = vsel %vm1798_vm3, %v13385_v62, 0.0  ;;  %v13092_v63 = vld [vmem:[#allocation20 + $0x38] sm:$0xff]  }
0x10bc   : > { %3169 = vadd.xlane.f32.xlu1 %v3168_v0  ;;  %v13093_v0 = vld [vmem:[#allocation20 + $0xb8] sm:$0xff]  }
0x1148   : > { %v3173_v3 = vpop.xlane.xlu0 %3172 }
0x1149   : > { %13386 = vrcp.f32 %v3173_v3  ;;  %v3170_v4 = vpop.xlane.xlu1 %3169  ;;  %v13095_v3 = vld [vmem:[#allocation20 + $0x1c0] sm:$0xff]  }
0x114a   : > { %13388 = vrcp.f32 %v3170_v4 }
0x1153   : > { %v13387_v5 = vpop.eup %13386 }
0x1154   : > { %v13389_v6 = vpop.eup %13388  ;;  %v3177_v8 = vmul.f32 %v13387_v5, %v13383_v51  ;;  %v13090_v51 = vld [vmem:[#allocation20 + $0x78] sm:$0xff]  }
0x1155   : > { %v3176_v7 = vmul.f32 %v13389_v6, %v13385_v62  ;;  %v13091_v62 = vld [vmem:[#allocation20 + $0xf8] sm:$0xff]  }
0x1157   : > { %12389 = vmatprep.mubr.msk.f32.mxu1 %vm1798_vm3, %v3176_v7 }
0x1158   : > { %12390 = vmatmul.mubr.msk.f32.vlgmr.msra.gmra.mrb[30].mxu1 %vm1798_vm3, %v3177_v8 }
0x1159   : > { %11840 = vmatpush3.bf16.xpose.msra.mxu1 %v13064_v31  ;;  %v13101_v31 = vld [vmem:[#allocation20 + $0x188] sm:$0xff]  }
0x115a   : > { %11841 = vmatprep.subr.bf16.mxu1 %v13066_v35  ;;  %v13103_v35 = vld [vmem:[#allocation20 + $0x1d0] sm:$0xff]  }
0x1161   : > { %11842 = vmatpush3.bf16.xpose.msra.mxu1 %v13068_v29  ;;  %v13105_v29 = vld [vmem:[#allocation20 + $0x190] sm:$0xff]  }
0x1162   : > { %11843 = vmatprep.subr.bf16.mxu1 %v13070_v38  ;;  %v13107_v38 = vld [vmem:[#allocation20 + $0x1d8] sm:$0xff]  }
0x122b   : > { %v12391_v10 = vpop.f32.mrb[30].mxu1 }
0x122c   : > { %v3250_v11 = vpop.f32.mrb[31].mxu1 }
0x122d   : > { %v3259_v12 = vpack.c.bf16 %v12391_v10, %v3250_v11  ;;  %v11140_v11 = vld [vmem:[#allocation17] ss:$0 sm:$0xff] }
0x122f   : > { %12397 = vmatmul.mubr.msk.bf16.vlgmr.msra.gmra.mrb[44].mxu0 %vm1708_vm1, %v3259_v12 }
0x1230   : > { %11858 = vmatpush3.bf16.xpose.msra.mxu0 %v13065_v34  ;;  %v13102_v34 = vld [vmem:[#allocation20 + $0x150] sm:$0xff]  }
0x1231   : > { %11859 = vmatprep.subr.bf16.mxu0 %v13067_v25  ;;  %v13104_v25 = vld [vmem:[#allocation20 + $0x110] sm:$0xff]  }
0x1238   : > { %11860 = vmatpush3.bf16.xpose.msra.mxu0 %v13069_v37  ;;  %v13106_v37 = vld [vmem:[#allocation20 + $0x158] sm:$0xff]  }
0x1302   : > { %v3314_v13 = vpop.f32.mrb[44].mxu0 }
0x1303   : > { %v3321_v15 = vadd.f32 %v3314_v13, %v2867_v39  ;;  %v12398_v19 = vpop.f32.mrb[45].mxu0  ;;  %v13073_v39 = vld [vmem:[#allocation20 + $0x90] sm:$0xff]  }
0x1304   : > { %v3317_v20 = vpop.f32.mrb[46].mxu0  ;;  %v11141_v19 = vld [vmem:[#allocation19] ss:$0 sm:$0xff] }
0x1305   : > { %v3330_v21 = vadd.f32 %v11139_v14, %v3321_v15  ;;  %v3322_v22 = vadd.f32 %v3317_v20, %v2868_v43  ;;  %v12399_v23 = vpop.f32.mrb[47].mxu0  ;;  %v13076_v43 = vld [vmem:[#allocation20 + $0x18] sm:$0xff]  }
0x1307   : > { %v3331_v24 = vadd.f32 %v11139_v14, %v3322_v22  ;;  %v3332_v26 = vadd.f32 %v3330_v21, %v15078_v16  ;;  %v13071_v16 = vld [vmem:[#allocation20 + $0xd0] sm:$0xff]  }
0x1308   : > { %11861 = vmatprep.subr.bf16.mxu0 %v13071_v16  ;;  %v13108_v16 = vld [vmem:[#allocation20 + $0x118] sm:$0xff]  }
0x1309   : > { %3336 = vadd.xlane.f32.xlu1 %v3332_v26  ;;  %v3333_v27 = vadd.f32 %v3331_v24, %v15080_v17  ;;  %v13072_v17 = vld [vmem:[#allocation20 + $0x10] sm:$0xff]   ;;  %11862 = vmatpush3.bf16.xpose.msra.mxu0 %v13073_v39  ;;  %v13096_v24 = vld [vmem:[#allocation20 + $0x100] sm:$0xff]  }
0x130a   : > { %11844 = vmatpush3.bf16.xpose.msra.mxu1 %v13072_v17  ;;  %11863 = vmatprep.subr.bf16.mxu0 %v13075_v41  ;;  %v13109_v17 = vld [vmem:[#allocation20 + $0x198] sm:$0xff]   ;;  %v13110_v39 = vld [vmem:[#allocation20 + $0x160] sm:$0xff]  }
0x130b   : > { %3338 = vadd.xlane.f32.xlu0 %v3333_v27  ;;  %11845 = vmatprep.subr.bf16.mxu1 %v13074_v40  ;;  %v13111_v40 = vld [vmem:[#allocation20 + $0x1e0] sm:$0xff]  }
0x130c   : > { %v13112_v41 = vld [vmem:[#allocation20 + $0x120] sm:$0xff]  }
0x1311   : > { %11864 = vmatpush3.bf16.xpose.msra.mxu0 %v13077_v45  ;;  %v13114_v45 = vld [vmem:[#allocation20 + $0x168] sm:$0xff]  }
0x1312   : > { %11846 = vmatpush3.bf16.xpose.msra.mxu1 %v13076_v43  ;;  %11865 = vmatprep.subr.bf16.mxu0 %v13079_v46  ;;  %v13113_v43 = vld [vmem:[#allocation20 + $0x1a0] sm:$0xff]   ;;  %v13116_v46 = vld [vmem:[#allocation20 + $0x128] sm:$0xff]  }
0x1313   : > { %11847 = vmatprep.subr.bf16.mxu1 %v13078_v42  ;;  %v13115_v42 = vld [vmem:[#allocation20 + $0x1e8] sm:$0xff]  }
0x1319   : > { %11866 = vmatpush3.bf16.xpose.msra.mxu0 %v13081_v48  ;;  %v13118_v48 = vld [vmem:[#allocation20 + $0x170] sm:$0xff]  }
0x131a   : > { %11848 = vmatpush3.bf16.xpose.msra.mxu1 %v13080_v47  ;;  %11867 = vmatprep.subr.bf16.mxu0 %v13083_v32  ;;  %v13117_v47 = vld [vmem:[#allocation20 + $0x1a8] sm:$0xff]   ;;  %v13128_v32 = vld [vmem:[#allocation20 + $0x200] sm:$0xff]  }
0x131b   : > { %11849 = vmatprep.subr.bf16.mxu1 %v13082_v55  ;;  %v13127_v55 = vld [vmem:[#allocation20 + $0x2c0] sm:$0xff]  }
0x1321   : > { %11868 = vmatpush3.bf16.xpose.msra.mxu0 %v13085_v57  ;;  %v13130_v57 = vld [vmem:[#allocation20 + $0x248] sm:$0xff]  }
0x1322   : > { %11850 = vmatpush3.bf16.xpose.msra.mxu1 %v13084_v56  ;;  %11869 = vmatprep.subr.bf16.mxu0 %v13087_v59  ;;  %v13129_v56 = vld [vmem:[#allocation20 + $0x280] sm:$0xff]   ;;  %v13132_v59 = vld [vmem:[#allocation20 + $0x208] sm:$0xff]  }
0x1323   : > { %11851 = vmatprep.subr.bf16.mxu1 %v13086_v58  ;;  %v13131_v58 = vld [vmem:[#allocation20 + $0x2c8] sm:$0xff]  }
0x1329   : > { %11870 = vmatpush3.bf16.xpose.msra.mxu0 %v13089_v61  ;;  %v13134_v61 = vld [vmem:[#allocation20 + $0x250] sm:$0xff]  }
0x132a   : > { %11852 = vmatpush3.bf16.xpose.msra.mxu1 %v13088_v60  ;;  %11871 = vmatprep.subr.bf16.mxu0 %v13091_v62  ;;  %v13133_v60 = vld [vmem:[#allocation20 + $0x288] sm:$0xff]   ;;  %v13136_v62 = vld [vmem:[#allocation20 + $0x210] sm:$0xff]  }
0x132b   : > { %11853 = vmatprep.subr.bf16.mxu1 %v13090_v51  ;;  %v13135_v51 = vld [vmem:[#allocation20 + $0x2d0] sm:$0xff]  }
0x1331   : > { %11872 = vmatpush3.bf16.xpose.msra.mxu0 %v13093_v0  ;;  %v13138_v0 = vld [vmem:[#allocation20 + $0x258] sm:$0xff]  }
0x1332   : > { %11854 = vmatpush3.bf16.xpose.msra.mxu1 %v13092_v63  ;;  %11893 = vmatprep.subr.bf16.mxu0 %v13095_v3  ;;  %v13137_v63 = vld [vmem:[#allocation20 + $0x290] sm:$0xff]   ;;  %v13140_v3 = vld [vmem:[#allocation20 + $0x218] sm:$0xff]  }
0x1333   : > { %11875 = vmatprep.subr.bf16.mxu1 %v13094_v2  ;;  %v13139_v2 = vld [vmem:[#allocation20 + $0x2d8] sm:$0xff]  }
0x1396   : > { %v3337_v50 = vpop.xlane.xlu1 %3336 }
0x1397   : > { %v3341_v44 = vmul.f32 0.0078125, %v3337_v50  ;;  %v13119_v50 = vld [vmem:[#allocation20 + $0x1f0] sm:$0xff]  }
0x1398   : > { %v3339_v52 = vpop.xlane.xlu0 %3338 }
0x1399   : > { %v3343_v53 = vsub.f32 %v3332_v26, %v3341_v44  ;;  %v3342_v18 = vmul.f32 0.0078125, %v3339_v52  ;;  %v13097_v26 = vld [vmem:[#allocation20 + $0x180] sm:$0xff]   ;;  %v13120_v44 = vld [vmem:[#allocation20 + $0x130] sm:$0xff]  }
0x139a   : > { %v13121_v52 = vld [vmem:[#allocation20 + $0x1b0] sm:$0xff]  }
0x139b   : > { %v3344_v33 = vsub.f32 %v3333_v27, %v3342_v18  ;;  %v3345_v36 = vmul.f32 %v3343_v53, %v3343_v53  ;;  %v13098_v27 = vld [vmem:[#allocation20 + $0x148] sm:$0xff]   ;;  %v13123_v18 = vld [vmem:[#allocation20 + $0x1f8] sm:$0xff]  }
0x139d   : > { %3347 = vadd.xlane.f32.xlu1 %v3345_v36  ;;  %v3346_v54 = vmul.f32 %v3344_v33, %v3344_v33  ;;  %v13125_v36 = vld [vmem:[#allocation20 + $0x1b8] sm:$0xff]  }
0x139f   : > { %3349 = vadd.xlane.f32.xlu0 %v3346_v54  ;;  %v13126_v54 = vld [vmem:[#allocation20 + $0x240] sm:$0xff]  }
0x142a   : > { %v3348_v4 = vpop.xlane.xlu1 %3347 }
0x142b   : > { %v3351_v5 = vmul.f32 0.0078125, %v3348_v4  ;;  %v13141_v4 = vld [vmem:[#allocation20 + $0x298] sm:$0xff]  }
0x142c   : > { %v3350_v6 = vpop.xlane.xlu0 %3349 }
0x142d   : > { %v3353_v7 = vadd.f32 1e-05, %v3351_v5  ;;  %v3352_v8 = vmul.f32 0.0078125, %v3350_v6  ;;  %v13142_v5 = vld [vmem:[#allocation20 + $0x260] sm:$0xff]  }
0x142e   : > { %v13143_v6 = vld [vmem:[#allocation20 + $0x2e0] sm:$0xff]  }
0x142f   : > { %13390 = vrsqrt.f32 %v3353_v7  ;;  %v3354_v9 = vadd.f32 1e-05, %v3352_v8  ;;  %v13144_v7 = vld [vmem:[#allocation20 + $0x220] sm:$0xff]  }
0x1430   : > { %v13145_v8 = vld [vmem:[#allocation20 + $0x2a0] sm:$0xff]  }
0x1431   : > { %13392 = vrsqrt.f32 %v3354_v9  ;;  %v13146_v9 = vld [vmem:[#allocation20 + $0x268] sm:$0xff]  }
0x1439   : > { %v13391_v10 = vpop.eup %13390 }
0x143a   : > { %v3357_v12 = vmul.f32 %v13391_v10, %v3343_v53  ;;  %v13122_v53 = vld [vmem:[#allocation20 + $0x178] sm:$0xff]   ;;  %v13147_v10 = vld [vmem:[#allocation20 + $0x2e8] sm:$0xff]  }
0x143b   : > { %v13393_v13 = vpop.eup %13392 }
0x143c   : > { %v3365_v14 = vmul.f32 %v11140_v11, %v3357_v12  ;;  %v3358_v15 = vmul.f32 %v13393_v13, %v3344_v33  ;;  %v13124_v33 = vld [vmem:[#allocation20 + $0x138] sm:$0xff]   ;;  %v13149_v12 = vld [vmem:[#allocation20 + $0x2a8] sm:$0xff]   ;;  %v13150_v13 = vld [vmem:[#allocation20 + $0x270] sm:$0xff]  }
0x143e   : > { %v3366_v20 = vmul.f32 %v11140_v11, %v3358_v15  ;;  %v15256_v21 = vadd.f32 %v11141_v19, %v3365_v14  ;;  %v13148_v11 = vld [vmem:[#allocation20 + $0x228] sm:$0xff]   ;;  %v13151_v14 = vld [vmem:[#allocation20 + $0x2f0] sm:$0xff]  }
0x143f   : > { %v13152_v15 = vld [vmem:[#allocation20 + $0x230] sm:$0xff]  }
0x1440   : > { %v15258_v22 = vadd.f32 %v11141_v19, %v3366_v20  ;;  %v13153_v19 = vld [vmem:[#allocation20 + $0x2b0] sm:$0xff]   ;;  %v13154_v20 = vld [vmem:[#allocation20 + $0x278] sm:$0xff]  }
0x1442   : > { %v15262_v23 = vpack.c.bf16 %v15258_v22, %v15256_v21 }
0x1444   : > { %11855 = vmatprep.mubr.bf16.mxu1 %v15262_v23  ;;  %11873 = vmatprep.mubr.bf16.mxu0 %v15262_v23 }
0x1445   : > { %11856 = vmatmul.mubr.bf16.vlgmr.msra.gmra.mrb[32].mxu1 %v15262_v23  ;;  %11874 = vmatmul.mubr.bf16.vlgmr.msra.gmra.mrb[48].mxu0 %v15262_v23 }
0x1446   : > { %11876 = vmatpush3.bf16.xpose.msra.mxu1 %v13096_v24  ;;  %11894 = vmatpush3.bf16.xpose.msra.mxu0 %v13097_v26  ;;  %v13155_v24 = vld [vmem:[#allocation20 + $0x2f8] sm:$0xff]  }
0x1447   : > { %11891 = vmatprep.mubr.bf16.mxu1 %v15262_v23  ;;  %11909 = vmatprep.mubr.bf16.mxu0 %v15262_v23  ;;  %v13156_v26 = vld [vmem:[#allocation20 + $0x238] sm:$0xff]  }
0x1448   : > { %11877 = vmatprep.subr.bf16.mxu1 %v13098_v27  ;;  %11895 = vmatprep.subr.bf16.mxu0 %v13099_v28  ;;  %v13157_v27 = vld [vmem:[#allocation20 + $0x2b8] sm:$0xff]   ;;  %v13158_v28 = vld [vmem:[#allocation20 + $0x340] sm:$0xff]  }
0x144e   : > { %11878 = vmatpush3.bf16.xpose.msra.mxu1 %v13100_v30  ;;  %11896 = vmatpush3.bf16.xpose.msra.mxu0 %v13101_v31  ;;  %v13159_v30 = vld [vmem:[#allocation20 + $0x3c0] sm:$0xff]  }
0x144f   : > { %11879 = vmatprep.subr.bf16.mxu1 %v13102_v34  ;;  %11897 = vmatprep.subr.bf16.mxu0 %v13103_v35  ;;  %v13160_v31 = vld [vmem:[#allocation20 + $0x300] sm:$0xff]   ;;  %v13162_v35 = vld [vmem:[#allocation20 + $0x348] sm:$0xff]  }
0x1450   : > { %v13161_v34 = vld [vmem:[#allocation20 + $0x380] sm:$0xff]  }
0x1456   : > { %11880 = vmatpush3.bf16.xpose.msra.mxu1 %v13104_v25  ;;  %11898 = vmatpush3.bf16.xpose.msra.mxu0 %v13105_v29  ;;  %v13163_v25 = vld [vmem:[#allocation20 + $0x3c8] sm:$0xff]  }
0x1457   : > { %11881 = vmatprep.subr.bf16.mxu1 %v13106_v37  ;;  %11899 = vmatprep.subr.bf16.mxu0 %v13107_v38  ;;  %v13164_v29 = vld [vmem:[#allocation20 + $0x308] sm:$0xff]   ;;  %v13166_v38 = vld [vmem:[#allocation20 + $0x350] sm:$0xff]  }
0x1458   : > { %v13165_v37 = vld [vmem:[#allocation20 + $0x388] sm:$0xff]  }
0x145e   : > { %11882 = vmatpush3.bf16.xpose.msra.mxu1 %v13108_v16  ;;  %11900 = vmatpush3.bf16.xpose.msra.mxu0 %v13109_v17  ;;  %v13167_v16 = vld [vmem:[#allocation20 + $0x3d0] sm:$0xff]  }
0x145f   : > { %11883 = vmatprep.subr.bf16.mxu1 %v13110_v39  ;;  %11901 = vmatprep.subr.bf16.mxu0 %v13111_v40  ;;  %v13168_v17 = vld [vmem:[#allocation20 + $0x310] sm:$0xff]   ;;  %v13170_v40 = vld [vmem:[#allocation20 + $0x358] sm:$0xff]  }
0x1460   : > { %v13169_v39 = vld [vmem:[#allocation20 + $0x390] sm:$0xff]  }
0x1466   : > { %11884 = vmatpush3.bf16.xpose.msra.mxu1 %v13112_v41  ;;  %11902 = vmatpush3.bf16.xpose.msra.mxu0 %v13113_v43  ;;  %v13171_v41 = vld [vmem:[#allocation20 + $0x3d8] sm:$0xff]  }
0x1467   : > { %11885 = vmatprep.subr.bf16.mxu1 %v13114_v45  ;;  %11903 = vmatprep.subr.bf16.mxu0 %v13115_v42  ;;  %v13172_v43 = vld [vmem:[#allocation20 + $0x318] sm:$0xff]   ;;  %v13174_v42 = vld [vmem:[#allocation20 + $0x360] sm:$0xff]  }
0x1468   : > { %v13173_v45 = vld [vmem:[#allocation20 + $0x398] sm:$0xff]  }
0x146e   : > { %11886 = vmatpush3.bf16.xpose.msra.mxu1 %v13116_v46  ;;  %11904 = vmatpush3.bf16.xpose.msra.mxu0 %v13117_v47  ;;  %v13175_v46 = vld [vmem:[#allocation20 + $0x3e0] sm:$0xff]  }
0x146f   : > { %11887 = vmatprep.subr.bf16.mxu1 %v13118_v48  ;;  %11905 = vmatprep.subr.bf16.mxu0 %v13119_v50  ;;  %v13176_v47 = vld [vmem:[#allocation20 + $0x320] sm:$0xff]   ;;  %v13178_v50 = vld [vmem:[#allocation20 + $0x368] sm:$0xff]  }
0x1470   : > { %v13177_v48 = vld [vmem:[#allocation20 + $0x3a0] sm:$0xff]  }
0x1476   : > { %11888 = vmatpush3.bf16.xpose.msra.mxu1 %v13120_v44  ;;  %11906 = vmatpush3.bf16.xpose.msra.mxu0 %v13121_v52  ;;  %v13179_v44 = vld [vmem:[#allocation20 + $0x3e8] sm:$0xff]  }
0x1477   : > { %11889 = vmatprep.subr.bf16.mxu1 %v13122_v53  ;;  %11907 = vmatprep.subr.bf16.mxu0 %v13123_v18  ;;  %v13180_v52 = vld [vmem:[#allocation20 + $0x328] sm:$0xff]   ;;  %v13182_v18 = vld [vmem:[#allocation20 + $0x370] sm:$0xff]  }
0x1478   : > { %v13181_v53 = vld [vmem:[#allocation20 + $0x3a8] sm:$0xff]  }
0x147e   : > { %11890 = vmatpush3.bf16.xpose.msra.mxu1 %v13124_v33  ;;  %11908 = vmatpush3.bf16.xpose.msra.mxu0 %v13125_v36  ;;  %v13183_v33 = vld [vmem:[#allocation20 + $0x3f0] sm:$0xff]  }
0x147f   : > { %11911 = vmatprep.subr.bf16.mxu1 %v13126_v54  ;;  %11929 = vmatprep.subr.bf16.mxu0 %v13127_v55  ;;  %v13184_v36 = vld [vmem:[#allocation20 + $0x330] sm:$0xff]   ;;  %v13186_v55 = vld [vmem:[#allocation20 + $0x378] sm:$0xff]  }
0x1480   : > { %v13185_v54 = vld [vmem:[#allocation20 + $0x3b0] sm:$0xff]  }
0x1485   : > { %11892 = vmatmul.mubr.bf16.vlgmr.msra.gmra.mrb[36].mxu1 %v15262_v23  ;;  %11910 = vmatmul.mubr.bf16.vlgmr.msra.gmra.mrb[52].mxu0 %v15262_v23 }
0x1486   : > { %11912 = vmatpush3.bf16.xpose.msra.mxu1 %v13128_v32  ;;  %11927 = vmatprep.mubr.bf16.mxu1 %v15262_v23  ;;  %v13187_v32 = vld [vmem:[#allocation20 + $0x3f8] sm:$0xff]  }
0x1487   : > { %11930 = vmatpush3.bf16.xpose.msra.mxu0 %v13129_v56  ;;  %11945 = vmatprep.mubr.bf16.mxu0 %v15262_v23  ;;  %v4876_v56 = vld [vmem:[#allocation23] sm:$0xff] }
0x1488   : > { %11913 = vmatprep.subr.bf16.mxu1 %v13130_v57  ;;  %11931 = vmatprep.subr.bf16.mxu0 %v13131_v58  ;;  %v4884_v57 = vld [vmem:[#allocation23 + $0x40] sm:$0xff]  ;;  %v4877_v58 = vld [vmem:[#allocation23 + $0x8] sm:$0xff] }
0x148e   : > { %11914 = vmatpush3.bf16.xpose.msra.mxu1 %v13132_v59  ;;  %v4885_v59 = vld [vmem:[#allocation23 + $0x48] sm:$0xff] }
0x148f   : > { %11932 = vmatpush3.bf16.xpose.msra.mxu0 %v13133_v60  ;;  %11915 = vmatprep.subr.bf16.mxu1 %v13134_v61  ;;  %v13188_v60 = vld [vmem:[#allocation20 + $0x338] sm:$0xff]  }
0x1490   : > { %11933 = vmatprep.subr.bf16.mxu0 %v13135_v51  ;;  %v13189_v61 = vld [vmem:[#allocation20 + $0x3b8] sm:$0xff]   ;;  %v11272_v51 = vcombine.high %v4876_v56, %v4884_v57 }
0x1496   : > { %11916 = vmatpush3.bf16.xpose.msra.mxu1 %v13136_v62  ;;  %v11274_v62 = vcombine.high %v4877_v58, %v4885_v59 }
0x1497   : > { %11934 = vmatpush3.bf16.xpose.msra.mxu0 %v13137_v63  ;;  %11917 = vmatprep.subr.bf16.mxu1 %v13138_v0  ;;  %v4892_v63 = vld [vmem:[#allocation23 + $0x80] sm:$0xff] }
0x1498   : > { %11935 = vmatprep.subr.bf16.mxu0 %v13139_v2  ;;  %v4900_v0 = vld [vmem:[#allocation23 + $0xc0] sm:$0xff]  ;;  %v4893_v2 = vld [vmem:[#allocation23 + $0x88] sm:$0xff] }
0x149e   : > { %11918 = vmatpush3.bf16.xpose.msra.mxu1 %v13140_v3  ;;  %v4901_v3 = vld [vmem:[#allocation23 + $0xc8] sm:$0xff] }
0x149f   : > { %11936 = vmatpush3.bf16.xpose.msra.mxu0 %v13141_v4  ;;  %11919 = vmatprep.subr.bf16.mxu1 %v13142_v5  ;;  %v11271_v4 = vcombine.low %v4876_v56, %v4884_v57  ;;  %v11273_v5 = vcombine.low %v4877_v58, %v4885_v59 }
0x14a0   : > { %11937 = vmatprep.subr.bf16.mxu0 %v13143_v6  ;;  %v11288_v6 = vcombine.high %v4892_v63, %v4900_v0 }
0x14a6   : > { %11920 = vmatpush3.bf16.xpose.msra.mxu1 %v13144_v7  ;;  %v11290_v7 = vcombine.high %v4893_v2, %v4901_v3 }
0x14a7   : > { %11938 = vmatpush3.bf16.xpose.msra.mxu0 %v13145_v8  ;;  %11921 = vmatprep.subr.bf16.mxu1 %v13146_v9  ;;  %v4908_v8 = vld [vmem:[#allocation23 + $0x100] sm:$0xff] }
0x14a8   : > { %11939 = vmatprep.subr.bf16.mxu0 %v13147_v10  ;;  %v4916_v9 = vld [vmem:[#allocation23 + $0x140] sm:$0xff]  ;;  %v4909_v10 = vld [vmem:[#allocation23 + $0x108] sm:$0xff] }
0x14ae   : > { %11922 = vmatpush3.bf16.xpose.msra.mxu1 %v13148_v11  ;;  %v4917_v11 = vld [vmem:[#allocation23 + $0x148] sm:$0xff] }
0x14af   : > { %11940 = vmatpush3.bf16.xpose.msra.mxu0 %v13149_v12  ;;  %11923 = vmatprep.subr.bf16.mxu1 %v13150_v13  ;;  %v3636_v12 = vlaneseq  ;;  %v11287_v13 = vcombine.low %v4892_v63, %v4900_v0 }
0x14b0   : > { %11941 = vmatprep.subr.bf16.mxu0 %v13151_v14  ;;  %v11289_v14 = vcombine.low %v4893_v2, %v4901_v3 }
0x14b6   : > { %11924 = vmatpush3.bf16.xpose.msra.mxu1 %v13152_v15  ;;  %v11304_v15 = vcombine.high %v4908_v8, %v4916_v9 }
0x14b7   : > { %11942 = vmatpush3.bf16.xpose.msra.mxu0 %v13153_v19  ;;  %11925 = vmatprep.subr.bf16.mxu1 %v13154_v20  ;;  %v11306_v19 = vcombine.high %v4909_v10, %v4917_v11  ;;  %v15280_v20 = vshrl.u32 %v3636_v12, 7  ;;  %v4964_v12 = vld [vmem:[#allocation23 + $0x2c0] sm:$0xff] }
0x14b8   : > { %11943 = vmatprep.subr.bf16.mxu0 %v13155_v24  ;;  %v4932_v24 = vld [vmem:[#allocation23 + $0x1c0] sm:$0xff] }
0x14be   : > { %11926 = vmatpush3.bf16.xpose.msra.mxu1 %v13156_v26  ;;  %v15283_v26 = vsub.s32 0, %v15280_v20 }
0x14bf   : > { %11944 = vmatpush3.bf16.xpose.msra.mxu0 %v13157_v27  ;;  %11947 = vmatprep.subr.bf16.mxu1 %v13158_v28  ;;  %v15286_v27 = vsub.s32 2, %v15280_v20  ;;  %v4925_v28 = vld [vmem:[#allocation23 + $0x188] sm:$0xff] }
0x14c0   : > { %11965 = vmatprep.subr.bf16.mxu0 %v13159_v30  ;;  %v4933_v30 = vld [vmem:[#allocation23 + $0x1c8] sm:$0xff] }
0x14c1   : > { %v11321_v58 = vcombine.low %v4925_v28, %v4933_v30 }
0x14c5   : > { %11928 = vmatmul.mubr.bf16.vlgmr.msra.gmra.mrb[40].mxu1 %v15262_v23 }
0x14c6   : > { %11946 = vmatmul.mubr.bf16.vlgmr.msra.gmra.mrb[56].mxu0 %v15262_v23  ;;  %11948 = vmatpush3.bf16.xpose.msra.mxu1 %v13160_v31  ;;  %v11303_v31 = vcombine.low %v4908_v8, %v4916_v9 }
0x14c7   : > { %11963 = vmatprep.mubr.bf16.mxu1 %v15262_v23  ;;  %11966 = vmatpush3.bf16.xpose.msra.mxu0 %v13161_v34  ;;  %v15288_v34 = vld [vmem:[#allocation22] sm:$0xff] }
0x14c8   : > { %11981 = vmatprep.mubr.bf16.mxu0 %v15262_v23  ;;  %11949 = vmatprep.subr.bf16.mxu1 %v13162_v35  ;;  %v15291_v35 = vsub.s32 1, %v15280_v20 }
0x14c9   : > { %11967 = vmatprep.subr.bf16.mxu0 %v13163_v25  ;;  %v15294_v25 = vsub.s32 3, %v15280_v20 }
0x14ce   : > { %11950 = vmatpush3.bf16.xpose.msra.mxu1 %v13164_v29  ;;  %v11305_v29 = vcombine.low %v4909_v10, %v4917_v11  ;;  %v4956_v11 = vld [vmem:[#allocation23 + $0x280] sm:$0xff] }
0x14cf   : > { %11968 = vmatpush3.bf16.xpose.msra.mxu0 %v13165_v37  ;;  %11951 = vmatprep.subr.bf16.mxu1 %v13166_v38  ;;  %v11322_v38 = vcombine.high %v4925_v28, %v4933_v30  ;;  %v4972_v28 = vld [vmem:[#allocation23 + $0x300] sm:$0xff] }
0x14d0   : > { %11969 = vmatprep.subr.bf16.mxu0 %v13167_v16  ;;  %v3639_v16 = vrot.slane %v15288_v34, %v15283_v26  ;;  %v4980_v30 = vld [vmem:[#allocation23 + $0x340] sm:$0xff] }
0x14d6   : > { %11952 = vmatpush3.bf16.xpose.msra.mxu1 %v13168_v17  ;;  %v3647_v17 = vrot.slane %v15288_v34, %v15286_v27 }
0x14d7   : > { %11970 = vmatpush3.bf16.xpose.msra.mxu0 %v13169_v39  ;;  %11953 = vmatprep.subr.bf16.mxu1 %v13170_v40  ;;  %v3643_v39 = vrot.slane %v15288_v34, %v15291_v35  ;;  %v3651_v40 = vrot.slane %v15288_v34, %v15294_v25 }
0x14d8   : > { %11971 = vmatprep.subr.bf16.mxu0 %v13171_v41 }
0x14de   : > { %11954 = vmatpush3.bf16.xpose.msra.mxu1 %v13172_v43 }
0x14df   : > { %11972 = vmatpush3.bf16.xpose.msra.mxu0 %v13173_v45  ;;  %11955 = vmatprep.subr.bf16.mxu1 %v13174_v42  ;;  %v4940_v45 = vld [vmem:[#allocation23 + $0x200] sm:$0xff] }
0x14e0   : > { %11973 = vmatprep.subr.bf16.mxu0 %v13175_v46  ;;  %v4948_v42 = vld [vmem:[#allocation23 + $0x240] sm:$0xff] }
0x14e1   : > { %v11336_v59 = vcombine.high %v4940_v45, %v4948_v42 }
0x14e6   : > { %11956 = vmatpush3.bf16.xpose.msra.mxu1 %v13176_v47 }
0x14e7   : > { %11974 = vmatpush3.bf16.xpose.msra.mxu0 %v13177_v48  ;;  %11957 = vmatprep.subr.bf16.mxu1 %v13178_v50 }
0x14e8   : > { %11975 = vmatprep.subr.bf16.mxu0 %v13179_v44  ;;  %v4941_v44 = vld [vmem:[#allocation23 + $0x208] sm:$0xff] }
0x14ee   : > { %11958 = vmatpush3.bf16.xpose.msra.mxu1 %v13180_v52  ;;  %v4949_v52 = vld [vmem:[#allocation23 + $0x248] sm:$0xff] }
0x14ef   : > { %11976 = vmatpush3.bf16.xpose.msra.mxu0 %v13181_v53  ;;  %11959 = vmatprep.subr.bf16.mxu1 %v13182_v18 }
0x14f0   : > { %11977 = vmatprep.subr.bf16.mxu0 %v13183_v33 }
0x14f6   : > { %11960 = vmatpush3.bf16.xpose.msra.mxu1 %v13184_v36 }
0x14f7   : > { %11978 = vmatpush3.bf16.xpose.msra.mxu0 %v13185_v54  ;;  %11961 = vmatprep.subr.bf16.mxu1 %v13186_v55 }
0x14f8   : > { %11979 = vmatprep.subr.bf16.mxu0 %v13187_v32 }
0x14fe   : > { %11962 = vmatpush3.bf16.xpose.msra.mxu1 %v13188_v60 }
0x14ff   : > { %11980 = vmatpush3.bf16.xpose.msra.mxu0 %v13189_v61  ;;  %5651 = vmatprep.subr.bf16.mxu1 %v11272_v51  ;;  %v11338_v51 = vcombine.high %v4941_v44, %v4949_v52 }
0x1500   : > { %5692 = vmatprep.subr.bf16.mxu0 %v11274_v62 }
0x1505   : > { %11964 = vmatmul.mubr.bf16.vlgmr.msra.gmra.mrb[44].mxu1 %v15262_v23 }
0x1506   : > { %11982 = vmatmul.mubr.bf16.vlgmr.msra.gmra.mrb[60].mxu0 %v15262_v23  ;;  %5652 = vmatpush1.bf16.xpose.msra.mxu1 %v11271_v4  ;;  %v4924_v23 = vld [vmem:[#allocation23 + $0x180] sm:$0xff] }
0x1507   : > { %5693 = vmatpush1.bf16.xpose.msra.mxu0 %v11273_v5  ;;  %5653 = vmatprep.subr.bf16.mxu1 %v11288_v6  ;;  %v11320_v37 = vcombine.high %v4924_v23, %v4932_v24  ;;  %v11319_v54 = vcombine.low %v4924_v23, %v4932_v24  ;;  %v11352_v23 = vcombine.high %v4956_v11, %v4964_v12 }
0x1508   : > { %5694 = vmatprep.subr.bf16.mxu0 %v11290_v7 }
0x150e   : > { %5654 = vmatpush1.bf16.xpose.msra.mxu1 %v11287_v13  ;;  %v4957_v13 = vld [vmem:[#allocation23 + $0x288] sm:$0xff] }
0x150f   : > { %5695 = vmatpush1.bf16.xpose.msra.mxu0 %v11289_v14  ;;  %5655 = vmatprep.subr.bf16.mxu1 %v11304_v15  ;;  %v4965_v14 = vld [vmem:[#allocation23 + $0x2c8] sm:$0xff]  ;;  %v11335_v15 = vcombine.low %v4940_v45, %v4948_v42  ;;  %v11367_v45 = vcombine.low %v4972_v28, %v4980_v30 }
0x1510   : > { %5696 = vmatprep.subr.bf16.mxu0 %v11306_v19  ;;  %v11337_v19 = vcombine.low %v4941_v44, %v4949_v52  ;;  %v11354_v24 = vcombine.high %v4957_v13, %v4965_v14  ;;  %v4879_v44 = vld [vmem:[#allocation23 + $0x18] sm:$0xff] }
0x1511   : > { %v4887_v52 = vld [vmem:[#allocation23 + $0x58] sm:$0xff] }
0x1516   : > { %5656 = vmatpush1.bf16.xpose.msra.mxu1 %v11303_v31  ;;  %v4973_v31 = vld [vmem:[#allocation23 + $0x308] sm:$0xff] }
0x1517   : > { %5697 = vmatpush1.bf16.xpose.msra.mxu0 %v11305_v29  ;;  %5657 = vmatprep.subr.bf16.mxu1 %v11320_v37  ;;  %v4981_v29 = vld [vmem:[#allocation23 + $0x348] sm:$0xff]  ;;  %v11351_v37 = vcombine.low %v4956_v11, %v4964_v12  ;;  %v15317_v12 = vsub.s32 5, %v15280_v20 }
0x1518   : > { %v4518_v41 = vpop.f32.mrb[32].mxu1  ;;  %v4561_v43 = vpop.f32.mrb[48].mxu0  ;;  %5698 = vmatprep.subr.bf16.mxu0 %v11322_v38  ;;  %v11353_v38 = vcombine.low %v4957_v13, %v4965_v14  ;;  %v11369_v42 = vcombine.low %v4973_v31, %v4981_v29  ;;  %v15320_v13 = vsub.s32 7, %v15280_v20 }
0x1519   : > { %v4519_v46 = vadd.f32 %v4518_v41, %v3639_v16  ;;  %v4562_v47 = vadd.f32 %v4561_v43, %v3647_v17  ;;  %v4520_v48 = vpop.f32.mrb[33].mxu1  ;;  %v4563_v50 = vpop.f32.mrb[49].mxu0  ;;  %v4989_v41 = vld [vmem:[#allocation23 + $0x388] sm:$0xff] }
0x151a   : > { %v4521_v53 = vadd.f32 %v4520_v48, %v3643_v39  ;;  %v4564_v18 = vadd.f32 %v4563_v50, %v3651_v40  ;;  %v4522_v33 = vpop.f32.mrb[34].mxu1  ;;  %v4565_v36 = vpop.f32.mrb[50].mxu0  ;;  %v4997_v43 = vld [vmem:[#allocation23 + $0x3c8] sm:$0xff]  ;;  %v4878_v48 = vld [vmem:[#allocation23 + $0x10] sm:$0xff] }
0x151b   : > { %v4523_v55 = vadd.f32 %v4522_v33, %v3639_v16  ;;  %v4566_v32 = vadd.f32 %v4565_v36, %v3647_v17  ;;  %v4524_v56 = vpop.f32.mrb[35].mxu1  ;;  %v4567_v57 = vpop.f32.mrb[51].mxu0  ;;  %v4828_v62 = vmax.f32 %v4519_v46, 0.0  ;;  %v4830_v63 = vmax.f32 %v4562_v47, 0.0  ;;  %v4886_v50 = vld [vmem:[#allocation23 + $0x50] sm:$0xff] }
0x151c   : > { %v4525_v60 = vadd.f32 %v4524_v56, %v3643_v39  ;;  %v4568_v61 = vadd.f32 %v4567_v57, %v3651_v40  ;;  %v4829_v3 = vmax.f32 %v4521_v53, 0.0  ;;  %v4831_v4 = vmax.f32 %v4564_v18, 0.0  ;;  %v4988_v39 = vld [vmem:[#allocation23 + $0x380] sm:$0xff]  ;;  %v4903_v56 = vld [vmem:[#allocation23 + $0xd8] sm:$0xff] }
0x151d   : > { %v4844_v0 = vmax.f32 %v4523_v55, 0.0  ;;  %v4846_v2 = vmax.f32 %v4566_v32, 0.0  ;;  %v11368_v16 = vcombine.high %v4972_v28, %v4980_v30  ;;  %v11370_v17 = vcombine.high %v4973_v31, %v4981_v29  ;;  %v4996_v40 = vld [vmem:[#allocation23 + $0x3c0] sm:$0xff]  ;;  %v4902_v55 = vld [vmem:[#allocation23 + $0xd0] sm:$0xff]  ;;  %v4895_v32 = vld [vmem:[#allocation23 + $0x98] sm:$0xff] }
0x151e   : > { %v4845_v5 = vmax.f32 %v4525_v60, 0.0  ;;  %v4847_v6 = vmax.f32 %v4568_v61, 0.0  ;;  %5658 = vmatpush1.bf16.xpose.msra.mxu1 %v11319_v54  ;;  %v11384_v46 = vcombine.high %v4988_v39, %v4996_v40  ;;  %v11386_v47 = vcombine.high %v4989_v41, %v4997_v43  ;;  %v4894_v54 = vld [vmem:[#allocation23 + $0x90] sm:$0xff] }
0x151f   : > { %v15304_v7 = vpack.c.bf16 %v4844_v0, %v4828_v62  ;;  %v15306_v8 = vpack.c.bf16 %v4846_v2, %v4830_v63  ;;  %5699 = vmatpush1.bf16.xpose.msra.mxu0 %v11321_v58  ;;  %5659 = vmatprep.subr.bf16.mxu1 %v11336_v59  ;;  %v11383_v53 = vcombine.low %v4988_v39, %v4996_v40  ;;  %v4910_v61 = vld [vmem:[#allocation23 + $0x110] sm:$0xff]  ;;  %v4911_v62 = vld [vmem:[#allocation23 + $0x118] sm:$0xff] }
0x1520   : > { %v4861_v9 = vpack.c.bf16 %v4845_v5, %v4829_v3  ;;  %v4863_v10 = vpack.c.bf16 %v4847_v6, %v4831_v4  ;;  %5700 = vmatprep.subr.bf16.mxu0 %v11338_v51  ;;  %v11385_v18 = vcombine.low %v4989_v41, %v4997_v43  ;;  %v11276_v33 = vcombine.high %v4878_v48, %v4886_v50  ;;  %v4918_v51 = vld [vmem:[#allocation23 + $0x150] sm:$0xff]  ;;  %v4919_v63 = vld [vmem:[#allocation23 + $0x158] sm:$0xff] }
0x1521   : > { %v11278_v36 = vcombine.high %v4879_v44, %v4887_v52  ;;  %v11275_v57 = vcombine.low %v4878_v48, %v4886_v50  ;;  %v11277_v58 = vcombine.low %v4879_v44, %v4887_v52  ;;  %v11292_v59 = vcombine.high %v4894_v54, %v4902_v55  ;;  %v4926_v5 = vld [vmem:[#allocation23 + $0x190] sm:$0xff]  ;;  %v4943_v40 = vld [vmem:[#allocation23 + $0x218] sm:$0xff] }
0x1522   : > { %5683 = vmatprep.mubr.bf16.mxu1 %v4861_v9  ;;  %5724 = vmatprep.mubr.bf16.mxu0 %v4863_v10  ;;  %v11294_v60 = vcombine.high %v4895_v32, %v4903_v56  ;;  %v11291_v0 = vcombine.low %v4894_v54, %v4902_v55  ;;  %v11293_v2 = vcombine.low %v4895_v32, %v4903_v56  ;;  %v4934_v6 = vld [vmem:[#allocation23 + $0x1d0] sm:$0xff]  ;;  %v4927_v9 = vld [vmem:[#allocation23 + $0x198] sm:$0xff] }
0x1523   : > { %v11308_v3 = vcombine.high %v4910_v61, %v4918_v51  ;;  %v11310_v4 = vcombine.high %v4911_v62, %v4919_v63  ;;  %v4935_v10 = vld [vmem:[#allocation23 + $0x1d8] sm:$0xff]  ;;  %v11307_v11 = vcombine.low %v4910_v61, %v4918_v51  ;;  %v11309_v14 = vcombine.low %v4911_v62, %v4919_v63  ;;  %v4942_v29 = vld [vmem:[#allocation23 + $0x210] sm:$0xff] }
0x1524   : > { %v3659_v28 = vrot.slane %v15288_v34, %v15317_v12  ;;  %v3667_v30 = vrot.slane %v15288_v34, %v15320_v13  ;;  %v4951_v41 = vld [vmem:[#allocation23 + $0x258] sm:$0xff]  ;;  %v11325_v52 = vcombine.low %v4927_v9, %v4935_v10 }
0x1526   : > { %5660 = vmatpush1.bf16.xpose.msra.mxu1 %v11335_v15  ;;  %v11324_v15 = vcombine.high %v4926_v5, %v4934_v6 }
0x1527   : > { %5701 = vmatpush1.bf16.xpose.msra.mxu0 %v11337_v19  ;;  %5661 = vmatprep.subr.bf16.mxu1 %v11352_v23  ;;  %v11326_v19 = vcombine.high %v4927_v9, %v4935_v10 }
0x1528   : > { %5702 = vmatprep.subr.bf16.mxu0 %v11354_v24 }
0x152e   : > { %5662 = vmatpush1.bf16.xpose.msra.mxu1 %v11351_v37  ;;  %v4950_v37 = vld [vmem:[#allocation23 + $0x250] sm:$0xff] }
0x152f   : > { %5703 = vmatpush1.bf16.xpose.msra.mxu0 %v11353_v38  ;;  %5663 = vmatprep.subr.bf16.mxu1 %v11368_v16 }
0x1530   : > { %5704 = vmatprep.subr.bf16.mxu0 %v11370_v17 }
0x1536   : > { %5664 = vmatpush1.bf16.xpose.msra.mxu1 %v11367_v45 }
0x1537   : > { %5705 = vmatpush1.bf16.xpose.msra.mxu0 %v11369_v42  ;;  %5665 = vmatprep.subr.bf16.mxu1 %v11384_v46 }
0x1538   : > { %5706 = vmatprep.subr.bf16.mxu0 %v11386_v47  ;;  %v11323_v47 = vcombine.low %v4926_v5, %v4934_v6  ;;  %v11339_v5 = vcombine.low %v4942_v29, %v4950_v37  ;;  %v11341_v6 = vcombine.low %v4943_v40, %v4951_v41 }
0x153e   : > { %5666 = vmatpush1.bf16.xpose.msra.mxu1 %v11383_v53  ;;  %v11340_v53 = vcombine.high %v4942_v29, %v4950_v37  ;;  %v4991_v29 = vld [vmem:[#allocation23 + $0x398] sm:$0xff] }
0x153f   : > { %5707 = vmatpush1.bf16.xpose.msra.mxu0 %v11385_v18  ;;  %5733 = vmatprep.subr.bf16.mxu1 %v11276_v33  ;;  %v4999_v37 = vld [vmem:[#allocation23 + $0x3d8] sm:$0xff] }
0x1540   : > { %5774 = vmatprep.subr.bf16.mxu0 %v11278_v36  ;;  %v11342_v36 = vcombine.high %v4943_v40, %v4951_v41  ;;  %v4880_v40 = vld [vmem:[#allocation23 + $0x20] sm:$0xff] }
0x1541   : > { %v4888_v41 = vld [vmem:[#allocation23 + $0x60] sm:$0xff] }
0x1545   : > { %5684 = vmatmul.mubr.bf16.vlgmr.msra.gmra.mrb[48].mxu1 %v15304_v7  ;;  %v15311_v7 = vsub.s32 4, %v15280_v20 }
0x1546   : > { %5725 = vmatmul.mubr.bf16.vlgmr.msra.gmra.mrb[64].mxu0 %v15306_v8  ;;  %5734 = vmatpush1.bf16.xpose.msra.mxu1 %v11275_v57  ;;  %v15314_v8 = vsub.s32 6, %v15280_v20 }
0x1547   : > { %5775 = vmatpush1.bf16.xpose.msra.mxu0 %v11277_v58  ;;  %5735 = vmatprep.subr.bf16.mxu1 %v11292_v59  ;;  %v3655_v23 = vrot.slane %v15288_v34, %v15311_v7 }
0x1548   : > { %5776 = vmatprep.subr.bf16.mxu0 %v11294_v60  ;;  %v3663_v24 = vrot.slane %v15288_v34, %v15314_v8 }
0x154e   : > { %5736 = vmatpush1.bf16.xpose.msra.mxu1 %v11291_v0  ;;  %v4958_v0 = vld [vmem:[#allocation23 + $0x290] sm:$0xff] }
0x154f   : > { %5777 = vmatpush1.bf16.xpose.msra.mxu0 %v11293_v2  ;;  %5737 = vmatprep.subr.bf16.mxu1 %v11308_v3  ;;  %v4966_v2 = vld [vmem:[#allocation23 + $0x2d0] sm:$0xff]  ;;  %v4959_v3 = vld [vmem:[#allocation23 + $0x298] sm:$0xff] }
0x1550   : > { %5778 = vmatprep.subr.bf16.mxu0 %v11310_v4  ;;  %v4967_v4 = vld [vmem:[#allocation23 + $0x2d8] sm:$0xff]  ;;  %v11356_v9 = vcombine.high %v4958_v0, %v4966_v2 }
0x1551   : > { %v11358_v10 = vcombine.high %v4959_v3, %v4967_v4 }
0x1556   : > { %5738 = vmatpush1.bf16.xpose.msra.mxu1 %v11307_v11  ;;  %v4974_v11 = vld [vmem:[#allocation23 + $0x310] sm:$0xff] }
0x1557   : > { %5779 = vmatpush1.bf16.xpose.msra.mxu0 %v11309_v14  ;;  %5739 = vmatprep.subr.bf16.mxu1 %v11324_v15  ;;  %v4982_v14 = vld [vmem:[#allocation23 + $0x350] sm:$0xff]  ;;  %v4975_v15 = vld [vmem:[#allocation23 + $0x318] sm:$0xff] }
0x1558   : > { %v4604_v20 = vpop.f32.mrb[36].mxu1  ;;  %v4647_v31 = vpop.f32.mrb[52].mxu0  ;;  %5780 = vmatprep.subr.bf16.mxu0 %v11326_v19  ;;  %v4983_v19 = vld [vmem:[#allocation23 + $0x358] sm:$0xff] }
0x1559   : > { %v4605_v38 = vadd.f32 %v4604_v20, %v3655_v23  ;;  %v4648_v16 = vadd.f32 %v4647_v31, %v3663_v24  ;;  %v4606_v17 = vpop.f32.mrb[37].mxu1  ;;  %v4649_v39 = vpop.f32.mrb[53].mxu0  ;;  %v4990_v20 = vld [vmem:[#allocation23 + $0x390] sm:$0xff] }
0x155a   : > { %v4607_v43 = vadd.f32 %v4606_v17, %v3659_v28  ;;  %v4650_v45 = vadd.f32 %v4649_v39, %v3667_v30  ;;  %v4608_v42 = vpop.f32.mrb[38].mxu1  ;;  %v4651_v46 = vpop.f32.mrb[54].mxu0  ;;  %v4998_v31 = vld [vmem:[#allocation23 + $0x3d0] sm:$0xff]  ;;  %v11390_v39 = vcombine.high %v4991_v29, %v4999_v37 }
0x155b   : > { %v4609_v48 = vadd.f32 %v4608_v42, %v3655_v23  ;;  %v4652_v34 = vadd.f32 %v4651_v46, %v3663_v24  ;;  %v4610_v50 = vpop.f32.mrb[39].mxu1  ;;  %v4653_v44 = vpop.f32.mrb[55].mxu0  ;;  %v4832_v54 = vmax.f32 %v4605_v38, 0.0  ;;  %v4834_v55 = vmax.f32 %v4648_v16, 0.0 }
0x155c   : > { %v4611_v18 = vadd.f32 %v4610_v50, %v3659_v28  ;;  %v4654_v33 = vadd.f32 %v4653_v44, %v3667_v30  ;;  %v4833_v57 = vmax.f32 %v4607_v43, 0.0  ;;  %v4835_v58 = vmax.f32 %v4650_v45, 0.0  ;;  %v4881_v43 = vld [vmem:[#allocation23 + $0x28] sm:$0xff]  ;;  %v4904_v50 = vld [vmem:[#allocation23 + $0xe0] sm:$0xff] }
0x155d   : > { %v4848_v32 = vmax.f32 %v4609_v48, 0.0  ;;  %v4850_v56 = vmax.f32 %v4652_v34, 0.0  ;;  %v11355_v23 = vcombine.low %v4958_v0, %v4966_v2  ;;  %v11357_v24 = vcombine.low %v4959_v3, %v4967_v4  ;;  %v4889_v45 = vld [vmem:[#allocation23 + $0x68] sm:$0xff]  ;;  %v4896_v34 = vld [vmem:[#allocation23 + $0xa0] sm:$0xff]  ;;  %v15336_v2 = vld [vmem:[#allocation22 + $0x8] sm:$0xff] }
0x155e   : > { %v4849_v59 = vmax.f32 %v4611_v18, 0.0  ;;  %v4851_v60 = vmax.f32 %v4654_v33, 0.0  ;;  %5740 = vmatpush1.bf16.xpose.msra.mxu1 %v11323_v47  ;;  %v11372_v28 = vcombine.high %v4974_v11, %v4982_v14  ;;  %v11374_v30 = vcombine.high %v4975_v15, %v4983_v19  ;;  %v4897_v44 = vld [vmem:[#allocation23 + $0xa8] sm:$0xff] }
0x155f   : > { %v15330_v61 = vpack.c.bf16 %v4848_v32, %v4832_v54  ;;  %v15332_v51 = vpack.c.bf16 %v4850_v56, %v4834_v55  ;;  %5781 = vmatpush1.bf16.xpose.msra.mxu0 %v11325_v52  ;;  %5741 = vmatprep.subr.bf16.mxu1 %v11340_v53  ;;  %v11371_v38 = vcombine.low %v4974_v11, %v4982_v14  ;;  %v4905_v52 = vld [vmem:[#allocation23 + $0xe8] sm:$0xff]  ;;  %v4912_v54 = vld [vmem:[#allocation23 + $0x120] sm:$0xff] }
0x1560   : > { %v4865_v62 = vpack.c.bf16 %v4849_v59, %v4833_v57  ;;  %v4867_v63 = vpack.c.bf16 %v4851_v60, %v4835_v58  ;;  %5782 = vmatprep.subr.bf16.mxu0 %v11342_v36  ;;  %v11373_v16 = vcombine.low %v4975_v15, %v4983_v19  ;;  %v11388_v17 = vcombine.high %v4990_v20, %v4998_v31  ;;  %v4920_v55 = vld [vmem:[#allocation23 + $0x160] sm:$0xff]  ;;  %v4913_v32 = vld [vmem:[#allocation23 + $0x128] sm:$0xff] }
0x1561   : > { %v11387_v42 = vcombine.low %v4990_v20, %v4998_v31  ;;  %v11389_v46 = vcombine.low %v4991_v29, %v4999_v37  ;;  %v11280_v47 = vcombine.high %v4880_v40, %v4888_v41  ;;  %v11282_v48 = vcombine.high %v4881_v43, %v4889_v45  ;;  %v4921_v56 = vld [vmem:[#allocation23 + $0x168] sm:$0xff]  ;;  %v4944_v15 = vld [vmem:[#allocation23 + $0x220] sm:$0xff] }
0x1562   : > { %5765 = vmatprep.mubr.bf16.mxu1 %v4865_v62  ;;  %5806 = vmatprep.mubr.bf16.mxu0 %v4867_v63  ;;  %v11279_v53 = vcombine.low %v4880_v40, %v4888_v41  ;;  %v11281_v18 = vcombine.low %v4881_v43, %v4889_v45  ;;  %v11296_v33 = vcombine.high %v4896_v34, %v4904_v50  ;;  %v4928_v62 = vld [vmem:[#allocation23 + $0x1a0] sm:$0xff]  ;;  %v4929_v63 = vld [vmem:[#allocation23 + $0x1a8] sm:$0xff] }
0x1563   : > { %v11298_v36 = vcombine.high %v4897_v44, %v4905_v52  ;;  %v11295_v57 = vcombine.low %v4896_v34, %v4904_v50  ;;  %v11297_v58 = vcombine.low %v4897_v44, %v4905_v52  ;;  %v11312_v59 = vcombine.high %v4912_v54, %v4920_v55  ;;  %v4952_v19 = vld [vmem:[#allocation23 + $0x260] sm:$0xff]  ;;  %v4953_v20 = vld [vmem:[#allocation23 + $0x268] sm:$0xff] }
0x1564   : > { %v11314_v60 = vcombine.high %v4913_v32, %v4921_v56  ;;  %v11311_v0 = vcombine.low %v4912_v54, %v4920_v55  ;;  %v11313_v3 = vcombine.low %v4913_v32, %v4921_v56  ;;  %v3683_v11 = vrot.slane %v15336_v2, %v15294_v25 }
0x1565   : > { %v11344_v45 = vcombine.high %v4944_v15, %v4952_v19 }
0x1566   : > { %5742 = vmatpush1.bf16.xpose.msra.mxu1 %v11339_v5 }
0x1567   : > { %5783 = vmatpush1.bf16.xpose.msra.mxu0 %v11341_v6  ;;  %5743 = vmatprep.subr.bf16.mxu1 %v11356_v9  ;;  %v3671_v6 = vrot.slane %v15336_v2, %v15283_v26  ;;  %v3679_v9 = vrot.slane %v15336_v2, %v15286_v27 }
0x1568   : > { %5784 = vmatprep.subr.bf16.mxu0 %v11358_v10  ;;  %v3675_v10 = vrot.slane %v15336_v2, %v15291_v35 }
0x156e   : > { %5744 = vmatpush1.bf16.xpose.msra.mxu1 %v11355_v23 }
0x156f   : > { %5785 = vmatpush1.bf16.xpose.msra.mxu0 %v11357_v24  ;;  %5745 = vmatprep.subr.bf16.mxu1 %v11372_v28 }
0x1570   : > { %5786 = vmatprep.subr.bf16.mxu0 %v11374_v30  ;;  %v4945_v30 = vld [vmem:[#allocation23 + $0x228] sm:$0xff] }
0x1576   : > { %5746 = vmatpush1.bf16.xpose.msra.mxu1 %v11371_v38 }
0x1577   : > { %5787 = vmatpush1.bf16.xpose.msra.mxu0 %v11373_v16  ;;  %5747 = vmatprep.subr.bf16.mxu1 %v11388_v17 }
0x1578   : > { %5788 = vmatprep.subr.bf16.mxu0 %v11390_v39 }
0x157e   : > { %5748 = vmatpush1.bf16.xpose.msra.mxu1 %v11387_v42 }
0x157f   : > { %5789 = vmatpush1.bf16.xpose.msra.mxu0 %v11389_v46  ;;  %5815 = vmatprep.subr.bf16.mxu1 %v11280_v47 }
0x1580   : > { %5856 = vmatprep.subr.bf16.mxu0 %v11282_v48  ;;  %v11346_v48 = vcombine.high %v4945_v30, %v4953_v20 }
0x1585   : > { %5766 = vmatmul.mubr.bf16.vlgmr.msra.gmra.mrb[52].mxu1 %v15330_v61  ;;  %v4936_v61 = vld [vmem:[#allocation23 + $0x1e0] sm:$0xff] }
0x1586   : > { %5807 = vmatmul.mubr.bf16.vlgmr.msra.gmra.mrb[68].mxu0 %v15332_v51  ;;  %5816 = vmatpush1.bf16.xpose.msra.mxu1 %v11279_v53  ;;  %v4937_v51 = vld [vmem:[#allocation23 + $0x1e8] sm:$0xff]  ;;  %v11328_v4 = vcombine.high %v4928_v62, %v4936_v61  ;;  %v11327_v16 = vcombine.low %v4928_v62, %v4936_v61  ;;  %v11343_v61 = vcombine.low %v4944_v15, %v4952_v19  ;;  %v4992_v15 = vld [vmem:[#allocation23 + $0x3a0] sm:$0xff] }
0x1587   : > { %5857 = vmatpush1.bf16.xpose.msra.mxu0 %v11281_v18  ;;  %5817 = vmatprep.subr.bf16.mxu1 %v11296_v33  ;;  %v11330_v5 = vcombine.high %v4929_v63, %v4937_v51  ;;  %v11329_v43 = vcombine.low %v4929_v63, %v4937_v51  ;;  %v4969_v62 = vld [vmem:[#allocation23 + $0x2e8] sm:$0xff]  ;;  %v11345_v63 = vcombine.low %v4945_v30, %v4953_v20  ;;  %v5000_v19 = vld [vmem:[#allocation23 + $0x3e0] sm:$0xff] }
0x1588   : > { %5858 = vmatprep.subr.bf16.mxu0 %v11298_v36  ;;  %v11392_v20 = vcombine.high %v4992_v15, %v5000_v19 }
0x158e   : > { %5818 = vmatpush1.bf16.xpose.msra.mxu1 %v11295_v57  ;;  %v4960_v57 = vld [vmem:[#allocation23 + $0x2a0] sm:$0xff] }
0x158f   : > { %5859 = vmatpush1.bf16.xpose.msra.mxu0 %v11297_v58  ;;  %5819 = vmatprep.subr.bf16.mxu1 %v11312_v59  ;;  %v4968_v58 = vld [vmem:[#allocation23 + $0x2e0] sm:$0xff] }
0x1590   : > { %5860 = vmatprep.subr.bf16.mxu0 %v11314_v60  ;;  %v4961_v60 = vld [vmem:[#allocation23 + $0x2a8] sm:$0xff]  ;;  %v11360_v51 = vcombine.high %v4960_v57, %v4968_v58 }
0x1596   : > { %5820 = vmatpush1.bf16.xpose.msra.mxu1 %v11311_v0  ;;  %v11362_v0 = vcombine.high %v4961_v60, %v4969_v62 }
0x1597   : > { %5861 = vmatpush1.bf16.xpose.msra.mxu0 %v11313_v3  ;;  %5821 = vmatprep.subr.bf16.mxu1 %v11328_v4  ;;  %v4976_v3 = vld [vmem:[#allocation23 + $0x320] sm:$0xff] }
0x1598   : > { %v4690_v14 = vpop.f32.mrb[40].mxu1  ;;  %5862 = vmatprep.subr.bf16.mxu0 %v11330_v5  ;;  %v4984_v4 = vld [vmem:[#allocation23 + $0x360] sm:$0xff]  ;;  %v4977_v5 = vld [vmem:[#allocation23 + $0x328] sm:$0xff] }
0x1599   : > { %v4691_v23 = vadd.f32 %v4690_v14, %v3671_v6  ;;  %v4733_v24 = vpop.f32.mrb[56].mxu0  ;;  %v4692_v28 = vpop.f32.mrb[41].mxu1 }
0x159a   : > { %v4734_v31 = vadd.f32 %v4733_v24, %v3679_v9  ;;  %v4693_v29 = vadd.f32 %v4692_v28, %v3675_v10  ;;  %v4735_v37 = vpop.f32.mrb[57].mxu0  ;;  %v4694_v38 = vpop.f32.mrb[42].mxu1  ;;  %v5001_v24 = vld [vmem:[#allocation23 + $0x3e8] sm:$0xff]  ;;  %v11375_v28 = vcombine.low %v4976_v3, %v4984_v4 }
0x159b   : > { %v4736_v17 = vadd.f32 %v4735_v37, %v3683_v11  ;;  %v4695_v39 = vadd.f32 %v4694_v38, %v3671_v6  ;;  %v4737_v40 = vpop.f32.mrb[58].mxu0  ;;  %v4696_v41 = vpop.f32.mrb[43].mxu1  ;;  %v4836_v34 = vmax.f32 %v4691_v23, 0.0  ;;  %v4985_v6 = vld [vmem:[#allocation23 + $0x368] sm:$0xff]  ;;  %v4890_v37 = vld [vmem:[#allocation23 + $0x70] sm:$0xff]  ;;  %v4883_v38 = vld [vmem:[#allocation23 + $0x38] sm:$0xff] }
0x159c   : > { %v4738_v42 = vadd.f32 %v4737_v40, %v3679_v9  ;;  %v4697_v46 = vadd.f32 %v4696_v41, %v3675_v10  ;;  %v4739_v47 = vpop.f32.mrb[59].mxu0  ;;  %v4838_v52 = vmax.f32 %v4734_v31, 0.0  ;;  %v4837_v53 = vmax.f32 %v4693_v29, 0.0  ;;  %v4993_v23 = vld [vmem:[#allocation23 + $0x3a8] sm:$0xff]  ;;  %v4882_v29 = vld [vmem:[#allocation23 + $0x30] sm:$0xff] }
0x159d   : > { %v4852_v50 = vmax.f32 %v4695_v39, 0.0  ;;  %v4740_v44 = vadd.f32 %v4739_v47, %v3683_v11  ;;  %v4839_v36 = vmax.f32 %v4736_v17, 0.0  ;;  %v11359_v9 = vcombine.low %v4960_v57, %v4968_v58  ;;  %v4930_v57 = vld [vmem:[#allocation23 + $0x1b0] sm:$0xff] }
0x159e   : > { %v4854_v18 = vmax.f32 %v4738_v42, 0.0  ;;  %v4853_v33 = vmax.f32 %v4697_v46, 0.0  ;;  %5822 = vmatpush1.bf16.xpose.msra.mxu1 %v11327_v16  ;;  %v11361_v10 = vcombine.low %v4961_v60, %v4969_v62  ;;  %v11376_v11 = vcombine.high %v4976_v3, %v4984_v4  ;;  %v4891_v16 = vld [vmem:[#allocation23 + $0x78] sm:$0xff]  ;;  %v4938_v58 = vld [vmem:[#allocation23 + $0x1f0] sm:$0xff] }
0x159f   : > { %v15346_v54 = vpack.c.bf16 %v4852_v50, %v4836_v34  ;;  %v4855_v55 = vmax.f32 %v4740_v44, 0.0  ;;  %5863 = vmatpush1.bf16.xpose.msra.mxu0 %v11329_v43  ;;  %5823 = vmatprep.subr.bf16.mxu1 %v11344_v45  ;;  %v11378_v14 = vcombine.high %v4977_v5, %v4985_v6  ;;  %v11377_v30 = vcombine.low %v4977_v5, %v4985_v6  ;;  %v4898_v43 = vld [vmem:[#allocation23 + $0xb0] sm:$0xff]  ;;  %v4899_v42 = vld [vmem:[#allocation23 + $0xb8] sm:$0xff] }
0x15a0   : > { %v4870_v32 = vpack.c.bf16 %v4854_v18, %v4838_v52  ;;  %v4869_v56 = vpack.c.bf16 %v4853_v33, %v4837_v53  ;;  %5864 = vmatprep.subr.bf16.mxu0 %v11346_v48  ;;  %v11394_v31 = vcombine.high %v4993_v23, %v5001_v24  ;;  %v11391_v17 = vcombine.low %v4992_v15, %v5000_v19  ;;  %v4906_v45 = vld [vmem:[#allocation23 + $0xf0] sm:$0xff]  ;;  %v4907_v46 = vld [vmem:[#allocation23 + $0xf8] sm:$0xff] }
0x15a1   : > { %v4871_v59 = vpack.c.bf16 %v4855_v55, %v4839_v36  ;;  %v11393_v39 = vcombine.low %v4993_v23, %v5001_v24  ;;  %v11284_v40 = vcombine.high %v4882_v29, %v4890_v37  ;;  %v11286_v41 = vcombine.high %v4883_v38, %v4891_v16  ;;  %v4914_v44 = vld [vmem:[#allocation23 + $0x130] sm:$0xff]  ;;  %v4915_v53 = vld [vmem:[#allocation23 + $0x138] sm:$0xff] }
0x15a2   : > { %5847 = vmatprep.mubr.bf16.mxu1 %v4869_v56  ;;  %v11283_v47 = vcombine.low %v4882_v29, %v4890_v37  ;;  %v11285_v48 = vcombine.low %v4883_v38, %v4891_v16  ;;  %v11300_v34 = vcombine.high %v4898_v43, %v4906_v45  ;;  %v11302_v50 = vcombine.high %v4899_v42, %v4907_v46  ;;  %v4922_v52 = vld [vmem:[#allocation23 + $0x170] sm:$0xff]  ;;  %v4923_v18 = vld [vmem:[#allocation23 + $0x178] sm:$0xff] }
0x15a3   : > { %5888 = vmatprep.mubr.bf16.mxu0 %v4871_v59  ;;  %v11299_v33 = vcombine.low %v4898_v43, %v4906_v45  ;;  %v11301_v36 = vcombine.low %v4899_v42, %v4907_v46  ;;  %v11316_v55 = vcombine.high %v4914_v44, %v4922_v52  ;;  %v11318_v56 = vcombine.high %v4915_v53, %v4923_v18  ;;  %v4946_v5 = vld [vmem:[#allocation23 + $0x230] sm:$0xff]  ;;  %v4955_v15 = vld [vmem:[#allocation23 + $0x278] sm:$0xff] }
0x15a4   : > { %v11315_v59 = vcombine.low %v4914_v44, %v4922_v52  ;;  %v11317_v60 = vcombine.low %v4915_v53, %v4923_v18  ;;  %v11332_v62 = vcombine.high %v4930_v57, %v4938_v58  ;;  %v3699_v3 = vrot.slane %v15336_v2, %v15320_v13  ;;  %v4954_v6 = vld [vmem:[#allocation23 + $0x270] sm:$0xff] }
0x15a5   : > { %v11348_v38 = vcombine.high %v4946_v5, %v4954_v6  ;;  %v4962_v18 = vld [vmem:[#allocation23 + $0x2b0] sm:$0xff] }
0x15a6   : > { %5824 = vmatpush1.bf16.xpose.msra.mxu1 %v11343_v61 }
0x15a7   : > { %5865 = vmatpush1.bf16.xpose.msra.mxu0 %v11345_v63  ;;  %5825 = vmatprep.subr.bf16.mxu1 %v11360_v51  ;;  %v3687_v63 = vrot.slane %v15336_v2, %v15311_v7  ;;  %v3695_v51 = vrot.slane %v15336_v2, %v15314_v8 }
0x15a8   : > { %5866 = vmatprep.subr.bf16.mxu0 %v11362_v0  ;;  %v3691_v0 = vrot.slane %v15336_v2, %v15317_v12 }
0x15ae   : > { %5826 = vmatpush1.bf16.xpose.msra.mxu1 %v11359_v9 }
0x15af   : > { %5867 = vmatpush1.bf16.xpose.msra.mxu0 %v11361_v10  ;;  %5827 = vmatprep.subr.bf16.mxu1 %v11376_v11 }
0x15b0   : > { %5868 = vmatprep.subr.bf16.mxu0 %v11378_v14  ;;  %v4947_v14 = vld [vmem:[#allocation23 + $0x238] sm:$0xff] }
0x15b6   : > { %5828 = vmatpush1.bf16.xpose.msra.mxu1 %v11375_v28 }
0x15b7   : > { %5869 = vmatpush1.bf16.xpose.msra.mxu0 %v11377_v30  ;;  %5829 = vmatprep.subr.bf16.mxu1 %v11392_v20  ;;  %v11331_v30 = vcombine.low %v4930_v57, %v4938_v58  ;;  %v11347_v57 = vcombine.low %v4946_v5, %v4954_v6  ;;  %v11349_v58 = vcombine.low %v4947_v14, %v4955_v15  ;;  %v5002_v5 = vld [vmem:[#allocation23 + $0x3f0] sm:$0xff]  ;;  %v4995_v6 = vld [vmem:[#allocation23 + $0x3b8] sm:$0xff] }
0x15b8   : > { %5870 = vmatprep.subr.bf16.mxu0 %v11394_v31 }
0x15be   : > { %5830 = vmatpush1.bf16.xpose.msra.mxu1 %v11391_v17 }
0x15bf   : > { %5871 = vmatpush1.bf16.xpose.msra.mxu0 %v11393_v39  ;;  %5897 = vmatprep.subr.bf16.mxu1 %v11284_v40  ;;  %v11350_v40 = vcombine.high %v4947_v14, %v4955_v15 }
0x15c0   : > { %5938 = vmatprep.subr.bf16.mxu0 %v11286_v41 }
0x15c5   : > { %5848 = vmatmul.mubr.bf16.vlgmr.msra.gmra.mrb[56].mxu1 %v15346_v54  ;;  %v4931_v54 = vld [vmem:[#allocation23 + $0x1b8] sm:$0xff] }
0x15c6   : > { %5889 = vmatmul.mubr.bf16.vlgmr.msra.gmra.mrb[72].mxu0 %v4870_v32  ;;  %5898 = vmatpush1.bf16.xpose.msra.mxu1 %v11283_v47  ;;  %v4939_v32 = vld [vmem:[#allocation23 + $0x1f8] sm:$0xff] }
0x15c7   : > { %5939 = vmatpush1.bf16.xpose.msra.mxu0 %v11285_v48  ;;  %5899 = vmatprep.subr.bf16.mxu1 %v11300_v34  ;;  %v11334_v61 = vcombine.high %v4931_v54, %v4939_v32  ;;  %v11333_v2 = vcombine.low %v4931_v54, %v4939_v32 }
0x15c8   : > { %5940 = vmatprep.subr.bf16.mxu0 %v11302_v50 }
0x15ce   : > { %5900 = vmatpush1.bf16.xpose.msra.mxu1 %v11299_v33  ;;  %v4970_v33 = vld [vmem:[#allocation23 + $0x2f0] sm:$0xff] }
0x15cf   : > { %5941 = vmatpush1.bf16.xpose.msra.mxu0 %v11301_v36  ;;  %5901 = vmatprep.subr.bf16.mxu1 %v11316_v55  ;;  %v4963_v55 = vld [vmem:[#allocation23 + $0x2b8] sm:$0xff]  ;;  %v11364_v54 = vcombine.high %v4962_v18, %v4970_v33 }
0x15d0   : > { %5942 = vmatprep.subr.bf16.mxu0 %v11318_v56  ;;  %v4971_v56 = vld [vmem:[#allocation23 + $0x2f8] sm:$0xff] }
0x15d1   : > { %v11366_v32 = vcombine.high %v4963_v55, %v4971_v56 }
0x15d6   : > { %5902 = vmatpush1.bf16.xpose.msra.mxu1 %v11315_v59  ;;  %v4978_v59 = vld [vmem:[#allocation23 + $0x330] sm:$0xff] }
0x15d7   : > { %5943 = vmatpush1.bf16.xpose.msra.mxu0 %v11317_v60  ;;  %5903 = vmatprep.subr.bf16.mxu1 %v11332_v62  ;;  %v4986_v60 = vld [vmem:[#allocation23 + $0x370] sm:$0xff]  ;;  %v4979_v62 = vld [vmem:[#allocation23 + $0x338] sm:$0xff] }
0x15d8   : > { %v4776_v4 = vpop.f32.mrb[44].mxu1  ;;  %5944 = vmatprep.subr.bf16.mxu0 %v11334_v61  ;;  %v4987_v61 = vld [vmem:[#allocation23 + $0x378] sm:$0xff] }
0x15d9   : > { %v4777_v9 = vadd.f32 %v4776_v4, %v3687_v63  ;;  %v4819_v10 = vpop.f32.mrb[60].mxu0  ;;  %v4778_v11 = vpop.f32.mrb[45].mxu1  ;;  %v4994_v4 = vld [vmem:[#allocation23 + $0x3b0] sm:$0xff] }
0x15da   : > { %v4820_v19 = vadd.f32 %v4819_v10, %v3695_v51  ;;  %v4779_v23 = vadd.f32 %v4778_v11, %v3691_v0  ;;  %v4821_v24 = vpop.f32.mrb[61].mxu0  ;;  %v4780_v28 = vpop.f32.mrb[46].mxu1  ;;  %v11379_v10 = vcombine.low %v4978_v59, %v4986_v60  ;;  %v11381_v11 = vcombine.low %v4979_v62, %v4987_v61 }
0x15db   : > { %v4822_v20 = vadd.f32 %v4821_v24, %v3699_v3  ;;  %v4781_v31 = vadd.f32 %v4780_v28, %v3687_v63  ;;  %v4823_v29 = vpop.f32.mrb[62].mxu0  ;;  %v4782_v37 = vpop.f32.mrb[47].mxu1  ;;  %v4840_v41 = vmax.f32 %v4777_v9, 0.0  ;;  %v11363_v63 = vcombine.low %v4962_v18, %v4970_v33  ;;  %v5003_v9 = vld [vmem:[#allocation23 + $0x3f8] sm:$0xff]  ;;  %v11270_v24 = vld [vmem:[#allocation25] ss:$0 sm:$0xff] }
0x15dc   : > { %v4824_v16 = vadd.f32 %v4823_v29, %v3695_v51  ;;  %v4783_v17 = vadd.f32 %v4782_v37, %v3691_v0  ;;  %v4825_v39 = vpop.f32.mrb[63].mxu0  ;;  %v4842_v42 = vmax.f32 %v4820_v19, 0.0  ;;  %v4841_v46 = vmax.f32 %v4779_v23, 0.0 }
0x15dd   : > { %v4856_v43 = vmax.f32 %v4781_v31, 0.0  ;;  %v4826_v45 = vadd.f32 %v4825_v39, %v3699_v3  ;;  %v4843_v34 = vmax.f32 %v4822_v20, 0.0  ;;  %v11365_v51 = vcombine.low %v4963_v55, %v4971_v56 }
0x15de   : > { %v4858_v47 = vmax.f32 %v4824_v16, 0.0  ;;  %v4857_v48 = vmax.f32 %v4783_v17, 0.0  ;;  %5904 = vmatpush1.bf16.xpose.msra.mxu1 %v11331_v30  ;;  %v11380_v0 = vcombine.high %v4978_v59, %v4986_v60  ;;  %v11382_v3 = vcombine.high %v4979_v62, %v4987_v61 }
0x15df   : > { %v4872_v50 = vpack.c.bf16 %v4856_v43, %v4840_v41  ;;  %v4859_v44 = vmax.f32 %v4826_v45, 0.0  ;;  %5945 = vmatpush1.bf16.xpose.msra.mxu0 %v11333_v2  ;;  %5905 = vmatprep.subr.bf16.mxu1 %v11348_v38  ;;  %v11396_v14 = vcombine.high %v4994_v4, %v5002_v5  ;;  %v11398_v15 = vcombine.high %v4995_v6, %v5003_v9 }
0x15e0   : > { %v4874_v52 = vpack.c.bf16 %v4858_v47, %v4842_v42  ;;  %v4873_v53 = vpack.c.bf16 %v4857_v48, %v4841_v46  ;;  %5946 = vmatprep.subr.bf16.mxu0 %v11350_v40  ;;  %v11395_v19 = vcombine.low %v4994_v4, %v5002_v5  ;;  %v11397_v23 = vcombine.low %v4995_v6, %v5003_v9 }
0x15e1   : > { %v4875_v36 = vpack.c.bf16 %v4859_v44, %v4843_v34 }
0x15e2   : > { %5929 = vmatprep.mubr.bf16.mxu1 %v4873_v53 }
0x15e3   : > { %5970 = vmatprep.mubr.bf16.mxu0 %v4875_v36 }
0x15e6   : > { %5906 = vmatpush1.bf16.xpose.msra.mxu1 %v11347_v57 }
0x15e7   : > { %5947 = vmatpush1.bf16.xpose.msra.mxu0 %v11349_v58  ;;  %5907 = vmatprep.subr.bf16.mxu1 %v11364_v54 }
0x15e8   : > { %5948 = vmatprep.subr.bf16.mxu0 %v11366_v32 }
0x15ee   : > { %5908 = vmatpush1.bf16.xpose.msra.mxu1 %v11363_v63 }
0x15ef   : > { %5949 = vmatpush1.bf16.xpose.msra.mxu0 %v11365_v51  ;;  %5909 = vmatprep.subr.bf16.mxu1 %v11380_v0 }
0x15f0   : > { %5950 = vmatprep.subr.bf16.mxu0 %v11382_v3 }
0x15f6   : > { %5910 = vmatpush1.bf16.xpose.msra.mxu1 %v11379_v10 }
0x15f7   : > { %5951 = vmatpush1.bf16.xpose.msra.mxu0 %v11381_v11  ;;  %5911 = vmatprep.subr.bf16.mxu1 %v11396_v14 }
0x15f8   : > { %5952 = vmatprep.subr.bf16.mxu0 %v11398_v15 }
0x15fe   : > { %5912 = vmatpush1.bf16.xpose.msra.mxu1 %v11395_v19 }
0x15ff   : > { %5953 = vmatpush1.bf16.xpose.msra.mxu0 %v11397_v23  ;;  %12400 = vmatprep.subr.bf16.mxu1 %v14355_v1 }
0x1600   : > { %12408 = vmatprep.subr.bf16.mxu0 %v14355_v1 }
0x1605   : > { %5930 = vmatmul.mubr.bf16.vlgmr.msra.gmra.mrb[60].mxu1 %v4872_v50 }
0x1606   : > { %5971 = vmatmul.mubr.bf16.vlgmr.msra.gmra.mrb[76].mxu0 %v4874_v52  ;;  %12404 = vmatprep.mubr.msk.bf16.mxu1 %vm14356_vm0, %v14355_v1 }
0x1607   : > { %12412 = vmatprep.mubr.msk.bf16.mxu0 %vm14356_vm0, %v14355_v1 }
0x1618   : > { %v5685_v28 = vpop.f32.mrb[48].mxu1 }
0x1619   : > { %v5686_v30 = vadd.f32 %v11270_v24, %v5685_v28  ;;  %v5726_v20 = vpop.f32.mrb[64].mxu0  ;;  %v5687_v31 = vpop.f32.mrb[49].mxu1 }
0x161a   : > { %v5728_v29 = vpop.f32.mrb[65].mxu0  ;;  %v5688_v37 = vpop.f32.mrb[50].mxu1 }
0x161b   : > { %v5727_v2 = vadd.f32 %v5726_v20, %v5686_v30  ;;  %v5689_v38 = vadd.f32 %v11270_v24, %v5688_v37  ;;  %v5729_v16 = vpop.f32.mrb[66].mxu0  ;;  %v5690_v17 = vpop.f32.mrb[51].mxu1 }
0x161c   : > { %v5731_v39 = vpop.f32.mrb[67].mxu0 }
0x161d   : > { %v5730_v40 = vadd.f32 %v5729_v16, %v5689_v38  ;;  %v13191_v38 = vld [vmem:[#allocation31] sm:$0xff]  }
0x161e   : > { %12409 = vmatpush3.bf16.xpose.msra.mxu0 %v13191_v38 }
0x161f   : > { %12410 = vmatprep.subr.bf16.mxu0 %v14355_v1 }
0x1658   : > { %v5767_v41 = vpop.f32.mrb[52].mxu1 }
0x1659   : > { %v5768_v43 = vadd.f32 %v5767_v41, %v5727_v2  ;;  %v5808_v45 = vpop.f32.mrb[68].mxu0  ;;  %v5769_v42 = vpop.f32.mrb[53].mxu1  ;;  %v13190_v2 = vld [vmem:[#allocation29] sm:$0xff]  }
0x165a   : > { %v5810_v46 = vpop.f32.mrb[69].mxu0  ;;  %v5770_v47 = vpop.f32.mrb[54].mxu1  ;;  %12401 = vmatpush3.bf16.xpose.msra.mxu1 %v13190_v2  ;;  %v11399_v42 = vld [vmem:[#allocation26] ss:$0 sm:$0xff] }
0x165b   : > { %v5809_v48 = vadd.f32 %v5808_v45, %v5768_v43  ;;  %v5771_v34 = vadd.f32 %v5770_v47, %v5730_v40  ;;  %v5811_v50 = vpop.f32.mrb[70].mxu0  ;;  %v5772_v44 = vpop.f32.mrb[55].mxu1  ;;  %12402 = vmatprep.subr.bf16.mxu1 %v14355_v1 }
0x165c   : > { %v5813_v52 = vpop.f32.mrb[71].mxu0 }
0x165d   : > { %v5812_v53 = vadd.f32 %v5811_v50, %v5771_v34  ;;  %v11400_v50 = vld [vmem:[#allocation28] ss:$0 sm:$0xff] }
0x1698   : > { %v5849_v18 = vpop.f32.mrb[56].mxu1 }
0x1699   : > { %v5850_v33 = vadd.f32 %v5849_v18, %v5809_v48  ;;  %v5890_v36 = vpop.f32.mrb[72].mxu0  ;;  %v5851_v55 = vpop.f32.mrb[57].mxu1  ;;  %v13194_v18 = vld [vmem:[#allocation32] sm:$0xff]  }
0x169a   : > { %v5892_v56 = vpop.f32.mrb[73].mxu0  ;;  %v5852_v57 = vpop.f32.mrb[58].mxu1  ;;  %v13196_v55 = vld [vmem:[#allocation29 + $0x10] sm:$0xff]  }
0x169b   : > { %v5891_v58 = vadd.f32 %v5890_v36, %v5850_v33  ;;  %v5853_v54 = vadd.f32 %v5852_v57, %v5812_v53  ;;  %v5893_v32 = vpop.f32.mrb[74].mxu0  ;;  %v5854_v59 = vpop.f32.mrb[59].mxu1  ;;  %v13195_v36 = vld [vmem:[#allocation32 + $0x8] sm:$0xff]   ;;  %v13197_v56 = vld [vmem:[#allocation29 + $0x18] sm:$0xff]   ;;  %v13198_v57 = vld [vmem:[#allocation32 + $0x10] sm:$0xff]  }
0x169c   : > { %v5895_v60 = vpop.f32.mrb[75].mxu0  ;;  %v11404_v59 = vld [vmem:[#allocation35] ss:$0 sm:$0xff] }
0x169d   : > { %v5894_v62 = vadd.f32 %v5893_v32, %v5853_v54  ;;  %v11401_v54 = vld [vmem:[#allocation34] ss:$0 sm:$0xff] }
0x16d8   : > { %v5931_v61 = vpop.f32.mrb[60].mxu1 }
0x16d9   : > { %v5932_v63 = vadd.f32 %v5931_v61, %v5891_v58  ;;  %v5972_v51 = vpop.f32.mrb[76].mxu0  ;;  %v5933_v0 = vpop.f32.mrb[61].mxu1  ;;  %v13199_v58 = vld [vmem:[#allocation32 + $0x18] sm:$0xff]  }
0x16da   : > { %v5974_v3 = vpop.f32.mrb[77].mxu0  ;;  %v5934_v4 = vpop.f32.mrb[62].mxu1 }
0x16db   : > { %v5973_v5 = vadd.f32 %v5972_v51, %v5932_v63  ;;  %v5935_v6 = vadd.f32 %v5934_v4, %v5894_v62  ;;  %v5975_v9 = vpop.f32.mrb[78].mxu0  ;;  %v5936_v10 = vpop.f32.mrb[63].mxu1 }
0x16dc   : > { %v5977_v11 = vpop.f32.mrb[79].mxu0 }
0x16dd   : > { %v5976_v14 = vadd.f32 %v5975_v9, %v5935_v6  ;;  %v5979_v15 = vadd.f32 %v5973_v5, %v15256_v21  ;;  %v13192_v21 = vld [vmem:[#allocation29 + $0x8] sm:$0xff]  }
0x16de   : > { %12403 = vmatpush3.bf16.xpose.msra.mxu1 %v13192_v21  ;;  %v11407_v11 = vld [vmem:[#allocation37] ss:$0 sm:$0xff]  ;;  %v11422_v21 = vld [vmem:[#allocation37 + $0x1] ss:$0 sm:$0xff] }
0x16df   : > { %5983 = vadd.xlane.f32.xlu1 %v5979_v15  ;;  %v5980_v19 = vadd.f32 %v5976_v14, %v15258_v22  ;;  %v13193_v22 = vld [vmem:[#allocation31 + $0x8] sm:$0xff]   ;;  %12416 = vmatprep.subr.bf16.mxu1 %v14355_v1 }
0x16e0   : > { %12411 = vmatpush3.bf16.xpose.msra.mxu0 %v13193_v22 }
0x16e1   : > { %5985 = vadd.xlane.f32.xlu0 %v5980_v19 }
0x176c   : > { %v5984_v23 = vpop.xlane.xlu1 %5983 }
0x176d   : > { %v5987_v24 = vmul.f32 0.0078125, %v5984_v23 }
0x176e   : > { %v5986_v28 = vpop.xlane.xlu0 %5985 }
0x176f   : > { %v5989_v30 = vsub.f32 %v5979_v15, %v5987_v24  ;;  %v5988_v20 = vmul.f32 0.0078125, %v5986_v28 }
0x1771   : > { %v5990_v31 = vsub.f32 %v5980_v19, %v5988_v20  ;;  %v5991_v29 = vmul.f32 %v5989_v30, %v5989_v30 }
0x1773   : > { %5993 = vadd.xlane.f32.xlu1 %v5991_v29  ;;  %v5992_v37 = vmul.f32 %v5990_v31, %v5990_v31  ;;  %v11416_v29 = vld [vmem:[#allocation34 + $0x1] ss:$0 sm:$0xff] }
0x1775   : > { %5995 = vadd.xlane.f32.xlu0 %v5992_v37 }
0x1800   : > { %v5994_v16 = vpop.xlane.xlu1 %5993 }
0x1801   : > { %v5997_v17 = vmul.f32 0.0078125, %v5994_v16 }
0x1802   : > { %v5996_v39 = vpop.xlane.xlu0 %5995 }
0x1803   : > { %v5999_v40 = vadd.f32 1e-05, %v5997_v17  ;;  %v5998_v41 = vmul.f32 0.0078125, %v5996_v39 }
0x1805   : > { %13394 = vrsqrt.f32 %v5999_v40  ;;  %v6000_v43 = vadd.f32 1e-05, %v5998_v41 }
0x1807   : > { %13396 = vrsqrt.f32 %v6000_v43 }
0x180f   : > { %v13395_v45 = vpop.eup %13394 }
0x1810   : > { %v6003_v46 = vmul.f32 %v13395_v45, %v5989_v30 }
0x1811   : > { %v13397_v47 = vpop.eup %13396 }
0x1812   : > { %v6011_v48 = vmul.f32 %v11399_v42, %v6003_v46  ;;  %v6004_v34 = vmul.f32 %v13397_v47, %v5990_v31 }
0x1814   : > { %v6012_v44 = vmul.f32 %v11399_v42, %v6004_v34  ;;  %v15368_v52 = vadd.f32 %v11400_v50, %v6011_v48 }
0x1816   : > { %v15370_v53 = vadd.f32 %v11400_v50, %v6012_v44 }
0x1818   : > { %v15374_v33 = vpack.c.bf16 %v15370_v53, %v15368_v52 }
0x181a   : > { %12405 = vmatmul.mubr.bf16.vlgmr.msra.gmra.mrb[64].mxu1 %v15374_v33  ;;  %12413 = vmatmul.mubr.bf16.vlgmr.msra.gmra.mrb[80].mxu0 %v15374_v33 }
0x181b   : > { %12417 = vmatpush3.bf16.xpose.msra.mxu1 %v13194_v18  ;;  %12420 = vmatprep.mubr.msk.bf16.mxu1 %vm14356_vm0, %v14355_v1 }
0x181c   : > { %12418 = vmatprep.subr.bf16.mxu1 %v14355_v1 }
0x1823   : > { %12419 = vmatpush3.bf16.xpose.msra.mxu1 %v13195_v36 }
0x1824   : > { %12438 = vmatprep.subr.bf16.mxu1 %v14355_v1 }
0x182a   : > { %12421 = vmatmul.mubr.bf16.vlgmr.msra.gmra.mrb[68].mxu1 %v15374_v33 }
0x182b   : > { %12439 = vmatpush3.bf16.xpose.msra.mxu1 %v13196_v55  ;;  %12442 = vmatprep.mubr.msk.bf16.mxu1 %vm14356_vm0, %v14355_v1 }
0x182c   : > { %12440 = vmatprep.subr.bf16.mxu1 %v14355_v1 }
0x1833   : > { %12441 = vmatpush3.bf16.xpose.msra.mxu1 %v13197_v56 }
0x1834   : > { %12454 = vmatprep.subr.bf16.mxu1 %v14355_v1 }
0x183a   : > { %12443 = vmatmul.mubr.bf16.vlgmr.msra.gmra.mrb[72].mxu1 %v15374_v33 }
0x183b   : > { %12455 = vmatpush3.bf16.xpose.msra.mxu1 %v13198_v57  ;;  %12458 = vmatprep.mubr.msk.bf16.mxu1 %vm14356_vm0, %v14355_v1 }
0x183c   : > { %12456 = vmatprep.subr.bf16.mxu1 %v14355_v1 }
0x1843   : > { %12457 = vmatpush3.bf16.xpose.msra.mxu1 %v13199_v58 }
0x1844   : > { %12484 = vmatprep.subr.bf16.mxu1 %v14355_v1 }
0x184a   : > { %12459 = vmatmul.mubr.bf16.vlgmr.msra.gmra.mrb[76].mxu1 %v15374_v33 }
0x184b   : > { %12488 = vmatprep.mubr.msk.bf16.mxu1 %vm14356_vm0, %v14355_v1 }
0x18ed   : > { %v6079_v32 = vpop.f32.mrb[64].mxu1  ;;  %v6143_v60 = vpop.f32.mrb[80].mxu0 }
0x18ee   : > { %v6080_v62 = vadd.f32 %v11401_v54, %v6079_v32  ;;  %v12406_v61 = vpop.f32.mrb[65].mxu1  ;;  %v12414_v63 = vpop.f32.mrb[81].mxu0  ;;  %v6144_v3 = vadd.f32 %v11404_v59, %v6143_v60  ;;  %v13203_v60 = vld [vmem:[%s15817_s5 + $0x8] sm:$0xff]  }
0x18ef   : > { %v6082_v51 = vpop.f32.mrb[66].mxu1  ;;  %v6146_v0 = vpop.f32.mrb[82].mxu0 }
0x18f0   : > { %v6147_v4 = vadd.f32 %v11404_v59, %v6146_v0  ;;  %v12407_v5 = vpop.f32.mrb[67].mxu1  ;;  %v12415_v6 = vpop.f32.mrb[83].mxu0  ;;  %12428 = vmatprep.mubr.msk.f32.mxu0 %vm1708_vm1, %v6080_v62  ;;  %v6083_v10 = vadd.f32 %v11401_v54, %v6082_v51  ;;  %v13202_v59 = vld [vmem:[%s15817_s5] sm:$0xff]  }
0x18f1   : > { %12485 = vmatpush3.bf16.msra.mxu1 %v13202_v59  ;;  %v13201_v5 = vld [vmem:[#allocation31 + $0x18] sm:$0xff]  }
0x18f2   : > { %v12644_v9 = vpack.c.bf16 %v6147_v4, %v6144_v3  ;;  %12486 = vmatprep.subr.bf16.mxu1 %v14355_v1  ;;  %v13200_v3 = vld [vmem:[#allocation31 + $0x10] sm:$0xff]  }
0x18f4   : > { %12646 = vmatprep.subr.msk.bf16.mxu0 %vm15114_vm2, %v12644_v9 }
0x18f5   : > { %12649 = vmatpush3.bf16.xpose.msk.msra.mxu0 %vm15114_vm2, %v12644_v9  ;;  %12487 = vmatpush3.bf16.msra.mxu1 %v13203_v60 }
0x18f6   : > { %12500 = vmatprep.subr.bf16.mxu1 %v14355_v1 }
0x18fc   : > { %12429 = vmatmul.mubr.msk.f32.vlgmr.msra.gmra.mrb[84].mxu0 %vm1708_vm1, %v6083_v10 }
0x18fd   : > { %v6207_v14 = vpop.f32.mrb[68].mxu1 }
0x18fe   : > { %v12422_v15 = vpop.f32.mrb[69].mxu1  ;;  %v6208_v23 = vadd.f32 %v11407_v11, %v6207_v14 }
0x18ff   : > { %v6210_v19 = vpop.f32.mrb[70].mxu1  ;;  %v13205_v15 = vld [vmem:[#allocation31 + $0x28] sm:$0xff]  }
0x1900   : > { %v6211_v24 = vadd.f32 %v11407_v11, %v6210_v19  ;;  %v12423_v28 = vpop.f32.mrb[71].mxu1  ;;  %v13204_v11 = vld [vmem:[#allocation31 + $0x20] sm:$0xff]  }
0x1901   : > { %v11419_v19 = vld [vmem:[#allocation35 + $0x1] ss:$0 sm:$0xff] }
0x1902   : > { %v12650_v30 = vpack.c.bf16 %v6211_v24, %v6208_v23 }
0x1904   : > { %12651 = vmatprep.subr.bf16.mxu0 %v12650_v30 }
0x1905   : > { %12653 = vmatpush3.bf16.msra.mxu0 %v12650_v30 }
0x1906   : > { %12446 = vmatprep.subr.bf16.mxu0 %v14355_v1 }
0x190d   : > { %v6470_v20 = vpop.f32.mrb[72].mxu1 }
0x190e   : > { %v12444_v31 = vpop.f32.mrb[73].mxu1  ;;  %v6471_v6 = vadd.f32 %v11416_v29, %v6470_v20 }
0x190f   : > { %v6473_v37 = vpop.f32.mrb[74].mxu1 }
0x1910   : > { %v15402_v2 = vadd.f32 %v11416_v29, %v6473_v37  ;;  %v12445_v38 = vpop.f32.mrb[75].mxu1 }
0x191d   : > { %v6602_v22 = vpop.f32.mrb[76].mxu1 }
0x191e   : > { %v12460_v16 = vpop.f32.mrb[77].mxu1  ;;  %v6603_v39 = vadd.f32 %v11422_v21, %v6602_v22 }
0x191f   : > { %v6605_v17 = vpop.f32.mrb[78].mxu1  ;;  %v11444_v16 = vld [vmem:[#allocation35 + $0x2] ss:$0 sm:$0xff] }
0x1920   : > { %v6606_v40 = vadd.f32 %v11422_v21, %v6605_v17  ;;  %v12461_v41 = vpop.f32.mrb[79].mxu1 }
0x1922   : > { %v15404_v43 = vpack.c.bf16 %v6606_v40, %v6603_v39 }
0x19cf   : > { %v12430_v45 = vpop.f32.mrb[84].mxu0 }
0x19d0   : > { %v6302_v42 = vmul.f32 0.17677669, %v12430_v45  ;;  %v6292_v46 = vpop.f32.mrb[85].mxu0 }
0x19d1   : > { %v6301_v47 = vmul.f32 0.17677669, %v6292_v46 }
0x19d2   : > { %v6306_v48 = vsel %vm1798_vm3, %v6302_v42, -inf }
0x19d3   : > { %6307 = vmax.xlane.f32.xlu0 %v6306_v48  ;;  %v6303_v34 = vsel %vm1798_vm3, %v6301_v47, -inf }
0x19d4   : > { %6304 = vmax.xlane.f32.xlu1 %v6303_v34 }
0x1a60   : > { %v6308_v50 = vpop.xlane.xlu0 %6307 }
0x1a61   : > { %v6310_v44 = vsub.f32 %v6302_v42, %v6308_v50  ;;  %v6305_v18 = vpop.xlane.xlu1 %6304 }
0x1a62   : > { %v6309_v36 = vsub.f32 %v6301_v47, %v6305_v18 }
0x1a63   : > { %v6313_v55 = vmul.f32 1.442695, %v6310_v44 }
0x1a64   : > { %v6311_v56 = vmul.f32 1.442695, %v6309_v36 }
0x1a65   : > { %13398 = vpow2.f32 %v6313_v55 }
0x1a66   : > { %13400 = vpow2.f32 %v6311_v56 }
0x1a6f   : > { %v13399_v57 = vpop.eup %13398 }
0x1a70   : > { %v13401_v58 = vpop.eup %13400  ;;  %v6318_v54 = vsel %vm1798_vm3, %v13399_v57, 0.0 }
0x1a71   : > { %6319 = vadd.xlane.f32.xlu0 %v6318_v54  ;;  %v6315_v32 = vsel %vm1798_vm3, %v13401_v58, 0.0 }
0x1a72   : > { %6316 = vadd.xlane.f32.xlu1 %v6315_v32 }
0x1afe   : > { %v6320_v62 = vpop.xlane.xlu0 %6319 }
0x1aff   : > { %13402 = vrcp.f32 %v6320_v62  ;;  %v6317_v61 = vpop.xlane.xlu1 %6316 }
0x1b00   : > { %13404 = vrcp.f32 %v6317_v61 }
0x1b09   : > { %v13403_v63 = vpop.eup %13402 }
0x1b0a   : > { %v13405_v51 = vpop.eup %13404  ;;  %v6324_v4 = vmul.f32 %v13403_v63, %v13399_v57 }
0x1b0b   : > { %v6323_v0 = vmul.f32 %v13405_v51, %v13401_v58 }
0x1b0d   : > { %12435 = vmatprep.mubr.msk.f32.mxu0 %vm1798_vm3, %v6323_v0  ;;  %v13206_v0 = vld [vmem:[%s15817_s5 + $0x10] sm:$0xff]  }
0x1b0e   : > { %12436 = vmatmul.mubr.msk.f32.vlgmr.msra.gmra.mrb[86].mxu0 %vm1798_vm3, %v6324_v4  ;;  %v13207_v4 = vld [vmem:[%s15817_s5 + $0x18] sm:$0xff]  }
0x1b0f   : > { %12447 = vmatpush3.bf16.xpose.msra.mxu0 %v13200_v3  ;;  %12450 = vmatprep.mubr.msk.bf16.mxu0 %vm14356_vm0, %v14355_v1 }
0x1b10   : > { %12448 = vmatprep.subr.bf16.mxu0 %v14355_v1 }
0x1b17   : > { %12449 = vmatpush3.bf16.xpose.msra.mxu0 %v13201_v5 }
0x1b1e   : > { %12451 = vmatmul.mubr.bf16.vlgmr.msra.gmra.mrb[88].mxu0 %v15374_v33 }
0x1b1f   : > { %12466 = vmatprep.mubr.msk.f32.mxu0 %vm1708_vm1, %v6471_v6 }
0x1be1   : > { %v12437_v9 = vpop.f32.mrb[86].mxu0 }
0x1be2   : > { %v6397_v10 = vpop.f32.mrb[87].mxu0 }
0x1be3   : > { %v6406_v14 = vpack.c.bf16 %v12437_v9, %v6397_v10  ;;  %v13208_v9 = vld [vmem:[#allocation29 + $0x20] sm:$0xff]  }
0x1be5   : > { %12489 = vmatmul.mubr.msk.bf16.vlgmr.msra.gmra.mrb[80].mxu1 %vm1708_vm1, %v6406_v14  ;;  %v13210_v14 = vld [vmem:[#allocation32 + $0x20] sm:$0xff]  }
0x1be6   : > { %12501 = vmatpush3.bf16.xpose.msra.mxu1 %v13204_v11  ;;  %12504 = vmatprep.mubr.msk.bf16.mxu1 %vm14356_vm0, %v14355_v1  ;;  %v13209_v11 = vld [vmem:[#allocation29 + $0x28] sm:$0xff]  }
0x1be7   : > { %12502 = vmatprep.subr.bf16.mxu1 %v14355_v1 }
0x1bee   : > { %12503 = vmatpush3.bf16.xpose.msra.mxu1 %v13205_v15  ;;  %v13211_v15 = vld [vmem:[#allocation32 + $0x28] sm:$0xff]  }
0x1bf1   : > { %v6536_v23 = vpop.f32.mrb[88].mxu0 }
0x1bf2   : > { %v12452_v24 = vpop.f32.mrb[89].mxu0  ;;  %v6537_v30 = vadd.f32 %v11419_v19, %v6536_v23  ;;  %v13213_v23 = vld [vmem:[#allocation29 + $0x38] sm:$0xff]  }
0x1bf3   : > { %v6539_v28 = vpop.f32.mrb[90].mxu0  ;;  %v13214_v24 = vld [vmem:[#allocation32 + $0x30] sm:$0xff]  }
0x1bf4   : > { %v6540_v20 = vadd.f32 %v11419_v19, %v6539_v28  ;;  %v12453_v31 = vpop.f32.mrb[91].mxu0  ;;  %v13212_v19 = vld [vmem:[#allocation29 + $0x30] sm:$0xff]   ;;  %v13215_v28 = vld [vmem:[#allocation32 + $0x38] sm:$0xff]  }
0x1bf5   : > { %12505 = vmatmul.mubr.bf16.vlgmr.msra.gmra.mrb[84].mxu1 %v15374_v33 }
0x1bf6   : > { %v12654_v29 = vpack.c.bf16 %v6540_v20, %v6537_v30 }
0x1bf8   : > { %12656 = vmatprep.subr.msk.bf16.mxu0 %vm15114_vm2, %v12654_v29 }
0x1bf9   : > { %12659 = vmatpush3.bf16.xpose.msk.msra.mxu0 %vm15114_vm2, %v12654_v29 }
0x1bfa   : > { %12661 = vmatprep.subr.bf16.mxu0 %v15404_v43 }
0x1c00   : > { %12467 = vmatmul.mubr.msk.f32.vlgmr.msra.gmra.mrb[92].mxu0 %vm1708_vm1, %v15402_v2 }
0x1c01   : > { %12663 = vmatpush3.bf16.msra.mxu0 %v15404_v43 }
0x1c02   : > { %12476 = vmatprep.subr.bf16.mxu0 %v14355_v1 }
0x1cb8   : > { %v15435_v37 = vpop.f32.mrb[80].mxu1 }
0x1cb9   : > { %v12490_v38 = vpop.f32.mrb[81].mxu1 }
0x1cba   : > { %v15437_v21 = vpop.f32.mrb[82].mxu1 }
0x1cbb   : > { %v12491_v22 = vpop.f32.mrb[83].mxu1 }
0x1cc8   : > { %v7044_v17 = vpop.f32.mrb[84].mxu1 }
0x1cc9   : > { %v12506_v39 = vpop.f32.mrb[85].mxu1  ;;  %v7045_v41 = vadd.f32 %v11444_v16, %v7044_v17 }
0x1cca   : > { %v7047_v40 = vpop.f32.mrb[86].mxu1 }
0x1ccb   : > { %v7048_v45 = vadd.f32 %v11444_v16, %v7047_v40  ;;  %v12507_v42 = vpop.f32.mrb[87].mxu1  ;;  %v11441_v16 = vld [vmem:[#allocation34 + $0x2] ss:$0 sm:$0xff] }
0x1ccd   : > { %v12664_v46 = vpack.c.bf16 %v7048_v45, %v7045_v41 }
0x1ccf   : > { %12666 = vmatprep.subr.msk.bf16.mxu1 %vm15114_vm2, %v12664_v46 }
0x1cd0   : > { %12669 = vmatpush3.bf16.xpose.msk.msra.mxu1 %vm15114_vm2, %v12664_v46  ;;  %v11447_v46 = vld [vmem:[#allocation37 + $0x2] ss:$0 sm:$0xff] }
0x1cd3   : > { %v12468_v2 = vpop.f32.mrb[92].mxu0 }
0x1cd4   : > { %v6697_v43 = vmul.f32 0.17677669, %v12468_v2  ;;  %v6687_v47 = vpop.f32.mrb[93].mxu0 }
0x1cd5   : > { %v6696_v48 = vmul.f32 0.17677669, %v6687_v47 }
0x1cd6   : > { %v6701_v34 = vsel %vm1798_vm3, %v6697_v43, -inf }
0x1cd7   : > { %6702 = vmax.xlane.f32.xlu0 %v6701_v34  ;;  %v6698_v50 = vsel %vm1798_vm3, %v6696_v48, -inf }
0x1cd8   : > { %6699 = vmax.xlane.f32.xlu1 %v6698_v50 }
0x1d64   : > { %v6703_v44 = vpop.xlane.xlu0 %6702 }
0x1d65   : > { %v6705_v18 = vsub.f32 %v6697_v43, %v6703_v44  ;;  %v6700_v36 = vpop.xlane.xlu1 %6699 }
0x1d66   : > { %v6704_v55 = vsub.f32 %v6696_v48, %v6700_v36 }
0x1d67   : > { %v6708_v56 = vmul.f32 1.442695, %v6705_v18  ;;  %v11463_v18 = vld [vmem:[#allocation34 + $0x3] ss:$0 sm:$0xff] }
0x1d68   : > { %v6706_v57 = vmul.f32 1.442695, %v6704_v55 }
0x1d69   : > { %13406 = vpow2.f32 %v6708_v56 }
0x1d6a   : > { %13408 = vpow2.f32 %v6706_v57  ;;  %v11469_v57 = vld [vmem:[#allocation37 + $0x3] ss:$0 sm:$0xff] }
0x1d73   : > { %v13407_v58 = vpop.eup %13406 }
0x1d74   : > { %v13409_v54 = vpop.eup %13408  ;;  %v6713_v32 = vsel %vm1798_vm3, %v13407_v58, 0.0 }
0x1d75   : > { %6714 = vadd.xlane.f32.xlu0 %v6713_v32  ;;  %v6710_v59 = vsel %vm1798_vm3, %v13409_v54, 0.0 }
0x1d76   : > { %6711 = vadd.xlane.f32.xlu1 %v6710_v59 }
0x1e02   : > { %v6715_v60 = vpop.xlane.xlu0 %6714 }
0x1e03   : > { %13410 = vrcp.f32 %v6715_v60  ;;  %v6712_v62 = vpop.xlane.xlu1 %6711 }
0x1e04   : > { %13412 = vrcp.f32 %v6712_v62 }
0x1e0d   : > { %v13411_v61 = vpop.eup %13410 }
0x1e0e   : > { %v13413_v63 = vpop.eup %13412  ;;  %v6719_v3 = vmul.f32 %v13411_v61, %v13407_v58 }
0x1e0f   : > { %v6718_v51 = vmul.f32 %v13413_v63, %v13409_v54 }
0x1e11   : > { %12473 = vmatprep.mubr.msk.f32.mxu0 %vm1798_vm3, %v6718_v51 }
0x1e12   : > { %12474 = vmatmul.mubr.msk.f32.vlgmr.msra.gmra.mrb[94].mxu0 %vm1798_vm3, %v6719_v3 }
0x1e13   : > { %12477 = vmatpush3.bf16.msra.mxu0 %v13206_v0  ;;  %12480 = vmatprep.mubr.msk.bf16.mxu0 %vm14356_vm0, %v14355_v1 }
0x1e14   : > { %12478 = vmatprep.subr.bf16.mxu0 %v14355_v1 }
0x1e17   : > { %12479 = vmatpush3.bf16.msra.mxu0 %v13207_v4 }
0x1e18   : > { %12492 = vmatprep.subr.bf16.mxu0 %v14355_v1 }
0x1ee5   : > { %v12475_v5 = vpop.f32.mrb[94].mxu0 }
0x1ee6   : > { %v6792_v6 = vpop.f32.mrb[95].mxu0 }
0x1ee7   : > { %v6801_v10 = vpack.c.bf16 %v12475_v5, %v6792_v6 }
0x1ee9   : > { %12481 = vmatmul.mubr.msk.bf16.vlgmr.msra.gmra.mrb[96].mxu0 %vm1708_vm1, %v6801_v10 }
0x1eea   : > { %12493 = vmatpush3.bf16.xpose.msra.mxu0 %v13208_v9  ;;  %12496 = vmatprep.mubr.msk.bf16.mxu0 %vm14356_vm0, %v14355_v1 }
0x1eeb   : > { %12494 = vmatprep.subr.bf16.mxu0 %v14355_v1 }
0x1ef2   : > { %12495 = vmatpush3.bf16.xpose.msra.mxu0 %v13209_v11 }
0x1ef3   : > { %12508 = vmatprep.subr.bf16.mxu0 %v14355_v1 }
0x1ef9   : > { %12497 = vmatmul.mubr.bf16.vlgmr.msra.gmra.mrb[100].mxu0 %v15374_v33 }
0x1efa   : > { %12509 = vmatpush3.bf16.xpose.msra.mxu0 %v13210_v14  ;;  %12512 = vmatprep.mubr.msk.bf16.mxu0 %vm14356_vm0, %v14355_v1 }
0x1efb   : > { %12510 = vmatprep.subr.bf16.mxu0 %v14355_v1 }
0x1f02   : > { %12511 = vmatpush3.bf16.xpose.msra.mxu0 %v13211_v15 }
0x1f03   : > { %12538 = vmatprep.subr.bf16.mxu0 %v14355_v1 }
0x1f09   : > { %12513 = vmatmul.mubr.bf16.vlgmr.msra.gmra.mrb[104].mxu0 %v15374_v33 }
0x1f0a   : > { %12539 = vmatpush3.bf16.xpose.msra.mxu0 %v13212_v19  ;;  %12542 = vmatprep.mubr.msk.bf16.mxu0 %vm14356_vm0, %v14355_v1 }
0x1f0b   : > { %12540 = vmatprep.subr.bf16.mxu0 %v14355_v1 }
0x1f12   : > { %12541 = vmatpush3.bf16.xpose.msra.mxu0 %v13213_v23 }
0x1f13   : > { %12554 = vmatprep.subr.bf16.mxu0 %v14355_v1 }
0x1f19   : > { %12543 = vmatmul.mubr.bf16.vlgmr.msra.gmra.mrb[108].mxu0 %v15374_v33 }
0x1f1a   : > { %12555 = vmatpush3.bf16.xpose.msra.mxu0 %v13214_v24  ;;  %12558 = vmatprep.mubr.msk.bf16.mxu0 %vm14356_vm0, %v14355_v1 }
0x1f1b   : > { %12556 = vmatprep.subr.bf16.mxu0 %v14355_v1 }
0x1f22   : > { %12557 = vmatpush3.bf16.xpose.msra.mxu0 %v13215_v28 }
0x1f23   : > { %12576 = vmatprep.subr.bf16.mxu0 %v14355_v1 }
0x1f29   : > { %12559 = vmatmul.mubr.bf16.vlgmr.msra.gmra.mrb[112].mxu0 %v15374_v33 }
0x1f2a   : > { %12580 = vmatprep.mubr.msk.bf16.mxu0 %vm14356_vm0, %v14355_v1 }
0x1fbc   : > { %v6856_v30 = vpop.f32.mrb[96].mxu0 }
0x1fbd   : > { %v15479_v20 = vadd.f32 %v15435_v37, %v6856_v30  ;;  %v12482_v31 = vpop.f32.mrb[97].mxu0 }
0x1fbe   : > { %v6859_v29 = vpop.f32.mrb[98].mxu0 }
0x1fbf   : > { %v15482_v38 = vadd.f32 %v15437_v21, %v6859_v29  ;;  %v12483_v22 = vpop.f32.mrb[99].mxu0 }
0x1fcc   : > { %v6978_v17 = vpop.f32.mrb[100].mxu0 }
0x1fcd   : > { %v6979_v39 = vadd.f32 %v11441_v16, %v6978_v17  ;;  %v12498_v40 = vpop.f32.mrb[101].mxu0  ;;  %v13216_v17 = vld [vmem:[%s15817_s5 + $0x20] sm:$0xff]  }
0x1fce   : > { %v6981_v41 = vpop.f32.mrb[102].mxu0  ;;  %v13217_v40 = vld [vmem:[%s15817_s5 + $0x28] sm:$0xff]  }
0x1fcf   : > { %v6982_v45 = vadd.f32 %v11441_v16, %v6981_v41  ;;  %v12499_v42 = vpop.f32.mrb[103].mxu0  ;;  %12520 = vmatprep.mubr.msk.f32.mxu1 %vm1708_vm1, %v6979_v39 }
0x1fd0   : > { %v13218_v42 = vld [vmem:[#allocation31 + $0x30] sm:$0xff]  }
0x1fd1   : > { %12521 = vmatmul.mubr.msk.f32.vlgmr.msra.gmra.mrb[88].mxu1 %vm1708_vm1, %v6982_v45 }
0x1fdc   : > { %v7110_v37 = vpop.f32.mrb[104].mxu0 }
0x1fdd   : > { %v12514_v2 = vpop.f32.mrb[105].mxu0  ;;  %v7111_v47 = vadd.f32 %v11447_v46, %v7110_v37  ;;  %v13219_v37 = vld [vmem:[#allocation31 + $0x38] sm:$0xff]  }
0x1fde   : > { %v7113_v43 = vpop.f32.mrb[106].mxu0 }
0x1fdf   : > { %v7114_v48 = vadd.f32 %v11447_v46, %v7113_v43  ;;  %v12515_v21 = vpop.f32.mrb[107].mxu0 }
0x1fe1   : > { %v12670_v34 = vpack.c.bf16 %v7114_v48, %v7111_v47 }
0x1fe3   : > { %12671 = vmatprep.subr.bf16.mxu1 %v12670_v34 }
0x1fe4   : > { %12673 = vmatpush3.bf16.msra.mxu1 %v12670_v34 }
0x1fe5   : > { %12530 = vmatprep.subr.bf16.mxu1 %v14355_v1 }
0x1fec   : > { %v15487_v50 = vpop.f32.mrb[108].mxu0 }
0x1fed   : > { %v12544_v44 = vpop.f32.mrb[109].mxu0  ;;  %v7433_v2 = vadd.f32 %v11463_v18, %v15487_v50 }
0x1fee   : > { %v7435_v36 = vpop.f32.mrb[110].mxu0 }
0x1fef   : > { %v15489_v55 = vadd.f32 %v11463_v18, %v7435_v36  ;;  %v12545_v56 = vpop.f32.mrb[111].mxu0  ;;  %v11466_v36 = vld [vmem:[#allocation35 + $0x3] ss:$0 sm:$0xff] }
0x1ffc   : > { %v7564_v58 = vpop.f32.mrb[112].mxu0 }
0x1ffd   : > { %v12560_v54 = vpop.f32.mrb[113].mxu0  ;;  %v7565_v59 = vadd.f32 %v11469_v57, %v7564_v58 }
0x1ffe   : > { %v7567_v32 = vpop.f32.mrb[114].mxu0 }
0x1fff   : > { %v7568_v60 = vadd.f32 %v11469_v57, %v7567_v32  ;;  %v12561_v62 = vpop.f32.mrb[115].mxu0 }
0x2001   : > { %v15491_v61 = vpack.c.bf16 %v7568_v60, %v7565_v59 }
0x20a4   : > { %v12522_v63 = vpop.f32.mrb[88].mxu1 }
0x20a5   : > { %v7205_v51 = vmul.f32 0.17677669, %v12522_v63  ;;  %v7195_v0 = vpop.f32.mrb[89].mxu1 }
0x20a6   : > { %v7204_v3 = vmul.f32 0.17677669, %v7195_v0 }
0x20a7   : > { %v7209_v4 = vsel %vm1798_vm3, %v7205_v51, -inf }
0x20a8   : > { %7210 = vmax.xlane.f32.xlu0 %v7209_v4  ;;  %v7206_v5 = vsel %vm1798_vm3, %v7204_v3, -inf }
0x20a9   : > { %7207 = vmax.xlane.f32.xlu1 %v7206_v5 }
0x2135   : > { %v7211_v6 = vpop.xlane.xlu0 %7210 }
0x2136   : > { %v7213_v9 = vsub.f32 %v7205_v51, %v7211_v6  ;;  %v7208_v10 = vpop.xlane.xlu1 %7207 }
0x2137   : > { %v7212_v11 = vsub.f32 %v7204_v3, %v7208_v10 }
0x2138   : > { %v7216_v14 = vmul.f32 1.442695, %v7213_v9  ;;  %v13220_v9 = vld [vmem:[%s15817_s5 + $0x30] sm:$0xff]  }
0x2139   : > { %v7214_v15 = vmul.f32 1.442695, %v7212_v11  ;;  %12577 = vmatpush3.bf16.msra.mxu0 %v13220_v9  ;;  %v13247_v9 = vld [vmem:[#allocation38 + $0xf0] sm:$0xff]  }
0x213a   : > { %13414 = vpow2.f32 %v7216_v14  ;;  %12578 = vmatprep.subr.bf16.mxu0 %v14355_v1 }
0x213b   : > { %13416 = vpow2.f32 %v7214_v15 }
0x2144   : > { %v13415_v19 = vpop.eup %13414 }
0x2145   : > { %v13417_v23 = vpop.eup %13416  ;;  %v7221_v24 = vsel %vm1798_vm3, %v13415_v19, 0.0 }
0x2146   : > { %7222 = vadd.xlane.f32.xlu0 %v7221_v24  ;;  %v7218_v28 = vsel %vm1798_vm3, %v13417_v23, 0.0  ;;  %v13221_v24 = vld [vmem:[%s15817_s5 + $0x38] sm:$0xff]  }
0x2147   : > { %7219 = vadd.xlane.f32.xlu1 %v7218_v28  ;;  %12579 = vmatpush3.bf16.msra.mxu0 %v13221_v24  ;;  %v13254_v24 = vld [vmem:[#allocation38 + $0x140] sm:$0xff]  }
0x21d3   : > { %v7223_v30 = vpop.xlane.xlu0 %7222 }
0x21d4   : > { %13418 = vrcp.f32 %v7223_v30  ;;  %v7220_v31 = vpop.xlane.xlu1 %7219 }
0x21d5   : > { %13420 = vrcp.f32 %v7220_v31 }
0x21de   : > { %v13419_v29 = vpop.eup %13418 }
0x21df   : > { %v13421_v22 = vpop.eup %13420  ;;  %v7227_v39 = vmul.f32 %v13419_v29, %v13415_v19 }
0x21e0   : > { %v7226_v16 = vmul.f32 %v13421_v22, %v13417_v23  ;;  %v11485_v22 = vld [vmem:[%s15818_s17] ss:$0 sm:$0xff]  ;;  %s10641_s17 = scalar_lea.sflag [#allocation4], %s1477_s11 }
0x21e2   : > { %12527 = vmatprep.mubr.msk.f32.mxu1 %vm1798_vm3, %v7226_v16 }
0x21e3   : > { %12528 = vmatmul.mubr.msk.f32.vlgmr.msra.gmra.mrb[90].mxu1 %vm1798_vm3, %v7227_v39 }
0x21e4   : > { %12531 = vmatpush3.bf16.msra.mxu1 %v13216_v17  ;;  %12534 = vmatprep.mubr.msk.bf16.mxu1 %vm14356_vm0, %v14355_v1 }
0x21e5   : > { %12532 = vmatprep.subr.bf16.mxu1 %v14355_v1 }
0x21e8   : > { %12533 = vmatpush3.bf16.msra.mxu1 %v13217_v40 }
0x21e9   : > { %12546 = vmatprep.subr.bf16.mxu1 %v14355_v1 }
0x22b6   : > { %v12529_v41 = vpop.f32.mrb[90].mxu1 }
0x22b7   : > { %v7300_v45 = vpop.f32.mrb[91].mxu1 }
0x22b8   : > { %v7309_v46 = vpack.c.bf16 %v12529_v41, %v7300_v45 }
0x22ba   : > { %12535 = vmatmul.mubr.msk.bf16.vlgmr.msra.gmra.mrb[92].mxu1 %vm1708_vm1, %v7309_v46 }
0x22bb   : > { %12547 = vmatpush3.bf16.xpose.msra.mxu1 %v13218_v42  ;;  %12550 = vmatprep.mubr.msk.bf16.mxu1 %vm14356_vm0, %v14355_v1 }
0x22bc   : > { %12548 = vmatprep.subr.bf16.mxu1 %v14355_v1 }
0x22c3   : > { %12549 = vmatpush3.bf16.xpose.msra.mxu1 %v13219_v37 }
0x22ca   : > { %12551 = vmatmul.mubr.bf16.vlgmr.msra.gmra.mrb[96].mxu1 %v15374_v33 }
0x22cb   : > { %12566 = vmatprep.mubr.msk.f32.mxu1 %vm1708_vm1, %v7433_v2  ;;  %v13222_v2 = vld [vmem:[#allocation38 + $0x40] sm:$0xff]  }
0x238d   : > { %v7364_v43 = vpop.f32.mrb[92].mxu1 }
0x238e   : > { %v7371_v47 = vadd.f32 %v7364_v43, %v15479_v20  ;;  %v12536_v48 = vpop.f32.mrb[93].mxu1  ;;  %v13223_v43 = vld [vmem:[#allocation38 + $0xc0] sm:$0xff]  }
0x238f   : > { %v7367_v21 = vpop.f32.mrb[94].mxu1  ;;  %v13224_v48 = vld [vmem:[#allocation38] sm:$0xff]   ;;  %12081 = vmatprep.subr.bf16.mxu0 %v13223_v43 }
0x2390   : > { %v7372_v34 = vadd.f32 %v7367_v21, %v15482_v38  ;;  %v12537_v44 = vpop.f32.mrb[95].mxu1  ;;  %v13225_v21 = vld [vmem:[#allocation38 + $0x80] sm:$0xff]  }
0x2391   : > { %v13226_v44 = vld [vmem:[#allocation38 + $0x48] sm:$0xff]  }
0x239d   : > { %v7498_v56 = vpop.f32.mrb[96].mxu1 }
0x239e   : > { %v12552_v57 = vpop.f32.mrb[97].mxu1  ;;  %v7499_v54 = vadd.f32 %v11466_v36, %v7498_v56  ;;  %v13230_v56 = vld [vmem:[#allocation38 + $0x50] sm:$0xff]  }
0x239f   : > { %v7501_v58 = vpop.f32.mrb[98].mxu1  ;;  %v13233_v57 = vld [vmem:[#allocation38 + $0x90] sm:$0xff]  }
0x23a0   : > { %v7502_v32 = vadd.f32 %v11466_v36, %v7501_v58  ;;  %v12553_v59 = vpop.f32.mrb[99].mxu1  ;;  %v13227_v36 = vld [vmem:[#allocation38 + $0xc8] sm:$0xff]   ;;  %v13234_v58 = vld [vmem:[#allocation38 + $0x58] sm:$0xff]  }
0x23a1   : > { %v13237_v59 = vld [vmem:[#allocation38 + $0x98] sm:$0xff]  }
0x23a2   : > { %v12674_v50 = vpack.c.bf16 %v7502_v32, %v7499_v54  ;;  %v13235_v54 = vld [vmem:[#allocation38 + $0xd8] sm:$0xff]  }
0x23a3   : > { %v13236_v32 = vld [vmem:[#allocation38 + $0x18] sm:$0xff]  }
0x23a4   : > { %12676 = vmatprep.subr.msk.bf16.mxu1 %vm15114_vm2, %v12674_v50 }
0x23a5   : > { %12679 = vmatpush3.bf16.xpose.msk.msra.mxu1 %vm15114_vm2, %v12674_v50  ;;  %v13238_v50 = vld [vmem:[#allocation38 + $0x60] sm:$0xff]  }
0x23a6   : > { %12681 = vmatprep.subr.bf16.mxu1 %v15491_v61 }
0x23ac   : > { %12567 = vmatmul.mubr.msk.f32.vlgmr.msra.gmra.mrb[100].mxu1 %vm1708_vm1, %v15489_v55 }
0x23ad   : > { %12683 = vmatpush3.bf16.msra.mxu1 %v15491_v61 }
0x23ae   : > { %12063 = vmatprep.subr.bf16.mxu1 %v13222_v2 }
0x247f   : > { %v12568_v33 = vpop.f32.mrb[100].mxu1 }
0x2480   : > { %v7659_v20 = vmul.f32 0.17677669, %v12568_v33  ;;  %v7649_v38 = vpop.f32.mrb[101].mxu1  ;;  %v13239_v33 = vld [vmem:[#allocation38 + $0xe0] sm:$0xff]  }
0x2481   : > { %v7658_v18 = vmul.f32 0.17677669, %v7649_v38  ;;  %v13241_v38 = vld [vmem:[#allocation38 + $0xa0] sm:$0xff]  }
0x2482   : > { %v7663_v60 = vsel %vm1798_vm3, %v7659_v20, -inf }
0x2483   : > { %7664 = vmax.xlane.f32.xlu0 %v7663_v60  ;;  %v7660_v62 = vsel %vm1798_vm3, %v7658_v18, -inf }
0x2484   : > { %7661 = vmax.xlane.f32.xlu1 %v7660_v62 }
0x2510   : > { %v7665_v49 = vpop.xlane.xlu0 %7664 }
0x2511   : > { %v7667_v63 = vsub.f32 %v7659_v20, %v7665_v49  ;;  %v7662_v51 = vpop.xlane.xlu1 %7661  ;;  %v13240_v20 = vld [vmem:[#allocation38 + $0x20] sm:$0xff]  }
0x2512   : > { %v7666_v0 = vsub.f32 %v7658_v18, %v7662_v51 }
0x2513   : > { %v7670_v3 = vmul.f32 1.442695, %v7667_v63 }
0x2514   : > { %v7668_v4 = vmul.f32 1.442695, %v7666_v0 }
0x2515   : > { %13422 = vpow2.f32 %v7670_v3 }
0x2516   : > { %13424 = vpow2.f32 %v7668_v4  ;;  %v13242_v4 = vld [vmem:[#allocation38 + $0x68] sm:$0xff]  }
0x251f   : > { %v13423_v55 = vpop.eup %13422 }
0x2520   : > { %v13425_v61 = vpop.eup %13424  ;;  %v7675_v5 = vsel %vm1798_vm3, %v13423_v55, 0.0 }
0x2521   : > { %7676 = vadd.xlane.f32.xlu0 %v7675_v5  ;;  %v7672_v6 = vsel %vm1798_vm3, %v13425_v61, 0.0  ;;  %v13245_v5 = vld [vmem:[#allocation38 + $0xa8] sm:$0xff]  }
0x2522   : > { %7673 = vadd.xlane.f32.xlu1 %v7672_v6  ;;  %v13246_v6 = vld [vmem:[#allocation38 + $0x70] sm:$0xff]  }
0x25ae   : > { %v7677_v10 = vpop.xlane.xlu0 %7676 }
0x25af   : > { %13426 = vrcp.f32 %v7677_v10  ;;  %v7674_v11 = vpop.xlane.xlu1 %7673  ;;  %v13248_v10 = vld [vmem:[#allocation38 + $0x30] sm:$0xff]  }
0x25b0   : > { %13428 = vrcp.f32 %v7674_v11  ;;  %v13249_v11 = vld [vmem:[#allocation38 + $0xb0] sm:$0xff]  }
0x25b9   : > { %v13427_v14 = vpop.eup %13426 }
0x25ba   : > { %v13429_v15 = vpop.eup %13428  ;;  %v7681_v23 = vmul.f32 %v13427_v14, %v13423_v55  ;;  %v13243_v55 = vld [vmem:[#allocation38 + $0xe8] sm:$0xff]   ;;  %v13250_v14 = vld [vmem:[#allocation38 + $0x78] sm:$0xff]  }
0x25bb   : > { %v7680_v19 = vmul.f32 %v13429_v15, %v13425_v61  ;;  %v13244_v61 = vld [vmem:[#allocation38 + $0x28] sm:$0xff]   ;;  %v13251_v15 = vld [vmem:[#allocation38 + $0xf8] sm:$0xff]  }
0x25bd   : > { %12573 = vmatprep.mubr.msk.f32.mxu1 %vm1798_vm3, %v7680_v19  ;;  %v13252_v19 = vld [vmem:[#allocation38 + $0x38] sm:$0xff]  }
0x25be   : > { %12574 = vmatmul.mubr.msk.f32.vlgmr.msra.gmra.mrb[102].mxu1 %vm1798_vm3, %v7681_v23  ;;  %v13253_v23 = vld [vmem:[#allocation38 + $0xb8] sm:$0xff]  }
0x25bf   : > { %12064 = vmatpush3.bf16.xpose.msra.mxu1 %v13224_v48 }
0x25c0   : > { %12065 = vmatprep.subr.bf16.mxu1 %v13226_v44  ;;  %v13256_v44 = vld [vmem:[#allocation38 + $0x100] sm:$0xff]  }
0x2691   : > { %v12575_v28 = vpop.f32.mrb[102].mxu1 }
0x2692   : > { %v7754_v30 = vpop.f32.mrb[103].mxu1 }
0x2693   : > { %v7763_v31 = vpack.c.bf16 %v12575_v28, %v7754_v30  ;;  %v13255_v28 = vld [vmem:[#allocation38 + $0x1c0] sm:$0xff]  }
0x2695   : > { %12581 = vmatmul.mubr.msk.bf16.vlgmr.msra.gmra.mrb[116].mxu0 %vm1708_vm1, %v7763_v31 }
0x2696   : > { %12082 = vmatpush3.bf16.xpose.msra.mxu0 %v13225_v21 }
0x2697   : > { %12083 = vmatprep.subr.bf16.mxu0 %v13227_v36  ;;  %v13257_v36 = vld [vmem:[#allocation38 + $0x180] sm:$0xff]  }
0x2768   : > { %v7818_v29 = vpop.f32.mrb[116].mxu0 }
0x2769   : > { %v7825_v16 = vadd.f32 %v7818_v29, %v7371_v47  ;;  %v12582_v17 = vpop.f32.mrb[117].mxu0  ;;  %v13228_v47 = vld [vmem:[#allocation38 + $0x8] sm:$0xff]  }
0x276a   : > { %v7821_v39 = vpop.f32.mrb[118].mxu0  ;;  %12066 = vmatpush3.bf16.xpose.msra.mxu1 %v13228_v47  ;;  %v13258_v47 = vld [vmem:[#allocation38 + $0x148] sm:$0xff]  }
0x276b   : > { %v7834_v40 = vadd.f32 %v11485_v22, %v7825_v16  ;;  %v7826_v41 = vadd.f32 %v7821_v39, %v7372_v34  ;;  %v12583_v45 = vpop.f32.mrb[119].mxu0  ;;  %v13229_v34 = vld [vmem:[#allocation38 + $0x88] sm:$0xff]   ;;  %12067 = vmatprep.subr.bf16.mxu1 %v13230_v56 }
0x276c   : > { %12084 = vmatpush3.bf16.xpose.msra.mxu0 %v13229_v34  ;;  %v13259_v34 = vld [vmem:[#allocation38 + $0x1c8] sm:$0xff]  }
0x276d   : > { %v7835_v42 = vadd.f32 %v11485_v22, %v7826_v41  ;;  %v7836_v46 = vadd.f32 %v7834_v40, %v15368_v52  ;;  %v13231_v52 = vld [vmem:[#allocation38 + $0xd0] sm:$0xff]   ;;  %v11486_v40 = vld [vmem:[%s15819_s8] ss:$0 sm:$0xff]  ;;  %v13260_v56 = vld [vmem:[#allocation38 + $0x108] sm:$0xff]   ;;  %s14166_s8 = scalar_lea.vmem %s15635_s16, 16 }
0x276e   : > { %12085 = vmatprep.subr.bf16.mxu0 %v13231_v52  ;;  %v13261_v52 = vld [vmem:[#allocation38 + $0x188] sm:$0xff]   ;;  %p14167_p0 = scmp.ne.s32.totalorder %s15635_s16, %s14166_s8 }
0x276f   : > { %7840 = vadd.xlane.f32.xlu1 %v7836_v46  ;;  %v7837_v37 = vadd.f32 %v7835_v42, %v15370_v53  ;;  %v13232_v53 = vld [vmem:[#allocation38 + $0x10] sm:$0xff]  }
0x2770   : > { %p14168_p3 = pnand %p14167_p0, %p15824_p2 }
0x2771   : > { %7842 = vadd.xlane.f32.xlu0 %v7837_v37 }
0x2772   : > { %12068 = vmatpush3.bf16.xpose.msra.mxu1 %v13232_v53  ;;  %v13262_v53 = vld [vmem:[#allocation38 + $0x150] sm:$0xff]   ;;  %p14169_p4 = pneg %p14168_p3 }
0x2773   : > { %12069 = vmatprep.subr.bf16.mxu1 %v13234_v58  ;;  %v13264_v58 = vld [vmem:[#allocation38 + $0x110] sm:$0xff]  }
0x2774   : > { %12086 = vmatpush3.bf16.xpose.msra.mxu0 %v13233_v57  ;;  %v13263_v57 = vld [vmem:[#allocation38 + $0x1d0] sm:$0xff]  }
0x2775   : > { %12087 = vmatprep.subr.bf16.mxu0 %v13235_v54  ;;  %v13265_v54 = vld [vmem:[#allocation38 + $0x190] sm:$0xff]  }
0x277a   : > { %12070 = vmatpush3.bf16.xpose.msra.mxu1 %v13236_v32  ;;  %v13266_v32 = vld [vmem:[#allocation38 + $0x158] sm:$0xff]  }
0x277b   : > { %12071 = vmatprep.subr.bf16.mxu1 %v13238_v50  ;;  %v13268_v50 = vld [vmem:[#allocation38 + $0x118] sm:$0xff]  }
0x277c   : > { %12088 = vmatpush3.bf16.xpose.msra.mxu0 %v13237_v59  ;;  %v13267_v59 = vld [vmem:[#allocation38 + $0x1d8] sm:$0xff]  }
0x277d   : > { %12089 = vmatprep.subr.bf16.mxu0 %v13239_v33  ;;  %v13269_v33 = vld [vmem:[#allocation38 + $0x198] sm:$0xff]  }
0x2782   : > { %12072 = vmatpush3.bf16.xpose.msra.mxu1 %v13240_v20  ;;  %v13270_v20 = vld [vmem:[#allocation38 + $0x160] sm:$0xff]  }
0x2783   : > { %12073 = vmatprep.subr.bf16.mxu1 %v13242_v4  ;;  %v13280_v4 = vld [vmem:[#allocation38 + $0x130] sm:$0xff]  }
0x2784   : > { %12090 = vmatpush3.bf16.xpose.msra.mxu0 %v13241_v38  ;;  %v13271_v38 = vld [vmem:[#allocation38 + $0x1e0] sm:$0xff]  }
0x2785   : > { %12091 = vmatprep.subr.bf16.mxu0 %v13243_v55  ;;  %v13281_v55 = vld [vmem:[#allocation38 + $0x1b0] sm:$0xff]  }
0x278a   : > { %12074 = vmatpush3.bf16.xpose.msra.mxu1 %v13244_v61  ;;  %v13282_v61 = vld [vmem:[#allocation38 + $0x178] sm:$0xff]  }
0x278b   : > { %12075 = vmatprep.subr.bf16.mxu1 %v13246_v6  ;;  %v13284_v6 = vld [vmem:[#allocation38 + $0x138] sm:$0xff]  }
0x278c   : > { %12092 = vmatpush3.bf16.xpose.msra.mxu0 %v13245_v5  ;;  %v13283_v5 = vld [vmem:[#allocation38 + $0x1f8] sm:$0xff]  }
0x278d   : > { %12093 = vmatprep.subr.bf16.mxu0 %v13247_v9  ;;  %v13285_v9 = vld [vmem:[#allocation38 + $0x1b8] sm:$0xff]  }
0x2792   : > { %12076 = vmatpush3.bf16.xpose.msra.mxu1 %v13248_v10  ;;  %v13286_v10 = vld [vmem:[#allocation38 + $0x240] sm:$0xff]  }
0x2793   : > { %12077 = vmatprep.subr.bf16.mxu1 %v13250_v14  ;;  %v13288_v14 = vld [vmem:[#allocation38 + $0x200] sm:$0xff]  }
0x2794   : > { %12094 = vmatpush3.bf16.xpose.msra.mxu0 %v13249_v11  ;;  %v13287_v11 = vld [vmem:[#allocation38 + $0x2c0] sm:$0xff]  }
0x2795   : > { %12095 = vmatprep.subr.bf16.mxu0 %v13251_v15  ;;  %v13289_v15 = vld [vmem:[#allocation38 + $0x280] sm:$0xff]  }
0x279a   : > { %12078 = vmatpush3.bf16.xpose.msra.mxu1 %v13252_v19  ;;  %v13290_v19 = vld [vmem:[#allocation38 + $0x248] sm:$0xff]  }
0x279b   : > { %12099 = vmatprep.subr.bf16.mxu1 %v13254_v24  ;;  %v13292_v24 = vld [vmem:[#allocation38 + $0x208] sm:$0xff]  }
0x279c   : > { %12096 = vmatpush3.bf16.xpose.msra.mxu0 %v13253_v23  ;;  %v13291_v23 = vld [vmem:[#allocation38 + $0x2c8] sm:$0xff]  }
0x279d   : > { %12117 = vmatprep.subr.bf16.mxu0 %v13255_v28  ;;  %v13293_v28 = vld [vmem:[#allocation38 + $0x288] sm:$0xff]  }
0x27fc   : > { %v7841_v18 = vpop.xlane.xlu1 %7840 }
0x27fd   : > { %v7844_v60 = vmul.f32 0.0078125, %v7841_v18  ;;  %v13272_v18 = vld [vmem:[#allocation38 + $0x120] sm:$0xff]  }
0x27fe   : > { %v7843_v62 = vpop.xlane.xlu0 %7842 }
0x27ff   : > { %v7846_v49 = vsub.f32 %v7836_v46, %v7844_v60  ;;  %v7845_v63 = vmul.f32 0.0078125, %v7843_v62  ;;  %v13273_v60 = vld [vmem:[#allocation38 + $0x1a0] sm:$0xff]   ;;  %v13274_v62 = vld [vmem:[#allocation38 + $0x168] sm:$0xff]  }
0x2801   : > { %v7847_v51 = vsub.f32 %v7837_v37, %v7845_v63  ;;  %v7848_v0 = vmul.f32 %v7846_v49, %v7846_v49  ;;  %v11487_v37 = vld [vmem:[%s15820_s10] ss:$0 sm:$0xff]  ;;  %v13276_v63 = vld [vmem:[#allocation38 + $0x128] sm:$0xff]   ;;  %s14170_s10 = sshll.u32 %s14357_s15, 4  ;;  %s14171_s10 = int_to_ptr.vmem [resolvable:$false] %s14170_s10 }
0x2802   : > { %p14173_p12 = scmp.lt.s32.totalorder %s15635_s16, %s14171_s10 }
0x2803   : > { %7850 = vadd.xlane.f32.xlu1 %v7848_v0  ;;  %v7849_v3 = vmul.f32 %v7847_v51, %v7847_v51  ;;  %v13278_v0 = vld [vmem:[#allocation38 + $0x170] sm:$0xff]  }
0x2805   : > { %7852 = vadd.xlane.f32.xlu0 %v7849_v3  ;;  %v13279_v3 = vld [vmem:[#allocation38 + $0x1f0] sm:$0xff]  }
0x2890   : > { %v7851_v30 = vpop.xlane.xlu1 %7850 }
0x2891   : > { %v7854_v31 = vmul.f32 0.0078125, %v7851_v30  ;;  %v13294_v30 = vld [vmem:[#allocation38 + $0x250] sm:$0xff]  }
0x2892   : > { %v7853_v29 = vpop.xlane.xlu0 %7852 }
0x2893   : > { %v7856_v22 = vadd.f32 1e-05, %v7854_v31  ;;  %v7855_v16 = vmul.f32 0.0078125, %v7853_v29  ;;  %v13295_v31 = vld [vmem:[#allocation38 + $0x2d0] sm:$0xff]  }
0x2894   : > { %v13296_v29 = vld [vmem:[#allocation38 + $0x210] sm:$0xff]  }
0x2895   : > { %13430 = vrsqrt.f32 %v7856_v22  ;;  %v7857_v17 = vadd.f32 1e-05, %v7855_v16  ;;  %v13297_v22 = vld [vmem:[#allocation38 + $0x290] sm:$0xff]   ;;  %v13298_v16 = vld [vmem:[#allocation38 + $0x258] sm:$0xff]  }
0x2897   : > { %13432 = vrsqrt.f32 %v7857_v17  ;;  %v13299_v17 = vld [vmem:[#allocation38 + $0x2d8] sm:$0xff]  }
0x289f   : > { %v13431_v39 = vpop.eup %13430 }
0x28a0   : > { %v7860_v41 = vmul.f32 %v13431_v39, %v7846_v49  ;;  %v13275_v49 = vld [vmem:[#allocation38 + $0x1e8] sm:$0xff]   ;;  %v13300_v39 = vld [vmem:[#allocation38 + $0x218] sm:$0xff]  }
0x28a1   : > { %v13433_v45 = vpop.eup %13432 }
0x28a2   : > { %v7868_v42 = vmul.f32 %v11486_v40, %v7860_v41  ;;  %v7861_v46 = vmul.f32 %v13433_v45, %v7847_v51  ;;  %v13277_v51 = vld [vmem:[#allocation38 + $0x1a8] sm:$0xff]   ;;  %v13302_v41 = vld [vmem:[#allocation38 + $0x260] sm:$0xff]  }
0x28a3   : > { %v13303_v45 = vld [vmem:[#allocation38 + $0x2e0] sm:$0xff]  }
0x28a4   : > { %v7869_v2 = vmul.f32 %v11486_v40, %v7861_v46  ;;  %v15537_v43 = vadd.f32 %v11487_v37, %v7868_v42  ;;  %v13301_v40 = vld [vmem:[#allocation38 + $0x298] sm:$0xff]   ;;  %v13304_v42 = vld [vmem:[#allocation38 + $0x220] sm:$0xff]  }
0x28a5   : > { %v13305_v46 = vld [vmem:[#allocation38 + $0x2a0] sm:$0xff]  }
0x28a6   : > { %v15539_v48 = vadd.f32 %v11487_v37, %v7869_v2  ;;  %v13306_v37 = vld [vmem:[#allocation38 + $0x268] sm:$0xff]  }
0x28a7   : > { %v13307_v2 = vld [vmem:[#allocation38 + $0x2e8] sm:$0xff]  }
0x28a8   : > { %v15543_v21 = vpack.c.bf16 %v15539_v48, %v15537_v43 }
0x28aa   : > { %12079 = vmatprep.mubr.bf16.mxu1 %v15543_v21  ;;  %12097 = vmatprep.mubr.bf16.mxu0 %v15543_v21 }
0x28ab   : > { %12080 = vmatmul.mubr.bf16.vlgmr.msra.gmra.mrb[104].mxu1 %v15543_v21  ;;  %12098 = vmatmul.mubr.bf16.vlgmr.msra.gmra.mrb[120].mxu0 %v15543_v21 }
0x28ac   : > { %12100 = vmatpush3.bf16.xpose.msra.mxu1 %v13256_v44  ;;  %12118 = vmatpush3.bf16.xpose.msra.mxu0 %v13257_v36  ;;  %v13308_v44 = vld [vmem:[#allocation38 + $0x228] sm:$0xff]  }
0x28ad   : > { %12115 = vmatprep.mubr.bf16.mxu1 %v15543_v21  ;;  %12133 = vmatprep.mubr.bf16.mxu0 %v15543_v21  ;;  %v13309_v36 = vld [vmem:[#allocation38 + $0x2a8] sm:$0xff]  }
0x28ae   : > { %12101 = vmatprep.subr.bf16.mxu1 %v13258_v47  ;;  %12119 = vmatprep.subr.bf16.mxu0 %v13259_v34  ;;  %v13310_v47 = vld [vmem:[#allocation38 + $0x270] sm:$0xff]  }
0x28af   : > { %v13311_v34 = vld [vmem:[#allocation38 + $0x2f0] sm:$0xff]  }
0x28b4   : > { %12102 = vmatpush3.bf16.xpose.msra.mxu1 %v13260_v56  ;;  %12120 = vmatpush3.bf16.xpose.msra.mxu0 %v13261_v52  ;;  %v13312_v56 = vld [vmem:[#allocation38 + $0x230] sm:$0xff]  }
0x28b5   : > { %12103 = vmatprep.subr.bf16.mxu1 %v13262_v53  ;;  %12121 = vmatprep.subr.bf16.mxu0 %v13263_v57  ;;  %v13313_v52 = vld [vmem:[#allocation38 + $0x2b0] sm:$0xff]   ;;  %v13314_v53 = vld [vmem:[#allocation38 + $0x278] sm:$0xff]  }
0x28b6   : > { %v13315_v57 = vld [vmem:[#allocation38 + $0x2f8] sm:$0xff]  }
0x28bc   : > { %12104 = vmatpush3.bf16.xpose.msra.mxu1 %v13264_v58  ;;  %12122 = vmatpush3.bf16.xpose.msra.mxu0 %v13265_v54  ;;  %v13316_v58 = vld [vmem:[#allocation38 + $0x238] sm:$0xff]  }
0x28bd   : > { %12105 = vmatprep.subr.bf16.mxu1 %v13266_v32  ;;  %12123 = vmatprep.subr.bf16.mxu0 %v13267_v59  ;;  %v13317_v54 = vld [vmem:[#allocation38 + $0x2b8] sm:$0xff]   ;;  %v13318_v32 = vld [vmem:[#allocation38 + $0x340] sm:$0xff]  }
0x28be   : > { %v13319_v59 = vld [vmem:[#allocation38 + $0x3c0] sm:$0xff]  }
0x28c4   : > { %12106 = vmatpush3.bf16.xpose.msra.mxu1 %v13268_v50  ;;  %12124 = vmatpush3.bf16.xpose.msra.mxu0 %v13269_v33  ;;  %v13320_v50 = vld [vmem:[#allocation38 + $0x300] sm:$0xff]  }
0x28c5   : > { %12107 = vmatprep.subr.bf16.mxu1 %v13270_v20  ;;  %12125 = vmatprep.subr.bf16.mxu0 %v13271_v38  ;;  %v13321_v33 = vld [vmem:[#allocation38 + $0x380] sm:$0xff]   ;;  %v13322_v20 = vld [vmem:[#allocation38 + $0x348] sm:$0xff]  }
0x28c6   : > { %v13323_v38 = vld [vmem:[#allocation38 + $0x3c8] sm:$0xff]  }
0x28cc   : > { %12108 = vmatpush3.bf16.xpose.msra.mxu1 %v13272_v18  ;;  %12126 = vmatpush3.bf16.xpose.msra.mxu0 %v13273_v60  ;;  %v13324_v18 = vld [vmem:[#allocation38 + $0x308] sm:$0xff]  }
0x28cd   : > { %12109 = vmatprep.subr.bf16.mxu1 %v13274_v62  ;;  %12127 = vmatprep.subr.bf16.mxu0 %v13275_v49  ;;  %v13325_v60 = vld [vmem:[#allocation38 + $0x388] sm:$0xff]   ;;  %v13326_v62 = vld [vmem:[#allocation38 + $0x350] sm:$0xff]  }
0x28ce   : > { %v13327_v49 = vld [vmem:[#allocation38 + $0x3d0] sm:$0xff]  }
0x28d4   : > { %12110 = vmatpush3.bf16.xpose.msra.mxu1 %v13276_v63  ;;  %12128 = vmatpush3.bf16.xpose.msra.mxu0 %v13277_v51  ;;  %v13328_v63 = vld [vmem:[#allocation38 + $0x310] sm:$0xff]  }
0x28d5   : > { %12111 = vmatprep.subr.bf16.mxu1 %v13278_v0  ;;  %12129 = vmatprep.subr.bf16.mxu0 %v13279_v3  ;;  %v13329_v51 = vld [vmem:[#allocation38 + $0x390] sm:$0xff]   ;;  %v13330_v0 = vld [vmem:[#allocation38 + $0x358] sm:$0xff]  }
0x28d6   : > { %v13331_v3 = vld [vmem:[#allocation38 + $0x3d8] sm:$0xff]  }
0x28dc   : > { %12112 = vmatpush3.bf16.xpose.msra.mxu1 %v13280_v4  ;;  %12130 = vmatpush3.bf16.xpose.msra.mxu0 %v13281_v55  ;;  %v13332_v4 = vld [vmem:[#allocation38 + $0x318] sm:$0xff]  }
0x28dd   : > { %12113 = vmatprep.subr.bf16.mxu1 %v13282_v61  ;;  %12131 = vmatprep.subr.bf16.mxu0 %v13283_v5  ;;  %v13333_v55 = vld [vmem:[#allocation38 + $0x398] sm:$0xff]   ;;  %v13334_v61 = vld [vmem:[#allocation38 + $0x360] sm:$0xff]  }
0x28de   : > { %v13335_v5 = vld [vmem:[#allocation38 + $0x3e0] sm:$0xff]  }
0x28e4   : > { %12114 = vmatpush3.bf16.xpose.msra.mxu1 %v13284_v6  ;;  %12132 = vmatpush3.bf16.xpose.msra.mxu0 %v13285_v9  ;;  %v13336_v6 = vld [vmem:[#allocation38 + $0x320] sm:$0xff]  }
0x28e5   : > { %12135 = vmatprep.subr.bf16.mxu1 %v13286_v10  ;;  %12153 = vmatprep.subr.bf16.mxu0 %v13287_v11  ;;  %v13337_v9 = vld [vmem:[#allocation38 + $0x3a0] sm:$0xff]   ;;  %v13338_v10 = vld [vmem:[#allocation38 + $0x368] sm:$0xff]  }
0x28e6   : > { %v13339_v11 = vld [vmem:[#allocation38 + $0x3e8] sm:$0xff]  }
0x28eb   : > { %12116 = vmatmul.mubr.bf16.vlgmr.msra.gmra.mrb[108].mxu1 %v15543_v21  ;;  %12134 = vmatmul.mubr.bf16.vlgmr.msra.gmra.mrb[124].mxu0 %v15543_v21 }
0x28ec   : > { %12136 = vmatpush3.bf16.xpose.msra.mxu1 %v13288_v14  ;;  %12151 = vmatprep.mubr.bf16.mxu1 %v15543_v21  ;;  %v13340_v14 = vld [vmem:[#allocation38 + $0x328] sm:$0xff]  }
0x28ed   : > { %12154 = vmatpush3.bf16.xpose.msra.mxu0 %v13289_v15  ;;  %12169 = vmatprep.mubr.bf16.mxu0 %v15543_v21  ;;  %v13341_v15 = vld [vmem:[#allocation38 + $0x3a8] sm:$0xff]  }
0x28ee   : > { %12137 = vmatprep.subr.bf16.mxu1 %v13290_v19  ;;  %12155 = vmatprep.subr.bf16.mxu0 %v13291_v23  ;;  %v13342_v19 = vld [vmem:[#allocation38 + $0x370] sm:$0xff]  }
0x28ef   : > { %v13343_v23 = vld [vmem:[#allocation38 + $0x3f0] sm:$0xff]  }
0x28f4   : > { %12138 = vmatpush3.bf16.xpose.msra.mxu1 %v13292_v24  ;;  %v13344_v24 = vld [vmem:[#allocation38 + $0x330] sm:$0xff]  }
0x28f5   : > { %12156 = vmatpush3.bf16.xpose.msra.mxu0 %v13293_v28  ;;  %12139 = vmatprep.subr.bf16.mxu1 %v13294_v30  ;;  %v13345_v28 = vld [vmem:[#allocation38 + $0x3b0] sm:$0xff]   ;;  %v13346_v30 = vld [vmem:[#allocation38 + $0x378] sm:$0xff]  }
0x28f6   : > { %12157 = vmatprep.subr.bf16.mxu0 %v13295_v31  ;;  %v13347_v31 = vld [vmem:[#allocation38 + $0x3f8] sm:$0xff]  }
0x28fc   : > { %12140 = vmatpush3.bf16.xpose.msra.mxu1 %v13296_v29  ;;  %v9379_v29 = vld [vmem:[#allocation40] sm:$0xff] }
0x28fd   : > { %12158 = vmatpush3.bf16.xpose.msra.mxu0 %v13297_v22  ;;  %12141 = vmatprep.subr.bf16.mxu1 %v13298_v16  ;;  %v9387_v22 = vld [vmem:[#allocation40 + $0x40] sm:$0xff]  ;;  %v9380_v16 = vld [vmem:[#allocation40 + $0x8] sm:$0xff] }
0x28fe   : > { %12159 = vmatprep.subr.bf16.mxu0 %v13299_v17  ;;  %v9388_v17 = vld [vmem:[#allocation40 + $0x48] sm:$0xff] }
0x2904   : > { %12142 = vmatpush3.bf16.xpose.msra.mxu1 %v13300_v39  ;;  %v13348_v39 = vld [vmem:[#allocation38 + $0x338] sm:$0xff]  }
0x2905   : > { %12160 = vmatpush3.bf16.xpose.msra.mxu0 %v13301_v40  ;;  %12143 = vmatprep.subr.bf16.mxu1 %v13302_v41  ;;  %v13349_v40 = vld [vmem:[#allocation38 + $0x3b8] sm:$0xff]   ;;  %v11618_v41 = vcombine.high %v9379_v29, %v9387_v22 }
0x2906   : > { %12161 = vmatprep.subr.bf16.mxu0 %v13303_v45  ;;  %v11620_v45 = vcombine.high %v9380_v16, %v9388_v17 }
0x290c   : > { %12144 = vmatpush3.bf16.xpose.msra.mxu1 %v13304_v42  ;;  %v9395_v42 = vld [vmem:[#allocation40 + $0x80] sm:$0xff] }
0x290d   : > { %12162 = vmatpush3.bf16.xpose.msra.mxu0 %v13305_v46  ;;  %12145 = vmatprep.subr.bf16.mxu1 %v13306_v37  ;;  %v9403_v46 = vld [vmem:[#allocation40 + $0xc0] sm:$0xff]  ;;  %v9396_v37 = vld [vmem:[#allocation40 + $0x88] sm:$0xff] }
0x290e   : > { %12163 = vmatprep.subr.bf16.mxu0 %v13307_v2  ;;  %v9404_v2 = vld [vmem:[#allocation40 + $0xc8] sm:$0xff] }
0x2914   : > { %12146 = vmatpush3.bf16.xpose.msra.mxu1 %v13308_v44  ;;  %v11617_v44 = vcombine.low %v9379_v29, %v9387_v22 }
0x2915   : > { %12164 = vmatpush3.bf16.xpose.msra.mxu0 %v13309_v36  ;;  %12147 = vmatprep.subr.bf16.mxu1 %v13310_v47  ;;  %v11619_v36 = vcombine.low %v9380_v16, %v9388_v17  ;;  %v11634_v47 = vcombine.high %v9395_v42, %v9403_v46 }
0x2916   : > { %12165 = vmatprep.subr.bf16.mxu0 %v13311_v34  ;;  %v11636_v34 = vcombine.high %v9396_v37, %v9404_v2 }
0x291c   : > { %12148 = vmatpush3.bf16.xpose.msra.mxu1 %v13312_v56  ;;  %v9411_v56 = vld [vmem:[#allocation40 + $0x100] sm:$0xff] }
0x291d   : > { %12166 = vmatpush3.bf16.xpose.msra.mxu0 %v13313_v52  ;;  %12149 = vmatprep.subr.bf16.mxu1 %v13314_v53  ;;  %v9419_v52 = vld [vmem:[#allocation40 + $0x140] sm:$0xff]  ;;  %v9412_v53 = vld [vmem:[#allocation40 + $0x108] sm:$0xff] }
0x291e   : > { %12167 = vmatprep.subr.bf16.mxu0 %v13315_v57  ;;  %v9420_v57 = vld [vmem:[#allocation40 + $0x148] sm:$0xff] }
0x2924   : > { %12150 = vmatpush3.bf16.xpose.msra.mxu1 %v13316_v58  ;;  %v11633_v58 = vcombine.low %v9395_v42, %v9403_v46 }
0x2925   : > { %12168 = vmatpush3.bf16.xpose.msra.mxu0 %v13317_v54  ;;  %12171 = vmatprep.subr.bf16.mxu1 %v13318_v32  ;;  %v11635_v54 = vcombine.low %v9396_v37, %v9404_v2  ;;  %v11650_v32 = vcombine.high %v9411_v56, %v9419_v52 }
0x2926   : > { %12189 = vmatprep.subr.bf16.mxu0 %v13319_v59  ;;  %v11652_v59 = vcombine.high %v9412_v53, %v9420_v57 }
0x292b   : > { %12152 = vmatmul.mubr.bf16.vlgmr.msra.gmra.mrb[112].mxu1 %v15543_v21 }
0x292c   : > { %12170 = vmatmul.mubr.bf16.vlgmr.msra.gmra.mrb[128].mxu0 %v15543_v21  ;;  %12172 = vmatpush3.bf16.xpose.msra.mxu1 %v13320_v50  ;;  %v9427_v50 = vld [vmem:[#allocation40 + $0x180] sm:$0xff] }
0x292d   : > { %12187 = vmatprep.mubr.bf16.mxu1 %v15543_v21  ;;  %12190 = vmatpush3.bf16.xpose.msra.mxu0 %v13321_v33  ;;  %v9435_v33 = vld [vmem:[#allocation40 + $0x1c0] sm:$0xff] }
0x292e   : > { %12205 = vmatprep.mubr.bf16.mxu0 %v15543_v21  ;;  %12173 = vmatprep.subr.bf16.mxu1 %v13322_v20  ;;  %v9436_v20 = vld [vmem:[#allocation40 + $0x1c8] sm:$0xff] }
0x292f   : > { %12191 = vmatprep.subr.bf16.mxu0 %v13323_v38  ;;  %v11649_v38 = vcombine.low %v9411_v56, %v9419_v52 }
0x2934   : > { %12174 = vmatpush3.bf16.xpose.msra.mxu1 %v13324_v18  ;;  %v15562_v18 = vld [vmem:[%s15821_s22] sm:$0xff] }
0x2935   : > { %12192 = vmatpush3.bf16.xpose.msra.mxu0 %v13325_v60  ;;  %12175 = vmatprep.subr.bf16.mxu1 %v13326_v62  ;;  %v11651_v60 = vcombine.low %v9412_v53, %v9420_v57  ;;  %v11666_v62 = vcombine.high %v9427_v50, %v9435_v33 }
0x2936   : > { %12193 = vmatprep.subr.bf16.mxu0 %v13327_v49 }
0x293c   : > { %12176 = vmatpush3.bf16.xpose.msra.mxu1 %v13328_v63  ;;  %v8142_v63 = vrot.slane %v15562_v18, %v15283_v26 }
0x293d   : > { %12194 = vmatpush3.bf16.xpose.msra.mxu0 %v13329_v51  ;;  %12177 = vmatprep.subr.bf16.mxu1 %v13330_v0  ;;  %v8150_v51 = vrot.slane %v15562_v18, %v15286_v27  ;;  %v8146_v0 = vrot.slane %v15562_v18, %v15291_v35 }
0x293e   : > { %12195 = vmatprep.subr.bf16.mxu0 %v13331_v3  ;;  %v8154_v3 = vrot.slane %v15562_v18, %v15294_v25 }
0x2944   : > { %12178 = vmatpush3.bf16.xpose.msra.mxu1 %v13332_v4 }
0x2945   : > { %12196 = vmatpush3.bf16.xpose.msra.mxu0 %v13333_v55  ;;  %12179 = vmatprep.subr.bf16.mxu1 %v13334_v61  ;;  %v9443_v61 = vld [vmem:[#allocation40 + $0x200] sm:$0xff] }
0x2946   : > { %12197 = vmatprep.subr.bf16.mxu0 %v13335_v5  ;;  %v9451_v5 = vld [vmem:[#allocation40 + $0x240] sm:$0xff] }
0x294c   : > { %12180 = vmatpush3.bf16.xpose.msra.mxu1 %v13336_v6 }
0x294d   : > { %12198 = vmatpush3.bf16.xpose.msra.mxu0 %v13337_v9  ;;  %12181 = vmatprep.subr.bf16.mxu1 %v13338_v10 }
0x294e   : > { %12199 = vmatprep.subr.bf16.mxu0 %v13339_v11 }
0x2954   : > { %12182 = vmatpush3.bf16.xpose.msra.mxu1 %v13340_v14  ;;  %v9444_v14 = vld [vmem:[#allocation40 + $0x208] sm:$0xff] }
0x2955   : > { %12200 = vmatpush3.bf16.xpose.msra.mxu0 %v13341_v15  ;;  %12183 = vmatprep.subr.bf16.mxu1 %v13342_v19  ;;  %v9452_v15 = vld [vmem:[#allocation40 + $0x248] sm:$0xff] }
0x2956   : > { %12201 = vmatprep.subr.bf16.mxu0 %v13343_v23 }
0x295c   : > { %12184 = vmatpush3.bf16.xpose.msra.mxu1 %v13344_v24 }
0x295d   : > { %12202 = vmatpush3.bf16.xpose.msra.mxu0 %v13345_v28  ;;  %12185 = vmatprep.subr.bf16.mxu1 %v13346_v30  ;;  %v11665_v30 = vcombine.low %v9427_v50, %v9435_v33  ;;  %v11681_v50 = vcombine.low %v9443_v61, %v9451_v5  ;;  %v11683_v33 = vcombine.low %v9444_v14, %v9452_v15 }
0x295e   : > { %12203 = vmatprep.subr.bf16.mxu0 %v13347_v31 }
0x2964   : > { %12186 = vmatpush3.bf16.xpose.msra.mxu1 %v13348_v39  ;;  %v11682_v39 = vcombine.high %v9443_v61, %v9451_v5  ;;  %v9492_v61 = vld [vmem:[#allocation40 + $0x388] sm:$0xff] }
0x2965   : > { %12204 = vmatpush3.bf16.xpose.msra.mxu0 %v13349_v40  ;;  %10154 = vmatprep.subr.bf16.mxu1 %v11618_v41  ;;  %v9500_v5 = vld [vmem:[#allocation40 + $0x3c8] sm:$0xff] }
0x2966   : > { %10195 = vmatprep.subr.bf16.mxu0 %v11620_v45  ;;  %v11684_v45 = vcombine.high %v9444_v14, %v9452_v15  ;;  %v9381_v14 = vld [vmem:[#allocation40 + $0x10] sm:$0xff] }
0x2967   : > { %v9389_v15 = vld [vmem:[#allocation40 + $0x50] sm:$0xff] }
0x296b   : > { %12188 = vmatmul.mubr.bf16.vlgmr.msra.gmra.mrb[116].mxu1 %v15543_v21 }
0x296c   : > { %12206 = vmatmul.mubr.bf16.vlgmr.msra.gmra.mrb[132].mxu0 %v15543_v21  ;;  %10155 = vmatpush1.bf16.xpose.msra.mxu1 %v11617_v44  ;;  %v9428_v21 = vld [vmem:[#allocation40 + $0x188] sm:$0xff] }
0x296d   : > { %10196 = vmatpush1.bf16.xpose.msra.mxu0 %v11619_v36  ;;  %10156 = vmatprep.subr.bf16.mxu1 %v11634_v47  ;;  %v11668_v49 = vcombine.high %v9428_v21, %v9436_v20  ;;  %v11667_v17 = vcombine.low %v9428_v21, %v9436_v20 }
0x296e   : > { %10197 = vmatprep.subr.bf16.mxu0 %v11636_v34 }
0x2974   : > { %10157 = vmatpush1.bf16.xpose.msra.mxu1 %v11633_v58  ;;  %v9459_v58 = vld [vmem:[#allocation40 + $0x280] sm:$0xff] }
0x2975   : > { %10198 = vmatpush1.bf16.xpose.msra.mxu0 %v11635_v54  ;;  %10158 = vmatprep.subr.bf16.mxu1 %v11650_v32  ;;  %v9467_v54 = vld [vmem:[#allocation40 + $0x2c0] sm:$0xff]  ;;  %v9460_v32 = vld [vmem:[#allocation40 + $0x288] sm:$0xff] }
0x2976   : > { %10199 = vmatprep.subr.bf16.mxu0 %v11652_v59  ;;  %v9468_v59 = vld [vmem:[#allocation40 + $0x2c8] sm:$0xff]  ;;  %v11698_v21 = vcombine.high %v9459_v58, %v9467_v54 }
0x2977   : > { %v11700_v20 = vcombine.high %v9460_v32, %v9468_v59 }
0x297c   : > { %10159 = vmatpush1.bf16.xpose.msra.mxu1 %v11649_v38  ;;  %v9475_v38 = vld [vmem:[#allocation40 + $0x300] sm:$0xff] }
0x297d   : > { %10200 = vmatpush1.bf16.xpose.msra.mxu0 %v11651_v60  ;;  %10160 = vmatprep.subr.bf16.mxu1 %v11666_v62  ;;  %v9483_v60 = vld [vmem:[#allocation40 + $0x340] sm:$0xff]  ;;  %v9476_v62 = vld [vmem:[#allocation40 + $0x308] sm:$0xff] }
0x297e   : > { %v9021_v4 = vpop.f32.mrb[104].mxu1  ;;  %v9064_v55 = vpop.f32.mrb[120].mxu0  ;;  %10201 = vmatprep.subr.bf16.mxu0 %v11668_v49  ;;  %v9484_v49 = vld [vmem:[#allocation40 + $0x348] sm:$0xff] }
0x297f   : > { %v9022_v6 = vadd.f32 %v9021_v4, %v8142_v63  ;;  %v9065_v9 = vadd.f32 %v9064_v55, %v8150_v51  ;;  %v9023_v10 = vpop.f32.mrb[105].mxu1  ;;  %v9066_v11 = vpop.f32.mrb[121].mxu0  ;;  %v9491_v4 = vld [vmem:[#allocation40 + $0x380] sm:$0xff] }
0x2980   : > { %v9024_v19 = vadd.f32 %v9023_v10, %v8146_v0  ;;  %v9067_v23 = vadd.f32 %v9066_v11, %v8154_v3  ;;  %v9025_v24 = vpop.f32.mrb[106].mxu1  ;;  %v9068_v28 = vpop.f32.mrb[122].mxu0  ;;  %v9499_v55 = vld [vmem:[#allocation40 + $0x3c0] sm:$0xff]  ;;  %v11732_v11 = vcombine.high %v9492_v61, %v9500_v5 }
0x2981   : > { %v9026_v31 = vadd.f32 %v9025_v24, %v8142_v63  ;;  %v9069_v29 = vadd.f32 %v9068_v28, %v8150_v51  ;;  %v9027_v22 = vpop.f32.mrb[107].mxu1  ;;  %v9070_v16 = vpop.f32.mrb[123].mxu0  ;;  %v9331_v42 = vmax.f32 %v9022_v6, 0.0  ;;  %v9333_v46 = vmax.f32 %v9065_v9, 0.0 }
0x2982   : > { %v9028_v40 = vadd.f32 %v9027_v22, %v8146_v0  ;;  %v9071_v41 = vadd.f32 %v9070_v16, %v8154_v3  ;;  %v9332_v44 = vmax.f32 %v9024_v19, 0.0  ;;  %v9334_v36 = vmax.f32 %v9067_v23, 0.0  ;;  %v9382_v19 = vld [vmem:[#allocation40 + $0x18] sm:$0xff]  ;;  %v9405_v22 = vld [vmem:[#allocation40 + $0xd0] sm:$0xff] }
0x2983   : > { %v9347_v37 = vmax.f32 %v9026_v31, 0.0  ;;  %v9349_v2 = vmax.f32 %v9069_v29, 0.0  ;;  %v11697_v63 = vcombine.low %v9459_v58, %v9467_v54  ;;  %v11699_v51 = vcombine.low %v9460_v32, %v9468_v59  ;;  %v9390_v23 = vld [vmem:[#allocation40 + $0x58] sm:$0xff]  ;;  %v9397_v29 = vld [vmem:[#allocation40 + $0x90] sm:$0xff] }
0x2984   : > { %v9348_v47 = vmax.f32 %v9028_v40, 0.0  ;;  %v9350_v34 = vmax.f32 %v9071_v41, 0.0  ;;  %10161 = vmatpush1.bf16.xpose.msra.mxu1 %v11665_v30  ;;  %v11714_v0 = vcombine.high %v9475_v38, %v9483_v60  ;;  %v11716_v3 = vcombine.high %v9476_v62, %v9484_v49  ;;  %v9398_v16 = vld [vmem:[#allocation40 + $0x98] sm:$0xff] }
0x2985   : > { %v15572_v56 = vpack.c.bf16 %v9347_v37, %v9331_v42  ;;  %v15574_v52 = vpack.c.bf16 %v9349_v2, %v9333_v46  ;;  %10202 = vmatpush1.bf16.xpose.msra.mxu0 %v11667_v17  ;;  %10162 = vmatprep.subr.bf16.mxu1 %v11682_v39  ;;  %v11713_v6 = vcombine.low %v9475_v38, %v9483_v60  ;;  %v9406_v17 = vld [vmem:[#allocation40 + $0xd8] sm:$0xff]  ;;  %v9413_v42 = vld [vmem:[#allocation40 + $0x110] sm:$0xff] }
0x2986   : > { %v9364_v53 = vpack.c.bf16 %v9348_v47, %v9332_v44  ;;  %v9366_v57 = vpack.c.bf16 %v9350_v34, %v9334_v36  ;;  %10203 = vmatprep.subr.bf16.mxu0 %v11684_v45  ;;  %v11715_v9 = vcombine.low %v9476_v62, %v9484_v49  ;;  %v11730_v10 = vcombine.high %v9491_v4, %v9499_v55  ;;  %v9421_v46 = vld [vmem:[#allocation40 + $0x150] sm:$0xff]  ;;  %v9414_v37 = vld [vmem:[#allocation40 + $0x118] sm:$0xff] }
0x2987   : > { %v11729_v24 = vcombine.low %v9491_v4, %v9499_v55  ;;  %v11731_v28 = vcombine.low %v9492_v61, %v9500_v5  ;;  %v11622_v30 = vcombine.high %v9381_v14, %v9389_v15  ;;  %v11624_v31 = vcombine.high %v9382_v19, %v9390_v23  ;;  %v9422_v2 = vld [vmem:[#allocation40 + $0x158] sm:$0xff]  ;;  %v9445_v62 = vld [vmem:[#allocation40 + $0x210] sm:$0xff] }
0x2988   : > { %10186 = vmatprep.mubr.bf16.mxu1 %v9364_v53  ;;  %10227 = vmatprep.mubr.bf16.mxu0 %v9366_v57  ;;  %v11621_v39 = vcombine.low %v9381_v14, %v9389_v15  ;;  %v11623_v40 = vcombine.low %v9382_v19, %v9390_v23  ;;  %v11638_v41 = vcombine.high %v9397_v29, %v9405_v22  ;;  %v9429_v53 = vld [vmem:[#allocation40 + $0x190] sm:$0xff]  ;;  %v9430_v57 = vld [vmem:[#allocation40 + $0x198] sm:$0xff] }
0x2989   : > { %v11640_v45 = vcombine.high %v9398_v16, %v9406_v17  ;;  %v11637_v44 = vcombine.low %v9397_v29, %v9405_v22  ;;  %v11639_v36 = vcombine.low %v9398_v16, %v9406_v17  ;;  %v11654_v47 = vcombine.high %v9413_v42, %v9421_v46  ;;  %v9453_v49 = vld [vmem:[#allocation40 + $0x250] sm:$0xff]  ;;  %v9446_v4 = vld [vmem:[#allocation40 + $0x218] sm:$0xff] }
0x298a   : > { %v11656_v34 = vcombine.high %v9414_v37, %v9422_v2  ;;  %v11653_v58 = vcombine.low %v9413_v42, %v9421_v46  ;;  %v11655_v54 = vcombine.low %v9414_v37, %v9422_v2  ;;  %v9454_v55 = vld [vmem:[#allocation40 + $0x258] sm:$0xff]  ;;  %v11686_v23 = vcombine.high %v9445_v62, %v9453_v49  ;;  %v9461_v2 = vld [vmem:[#allocation40 + $0x290] sm:$0xff] }
0x298c   : > { %10163 = vmatpush1.bf16.xpose.msra.mxu1 %v11681_v50  ;;  %v8158_v50 = vrot.slane %v15562_v18, %v15311_v7 }
0x298d   : > { %10204 = vmatpush1.bf16.xpose.msra.mxu0 %v11683_v33  ;;  %10164 = vmatprep.subr.bf16.mxu1 %v11698_v21  ;;  %v8166_v33 = vrot.slane %v15562_v18, %v15314_v8  ;;  %v8162_v21 = vrot.slane %v15562_v18, %v15317_v12 }
0x298e   : > { %10205 = vmatprep.subr.bf16.mxu0 %v11700_v20  ;;  %v8170_v20 = vrot.slane %v15562_v18, %v15320_v13 }
0x2994   : > { %10165 = vmatpush1.bf16.xpose.msra.mxu1 %v11697_v63 }
0x2995   : > { %10206 = vmatpush1.bf16.xpose.msra.mxu0 %v11699_v51  ;;  %10166 = vmatprep.subr.bf16.mxu1 %v11714_v0 }
0x2996   : > { %10207 = vmatprep.subr.bf16.mxu0 %v11716_v3 }
0x299c   : > { %10167 = vmatpush1.bf16.xpose.msra.mxu1 %v11713_v6 }
0x299d   : > { %10208 = vmatpush1.bf16.xpose.msra.mxu0 %v11715_v9  ;;  %10168 = vmatprep.subr.bf16.mxu1 %v11730_v10 }
0x299e   : > { %10209 = vmatprep.subr.bf16.mxu0 %v11732_v11 }
0x29a4   : > { %10169 = vmatpush1.bf16.xpose.msra.mxu1 %v11729_v24 }
0x29a5   : > { %10210 = vmatpush1.bf16.xpose.msra.mxu0 %v11731_v28  ;;  %10236 = vmatprep.subr.bf16.mxu1 %v11622_v30  ;;  %v11688_v30 = vcombine.high %v9446_v4, %v9454_v55 }
0x29a6   : > { %10277 = vmatprep.subr.bf16.mxu0 %v11624_v31 }
0x29ab   : > { %10187 = vmatmul.mubr.bf16.vlgmr.msra.gmra.mrb[120].mxu1 %v15572_v56  ;;  %v9437_v56 = vld [vmem:[#allocation40 + $0x1d0] sm:$0xff] }
0x29ac   : > { %10228 = vmatmul.mubr.bf16.vlgmr.msra.gmra.mrb[136].mxu0 %v15574_v52  ;;  %10237 = vmatpush1.bf16.xpose.msra.mxu1 %v11621_v39  ;;  %v9438_v52 = vld [vmem:[#allocation40 + $0x1d8] sm:$0xff]  ;;  %v11670_v32 = vcombine.high %v9429_v53, %v9437_v56  ;;  %v11669_v10 = vcombine.low %v9429_v53, %v9437_v56  ;;  %v11687_v53 = vcombine.low %v9446_v4, %v9454_v55  ;;  %v9391_v4 = vld [vmem:[#allocation40 + $0x60] sm:$0xff]  ;;  %v9384_v55 = vld [vmem:[#allocation40 + $0x28] sm:$0xff] }
0x29ad   : > { %10278 = vmatpush1.bf16.xpose.msra.mxu0 %v11623_v40  ;;  %10238 = vmatprep.subr.bf16.mxu1 %v11638_v41  ;;  %v11672_v59 = vcombine.high %v9430_v57, %v9438_v52  ;;  %v11671_v19 = vcombine.low %v9430_v57, %v9438_v52  ;;  %v9477_v52 = vld [vmem:[#allocation40 + $0x310] sm:$0xff] }
0x29ae   : > { %10279 = vmatprep.subr.bf16.mxu0 %v11640_v45 }
0x29b4   : > { %10239 = vmatpush1.bf16.xpose.msra.mxu1 %v11637_v44  ;;  %v9469_v44 = vld [vmem:[#allocation40 + $0x2d0] sm:$0xff] }
0x29b5   : > { %10280 = vmatpush1.bf16.xpose.msra.mxu0 %v11639_v36  ;;  %10240 = vmatprep.subr.bf16.mxu1 %v11654_v47  ;;  %v9462_v36 = vld [vmem:[#allocation40 + $0x298] sm:$0xff]  ;;  %v11702_v56 = vcombine.high %v9461_v2, %v9469_v44 }
0x29b6   : > { %10281 = vmatprep.subr.bf16.mxu0 %v11656_v34  ;;  %v9470_v47 = vld [vmem:[#allocation40 + $0x2d8] sm:$0xff]  ;;  %v11685_v34 = vcombine.low %v9445_v62, %v9453_v49 }
0x29b7   : > { %v11704_v57 = vcombine.high %v9462_v36, %v9470_v47  ;;  %v9502_v62 = vld [vmem:[#allocation40 + $0x3d8] sm:$0xff] }
0x29bc   : > { %10241 = vmatpush1.bf16.xpose.msra.mxu1 %v11653_v58  ;;  %v9485_v58 = vld [vmem:[#allocation40 + $0x350] sm:$0xff] }
0x29bd   : > { %10282 = vmatpush1.bf16.xpose.msra.mxu0 %v11655_v54  ;;  %10242 = vmatprep.subr.bf16.mxu1 %v11670_v32  ;;  %v9478_v54 = vld [vmem:[#allocation40 + $0x318] sm:$0xff]  ;;  %v11717_v49 = vcombine.low %v9477_v52, %v9485_v58 }
0x29be   : > { %v9107_v38 = vpop.f32.mrb[108].mxu1  ;;  %v9150_v60 = vpop.f32.mrb[124].mxu0  ;;  %10283 = vmatprep.subr.bf16.mxu0 %v11672_v59  ;;  %v9486_v32 = vld [vmem:[#allocation40 + $0x358] sm:$0xff]  ;;  %v11701_v59 = vcombine.low %v9461_v2, %v9469_v44  ;;  %v15593_v2 = vld [vmem:[%s15821_s22 + $0x8] sm:$0xff] }
0x29bf   : > { %v9108_v63 = vadd.f32 %v9107_v38, %v8158_v50  ;;  %v9151_v51 = vadd.f32 %v9150_v60, %v8166_v33  ;;  %v9109_v0 = vpop.f32.mrb[109].mxu1  ;;  %v9152_v3 = vpop.f32.mrb[125].mxu0  ;;  %v9501_v38 = vld [vmem:[#allocation40 + $0x3d0] sm:$0xff]  ;;  %v9494_v60 = vld [vmem:[#allocation40 + $0x398] sm:$0xff] }
0x29c0   : > { %v9110_v61 = vadd.f32 %v9109_v0, %v8162_v21  ;;  %v9153_v5 = vadd.f32 %v9152_v3, %v8170_v20  ;;  %v9111_v6 = vpop.f32.mrb[110].mxu1  ;;  %v9154_v9 = vpop.f32.mrb[126].mxu0  ;;  %v11736_v0 = vcombine.high %v9494_v60, %v9502_v62  ;;  %v9383_v3 = vld [vmem:[#allocation40 + $0x20] sm:$0xff] }
0x29c1   : > { %v9112_v11 = vadd.f32 %v9111_v6, %v8158_v50  ;;  %v9155_v18 = vadd.f32 %v9154_v9, %v8166_v33  ;;  %v9113_v14 = vpop.f32.mrb[111].mxu1  ;;  %v9156_v15 = vpop.f32.mrb[127].mxu0  ;;  %v9335_v31 = vmax.f32 %v9108_v63, 0.0  ;;  %v9337_v29 = vmax.f32 %v9151_v51, 0.0 }
0x29c2   : > { %v9114_v24 = vadd.f32 %v9113_v14, %v8162_v21  ;;  %v9157_v28 = vadd.f32 %v9156_v15, %v8170_v20  ;;  %v9336_v17 = vmax.f32 %v9110_v61, 0.0  ;;  %v9338_v39 = vmax.f32 %v9153_v5, 0.0  ;;  %v9493_v20 = vld [vmem:[#allocation40 + $0x390] sm:$0xff]  ;;  %v9392_v61 = vld [vmem:[#allocation40 + $0x68] sm:$0xff] }
0x29c3   : > { %v9351_v22 = vmax.f32 %v9112_v11, 0.0  ;;  %v9353_v16 = vmax.f32 %v9155_v18, 0.0  ;;  %v11703_v50 = vcombine.low %v9462_v36, %v9470_v47  ;;  %v11718_v33 = vcombine.high %v9477_v52, %v9485_v58  ;;  %v9399_v11 = vld [vmem:[#allocation40 + $0xa0] sm:$0xff]  ;;  %v9400_v14 = vld [vmem:[#allocation40 + $0xa8] sm:$0xff] }
0x29c4   : > { %v9352_v40 = vmax.f32 %v9114_v24, 0.0  ;;  %v9354_v41 = vmax.f32 %v9157_v28, 0.0  ;;  %10243 = vmatpush1.bf16.xpose.msra.mxu1 %v11669_v10  ;;  %v11720_v21 = vcombine.high %v9478_v54, %v9486_v32  ;;  %v11719_v63 = vcombine.low %v9478_v54, %v9486_v32  ;;  %v9407_v18 = vld [vmem:[#allocation40 + $0xe0] sm:$0xff]  ;;  %v9408_v15 = vld [vmem:[#allocation40 + $0xe8] sm:$0xff] }
0x29c5   : > { %v15586_v45 = vpack.c.bf16 %v9351_v22, %v9335_v31  ;;  %v15588_v42 = vpack.c.bf16 %v9353_v16, %v9337_v29  ;;  %10284 = vmatpush1.bf16.xpose.msra.mxu0 %v11671_v19  ;;  %10244 = vmatprep.subr.bf16.mxu1 %v11686_v23  ;;  %v11734_v51 = vcombine.high %v9493_v20, %v9501_v38  ;;  %v9423_v31 = vld [vmem:[#allocation40 + $0x160] sm:$0xff]  ;;  %v9416_v29 = vld [vmem:[#allocation40 + $0x128] sm:$0xff] }
0x29c6   : > { %v9368_v46 = vpack.c.bf16 %v9352_v40, %v9336_v17  ;;  %v9370_v37 = vpack.c.bf16 %v9354_v41, %v9338_v39  ;;  %10285 = vmatprep.subr.bf16.mxu0 %v11688_v30  ;;  %v11733_v5 = vcombine.low %v9493_v20, %v9501_v38  ;;  %v11735_v6 = vcombine.low %v9494_v60, %v9502_v62  ;;  %v9415_v30 = vld [vmem:[#allocation40 + $0x120] sm:$0xff]  ;;  %v9424_v22 = vld [vmem:[#allocation40 + $0x168] sm:$0xff] }
0x29c7   : > { %v11626_v9 = vcombine.high %v9383_v3, %v9391_v4  ;;  %v11628_v10 = vcombine.high %v9384_v55, %v9392_v61  ;;  %v11625_v19 = vcombine.low %v9383_v3, %v9391_v4  ;;  %v11627_v23 = vcombine.low %v9384_v55, %v9392_v61  ;;  %v9431_v41 = vld [vmem:[#allocation40 + $0x1a0] sm:$0xff] }
0x29c8   : > { %10268 = vmatprep.mubr.bf16.mxu1 %v9368_v46  ;;  %10309 = vmatprep.mubr.bf16.mxu0 %v9370_v37  ;;  %v11642_v24 = vcombine.high %v9399_v11, %v9407_v18  ;;  %v11644_v28 = vcombine.high %v9400_v14, %v9408_v15  ;;  %v11641_v16 = vcombine.low %v9399_v11, %v9407_v18  ;;  %v9440_v46 = vld [vmem:[#allocation40 + $0x1e8] sm:$0xff]  ;;  %v9447_v58 = vld [vmem:[#allocation40 + $0x220] sm:$0xff] }
0x29c9   : > { %v11643_v17 = vcombine.low %v9400_v14, %v9408_v15  ;;  %v11658_v39 = vcombine.high %v9415_v30, %v9423_v31  ;;  %v11660_v40 = vcombine.high %v9416_v29, %v9424_v22  ;;  %v11657_v37 = vcombine.low %v9415_v30, %v9423_v31  ;;  %v9455_v54 = vld [vmem:[#allocation40 + $0x260] sm:$0xff] }
0x29ca   : > { %v11659_v44 = vcombine.low %v9416_v29, %v9424_v22  ;;  %v9471_v30 = vld [vmem:[#allocation40 + $0x2e0] sm:$0xff]  ;;  %v9464_v29 = vld [vmem:[#allocation40 + $0x2a8] sm:$0xff] }
0x29cb   : > { %v9472_v22 = vld [vmem:[#allocation40 + $0x2e8] sm:$0xff] }
0x29cc   : > { %10245 = vmatpush1.bf16.xpose.msra.mxu1 %v11685_v34  ;;  %v8174_v34 = vrot.slane %v15593_v2, %v15283_v26  ;;  %v9448_v26 = vld [vmem:[#allocation40 + $0x228] sm:$0xff] }
0x29cd   : > { %10286 = vmatpush1.bf16.xpose.msra.mxu0 %v11687_v53  ;;  %10246 = vmatprep.subr.bf16.mxu1 %v11702_v56  ;;  %v8182_v53 = vrot.slane %v15593_v2, %v15286_v27  ;;  %v8178_v56 = vrot.slane %v15593_v2, %v15291_v35 }
0x29ce   : > { %10287 = vmatprep.subr.bf16.mxu0 %v11704_v57  ;;  %v8186_v57 = vrot.slane %v15593_v2, %v15294_v25 }
0x29d4   : > { %10247 = vmatpush1.bf16.xpose.msra.mxu1 %v11701_v59 }
0x29d5   : > { %10288 = vmatpush1.bf16.xpose.msra.mxu0 %v11703_v50  ;;  %10248 = vmatprep.subr.bf16.mxu1 %v11718_v33  ;;  %v9456_v33 = vld [vmem:[#allocation40 + $0x268] sm:$0xff] }
0x29d6   : > { %10289 = vmatprep.subr.bf16.mxu0 %v11720_v21  ;;  %v11692_v55 = vcombine.high %v9448_v26, %v9456_v33 }
0x29dc   : > { %10249 = vmatpush1.bf16.xpose.msra.mxu1 %v11717_v49 }
0x29dd   : > { %10290 = vmatpush1.bf16.xpose.msra.mxu0 %v11719_v63  ;;  %10250 = vmatprep.subr.bf16.mxu1 %v11734_v51  ;;  %v11690_v51 = vcombine.high %v9447_v58, %v9455_v54 }
0x29de   : > { %10291 = vmatprep.subr.bf16.mxu0 %v11736_v0 }
0x29e4   : > { %10251 = vmatpush1.bf16.xpose.msra.mxu1 %v11733_v5 }
0x29e5   : > { %10292 = vmatpush1.bf16.xpose.msra.mxu0 %v11735_v6  ;;  %10318 = vmatprep.subr.bf16.mxu1 %v11626_v9 }
0x29e6   : > { %10359 = vmatprep.subr.bf16.mxu0 %v11628_v10 }
0x29eb   : > { %10269 = vmatmul.mubr.bf16.vlgmr.msra.gmra.mrb[124].mxu1 %v15586_v45  ;;  %v9439_v45 = vld [vmem:[#allocation40 + $0x1e0] sm:$0xff] }
0x29ec   : > { %10310 = vmatmul.mubr.bf16.vlgmr.msra.gmra.mrb[140].mxu0 %v15588_v42  ;;  %10319 = vmatpush1.bf16.xpose.msra.mxu1 %v11625_v19  ;;  %v9432_v42 = vld [vmem:[#allocation40 + $0x1a8] sm:$0xff]  ;;  %v11674_v36 = vcombine.high %v9431_v41, %v9439_v45  ;;  %v11673_v60 = vcombine.low %v9431_v41, %v9439_v45  ;;  %v9479_v41 = vld [vmem:[#allocation40 + $0x320] sm:$0xff] }
0x29ed   : > { %10360 = vmatpush1.bf16.xpose.msra.mxu0 %v11627_v23  ;;  %10320 = vmatprep.subr.bf16.mxu1 %v11642_v24  ;;  %v11676_v47 = vcombine.high %v9432_v42, %v9440_v46  ;;  %v11675_v25 = vcombine.low %v9432_v42, %v9440_v46  ;;  %v9487_v45 = vld [vmem:[#allocation40 + $0x360] sm:$0xff]  ;;  %v9480_v42 = vld [vmem:[#allocation40 + $0x328] sm:$0xff] }
0x29ee   : > { %10361 = vmatprep.subr.bf16.mxu0 %v11644_v28  ;;  %v9463_v28 = vld [vmem:[#allocation40 + $0x2a0] sm:$0xff]  ;;  %v9488_v46 = vld [vmem:[#allocation40 + $0x368] sm:$0xff] }
0x29f4   : > { %10321 = vmatpush1.bf16.xpose.msra.mxu1 %v11641_v16  ;;  %v11689_v16 = vcombine.low %v9447_v58, %v9455_v54  ;;  %v11723_v58 = vcombine.low %v9480_v42, %v9488_v46 }
0x29f5   : > { %10362 = vmatpush1.bf16.xpose.msra.mxu0 %v11643_v17  ;;  %10322 = vmatprep.subr.bf16.mxu1 %v11658_v39  ;;  %v11691_v17 = vcombine.low %v9448_v26, %v9456_v33  ;;  %v11706_v39 = vcombine.high %v9463_v28, %v9471_v30  ;;  %v9386_v26 = vld [vmem:[#allocation40 + $0x38] sm:$0xff] }
0x29f6   : > { %10363 = vmatprep.subr.bf16.mxu0 %v11660_v40  ;;  %v11708_v40 = vcombine.high %v9464_v29, %v9472_v22  ;;  %v9394_v33 = vld [vmem:[#allocation40 + $0x78] sm:$0xff] }
0x29fc   : > { %10323 = vmatpush1.bf16.xpose.msra.mxu1 %v11657_v37  ;;  %v11705_v37 = vcombine.low %v9463_v28, %v9471_v30  ;;  %v8190_v30 = vrot.slane %v15593_v2, %v15311_v7  ;;  %v9450_v7 = vld [vmem:[#allocation40 + $0x238] sm:$0xff] }
0x29fd   : > { %10364 = vmatpush1.bf16.xpose.msra.mxu0 %v11659_v44  ;;  %10324 = vmatprep.subr.bf16.mxu1 %v11674_v36  ;;  %v11707_v44 = vcombine.low %v9464_v29, %v9472_v22  ;;  %v11722_v36 = vcombine.high %v9479_v41, %v9487_v45  ;;  %v8194_v29 = vrot.slane %v15593_v2, %v15317_v12 }
0x29fe   : > { %v9193_v52 = vpop.f32.mrb[112].mxu1  ;;  %10365 = vmatprep.subr.bf16.mxu0 %v11676_v47  ;;  %v11724_v47 = vcombine.high %v9480_v42, %v9488_v46  ;;  %v8202_v22 = vrot.slane %v15593_v2, %v15320_v13  ;;  %v9458_v42 = vld [vmem:[#allocation40 + $0x278] sm:$0xff] }
0x29ff   : > { %v9194_v32 = vadd.f32 %v9193_v52, %v8174_v34  ;;  %v9236_v59 = vpop.f32.mrb[128].mxu0  ;;  %v9195_v50 = vpop.f32.mrb[113].mxu1  ;;  %v11721_v52 = vcombine.low %v9479_v41, %v9487_v45 }
0x2a00   : > { %v9237_v21 = vadd.f32 %v9236_v59, %v8182_v53  ;;  %v9196_v20 = vadd.f32 %v9195_v50, %v8178_v56  ;;  %v9238_v27 = vpop.f32.mrb[129].mxu0  ;;  %v9197_v38 = vpop.f32.mrb[114].mxu1  ;;  %v9385_v59 = vld [vmem:[#allocation40 + $0x30] sm:$0xff] }
0x2a01   : > { %v9239_v35 = vadd.f32 %v9238_v27, %v8186_v57  ;;  %v9198_v62 = vadd.f32 %v9197_v38, %v8174_v34  ;;  %v9240_v49 = vpop.f32.mrb[130].mxu0  ;;  %v9199_v63 = vpop.f32.mrb[115].mxu1  ;;  %v9339_v61 = vmax.f32 %v9194_v32, 0.0  ;;  %v9495_v34 = vld [vmem:[#allocation40 + $0x3a0] sm:$0xff]  ;;  %v9393_v50 = vld [vmem:[#allocation40 + $0x70] sm:$0xff]  ;;  %v11632_v38 = vcombine.high %v9386_v26, %v9394_v33 }
0x2a02   : > { %v9241_v0 = vadd.f32 %v9240_v49, %v8182_v53  ;;  %v9200_v3 = vadd.f32 %v9199_v63, %v8178_v56  ;;  %v9242_v4 = vpop.f32.mrb[131].mxu0  ;;  %v9341_v9 = vmax.f32 %v9237_v21, 0.0  ;;  %v9340_v10 = vmax.f32 %v9196_v20, 0.0  ;;  %v9503_v53 = vld [vmem:[#allocation40 + $0x3e0] sm:$0xff]  ;;  %v9496_v56 = vld [vmem:[#allocation40 + $0x3a8] sm:$0xff]  ;;  %v9410_v49 = vld [vmem:[#allocation40 + $0xf8] sm:$0xff] }
0x2a03   : > { %v9355_v5 = vmax.f32 %v9198_v62, 0.0  ;;  %v9243_v6 = vadd.f32 %v9242_v4, %v8186_v57  ;;  %v9342_v14 = vmax.f32 %v9239_v35, 0.0  ;;  %v9504_v57 = vld [vmem:[#allocation40 + $0x3e8] sm:$0xff]  ;;  %v11738_v54 = vcombine.high %v9495_v34, %v9503_v53  ;;  %v9409_v35 = vld [vmem:[#allocation40 + $0xf0] sm:$0xff]  ;;  %v9402_v62 = vld [vmem:[#allocation40 + $0xb8] sm:$0xff] }
0x2a04   : > { %v9357_v11 = vmax.f32 %v9241_v0, 0.0  ;;  %v9356_v18 = vmax.f32 %v9200_v3, 0.0  ;;  %10325 = vmatpush1.bf16.xpose.msra.mxu1 %v11673_v60  ;;  %v11740_v32 = vcombine.high %v9496_v56, %v9504_v57  ;;  %v11737_v21 = vcombine.low %v9495_v34, %v9503_v53  ;;  %v9401_v60 = vld [vmem:[#allocation40 + $0xb0] sm:$0xff] }
0x2a05   : > { %v15603_v15 = vpack.c.bf16 %v9355_v5, %v9339_v61  ;;  %v9358_v19 = vmax.f32 %v9243_v6, 0.0  ;;  %10366 = vmatpush1.bf16.xpose.msra.mxu0 %v11675_v25  ;;  %10326 = vmatprep.subr.bf16.mxu1 %v11690_v51  ;;  %v11739_v20 = vcombine.low %v9496_v56, %v9504_v57  ;;  %v11630_v27 = vcombine.high %v9385_v59, %v9393_v50  ;;  %v9417_v3 = vld [vmem:[#allocation40 + $0x130] sm:$0xff]  ;;  %v9426_v61 = vld [vmem:[#allocation40 + $0x178] sm:$0xff] }
0x2a06   : > { %v9373_v23 = vpack.c.bf16 %v9357_v11, %v9341_v9  ;;  %v9372_v24 = vpack.c.bf16 %v9356_v18, %v9340_v10  ;;  %10367 = vmatprep.subr.bf16.mxu0 %v11692_v55  ;;  %v11629_v63 = vcombine.low %v9385_v59, %v9393_v50  ;;  %v11631_v25 = vcombine.low %v9386_v26, %v9394_v33  ;;  %v9425_v4 = vld [vmem:[#allocation40 + $0x170] sm:$0xff]  ;;  %v9418_v55 = vld [vmem:[#allocation40 + $0x138] sm:$0xff] }
0x2a07   : > { %v9374_v31 = vpack.c.bf16 %v9358_v19, %v9342_v14  ;;  %v11646_v51 = vcombine.high %v9401_v60, %v9409_v35  ;;  %v11648_v0 = vcombine.high %v9402_v62, %v9410_v49  ;;  %v11645_v5 = vcombine.low %v9401_v60, %v9409_v35  ;;  %v9433_v11 = vld [vmem:[#allocation40 + $0x1b0] sm:$0xff]  ;;  %v9434_v14 = vld [vmem:[#allocation40 + $0x1b8] sm:$0xff] }
0x2a08   : > { %10350 = vmatprep.mubr.bf16.mxu1 %v9372_v24  ;;  %v11647_v6 = vcombine.low %v9402_v62, %v9410_v49  ;;  %v11662_v9 = vcombine.high %v9417_v3, %v9425_v4  ;;  %v11664_v10 = vcombine.high %v9418_v55, %v9426_v61  ;;  %v9441_v18 = vld [vmem:[#allocation40 + $0x1f0] sm:$0xff]  ;;  %v11661_v19 = vcombine.low %v9417_v3, %v9425_v4 }
0x2a09   : > { %10391 = vmatprep.mubr.bf16.mxu0 %v9374_v31  ;;  %v11678_v24 = vcombine.high %v9433_v11, %v9441_v18  ;;  %v8198_v31 = vrot.slane %v15593_v2, %v15314_v8  ;;  %v9465_v62 = vld [vmem:[#allocation40 + $0x2b0] sm:$0xff]  ;;  %v11695_v3 = vcombine.low %v9450_v7, %v9458_v42 }
0x2a0a   : > { %v9473_v49 = vld [vmem:[#allocation40 + $0x2f0] sm:$0xff] }
0x2a0b   : > { %v11710_v4 = vcombine.high %v9465_v62, %v9473_v49 }
0x2a0c   : > { %10327 = vmatpush1.bf16.xpose.msra.mxu1 %v11689_v16 }
0x2a0d   : > { %10368 = vmatpush1.bf16.xpose.msra.mxu0 %v11691_v17  ;;  %10328 = vmatprep.subr.bf16.mxu1 %v11706_v39  ;;  %v9449_v17 = vld [vmem:[#allocation40 + $0x230] sm:$0xff] }
0x2a0e   : > { %10369 = vmatprep.subr.bf16.mxu0 %v11708_v40  ;;  %v9457_v39 = vld [vmem:[#allocation40 + $0x270] sm:$0xff] }
0x2a0f   : > { %v11694_v2 = vcombine.high %v9449_v17, %v9457_v39 }
0x2a14   : > { %10329 = vmatpush1.bf16.xpose.msra.mxu1 %v11705_v37 }
0x2a15   : > { %10370 = vmatpush1.bf16.xpose.msra.mxu0 %v11707_v44  ;;  %10330 = vmatprep.subr.bf16.mxu1 %v11722_v36  ;;  %v11677_v36 = vcombine.low %v9433_v11, %v9441_v18 }
0x2a16   : > { %10371 = vmatprep.subr.bf16.mxu0 %v11724_v47 }
0x2a1c   : > { %10331 = vmatpush1.bf16.xpose.msra.mxu1 %v11721_v52 }
0x2a1d   : > { %10372 = vmatpush1.bf16.xpose.msra.mxu0 %v11723_v58  ;;  %10332 = vmatprep.subr.bf16.mxu1 %v11738_v54  ;;  %v11696_v58 = vcombine.high %v9450_v7, %v9458_v42 }
0x2a1e   : > { %10373 = vmatprep.subr.bf16.mxu0 %v11740_v32 }
0x2a24   : > { %10333 = vmatpush1.bf16.xpose.msra.mxu1 %v11737_v21 }
0x2a25   : > { %10374 = vmatpush1.bf16.xpose.msra.mxu0 %v11739_v20  ;;  %10400 = vmatprep.subr.bf16.mxu1 %v11630_v27 }
0x2a26   : > { %10441 = vmatprep.subr.bf16.mxu0 %v11632_v38 }
0x2a2b   : > { %10351 = vmatmul.mubr.bf16.vlgmr.msra.gmra.mrb[128].mxu1 %v15603_v15  ;;  %v9442_v15 = vld [vmem:[#allocation40 + $0x1f8] sm:$0xff] }
0x2a2c   : > { %10392 = vmatmul.mubr.bf16.vlgmr.msra.gmra.mrb[144].mxu0 %v9373_v23  ;;  %10401 = vmatpush1.bf16.xpose.msra.mxu1 %v11629_v63  ;;  %v11663_v23 = vcombine.low %v9418_v55, %v9426_v61  ;;  %v11680_v28 = vcombine.high %v9434_v14, %v9442_v15  ;;  %v11679_v13 = vcombine.low %v9434_v14, %v9442_v15  ;;  %v9481_v61 = vld [vmem:[#allocation40 + $0x330] sm:$0xff] }
0x2a2d   : > { %10442 = vmatpush1.bf16.xpose.msra.mxu0 %v11631_v25  ;;  %10402 = vmatprep.subr.bf16.mxu1 %v11646_v51  ;;  %v9466_v25 = vld [vmem:[#allocation40 + $0x2b8] sm:$0xff]  ;;  %v9497_v15 = vld [vmem:[#allocation40 + $0x3b0] sm:$0xff] }
0x2a2e   : > { %10443 = vmatprep.subr.bf16.mxu0 %v11648_v0  ;;  %v9474_v51 = vld [vmem:[#allocation40 + $0x2f8] sm:$0xff]  ;;  %v11693_v0 = vcombine.low %v9449_v17, %v9457_v39 }
0x2a2f   : > { %v11712_v55 = vcombine.high %v9466_v25, %v9474_v51  ;;  %v11711_v11 = vcombine.low %v9466_v25, %v9474_v51  ;;  %v11616_v17 = vld [vmem:[%s15822_s7] ss:$0 sm:$0xff]  ;;  %s14172_s7 = scalar_lea.vmem %s14171_s10, 32 }
0x2a30   : > { %p14174_p5 = scmp.lt.s32.totalorder %s14172_s7, %s14166_s8 }
0x2a32   : > { %p14175_p6 = por %p14174_p5, %p14173_p12 }
0x2a34   : > { %10403 = vmatpush1.bf16.xpose.msra.mxu1 %v11645_v5  ;;  %v9489_v5 = vld [vmem:[#allocation40 + $0x370] sm:$0xff]  ;;  %p14176_p9 = pnand %p14175_p6, %p14169_p4 }
0x2a35   : > { %10444 = vmatpush1.bf16.xpose.msra.mxu0 %v11647_v6  ;;  %10404 = vmatprep.subr.bf16.mxu1 %v11662_v9  ;;  %v9482_v6 = vld [vmem:[#allocation40 + $0x338] sm:$0xff]  ;;  %v11726_v18 = vcombine.high %v9481_v61, %v9489_v5 }
0x2a36   : > { %10445 = vmatprep.subr.bf16.mxu0 %v11664_v10  ;;  %v9490_v9 = vld [vmem:[#allocation40 + $0x378] sm:$0xff]  ;;  %v11709_v10 = vcombine.low %v9465_v62, %v9473_v49 }
0x2a37   : > { %v11728_v14 = vcombine.high %v9482_v6, %v9490_v9 }
0x2a3c   : > { %10405 = vmatpush1.bf16.xpose.msra.mxu1 %v11661_v19  ;;  %v9505_v19 = vld [vmem:[#allocation40 + $0x3f0] sm:$0xff] }
0x2a3d   : > { %10446 = vmatpush1.bf16.xpose.msra.mxu0 %v11663_v23  ;;  %10406 = vmatprep.subr.bf16.mxu1 %v11678_v24  ;;  %v9498_v23 = vld [vmem:[#allocation40 + $0x3b8] sm:$0xff] }
0x2a3e   : > { %v9279_v16 = vpop.f32.mrb[116].mxu1  ;;  %10447 = vmatprep.subr.bf16.mxu0 %v11680_v28  ;;  %v9506_v24 = vld [vmem:[#allocation40 + $0x3f8] sm:$0xff]  ;;  %v11725_v28 = vcombine.low %v9481_v61, %v9489_v5 }
0x2a3f   : > { %v9280_v40 = vadd.f32 %v9279_v16, %v8190_v30  ;;  %v9322_v41 = vpop.f32.mrb[132].mxu0  ;;  %v9281_v45 = vpop.f32.mrb[117].mxu1  ;;  %v11743_v16 = vcombine.low %v9498_v23, %v9506_v24 }
0x2a40   : > { %v9323_v46 = vadd.f32 %v9322_v41, %v8198_v31  ;;  %v9282_v37 = vadd.f32 %v9281_v45, %v8194_v29  ;;  %v9324_v8 = vpop.f32.mrb[133].mxu0  ;;  %v9283_v44 = vpop.f32.mrb[118].mxu1 }
0x2a41   : > { %v9325_v12 = vadd.f32 %v9324_v8, %v8202_v22  ;;  %v9284_v47 = vadd.f32 %v9283_v44, %v8190_v30  ;;  %v9326_v34 = vpop.f32.mrb[134].mxu0  ;;  %v9285_v53 = vpop.f32.mrb[119].mxu1  ;;  %v9343_v54 = vmax.f32 %v9280_v40, 0.0  ;;  %v11727_v30 = vcombine.low %v9482_v6, %v9490_v9 }
0x2a42   : > { %v9327_v56 = vadd.f32 %v9326_v34, %v8198_v31  ;;  %v9286_v57 = vadd.f32 %v9285_v53, %v8194_v29  ;;  %v9328_v52 = vpop.f32.mrb[135].mxu0  ;;  %v9345_v50 = vmax.f32 %v9323_v46, 0.0  ;;  %v9344_v26 = vmax.f32 %v9282_v37, 0.0 }
0x2a43   : > { %v9359_v32 = vmax.f32 %v9284_v47, 0.0  ;;  %v9329_v59 = vadd.f32 %v9328_v52, %v8202_v22  ;;  %v9346_v20 = vmax.f32 %v9325_v12, 0.0  ;;  %v11742_v31 = vcombine.high %v9497_v15, %v9505_v19 }
0x2a44   : > { %v9361_v33 = vmax.f32 %v9327_v56, 0.0  ;;  %v9360_v21 = vmax.f32 %v9286_v57, 0.0  ;;  %10407 = vmatpush1.bf16.xpose.msra.mxu1 %v11677_v36  ;;  %v11744_v29 = vcombine.high %v9498_v23, %v9506_v24  ;;  %v11741_v22 = vcombine.low %v9497_v15, %v9505_v19  ;;  %v13350_v15 = vld [vmem:[#allocation41] sm:$0xff]   ;;  %v13351_v19 = vld [vmem:[#allocation41 + $0x8] sm:$0xff]   ;;  %v13352_v23 = vld [vmem:[#allocation41 + $0x10] sm:$0xff]  }
0x2a45   : > { %v9375_v27 = vpack.c.bf16 %v9359_v32, %v9343_v54  ;;  %v9362_v38 = vmax.f32 %v9329_v59, 0.0  ;;  %10448 = vmatpush1.bf16.xpose.msra.mxu0 %v11679_v13  ;;  %10408 = vmatprep.subr.bf16.mxu1 %v11694_v2 }
0x2a46   : > { %v9377_v60 = vpack.c.bf16 %v9361_v33, %v9345_v50  ;;  %v9376_v35 = vpack.c.bf16 %v9360_v21, %v9344_v26  ;;  %10449 = vmatprep.subr.bf16.mxu0 %v11696_v58 }
0x2a47   : > { %v9378_v63 = vpack.c.bf16 %v9362_v38, %v9346_v20 }
0x2a48   : > { %10432 = vmatprep.mubr.bf16.mxu1 %v9376_v35 }
0x2a49   : > { %10473 = vmatprep.mubr.bf16.mxu0 %v9378_v63 }
0x2a4c   : > { %10409 = vmatpush1.bf16.xpose.msra.mxu1 %v11693_v0 }
0x2a4d   : > { %10450 = vmatpush1.bf16.xpose.msra.mxu0 %v11695_v3  ;;  %10410 = vmatprep.subr.bf16.mxu1 %v11710_v4 }
0x2a4e   : > { %10451 = vmatprep.subr.bf16.mxu0 %v11712_v55 }
0x2a54   : > { %10411 = vmatpush1.bf16.xpose.msra.mxu1 %v11709_v10 }
0x2a55   : > { %10452 = vmatpush1.bf16.xpose.msra.mxu0 %v11711_v11  ;;  %10412 = vmatprep.subr.bf16.mxu1 %v11726_v18 }
0x2a56   : > { %10453 = vmatprep.subr.bf16.mxu0 %v11728_v14 }
0x2a5c   : > { %10413 = vmatpush1.bf16.xpose.msra.mxu1 %v11725_v28 }
0x2a5d   : > { %10454 = vmatpush1.bf16.xpose.msra.mxu0 %v11727_v30  ;;  %10414 = vmatprep.subr.bf16.mxu1 %v11742_v31 }
0x2a5e   : > { %10455 = vmatprep.subr.bf16.mxu0 %v11744_v29 }
0x2a64   : > { %10415 = vmatpush1.bf16.xpose.msra.mxu1 %v11741_v22 }
0x2a65   : > { %10456 = vmatpush1.bf16.xpose.msra.mxu0 %v11743_v16  ;;  %12584 = vmatprep.subr.bf16.mxu1 %v14355_v1  ;;  %v13353_v16 = vld [vmem:[#allocation41 + $0x18] sm:$0xff]  }
0x2a6b   : > { %10433 = vmatmul.mubr.bf16.vlgmr.msra.gmra.mrb[132].mxu1 %v9375_v27 }
0x2a6c   : > { %10474 = vmatmul.mubr.bf16.vlgmr.msra.gmra.mrb[148].mxu0 %v9377_v60  ;;  %12600 = vmatprep.mubr.msk.bf16.mxu1 %vm14356_vm0, %v14355_v1 }
0x2a6d   : > { %12585 = vmatpush3.bf16.xpose.msra.mxu1 %v13350_v15 }
0x2a6e   : > { %12586 = vmatprep.subr.bf16.mxu1 %v14355_v1 }
0x2a75   : > { %12587 = vmatpush3.bf16.xpose.msra.mxu1 %v13351_v19 }
0x2a76   : > { %12588 = vmatprep.subr.bf16.mxu1 %v14355_v1 }
0x2a7d   : > { %12589 = vmatpush3.bf16.xpose.msra.mxu1 %v13352_v23 }
0x2a7e   : > { %v10188_v39 = vpop.f32.mrb[120].mxu1  ;;  %12590 = vmatprep.subr.bf16.mxu1 %v14355_v1 }
0x2a7f   : > { %v10189_v40 = vadd.f32 %v11616_v17, %v10188_v39  ;;  %v10229_v41 = vpop.f32.mrb[136].mxu0  ;;  %v10190_v45 = vpop.f32.mrb[121].mxu1  ;;  %v13355_v39 = vld [vmem:[#allocation41 + $0x28] sm:$0xff]  }
0x2a80   : > { %v10231_v7 = vpop.f32.mrb[137].mxu0  ;;  %v10191_v42 = vpop.f32.mrb[122].mxu1 }
0x2a81   : > { %v10230_v46 = vadd.f32 %v10229_v41, %v10189_v40  ;;  %v10192_v37 = vadd.f32 %v11616_v17, %v10191_v42  ;;  %v10232_v8 = vpop.f32.mrb[138].mxu0  ;;  %v10193_v44 = vpop.f32.mrb[123].mxu1  ;;  %v13354_v17 = vld [vmem:[#allocation41 + $0x20] sm:$0xff]   ;;  %v13356_v40 = vld [vmem:[#allocation41 + $0x30] sm:$0xff]   ;;  %v13357_v41 = vld [vmem:[#allocation41 + $0x38] sm:$0xff]  }
0x2a82   : > { %v10234_v36 = vpop.f32.mrb[139].mxu0 }
0x2a83   : > { %v10233_v12 = vadd.f32 %v10232_v8, %v10192_v37  ;;  %v11745_v36 = vld [vmem:[%s15823_s9] ss:$0 sm:$0xff] }
0x2a85   : > { %12591 = vmatpush3.bf16.xpose.msra.mxu1 %v13353_v16 }
0x2a86   : > { %12592 = vmatprep.subr.bf16.mxu1 %v14355_v1 }
0x2a8d   : > { %12593 = vmatpush3.bf16.xpose.msra.mxu1 %v13354_v17 }
0x2a8e   : > { %12594 = vmatprep.subr.bf16.mxu1 %v14355_v1 }
0x2a95   : > { %12595 = vmatpush3.bf16.xpose.msra.mxu1 %v13355_v39 }
0x2a96   : > { %12596 = vmatprep.subr.bf16.mxu1 %v14355_v1 }
0x2a9d   : > { %12597 = vmatpush3.bf16.xpose.msra.mxu1 %v13356_v40 }
0x2a9e   : > { %12598 = vmatprep.subr.bf16.mxu1 %v14355_v1  ;;  %v11746_v1 = vld [vmem:[%s14536_s14] ss:$0 sm:$0xff] }
0x2aa5   : > { %12599 = vmatpush3.bf16.xpose.msra.mxu1 %v13357_v41 }
0x2abe   : > { %v10270_v47 = vpop.f32.mrb[124].mxu1 }
0x2abf   : > { %v10271_v34 = vadd.f32 %v10270_v47, %v10230_v46  ;;  %v10311_v53 = vpop.f32.mrb[140].mxu0  ;;  %v10272_v13 = vpop.f32.mrb[125].mxu1 }
0x2ac0   : > { %v10313_v2 = vpop.f32.mrb[141].mxu0  ;;  %v10273_v56 = vpop.f32.mrb[126].mxu1 }
0x2ac1   : > { %v10312_v57 = vadd.f32 %v10311_v53, %v10271_v34  ;;  %v10274_v52 = vadd.f32 %v10273_v56, %v10233_v12  ;;  %v10314_v58 = vpop.f32.mrb[142].mxu0  ;;  %v10275_v54 = vpop.f32.mrb[127].mxu1 }
0x2ac2   : > { %v10316_v32 = vpop.f32.mrb[143].mxu0 }
0x2ac3   : > { %v10315_v59 = vadd.f32 %v10314_v58, %v10274_v52 }
0x2afe   : > { %v10352_v50 = vpop.f32.mrb[128].mxu1 }
0x2aff   : > { %v10353_v26 = vadd.f32 %v10352_v50, %v10312_v57  ;;  %v10393_v33 = vpop.f32.mrb[144].mxu0  ;;  %v10354_v21 = vpop.f32.mrb[129].mxu1 }
0x2b00   : > { %v10395_v20 = vpop.f32.mrb[145].mxu0  ;;  %v10355_v27 = vpop.f32.mrb[130].mxu1  ;;  %v10550_v21 = vld [vmem:[%s14546_s27] sm:$0x1] }
0x2b01   : > { %v10394_v38 = vadd.f32 %v10393_v33, %v10353_v26  ;;  %v10356_v60 = vadd.f32 %v10355_v27, %v10315_v59  ;;  %v10396_v35 = vpop.f32.mrb[146].mxu0  ;;  %v10357_v62 = vpop.f32.mrb[131].mxu1 }
0x2b02   : > { %v10398_v49 = vpop.f32.mrb[147].mxu0 }
0x2b03   : > { %v10397_v63 = vadd.f32 %v10396_v35, %v10356_v60 }
0x2b3e   : > { %v10434_v25 = vpop.f32.mrb[132].mxu1 }
0x2b3f   : > { %v10435_v51 = vadd.f32 %v10434_v25, %v10394_v38  ;;  %v10475_v0 = vpop.f32.mrb[148].mxu0  ;;  %v10436_v3 = vpop.f32.mrb[133].mxu1 }
0x2b40   : > { %v10477_v4 = vpop.f32.mrb[149].mxu0  ;;  %v10437_v55 = vpop.f32.mrb[134].mxu1 }
0x2b41   : > { %v10476_v61 = vadd.f32 %v10475_v0, %v10435_v51  ;;  %v10438_v5 = vadd.f32 %v10437_v55, %v10397_v63  ;;  %v10478_v6 = vpop.f32.mrb[150].mxu0  ;;  %v10439_v9 = vpop.f32.mrb[135].mxu1 }
0x2b42   : > { %v10480_v10 = vpop.f32.mrb[151].mxu0 }
0x2b43   : > { %v10479_v11 = vadd.f32 %v10478_v6, %v10438_v5  ;;  %v10482_v18 = vadd.f32 %v10476_v61, %v15537_v43 }
0x2b45   : > { %10486 = vadd.xlane.f32.xlu1 %v10482_v18  ;;  %v10483_v14 = vadd.f32 %v10479_v11, %v15539_v48 }
0x2b47   : > { %10488 = vadd.xlane.f32.xlu0 %v10483_v14 }
0x2bd2   : > { %v10487_v24 = vpop.xlane.xlu1 %10486 }
0x2bd3   : > { %v10490_v28 = vmul.f32 0.0078125, %v10487_v24 }
0x2bd4   : > { %v10489_v30 = vpop.xlane.xlu0 %10488 }
0x2bd5   : > { %v10492_v43 = vsub.f32 %v10482_v18, %v10490_v28  ;;  %v10491_v31 = vmul.f32 0.0078125, %v10489_v30 }
0x2bd7   : > { %v10493_v29 = vsub.f32 %v10483_v14, %v10491_v31  ;;  %v10494_v48 = vmul.f32 %v10492_v43, %v10492_v43 }
0x2bd9   : > { %10496 = vadd.xlane.f32.xlu1 %v10494_v48  ;;  %v10495_v22 = vmul.f32 %v10493_v29, %v10493_v29 }
0x2bdb   : > { %10498 = vadd.xlane.f32.xlu0 %v10495_v22 }
0x2c66   : > { %v10497_v45 = vpop.xlane.xlu1 %10496 }
0x2c67   : > { %v10500_v7 = vmul.f32 0.0078125, %v10497_v45 }
0x2c68   : > { %v10499_v42 = vpop.xlane.xlu0 %10498 }
0x2c69   : > { %v10502_v46 = vadd.f32 1e-05, %v10500_v7  ;;  %v10501_v37 = vmul.f32 0.0078125, %v10499_v42 }
0x2c6b   : > { %13434 = vrsqrt.f32 %v10502_v46  ;;  %v10503_v8 = vadd.f32 1e-05, %v10501_v37 }
0x2c6d   : > { %13436 = vrsqrt.f32 %v10503_v8 }
0x2c75   : > { %v13435_v44 = vpop.eup %13434 }
0x2c76   : > { %v10506_v12 = vmul.f32 %v13435_v44, %v10492_v43 }
0x2c77   : > { %v13437_v47 = vpop.eup %13436 }
0x2c78   : > { %v10514_v34 = vmul.f32 %v11745_v36, %v10506_v12  ;;  %v10507_v53 = vmul.f32 %v13437_v47, %v10493_v29 }
0x2c7a   : > { %v10515_v13 = vmul.f32 %v11745_v36, %v10507_v53  ;;  %v10522_v2 = vadd.f32 %v11746_v1, %v10514_v34 }
0x2c7c   : > { %v10523_v56 = vadd.f32 %v11746_v1, %v10515_v13 }
0x2c7e   : > { %v10524_v57 = vadd.f32 %v10523_v56, %v10522_v2 }
0x2c80   : > { %v10525_v52 = vrot.slane %v10524_v57, 4 }
0x2c82   : > { %v10526_v58 = vadd.f32 %v10525_v52, %v10524_v57 }
0x2c84   : > { %v10527_v54 = vrot.slane %v10526_v58, 2 }
0x2c86   : > { %v10528_v32 = vadd.f32 %v10527_v54, %v10526_v58 }
0x2c88   : > { %v10529_v59 = vrot.slane %v10528_v32, 1 }
0x2c8a   : > { %v10530_v50 = vadd.f32 %v10529_v59, %v10528_v32 }
0x2c8c   : > { %v10532_v26 = vmul.f32 0.0625, %v10530_v50 }
0x2c8e   : > { %v10533_v33 = vpack.c.bf16 %v10532_v26, %v10532_v26 }
0x2c90   : > { %12601 = vmatmul.mubr.bf16.vlgmr.msra.gmra.mrb[136].mxu1 %v10533_v33 }
0x2d63   : > { %v10633_v20 = vpop.f32.mrb[136].mxu1 }
0x2d64   : > { %v10634_v27 = vadd.f32 %v10633_v20, %v10550_v21  ;;  %v12602_v38 = vpop.f32.mrb[137].mxu1 }
0x2d65   : > { %v10636_v60 = vpop.f32.mrb[138].mxu1 }
0x2d66   : > { %10639 = vst [vmem:[%s1478_s23] sm:$0x1] %v10634_v27  ;;  %v12603_v35 = vpop.f32.mrb[139].mxu1 }
0x2d67   : > { %14179 = shalt.err (!%p14176_p9)
}
0x2d68   : > { %s14180_s9 = scalar_lea.hbm %s15633_s13, 16  ;;  %s14184_s11 = scalar_lea.hbm %s14551_s25, 32 }
0x2d69   : > { %p14181_p10 = scmp.ne.s32.totalorder %s15633_s13, %s14180_s9  ;;  %p14185_p11 = scmp.lt.u32.totalorder %s15633_s13, %s14551_s25 }
0x2d6a   : > { %p14186_p13 = scmp.lt.u32.totalorder %s14184_s11, %s14180_s9  ;;  %p14188_p0 = scmp.lt.u32.totalorder %s14180_s9, %s15633_s13 }
0x2d6b   : > { %p14182_p7 = pnand %p14181_p10, %p15824_p2 }
0x2d6c   : > { %p14187_p1 = por %p14186_p13, %p14185_p11 }
0x2d6d   : > { %p14183_p8 = pneg %p14182_p7 }
0x2d6e   : > { %p14189_p3 = por %p14188_p0, %p14187_p1 }
0x2d70   : > { %p14190_p4 = pnand %p14189_p3, %p14183_p8 }
0x2d72   : > { %14193 = shalt.err (!%p14190_p4)
}
0x2d73   : > { %12788 = dma.vmem_to_hbm [thread:$0]  (%p15824_p2), %s15635_s16, 16, %s15633_s13, %s10641_s17  }
0x2d74 PF: > { %s15825_s2 = sld [smem:[#allocation90_spill]]  ;;  %s15826_s23 = sld [smem:[#allocation88_spill]] }
0x2d75   : > { %s15827_s8 = sld [smem:[#allocation93_spill]] }
0x2d7a   : > { %p12925_p12 = scmp.ge.s32.totalorder %s15825_s2, 2  ;;  %s10665_s15 = sand.u32 1, %s15826_s23  }
0x2d7b   : > { %p15828_p5 = scmp.ne.s32.totalorder %s15827_s8, 0  ;;  %s10666_s10 = scalar_lea.sflag [#allocation4], %s10665_s15 }
0x2d7d   : > { %p12870_p6 = pnand %p12925_p12, %p15828_p5 }
0x2d7f   : > { %14267 = dma.done.wait (!%p12870_p6), %s10666_s10, 16  }
0x2d80   : > { %14269 = vsyncadd (!%p12870_p6), %s10666_s10, 4294967280  ;;  %s15829_s11 = sld [smem:[#allocation91_spill]]  ;;  %s15830_s9 = sld [smem:[#allocation89_spill]] }
0x2d81   : > { %s15831_s10 = sld [smem:[#allocation92_spill]]  ;;  %s15832_s7 = smov %s14276_s0 }
0x2d86   : > { %p99_p9 = scmp.ge.s32.totalorder %s15829_s11, 4   ;;  %s15833_s0 = smov %s15830_s9 }
0x2d88   :  { %101 = sbr.rel (!%p99_p9) target bundleno = 86 (0x56), region = 387 }
0x2d8f   :  { %10670 = vsyncpa [#allocation3], 1 }
0x2d90   :  { %10672 = vsyncpa [#allocation3 + $0x1], 1 }
0x2d91   :  { %10673 = vsyncpa [#allocation6], 1 }
0x2d92   :  { %10674 = vsyncpa [#allocation9], 1 }
0x2d93   :  { %10675 = vsyncpa [#allocation12], 1 }
0x2d94   :  { %10676 = vsyncpa [#allocation15], 1 }
0x2d95   :  { %10677 = vsyncpa [#allocation18], 1 }
0x2d96   :  { %10678 = vsyncpa [#allocation21], 1 }
0x2d97   :  { %10679 = vsyncpa [#allocation24], 1 }
0x2d98   :  { %10680 = vsyncpa [#allocation27], 1 }
0x2d99   :  { %10681 = vsyncpa [#allocation30], 1 }
0x2d9a   :  { %10682 = vsyncpa [#allocation33], 1 }
0x2d9b   :  { %10683 = vsyncpa [#allocation36], 1 }
0x2d9c   :  { %10684 = vsyncpa [#allocation39], 1 }
0x2d9d   :  { %10685 = vsyncpa [#allocation42], 1 }
0x2d9e   :  { %10686 = vsyncpa [#allocation4], 1 }
0x2d9f   :  { %10688 = vsyncpa [#allocation4 + $0x1], 1 }

</bundles_post_ra>
